<compile_context>
chip_gen: v6e
topology: v6e:2x2x1
jax: 0.10.0
libtpu: 0.0.40
codegen_flags: <defaults>
</compile_context>

<pallas_src>
import jax
import jax.numpy as jnp
from jax import lax
from jax.experimental import pallas as pl
from jax.experimental.pallas import tpu as pltpu


# ---------------------------------------------------------------------------
# Padded FC sizes (lane / sublane aligned). Zero padding keeps the math exact.
# ---------------------------------------------------------------------------
M_PAD = 8            # fused batch (2 branches x 2) padded 4 -> 8
K_FC1 = 6272         # 8 * 28 * 28 (PyTorch NCHW flatten)
K_PAD = 6400         # 50 * 128, divisible by TK
N1_PAD = 1024        # 1000 -> 1024
N2_PAD = 128         # 100  -> 128
N3_PAD = 128         # 5    -> 128
TK = 3200            # 2 K-steps of 6.25 MiB bf16 weight each


# ---------------------------------------------------------------------------
# Single fused FC kernel:
#   acc += a_k @ W1_k                      (K-tiled, f32 accumulate in VMEM)
#   last K step: h1 = relu(acc + b1)
#                h2 = relu(h1 @ W2 + b2)
#                out = h2 @ W3 + b3
# ---------------------------------------------------------------------------
def _fc_kernel(a_ref, w1_ref, b1_ref, w2_ref, b2_ref, w3_ref, b3_ref,
               o_ref, acc_ref):
    k = pl.program_id(0)

    @pl.when(k == 0)
    def _():
        acc_ref[...] = jnp.zeros_like(acc_ref)

    acc_ref[...] += jnp.dot(a_ref[...], w1_ref[...],
                            preferred_element_type=jnp.float32)

    @pl.when(k == pl.num_programs(0) - 1)
    def _():
        h1 = jnp.maximum(acc_ref[...] + b1_ref[...], 0.0)
        h2 = jnp.dot(h1.astype(jnp.bfloat16), w2_ref[...],
                     preferred_element_type=jnp.float32)
        h2 = jnp.maximum(h2 + b2_ref[...], 0.0)
        y = jnp.dot(h2.astype(jnp.bfloat16), w3_ref[...],
                    preferred_element_type=jnp.float32)
        o_ref[...] = (y + b3_ref[...]).astype(o_ref.dtype)


def fc_stack(a_bf16, w1, b1, w2, b2, w3, b3):
    """a: (M_PAD, K_PAD) bf16 -> (M_PAD, N3_PAD) f32."""
    M, K = a_bf16.shape
    assert M == M_PAD and K == K_PAD and K % TK == 0
    n_k = K // TK

    flops = 2 * M * (K * N1_PAD + N1_PAD * N2_PAD + N2_PAD * N3_PAD)
    bytes_accessed = (a_bf16.size * 2 + w1.size * 2 + w2.size * 2 + w3.size * 2
                      + (b1.size + b2.size + b3.size) * 4 + M * N3_PAD * 4)

    return pl.pallas_call(
        _fc_kernel,
        out_shape=jax.ShapeDtypeStruct((M, N3_PAD), jnp.float32),
        grid_spec=pltpu.PrefetchScalarGridSpec(
            num_scalar_prefetch=0,
            grid=(n_k,),                                        # K reduction
            in_specs=[
                pl.BlockSpec((M, TK), lambda k: (0, k)),          # activations
                pl.BlockSpec((TK, N1_PAD), lambda k: (k, 0)),     # fc1 W (streamed)
                pl.BlockSpec((1, N1_PAD), lambda k: (0, 0)),      # fc1 bias
                pl.BlockSpec((N1_PAD, N2_PAD), lambda k: (0, 0)), # fc2 W (resident)
                pl.BlockSpec((1, N2_PAD), lambda k: (0, 0)),      # fc2 bias
                pl.BlockSpec((N2_PAD, N3_PAD), lambda k: (0, 0)), # fc3 W (resident)
                pl.BlockSpec((1, N3_PAD), lambda k: (0, 0)),      # fc3 bias
            ],
            out_specs=pl.BlockSpec((M, N3_PAD), lambda k: (0, 0)),
            scratch_shapes=[pltpu.VMEM((M, N1_PAD), jnp.float32)],
        ),
        compiler_params=pltpu.CompilerParams(
            dimension_semantics=("arbitrary",),
            vmem_limit_bytes=32 * 1024 * 1024),
        cost_estimate=pl.CostEstimate(
            flops=flops, transcendentals=0, bytes_accessed=bytes_accessed),
    )(a_bf16, w1, b1.reshape(1, -1), w2, b2.reshape(1, -1), w3, b3.reshape(1, -1))


# ---------------------------------------------------------------------------
# Conv stage: ReflectionPad(1) -> Conv3x3 -> ReLU -> BatchNorm (eval affine),
# NHWC end to end, plain XLA (tiny tensors; MXU utilization <1%).
# ---------------------------------------------------------------------------
def _conv_relu_bn_nhwc(x, w_hwio, b, bn_scale, bn_shift):
    xp = jnp.pad(x, ((0, 0), (1, 1), (1, 1), (0, 0)), mode="reflect")
    y = lax.conv_general_dilated(
        xp, w_hwio, window_strides=(1, 1), padding="VALID",
        dimension_numbers=("NHWC", "HWIO", "NHWC"))
    y = jnp.maximum(y + b, 0.0)          # Conv -> ReLU
    return y * bn_scale + bn_shift       # BatchNorm folded to affine


# ---------------------------------------------------------------------------
# Deterministic parameter construction (mnist=True configuration).
# NOTE: PyTorch nn.Linear stores (fout, fin); synthetic params here are
# generated directly as (fin, fout).  Transpose if loading real weights.
# ---------------------------------------------------------------------------
def _pad2(w, rows, cols):
    r, c = w.shape
    return jnp.pad(w, ((0, rows - r), (0, cols - c)))


def init_params(key):
    conv_cfg = [(1, 4), (4, 8), (8, 8)]
    eps = 1e-5
    params = {"conv": []}

    for cin, cout in conv_cfg:
        key, k1, k2, k3, k4, k5, k6 = jax.random.split(key, 7)
        w = jax.random.normal(k1, (cout, cin, 3, 3), jnp.float32) * 0.1
        b = jax.random.normal(k2, (cout,), jnp.float32) * 0.05
        gamma = 1.0 + 0.1 * jax.random.normal(k3, (cout,), jnp.float32)
        beta = 0.05 * jax.random.normal(k4, (cout,), jnp.float32)
        run_mean = 0.05 * jax.random.normal(k5, (cout,), jnp.float32)
        run_var = jax.random.uniform(k6, (cout,), jnp.float32, 0.8, 1.2)
        scale = gamma / jnp.sqrt(run_var + eps)
        shift = beta - run_mean * scale
        params["conv"].append(dict(
            w_hwio=jnp.transpose(w, (2, 3, 1, 0)),     # (KH, KW, Cin, Cout)
            b=b, bn_scale=scale, bn_shift=shift))

    fc_cfg = [(6272, 1000), (1000, 100), (100, 5)]
    ws, bs = [], []
    for fin, fout in fc_cfg:
        key, k1, k2 = jax.random.split(key, 3)
        ws.append(jax.random.normal(k1, (fin, fout), jnp.float32) / jnp.sqrt(fin))
        bs.append(jax.random.normal(k2, (fout,), jnp.float32) * 0.05)

    params["fc1_w"] = _pad2(ws[0], K_PAD, N1_PAD).astype(jnp.bfloat16)
    params["fc1_b"] = jnp.pad(bs[0], (0, N1_PAD - 1000))
    params["fc2_w"] = _pad2(ws[1], N1_PAD, N2_PAD).astype(jnp.bfloat16)
    params["fc2_b"] = jnp.pad(bs[1], (0, N2_PAD - 100))
    params["fc3_w"] = _pad2(ws[2], N2_PAD, N3_PAD).astype(jnp.bfloat16)
    params["fc3_b"] = jnp.pad(bs[2], (0, N3_PAD - 5))
    return params


# ---------------------------------------------------------------------------
# Forward pass: both siamese branches share one pass through every layer.
# ---------------------------------------------------------------------------
def sia_net_forward(x1, x2, params):
    n1 = x1.shape[0]
    x = jnp.concatenate([x1, x2], axis=0)               # fuse the two branches
    x = jnp.transpose(x, (0, 2, 3, 1))                  # NCHW -> NHWC (once)
    for p in params["conv"]:
        x = _conv_relu_bn_nhwc(x, p["w_hwio"], p["b"], p["bn_scale"], p["bn_shift"])
    B = x.shape[0]
    # PyTorch flattens NCHW -> (B, C*H*W): single layout shuffle feeding fc1.
    flat = jnp.transpose(x, (0, 3, 1, 2)).reshape(B, -1)        # (B, 6272)
    # Zero-pad batch 4->8 (full sublane tile) and K 6272->6400 (lane-aligned TK).
    flat = jnp.pad(flat, ((0, M_PAD - B), (0, K_PAD - K_FC1)))

    out = fc_stack(flat.astype(jnp.bfloat16),
                   params["fc1_w"], params["fc1_b"],
                   params["fc2_w"], params["fc2_b"],
                   params["fc3_w"], params["fc3_b"])            # (8, 128)
    out = out[:B, :5]
    return out[:n1], out[n1:]


# ---------------------------------------------------------------------------
# Pure-JAX reference (same bf16 roundings) - numerical sanity check.
# ---------------------------------------------------------------------------
def _forward_reference(x1, x2, params):
    n1 = x1.shape[0]
    x = jnp.concatenate([x1, x2], axis=0)
    x = jnp.transpose(x, (0, 2, 3, 1))
    for p in params["conv"]:
        x = _conv_relu_bn_nhwc(x, p["w_hwio"], p["b"], p["bn_scale"], p["bn_shift"])
    B = x.shape[0]
    flat = jnp.transpose(x, (0, 3, 1, 2)).reshape(B, -1)
    flat = jnp.pad(flat, ((0, M_PAD - B), (0, K_PAD - K_FC1)))
    hp = lax.Precision.HIGHEST
    a = flat.astype(jnp.bfloat16).astype(jnp.float32)
    w1 = params["fc1_w"].astype(jnp.float32)
    w2 = params["fc2_w"].astype(jnp.float32)
    w3 = params["fc3_w"].astype(jnp.float32)
    h1 = jnp.maximum(jnp.dot(a, w1, precision=hp) + params["fc1_b"], 0.0)
    h1 = h1.astype(jnp.bfloat16).astype(jnp.float32)
    h2 = jnp.maximum(jnp.dot(h1, w2, precision=hp) + params["fc2_b"], 0.0)
    h2 = h2.astype(jnp.bfloat16).astype(jnp.float32)
    out = (jnp.dot(h2, w3, precision=hp) + params["fc3_b"])[:B, :5]
    return out[:n1], out[n1:]


if __name__ == "__main__":
    key = jax.random.PRNGKey(0)
    kp, kx1, kx2 = jax.random.split(key, 3)
    params = init_params(kp)

    # MNIST-style inputs: batch=2 per branch, 1 channel, 28x28
    # (6272 = 8*28*28 is fixed by the architecture's first fc layer).
    x1 = jax.random.normal(kx1, (2, 1, 28, 28), jnp.float32)
    x2 = jax.random.normal(kx2, (2, 1, 28, 28), jnp.float32)

    fwd = jax.jit(sia_net_forward)
    out1, out2 = fwd(x1, x2, params)
    jax.block_until_ready((out1, out2))
    assert out1.shape == (2, 5) and out2.shape == (2, 5)
    assert bool(jnp.all(jnp.isfinite(out1))) and bool(jnp.all(jnp.isfinite(out2)))

    # Numerical sanity check against a pure-JAX reference (same bf16 rounding).
    r1, r2 = jax.jit(_forward_reference)(x1, x2, params)
    assert bool(jnp.allclose(out1, r1, atol=2e-2, rtol=2e-2))
    assert bool(jnp.allclose(out2, r2, atol=2e-2, rtol=2e-2))

    print("KERNEL_OK")
</pallas_src>

<mosaic_0001>
module attributes {stable_mosaic.version = 11 : i64} {
  func.func @_fc_kernel(%arg0: i32, %arg1: memref<8x3200xbf16, #tpu.memory_space<vmem>>, %arg2: memref<3200x1024xbf16, #tpu.memory_space<vmem>>, %arg3: memref<1x1024xf32, #tpu.memory_space<vmem>>, %arg4: memref<1024x128xbf16, #tpu.memory_space<vmem>>, %arg5: memref<1x128xf32, #tpu.memory_space<vmem>>, %arg6: memref<128x128xbf16, #tpu.memory_space<vmem>>, %arg7: memref<1x128xf32, #tpu.memory_space<vmem>>, %arg8: memref<8x128xf32, #tpu.memory_space<vmem>>, %arg9: memref<8x1024xf32, #tpu.memory_space<vmem>>) attributes {dimension_semantics = [#tpu.dimension_semantics<arbitrary>], iteration_bounds = array<i64: 2>, scalar_prefetch = 0 : i64, scratch_operands = 1 : i64, tpu.core_type = #tpu.core_type<tc>, window_params = [{transform_indices = @transform_0, window_bounds = array<i64: 8, 3200>}, {transform_indices = @transform_1, window_bounds = array<i64: 3200, 1024>}, {pipeline_mode = #tpu.pipeline_mode<synchronous>, transform_indices = @transform_2, window_bounds = array<i64: 1, 1024>}, {pipeline_mode = #tpu.pipeline_mode<synchronous>, transform_indices = @transform_3, window_bounds = array<i64: 1024, 128>}, {pipeline_mode = #tpu.pipeline_mode<synchronous>, transform_indices = @transform_4, window_bounds = array<i64: 1, 128>}, {pipeline_mode = #tpu.pipeline_mode<synchronous>, transform_indices = @transform_5, window_bounds = array<i64: 128, 128>}, {pipeline_mode = #tpu.pipeline_mode<synchronous>, transform_indices = @transform_6, window_bounds = array<i64: 1, 128>}, {pipeline_mode = #tpu.pipeline_mode<synchronous>, transform_indices = @transform_7, window_bounds = array<i64: 8, 128>}]} {
    %c0_i32 = arith.constant 0 : i32
    %0 = arith.cmpi eq, %arg0, %c0_i32 : i32
    %1 = arith.extui %0 : i1 to i32
    %c0_i32_0 = arith.constant 0 : i32
    %2 = arith.cmpi ne, %1, %c0_i32_0 : i32
    scf.if %2 {
      %cst_9 = arith.constant 0.000000e+00 : f32
      %12 = vector.broadcast %cst_9 : f32 to vector<8x1024xf32>
      %c0_10 = arith.constant 0 : index
      %c0_11 = arith.constant 0 : index
      %13 = vector.load %arg9[%c0_10, %c0_11] : memref<8x1024xf32, #tpu.memory_space<vmem>>, vector<8x1024xf32>
      tpu.vector_store %arg9[%c0_10, %c0_11], %12 {strides = array<i32>} : memref<8x1024xf32, #tpu.memory_space<vmem>>, vector<8x1024xf32>,
    } else {
    }
    %c0 = arith.constant 0 : index
    %c0_1 = arith.constant 0 : index
    %3 = vector.load %arg9[%c0, %c0_1] : memref<8x1024xf32, #tpu.memory_space<vmem>>, vector<8x1024xf32>
    %c0_2 = arith.constant 0 : index
    %c0_3 = arith.constant 0 : index
    %4 = vector.load %arg1[%c0_2, %c0_3] : memref<8x3200xbf16, #tpu.memory_space<vmem>>, vector<8x3200xbf16>
    %c0_4 = arith.constant 0 : index
    %c0_5 = arith.constant 0 : index
    %5 = vector.load %arg2[%c0_4, %c0_5] : memref<3200x1024xbf16, #tpu.memory_space<vmem>>, vector<3200x1024xbf16>
    %cst = arith.constant dense<0.000000e+00> : vector<8x1024xf32>
    %6 = tpu.matmul %4, %5, %cst {dimension_numbers = #tpu.dot_dimension_numbers<[1], [0], [0], [1], [0, 0, 1, 1], [], []>} : vector<8x3200xbf16>, vector<3200x1024xbf16>, vector<8x1024xf32> -> vector<8x1024xf32>
    %7 = arith.addf %3, %6 : vector<8x1024xf32>
    %c0_6 = arith.constant 0 : index
    %c0_7 = arith.constant 0 : index
    %8 = vector.load %arg9[%c0_6, %c0_7] : memref<8x1024xf32, #tpu.memory_space<vmem>>, vector<8x1024xf32>
    tpu.vector_store %arg9[%c0_6, %c0_7], %7 {strides = array<i32>} : memref<8x1024xf32, #tpu.memory_space<vmem>>, vector<8x1024xf32>,
    %c1_i32 = arith.constant 1 : i32
    %9 = arith.cmpi eq, %arg0, %c1_i32 : i32
    %10 = arith.extui %9 : i1 to i32
    %c0_i32_8 = arith.constant 0 : i32
    %11 = arith.cmpi ne, %10, %c0_i32_8 : i32
    scf.if %11 {
      %c0_9 = arith.constant 0 : index
      %c0_10 = arith.constant 0 : index
      %12 = vector.load %arg9[%c0_9, %c0_10] : memref<8x1024xf32, #tpu.memory_space<vmem>>, vector<8x1024xf32>
      %c0_11 = arith.constant 0 : index
      %c0_12 = arith.constant 0 : index
      %13 = vector.load %arg3[%c0_11, %c0_12] : memref<1x1024xf32, #tpu.memory_space<vmem>>, vector<1x1024xf32>
      %14 = vector.broadcast %13 : vector<1x1024xf32> to vector<8x1024xf32>
      %15 = arith.addf %12, %14 : vector<8x1024xf32>
      %cst_13 = arith.constant 0.000000e+00 : f32
      %16 = vector.broadcast %cst_13 : f32 to vector<8x1024xf32>
      %17 = arith.maximumf %15, %16 : vector<8x1024xf32>
      %18 = arith.truncf %17 : vector<8x1024xf32> to vector<8x1024xbf16>
      %c0_14 = arith.constant 0 : index
      %c0_15 = arith.constant 0 : index
      %19 = vector.load %arg4[%c0_14, %c0_15] : memref<1024x128xbf16, #tpu.memory_space<vmem>>, vector<1024x128xbf16>
      %cst_16 = arith.constant dense<0.000000e+00> : vector<8x128xf32>
      %20 = tpu.matmul %18, %19, %cst_16 {dimension_numbers = #tpu.dot_dimension_numbers<[1], [0], [0], [1], [0, 0, 1, 1], [], []>} : vector<8x1024xbf16>, vector<1024x128xbf16>, vector<8x128xf32> -> vector<8x128xf32>
      %c0_17 = arith.constant 0 : index
      %c0_18 = arith.constant 0 : index
      %21 = vector.load %arg5[%c0_17, %c0_18] : memref<1x128xf32, #tpu.memory_space<vmem>>, vector<1x128xf32>
      %22 = vector.broadcast %21 : vector<1x128xf32> to vector<8x128xf32>
      %23 = arith.addf %20, %22 : vector<8x128xf32>
      %cst_19 = arith.constant 0.000000e+00 : f32
      %24 = vector.broadcast %cst_19 : f32 to vector<8x128xf32>
      %25 = arith.maximumf %23, %24 : vector<8x128xf32>
      %26 = arith.truncf %25 : vector<8x128xf32> to vector<8x128xbf16>
      %c0_20 = arith.constant 0 : index
      %c0_21 = arith.constant 0 : index
      %27 = vector.load %arg6[%c0_20, %c0_21] : memref<128x128xbf16, #tpu.memory_space<vmem>>, vector<128x128xbf16>
      %cst_22 = arith.constant dense<0.000000e+00> : vector<8x128xf32>
      %28 = tpu.matmul %26, %27, %cst_22 {dimension_numbers = #tpu.dot_dimension_numbers<[1], [0], [0], [1], [0, 0, 1, 1], [], []>} : vector<8x128xbf16>, vector<128x128xbf16>, vector<8x128xf32> -> vector<8x128xf32>
      %c0_23 = arith.constant 0 : index
      %c0_24 = arith.constant 0 : index
      %29 = vector.load %arg7[%c0_23, %c0_24] : memref<1x128xf32, #tpu.memory_space<vmem>>, vector<1x128xf32>
      %30 = vector.broadcast %29 : vector<1x128xf32> to vector<8x128xf32>
      %31 = arith.addf %28, %30 : vector<8x128xf32>
      %c0_25 = arith.constant 0 : index
      %c0_26 = arith.constant 0 : index
      %32 = vector.load %arg8[%c0_25, %c0_26] : memref<8x128xf32, #tpu.memory_space<vmem>>, vector<8x128xf32>
      tpu.vector_store %arg8[%c0_25, %c0_26], %31 {strides = array<i32>} : memref<8x128xf32, #tpu.memory_space<vmem>>, vector<8x128xf32>,
    } else {
    }
    return
  }
  func.func @transform_0(%arg0: i32) -> (i32, i32) {
    %c0_i32 = arith.constant 0 : i32
    %c0_i32_0 = arith.constant 0 : i32
    return %c0_i32, %arg0 : i32, i32
  }
  func.func @transform_1(%arg0: i32) -> (i32, i32) {
    %c0_i32 = arith.constant 0 : i32
    %c0_i32_0 = arith.constant 0 : i32
    return %arg0, %c0_i32 : i32, i32
  }
  func.func @transform_2(%arg0: i32) -> (i32, i32) {
    %c0_i32 = arith.constant 0 : i32
    %c0_i32_0 = arith.constant 0 : i32
    %c0_i32_1 = arith.constant 0 : i32
    return %c0_i32, %c0_i32_0 : i32, i32
  }
  func.func @transform_3(%arg0: i32) -> (i32, i32) {
    %c0_i32 = arith.constant 0 : i32
    %c0_i32_0 = arith.constant 0 : i32
    %c0_i32_1 = arith.constant 0 : i32
    return %c0_i32, %c0_i32_0 : i32, i32
  }
  func.func @transform_4(%arg0: i32) -> (i32, i32) {
    %c0_i32 = arith.constant 0 : i32
    %c0_i32_0 = arith.constant 0 : i32
    %c0_i32_1 = arith.constant 0 : i32
    return %c0_i32, %c0_i32_0 : i32, i32
  }
  func.func @transform_5(%arg0: i32) -> (i32, i32) {
    %c0_i32 = arith.constant 0 : i32
    %c0_i32_0 = arith.constant 0 : i32
    %c0_i32_1 = arith.constant 0 : i32
    return %c0_i32, %c0_i32_0 : i32, i32
  }
  func.func @transform_6(%arg0: i32) -> (i32, i32) {
    %c0_i32 = arith.constant 0 : i32
    %c0_i32_0 = arith.constant 0 : i32
    %c0_i32_1 = arith.constant 0 : i32
    return %c0_i32, %c0_i32_0 : i32, i32
  }
  func.func @transform_7(%arg0: i32) -> (i32, i32) {
    %c0_i32 = arith.constant 0 : i32
    %c0_i32_0 = arith.constant 0 : i32
    %c0_i32_1 = arith.constant 0 : i32
    return %c0_i32, %c0_i32_0 : i32, i32
  }
}

</mosaic_0001>

<bundles_post_ra>
// kernel: sia_net_forward.1
= control target key start
LH: loop header
LB: loop body
LE: loop exit
PB: predicated region body
PF: predicated region fallthrough
CT: control target
= control target key end

     0   :  { %s15064_s24 = smov 0   ;;  %s17355_s0 = inlined_call_operand.vmem [shape: bf16[8,6400], index: 0, kind: input, shape index: {}]   ;;  %s17356_s1 = inlined_call_operand.vmem [shape: bf16[6400,1024], index: 1, kind: input, shape index: {}]   ;;  %s17357_s2 = inlined_call_operand.vmem [shape: f32[1,1024], index: 2, kind: input, shape index: {}]   ;;  %s17358_s3 = inlined_call_operand.vmem [shape: bf16[1024,128], index: 3, kind: input, shape index: {}]   ;;  %s17359_s4 = inlined_call_operand.vmem [shape: f32[1,128], index: 4, kind: input, shape index: {}]   ;;  %s17360_s5 = inlined_call_operand.vmem [shape: bf16[128,128], index: 5, kind: input, shape index: {}]   ;;  %s17361_s6 = inlined_call_operand.vmem [shape: f32[1,128], index: 6, kind: input, shape index: {}]   ;;  %s17362_s7 = inlined_call_operand.vmem [shape: f32[8,128], index: 7, kind: output, shape index: {}]  }
   0x1 LB: > { %s15070_s25 = sadd.s32 4294967295, %s15018_s24   ;;  %p13075_p0 = scmp.ge.s32.totalorder %s15018_s24, 1  ;;  %s15018_s24 = sphi %s15064_s24, %s17_s24  }
   0x2   : > { %p245_p1 = scmp.lt.s32.totalorder %s15018_s24, 3 }
   0x4   : > { %p246_p2 = pnand %p13075_p0, %p245_p1 }
   0x5   : > { %s278_s26 = smul.u32 (!%p246_p2), 25, %s15070_s25  ;;  %p13079_p5 = scmp.ne.s32.totalorder (!%p246_p2), %s15070_s25, 0 }
   0x6   : > { %249 = sbr.rel (%p246_p2) target bundleno = 2304 (0x900), region = 48 }
   0x7   : > { %s284_s27 = smul.u32 (!%p246_p2), 400, %s15070_s25  ;;  %p279_p3 = scmp.lt.s32.totalorder (!%p246_p2), %s278_s26, 49 }
   0x9   : > { %p285_p4 = scmp.lt.s32.totalorder (!%p246_p2), %s284_s27, 799 }
   0xb   : > { %s17364_s26 = smov (!%p279_p3, %s278_s26), 49  ;;  %s17366_s27 = smov (!%p285_p4, %s284_s27), 799 }
   0xc   : > { %s13076_s28 = sshll.u32 %s17364_s26, 2  ;;  %s14782_s9 = sshll.u32 %s17366_s27, 5 }
   0xd   : > { %s15079_s8 = scalar_lea.vmem %s17355_s0, %s13076_s28  ;;  %s15084_s12 = scalar_lea.vmem %s17356_s1, %s14782_s9 }
   0xe   : > { %295 = sbr.rel (%p13079_p5) target bundleno = 24 (0x18), region = 52 }
  0x13   : > { %v15020_v0 = vmov 0.0  }
  0x14   : > { %296 = vst [vmem:[#allocation2 + $0x30] sm:$0xff] %v15020_v0  ;;  %297 = vst [vmem:[#allocation2] sm:$0xff] %v15020_v0 }
  0x15   : > { %298 = vst [vmem:[#allocation2 + $0x18] sm:$0xff] %v15020_v0  ;;  %299 = vst [vmem:[#allocation2 + $0x10] sm:$0xff] %v15020_v0 }
  0x16   : > { %300 = vst [vmem:[#allocation2 + $0x8] sm:$0xff] %v15020_v0  ;;  %301 = vst [vmem:[#allocation2 + $0x20] sm:$0xff] %v15020_v0 }
  0x17   : > { %302 = vst [vmem:[#allocation2 + $0x28] sm:$0xff] %v15020_v0  ;;  %303 = vst [vmem:[#allocation2 + $0x38] sm:$0xff] %v15020_v0 }
  0x18 PF: > { %v381_v1 = vld [vmem:[%s15084_s12 + $0x1c0] sm:$0xff]  ;;  %v15119_v55 = vld [vmem:[%s15079_s8 + $0x8] sm:$0xff]  ;;  %p14705_p6 = scmp.ne.s32.totalorder %s15070_s25, 1 }
  0x19   : > { %v385_v2 = vld [vmem:[%s15084_s12 + $0x1e0] sm:$0xff]  ;;  %v15129_v60 = vcombine.high %v15119_v55, %v15119_v55 }
  0x1a   : > { %v509_v3 = vld [vmem:[%s15084_s12 + $0x5c0] sm:$0xff]  ;;  %v13162_v4 = vcombine.high %v381_v1, %v385_v2  ;;  %v13161_v6 = vcombine.low %v381_v1, %v385_v2 }
  0x1b   : > { %v513_v5 = vld [vmem:[%s15084_s12 + $0x5e0] sm:$0xff]  ;;  %10086 = vmatprep.mubr.bf16.mxu1 %v15129_v60 }
  0x1c   : > { %v373_v7 = vld [vmem:[%s15084_s12 + $0x180] sm:$0xff]  ;;  %v13290_v9 = vcombine.high %v509_v3, %v513_v5  ;;  %v13289_v10 = vcombine.low %v509_v3, %v513_v5  ;;  %10013 = vmatprep.subr.bf16.mxu0 %v13162_v4 }
  0x1d   : > { %v377_v8 = vld [vmem:[%s15084_s12 + $0x1a0] sm:$0xff]  ;;  %10014 = vmatpush1.bf16.msra.mxu0 %v13161_v6 }
  0x1e   : > { %v13154_v11 = vcombine.high %v373_v7, %v377_v8  ;;  %v501_v12 = vld [vmem:[%s15084_s12 + $0x580] sm:$0xff]  ;;  %10054 = vmatprep.subr.bf16.mxu1 %v13290_v9  ;;  %v13153_v19 = vcombine.low %v373_v7, %v377_v8 }
  0x1f   : > { %v505_v13 = vld [vmem:[%s15084_s12 + $0x5a0] sm:$0xff]  ;;  %10055 = vmatpush1.bf16.msra.mxu1 %v13289_v10 }
  0x20   : > { %v365_v14 = vld [vmem:[%s15084_s12 + $0x140] sm:$0xff]  ;;  %v13282_v15 = vcombine.high %v501_v12, %v505_v13  ;;  %10015 = vmatprep.subr.bf16.mxu0 %v13154_v11  ;;  %v13281_v20 = vcombine.low %v501_v12, %v505_v13 }
  0x21   : > { %v369_v16 = vld [vmem:[%s15084_s12 + $0x160] sm:$0xff]  ;;  %10016 = vmatpush1.bf16.msra.mxu0 %v13153_v19 }
  0x22   : > { %v493_v17 = vld [vmem:[%s15084_s12 + $0x540] sm:$0xff]  ;;  %v13146_v21 = vcombine.high %v365_v14, %v369_v16  ;;  %10056 = vmatprep.subr.bf16.mxu1 %v13282_v15  ;;  %v13145_v27 = vcombine.low %v365_v14, %v369_v16 }
  0x23   : > { %v497_v18 = vld [vmem:[%s15084_s12 + $0x560] sm:$0xff]  ;;  %10057 = vmatpush1.bf16.msra.mxu1 %v13281_v20 }
  0x24   : > { %v13274_v22 = vcombine.high %v493_v17, %v497_v18  ;;  %v357_v23 = vld [vmem:[%s15084_s12 + $0x100] sm:$0xff]  ;;  %10017 = vmatprep.subr.bf16.mxu0 %v13146_v21  ;;  %v13273_v28 = vcombine.low %v493_v17, %v497_v18 }
  0x25   : > { %v361_v24 = vld [vmem:[%s15084_s12 + $0x120] sm:$0xff]  ;;  %10018 = vmatpush1.bf16.msra.mxu0 %v13145_v27 }
  0x26   : > { %v485_v25 = vld [vmem:[%s15084_s12 + $0x500] sm:$0xff]  ;;  %v13138_v29 = vcombine.high %v357_v23, %v361_v24  ;;  %10058 = vmatprep.subr.bf16.mxu1 %v13274_v22  ;;  %v13137_v35 = vcombine.low %v357_v23, %v361_v24 }
  0x27   : > { %v489_v26 = vld [vmem:[%s15084_s12 + $0x520] sm:$0xff]  ;;  %10059 = vmatpush1.bf16.msra.mxu1 %v13273_v28 }
  0x28   : > { %v13266_v30 = vcombine.high %v485_v25, %v489_v26  ;;  %v349_v31 = vld [vmem:[%s15084_s12 + $0xc0] sm:$0xff]  ;;  %10019 = vmatprep.subr.bf16.mxu0 %v13138_v29  ;;  %v13265_v36 = vcombine.low %v485_v25, %v489_v26 }
  0x29   : > { %v353_v32 = vld [vmem:[%s15084_s12 + $0xe0] sm:$0xff]  ;;  %10020 = vmatpush1.bf16.msra.mxu0 %v13137_v35 }
  0x2a   : > { %v477_v33 = vld [vmem:[%s15084_s12 + $0x4c0] sm:$0xff]  ;;  %v13130_v37 = vcombine.high %v349_v31, %v353_v32  ;;  %10060 = vmatprep.subr.bf16.mxu1 %v13266_v30  ;;  %v13129_v43 = vcombine.low %v349_v31, %v353_v32 }
  0x2b   : > { %v481_v34 = vld [vmem:[%s15084_s12 + $0x4e0] sm:$0xff]  ;;  %10061 = vmatpush1.bf16.msra.mxu1 %v13265_v36 }
  0x2c   : > { %v13258_v38 = vcombine.high %v477_v33, %v481_v34  ;;  %v341_v39 = vld [vmem:[%s15084_s12 + $0x80] sm:$0xff]  ;;  %10021 = vmatprep.subr.bf16.mxu0 %v13130_v37  ;;  %v13257_v44 = vcombine.low %v477_v33, %v481_v34 }
  0x2d   : > { %v345_v40 = vld [vmem:[%s15084_s12 + $0xa0] sm:$0xff]  ;;  %10022 = vmatpush1.bf16.msra.mxu0 %v13129_v43 }
  0x2e   : > { %v469_v41 = vld [vmem:[%s15084_s12 + $0x480] sm:$0xff]  ;;  %v13122_v45 = vcombine.high %v341_v39, %v345_v40  ;;  %10062 = vmatprep.subr.bf16.mxu1 %v13258_v38  ;;  %v13121_v51 = vcombine.low %v341_v39, %v345_v40 }
  0x2f   : > { %v473_v42 = vld [vmem:[%s15084_s12 + $0x4a0] sm:$0xff]  ;;  %10063 = vmatpush1.bf16.msra.mxu1 %v13257_v44 }
  0x30   : > { %v13250_v46 = vcombine.high %v469_v41, %v473_v42  ;;  %v333_v47 = vld [vmem:[%s15084_s12 + $0x40] sm:$0xff]  ;;  %10023 = vmatprep.subr.bf16.mxu0 %v13122_v45  ;;  %v13249_v52 = vcombine.low %v469_v41, %v473_v42 }
  0x31   : > { %v337_v48 = vld [vmem:[%s15084_s12 + $0x60] sm:$0xff]  ;;  %10024 = vmatpush1.bf16.msra.mxu0 %v13121_v51 }
  0x32   : > { %v461_v49 = vld [vmem:[%s15084_s12 + $0x440] sm:$0xff]  ;;  %v13114_v53 = vcombine.high %v333_v47, %v337_v48  ;;  %10064 = vmatprep.subr.bf16.mxu1 %v13250_v46  ;;  %v13113_v63 = vcombine.low %v333_v47, %v337_v48 }
  0x33   : > { %v465_v50 = vld [vmem:[%s15084_s12 + $0x460] sm:$0xff]  ;;  %10065 = vmatpush1.bf16.msra.mxu1 %v13249_v52 }
  0x34   : > { %v15116_v54 = vld [vmem:[%s15079_s8] sm:$0xff]  ;;  %v13242_v56 = vcombine.high %v461_v49, %v465_v50  ;;  %10025 = vmatprep.subr.bf16.mxu0 %v13114_v53  ;;  %v13241_v0 = vcombine.low %v461_v49, %v465_v50 }
  0x35   : > { %v325_v57 = vld [vmem:[%s15084_s12] sm:$0xff]  ;;  %v15125_v59 = vcombine.high %v15116_v54, %v15116_v54  ;;  %10026 = vmatpush1.bf16.msra.mxu0 %v13113_v63 }
  0x36   : > { %v329_v58 = vld [vmem:[%s15084_s12 + $0x20] sm:$0xff]  ;;  %10066 = vmatprep.subr.bf16.mxu1 %v13242_v56 }
  0x37   : > { %v453_v61 = vld [vmem:[%s15084_s12 + $0x400] sm:$0xff]  ;;  %10045 = vmatprep.mubr.bf16.mxu0 %v15125_v59  ;;  %v13106_v1 = vcombine.high %v325_v57, %v329_v58  ;;  %v13105_v7 = vcombine.low %v325_v57, %v329_v58  ;;  %10067 = vmatpush1.bf16.msra.mxu1 %v13241_v0 }
  0x38   : > { %v457_v62 = vld [vmem:[%s15084_s12 + $0x420] sm:$0xff] }
  0x39   : > { %v13234_v2 = vcombine.high %v453_v61, %v457_v62  ;;  %v445_v3 = vld [vmem:[%s15084_s12 + $0x3c0] sm:$0xff]  ;;  %10027 = vmatprep.subr.bf16.mxu0 %v13106_v1  ;;  %v13233_v8 = vcombine.low %v453_v61, %v457_v62 }
  0x3a   : > { %v449_v4 = vld [vmem:[%s15084_s12 + $0x3e0] sm:$0xff]  ;;  %10028 = vmatpush1.bf16.msra.mxu0 %v13105_v7 }
  0x3b   : > { %v573_v5 = vld [vmem:[%s15084_s12 + $0x7c0] sm:$0xff]  ;;  %v13226_v9 = vcombine.high %v445_v3, %v449_v4  ;;  %10068 = vmatprep.subr.bf16.mxu1 %v13234_v2  ;;  %v13225_v15 = vcombine.low %v445_v3, %v449_v4 }
  0x3c   : > { %v577_v6 = vld [vmem:[%s15084_s12 + $0x7e0] sm:$0xff]  ;;  %10069 = vmatpush1.bf16.msra.mxu1 %v13233_v8 }
  0x3d   : > { %v13354_v10 = vcombine.high %v573_v5, %v577_v6  ;;  %v437_v11 = vld [vmem:[%s15084_s12 + $0x380] sm:$0xff]  ;;  %10029 = vmatprep.subr.bf16.mxu0 %v13226_v9  ;;  %v13353_v16 = vcombine.low %v573_v5, %v577_v6 }
  0x3e   : > { %v441_v12 = vld [vmem:[%s15084_s12 + $0x3a0] sm:$0xff]  ;;  %10030 = vmatpush2.bf16.msra.mxu0 %v13225_v15 }
  0x3f   : > { %v565_v13 = vld [vmem:[%s15084_s12 + $0x780] sm:$0xff]  ;;  %v13218_v17 = vcombine.high %v437_v11, %v441_v12  ;;  %10070 = vmatprep.subr.bf16.mxu1 %v13354_v10  ;;  %v13217_v23 = vcombine.low %v437_v11, %v441_v12 }
  0x40   : > { %v569_v14 = vld [vmem:[%s15084_s12 + $0x7a0] sm:$0xff]  ;;  %10071 = vmatpush2.bf16.msra.mxu1 %v13353_v16 }
  0x41   : > { %v13346_v18 = vcombine.high %v565_v13, %v569_v14  ;;  %v429_v19 = vld [vmem:[%s15084_s12 + $0x340] sm:$0xff]  ;;  %10031 = vmatprep.subr.bf16.mxu0 %v13218_v17  ;;  %v13345_v24 = vcombine.low %v565_v13, %v569_v14  ;;  %v15175_v17 = vcombine.low %v15116_v54, %v15116_v54 }
  0x42   : > { %v433_v20 = vld [vmem:[%s15084_s12 + $0x360] sm:$0xff]  ;;  %10032 = vmatpush2.bf16.msra.mxu0 %v13217_v23  ;;  %v15187_v23 = vld [vmem:[%s15079_s8 + $0x18] sm:$0xff] }
  0x43   : > { %v557_v21 = vld [vmem:[%s15084_s12 + $0x740] sm:$0xff]  ;;  %v13210_v25 = vcombine.high %v429_v19, %v433_v20  ;;  %10072 = vmatprep.subr.bf16.mxu1 %v13346_v18  ;;  %v13209_v31 = vcombine.low %v429_v19, %v433_v20  ;;  %v15180_v20 = vld [vmem:[%s15079_s8 + $0x10] sm:$0xff] }
  0x44   : > { %v561_v22 = vld [vmem:[%s15084_s12 + $0x760] sm:$0xff]  ;;  %10073 = vmatpush2.bf16.msra.mxu1 %v13345_v24 }
  0x45   : > { %v13338_v26 = vcombine.high %v557_v21, %v561_v22  ;;  %v421_v27 = vld [vmem:[%s15084_s12 + $0x300] sm:$0xff]  ;;  %10033 = vmatprep.subr.bf16.mxu0 %v13210_v25  ;;  %v13337_v32 = vcombine.low %v557_v21, %v561_v22  ;;  %v15184_v21 = vcombine.low %v15119_v55, %v15119_v55 }
  0x46   : > { %v425_v28 = vld [vmem:[%s15084_s12 + $0x320] sm:$0xff]  ;;  %10034 = vmatpush2.bf16.msra.mxu0 %v13209_v31 }
  0x47   : > { %v549_v29 = vld [vmem:[%s15084_s12 + $0x700] sm:$0xff]  ;;  %v13202_v33 = vcombine.high %v421_v27, %v425_v28  ;;  %10074 = vmatprep.subr.bf16.mxu1 %v13338_v26  ;;  %v13201_v39 = vcombine.low %v421_v27, %v425_v28  ;;  %v15193_v28 = vcombine.high %v15180_v20, %v15180_v20 }
  0x48   : > { %v553_v30 = vld [vmem:[%s15084_s12 + $0x720] sm:$0xff]  ;;  %10075 = vmatpush2.bf16.msra.mxu1 %v13337_v32 }
  0x49   : > { %v13330_v34 = vcombine.high %v549_v29, %v553_v30  ;;  %v413_v35 = vld [vmem:[%s15084_s12 + $0x2c0] sm:$0xff]  ;;  %10035 = vmatprep.subr.bf16.mxu0 %v13202_v33  ;;  %v13329_v40 = vcombine.low %v549_v29, %v553_v30  ;;  %v15200_v30 = vcombine.high %v15187_v23, %v15187_v23 }
  0x4a   : > { %v417_v36 = vld [vmem:[%s15084_s12 + $0x2e0] sm:$0xff]  ;;  %10036 = vmatpush2.bf16.msra.mxu0 %v13201_v39 }
  0x4b   : > { %v541_v37 = vld [vmem:[%s15084_s12 + $0x6c0] sm:$0xff]  ;;  %v13194_v41 = vcombine.high %v413_v35, %v417_v36  ;;  %10076 = vmatprep.subr.bf16.mxu1 %v13330_v34  ;;  %v13193_v47 = vcombine.low %v413_v35, %v417_v36 }
  0x4c   : > { %v545_v38 = vld [vmem:[%s15084_s12 + $0x6e0] sm:$0xff]  ;;  %10077 = vmatpush2.bf16.msra.mxu1 %v13329_v40 }
  0x4d   : > { %v13322_v42 = vcombine.high %v541_v37, %v545_v38  ;;  %v405_v43 = vld [vmem:[%s15084_s12 + $0x280] sm:$0xff]  ;;  %10037 = vmatprep.subr.bf16.mxu0 %v13194_v41  ;;  %v13321_v48 = vcombine.low %v541_v37, %v545_v38 }
  0x4e   : > { %v409_v44 = vld [vmem:[%s15084_s12 + $0x2a0] sm:$0xff]  ;;  %10038 = vmatpush2.bf16.msra.mxu0 %v13193_v47 }
  0x4f   : > { %v533_v45 = vld [vmem:[%s15084_s12 + $0x680] sm:$0xff]  ;;  %v13186_v49 = vcombine.high %v405_v43, %v409_v44  ;;  %10078 = vmatprep.subr.bf16.mxu1 %v13322_v42  ;;  %v13185_v57 = vcombine.low %v405_v43, %v409_v44 }
  0x50   : > { %v537_v46 = vld [vmem:[%s15084_s12 + $0x6a0] sm:$0xff]  ;;  %10079 = vmatpush2.bf16.msra.mxu1 %v13321_v48 }
  0x51   : > { %v13314_v50 = vcombine.high %v533_v45, %v537_v46  ;;  %v397_v51 = vld [vmem:[%s15084_s12 + $0x240] sm:$0xff]  ;;  %10039 = vmatprep.subr.bf16.mxu0 %v13186_v49  ;;  %v13313_v58 = vcombine.low %v533_v45, %v537_v46 }
  0x52   : > { %v401_v52 = vld [vmem:[%s15084_s12 + $0x260] sm:$0xff]  ;;  %10040 = vmatpush2.bf16.msra.mxu0 %v13185_v57 }
  0x53   : > { %v525_v53 = vld [vmem:[%s15084_s12 + $0x640] sm:$0xff]  ;;  %v13178_v61 = vcombine.high %v397_v51, %v401_v52  ;;  %10080 = vmatprep.subr.bf16.mxu1 %v13314_v50  ;;  %v13177_v3 = vcombine.low %v397_v51, %v401_v52 }
  0x54   : > { %v529_v56 = vld [vmem:[%s15084_s12 + $0x660] sm:$0xff]  ;;  %10081 = vmatpush2.bf16.msra.mxu1 %v13313_v58 }
  0x55   : > { %v13306_v62 = vcombine.high %v525_v53, %v529_v56  ;;  %v389_v63 = vld [vmem:[%s15084_s12 + $0x200] sm:$0xff]  ;;  %10041 = vmatprep.subr.bf16.mxu0 %v13178_v61  ;;  %v13305_v4 = vcombine.low %v525_v53, %v529_v56 }
  0x56   : > { %v393_v0 = vld [vmem:[%s15084_s12 + $0x220] sm:$0xff]  ;;  %10042 = vmatpush2.bf16.msra.mxu0 %v13177_v3 }
  0x57   : > { %v517_v1 = vld [vmem:[%s15084_s12 + $0x600] sm:$0xff]  ;;  %v13170_v5 = vcombine.high %v389_v63, %v393_v0  ;;  %10082 = vmatprep.subr.bf16.mxu1 %v13306_v62  ;;  %v13169_v11 = vcombine.low %v389_v63, %v393_v0 }
  0x58   : > { %v521_v2 = vld [vmem:[%s15084_s12 + $0x620] sm:$0xff]  ;;  %10083 = vmatpush2.bf16.msra.mxu1 %v13305_v4 }
  0x59   : > { %v13298_v6 = vcombine.high %v517_v1, %v521_v2  ;;  %v637_v7 = vld [vmem:[%s15084_s12 + $0x9c0] sm:$0xff]  ;;  %10043 = vmatprep.subr.bf16.mxu0 %v13170_v5  ;;  %v13297_v12 = vcombine.low %v517_v1, %v521_v2 }
  0x5a   : > { %v641_v8 = vld [vmem:[%s15084_s12 + $0x9e0] sm:$0xff]  ;;  %10044 = vmatpush2.bf16.msra.mxu0 %v13169_v11 }
  0x5b   : > { %v765_v9 = vld [vmem:[%s15084_s12 + $0xdc0] sm:$0xff]  ;;  %v13418_v13 = vcombine.high %v637_v7, %v641_v8  ;;  %10084 = vmatprep.subr.bf16.mxu1 %v13298_v6  ;;  %v13417_v22 = vcombine.low %v637_v7, %v641_v8 }
  0x5c   : > { %v769_v10 = vld [vmem:[%s15084_s12 + $0xde0] sm:$0xff]  ;;  %10085 = vmatpush2.bf16.msra.mxu1 %v13297_v12 }
  0x5d   : > { %v13546_v14 = vcombine.high %v765_v9, %v769_v10  ;;  %v629_v15 = vld [vmem:[%s15084_s12 + $0x980] sm:$0xff]  ;;  %10095 = vmatprep.subr.bf16.mxu0 %v13418_v13  ;;  %v13545_v24 = vcombine.low %v765_v9, %v769_v10  ;;  %10046 = vmatmul.mubr.bf16.vlgmr.msra.gmra.mxu0 %v15175_v17 }
  0x5e   : > { %v633_v16 = vld [vmem:[%s15084_s12 + $0x9a0] sm:$0xff]  ;;  %10096 = vmatpush1.bf16.msra.mxu0 %v13417_v22  ;;  %10127 = vmatprep.mubr.bf16.mxu0 %v15193_v28 }
  0x5f   : > { %v757_v18 = vld [vmem:[%s15084_s12 + $0xd80] sm:$0xff]  ;;  %v13410_v25 = vcombine.high %v629_v15, %v633_v16  ;;  %10136 = vmatprep.subr.bf16.mxu1 %v13546_v14  ;;  %10087 = vmatmul.mubr.bf16.vlgmr.msra.gmra.mxu1 %v15184_v21  ;;  %v13409_v31 = vcombine.low %v629_v15, %v633_v16 }
  0x60   : > { %v761_v19 = vld [vmem:[%s15084_s12 + $0xda0] sm:$0xff]  ;;  %10137 = vmatpush1.bf16.msra.mxu1 %v13545_v24  ;;  %10168 = vmatprep.mubr.bf16.mxu1 %v15200_v30 }
  0x61   : > { %v13538_v54 = vcombine.high %v757_v18, %v761_v19  ;;  %v621_v26 = vld [vmem:[%s15084_s12 + $0x940] sm:$0xff]  ;;  %10097 = vmatprep.subr.bf16.mxu0 %v13410_v25  ;;  %v13537_v32 = vcombine.low %v757_v18, %v761_v19 }
  0x62   : > { %v625_v27 = vld [vmem:[%s15084_s12 + $0x960] sm:$0xff]  ;;  %10098 = vmatpush1.bf16.msra.mxu0 %v13409_v31 }
  0x63   : > { %v749_v55 = vld [vmem:[%s15084_s12 + $0xd40] sm:$0xff]  ;;  %v13402_v33 = vcombine.high %v621_v26, %v625_v27  ;;  %10138 = vmatprep.subr.bf16.mxu1 %v13538_v54  ;;  %v13401_v39 = vcombine.low %v621_v26, %v625_v27 }
  0x64   : > { %v753_v29 = vld [vmem:[%s15084_s12 + $0xd60] sm:$0xff]  ;;  %10139 = vmatpush1.bf16.msra.mxu1 %v13537_v32 }
  0x65   : > { %v13530_v34 = vcombine.high %v749_v55, %v753_v29  ;;  %v613_v35 = vld [vmem:[%s15084_s12 + $0x900] sm:$0xff]  ;;  %10099 = vmatprep.subr.bf16.mxu0 %v13402_v33  ;;  %v13529_v40 = vcombine.low %v749_v55, %v753_v29 }
  0x66   : > { %v617_v36 = vld [vmem:[%s15084_s12 + $0x920] sm:$0xff]  ;;  %10100 = vmatpush1.bf16.msra.mxu0 %v13401_v39 }
  0x67   : > { %v741_v37 = vld [vmem:[%s15084_s12 + $0xd00] sm:$0xff]  ;;  %v13394_v41 = vcombine.high %v613_v35, %v617_v36  ;;  %10140 = vmatprep.subr.bf16.mxu1 %v13530_v34  ;;  %v13393_v47 = vcombine.low %v613_v35, %v617_v36 }
  0x68   : > { %v745_v38 = vld [vmem:[%s15084_s12 + $0xd20] sm:$0xff]  ;;  %10141 = vmatpush1.bf16.msra.mxu1 %v13529_v40 }
  0x69   : > { %v13522_v42 = vcombine.high %v741_v37, %v745_v38  ;;  %v605_v43 = vld [vmem:[%s15084_s12 + $0x8c0] sm:$0xff]  ;;  %10101 = vmatprep.subr.bf16.mxu0 %v13394_v41  ;;  %v13521_v48 = vcombine.low %v741_v37, %v745_v38 }
  0x6a   : > { %v609_v44 = vld [vmem:[%s15084_s12 + $0x8e0] sm:$0xff]  ;;  %10102 = vmatpush1.bf16.msra.mxu0 %v13393_v47 }
  0x6b   : > { %v733_v45 = vld [vmem:[%s15084_s12 + $0xcc0] sm:$0xff]  ;;  %v13386_v49 = vcombine.high %v605_v43, %v609_v44  ;;  %10142 = vmatprep.subr.bf16.mxu1 %v13522_v42  ;;  %v13385_v57 = vcombine.low %v605_v43, %v609_v44 }
  0x6c   : > { %v737_v46 = vld [vmem:[%s15084_s12 + $0xce0] sm:$0xff]  ;;  %10143 = vmatpush1.bf16.msra.mxu1 %v13521_v48 }
  0x6d   : > { %v13514_v50 = vcombine.high %v733_v45, %v737_v46  ;;  %v597_v51 = vld [vmem:[%s15084_s12 + $0x880] sm:$0xff]  ;;  %10103 = vmatprep.subr.bf16.mxu0 %v13386_v49  ;;  %v13513_v58 = vcombine.low %v733_v45, %v737_v46 }
  0x6e   : > { %v601_v52 = vld [vmem:[%s15084_s12 + $0x8a0] sm:$0xff]  ;;  %10104 = vmatpush1.bf16.msra.mxu0 %v13385_v57 }
  0x6f   : > { %v725_v53 = vld [vmem:[%s15084_s12 + $0xc80] sm:$0xff]  ;;  %v13378_v61 = vcombine.high %v597_v51, %v601_v52  ;;  %10144 = vmatprep.subr.bf16.mxu1 %v13514_v50  ;;  %v13377_v3 = vcombine.low %v597_v51, %v601_v52 }
  0x70   : > { %v729_v56 = vld [vmem:[%s15084_s12 + $0xca0] sm:$0xff]  ;;  %10145 = vmatpush1.bf16.msra.mxu1 %v13513_v58 }
  0x71   : > { %v13506_v62 = vcombine.high %v725_v53, %v729_v56  ;;  %v589_v63 = vld [vmem:[%s15084_s12 + $0x840] sm:$0xff]  ;;  %10105 = vmatprep.subr.bf16.mxu0 %v13378_v61  ;;  %v13505_v4 = vcombine.low %v725_v53, %v729_v56 }
  0x72   : > { %v593_v0 = vld [vmem:[%s15084_s12 + $0x860] sm:$0xff]  ;;  %10106 = vmatpush1.bf16.msra.mxu0 %v13377_v3 }
  0x73   : > { %v717_v1 = vld [vmem:[%s15084_s12 + $0xc40] sm:$0xff]  ;;  %v13370_v5 = vcombine.high %v589_v63, %v593_v0  ;;  %10146 = vmatprep.subr.bf16.mxu1 %v13506_v62  ;;  %v13369_v11 = vcombine.low %v589_v63, %v593_v0 }
  0x74   : > { %v721_v2 = vld [vmem:[%s15084_s12 + $0xc60] sm:$0xff]  ;;  %10147 = vmatpush1.bf16.msra.mxu1 %v13505_v4 }
  0x75   : > { %v13498_v6 = vcombine.high %v717_v1, %v721_v2  ;;  %v581_v7 = vld [vmem:[%s15084_s12 + $0x800] sm:$0xff]  ;;  %10107 = vmatprep.subr.bf16.mxu0 %v13370_v5  ;;  %v13497_v12 = vcombine.low %v717_v1, %v721_v2 }
  0x76   : > { %v585_v8 = vld [vmem:[%s15084_s12 + $0x820] sm:$0xff]  ;;  %10108 = vmatpush1.bf16.msra.mxu0 %v13369_v11 }
  0x77   : > { %v709_v9 = vld [vmem:[%s15084_s12 + $0xc00] sm:$0xff]  ;;  %v13362_v13 = vcombine.high %v581_v7, %v585_v8  ;;  %10148 = vmatprep.subr.bf16.mxu1 %v13498_v6  ;;  %v13361_v22 = vcombine.low %v581_v7, %v585_v8 }
  0x78   : > { %v713_v10 = vld [vmem:[%s15084_s12 + $0xc20] sm:$0xff]  ;;  %10149 = vmatpush1.bf16.msra.mxu1 %v13497_v12 }
  0x79   : > { %v13490_v14 = vcombine.high %v709_v9, %v713_v10  ;;  %v701_v15 = vld [vmem:[%s15084_s12 + $0xbc0] sm:$0xff]  ;;  %10109 = vmatprep.subr.bf16.mxu0 %v13362_v13  ;;  %v13489_v24 = vcombine.low %v709_v9, %v713_v10 }
  0x7a   : > { %v705_v16 = vld [vmem:[%s15084_s12 + $0xbe0] sm:$0xff]  ;;  %10110 = vmatpush1.bf16.msra.mxu0 %v13361_v22 }
  0x7b   : > { %v829_v18 = vld [vmem:[%s15084_s12 + $0xfc0] sm:$0xff]  ;;  %v13482_v25 = vcombine.high %v701_v15, %v705_v16  ;;  %10150 = vmatprep.subr.bf16.mxu1 %v13490_v14  ;;  %v13481_v31 = vcombine.low %v701_v15, %v705_v16 }
  0x7c   : > { %v833_v19 = vld [vmem:[%s15084_s12 + $0xfe0] sm:$0xff]  ;;  %10151 = vmatpush1.bf16.msra.mxu1 %v13489_v24 }
  0x7d   : > { %v13610_v54 = vcombine.high %v829_v18, %v833_v19  ;;  %v693_v26 = vld [vmem:[%s15084_s12 + $0xb80] sm:$0xff]  ;;  %10111 = vmatprep.subr.bf16.mxu0 %v13482_v25  ;;  %v13609_v32 = vcombine.low %v829_v18, %v833_v19 }
  0x7e   : > { %v697_v27 = vld [vmem:[%s15084_s12 + $0xba0] sm:$0xff]  ;;  %10112 = vmatpush2.bf16.msra.mxu0 %v13481_v31 }
  0x7f   : > { %v821_v55 = vld [vmem:[%s15084_s12 + $0xf80] sm:$0xff]  ;;  %v13474_v33 = vcombine.high %v693_v26, %v697_v27  ;;  %10152 = vmatprep.subr.bf16.mxu1 %v13610_v54  ;;  %v13473_v39 = vcombine.low %v693_v26, %v697_v27 }
  0x80   : > { %v825_v29 = vld [vmem:[%s15084_s12 + $0xfa0] sm:$0xff]  ;;  %10153 = vmatpush2.bf16.msra.mxu1 %v13609_v32 }
  0x81   : > { %v13602_v34 = vcombine.high %v821_v55, %v825_v29  ;;  %v685_v35 = vld [vmem:[%s15084_s12 + $0xb40] sm:$0xff]  ;;  %10113 = vmatprep.subr.bf16.mxu0 %v13474_v33  ;;  %v13601_v40 = vcombine.low %v821_v55, %v825_v29 }
  0x82   : > { %v689_v36 = vld [vmem:[%s15084_s12 + $0xb60] sm:$0xff]  ;;  %10114 = vmatpush2.bf16.msra.mxu0 %v13473_v39 }
  0x83   : > { %v813_v37 = vld [vmem:[%s15084_s12 + $0xf40] sm:$0xff]  ;;  %v13466_v41 = vcombine.high %v685_v35, %v689_v36  ;;  %10154 = vmatprep.subr.bf16.mxu1 %v13602_v34  ;;  %v13465_v47 = vcombine.low %v685_v35, %v689_v36 }
  0x84   : > { %v817_v38 = vld [vmem:[%s15084_s12 + $0xf60] sm:$0xff]  ;;  %10155 = vmatpush2.bf16.msra.mxu1 %v13601_v40 }
  0x85   : > { %v13594_v42 = vcombine.high %v813_v37, %v817_v38  ;;  %v677_v43 = vld [vmem:[%s15084_s12 + $0xb00] sm:$0xff]  ;;  %10115 = vmatprep.subr.bf16.mxu0 %v13466_v41  ;;  %v13593_v48 = vcombine.low %v813_v37, %v817_v38  ;;  %v15265_v37 = vcombine.low %v15180_v20, %v15180_v20  ;;  %v15274_v41 = vcombine.low %v15187_v23, %v15187_v23 }
  0x86   : > { %v681_v44 = vld [vmem:[%s15084_s12 + $0xb20] sm:$0xff]  ;;  %10116 = vmatpush2.bf16.msra.mxu0 %v13465_v47 }
  0x87   : > { %v805_v45 = vld [vmem:[%s15084_s12 + $0xf00] sm:$0xff]  ;;  %v13458_v49 = vcombine.high %v677_v43, %v681_v44  ;;  %10156 = vmatprep.subr.bf16.mxu1 %v13594_v42  ;;  %v13457_v57 = vcombine.low %v677_v43, %v681_v44  ;;  %v15277_v43 = vld [vmem:[%s15079_s8 + $0x28] sm:$0xff] }
  0x88   : > { %v809_v46 = vld [vmem:[%s15084_s12 + $0xf20] sm:$0xff]  ;;  %10157 = vmatpush2.bf16.msra.mxu1 %v13593_v48 }
  0x89   : > { %v13586_v50 = vcombine.high %v805_v45, %v809_v46  ;;  %v669_v51 = vld [vmem:[%s15084_s12 + $0xac0] sm:$0xff]  ;;  %10117 = vmatprep.subr.bf16.mxu0 %v13458_v49  ;;  %v13585_v58 = vcombine.low %v805_v45, %v809_v46 }
  0x8a   : > { %v673_v52 = vld [vmem:[%s15084_s12 + $0xae0] sm:$0xff]  ;;  %10118 = vmatpush2.bf16.msra.mxu0 %v13457_v57 }
  0x8b   : > { %v797_v53 = vld [vmem:[%s15084_s12 + $0xec0] sm:$0xff]  ;;  %v13450_v61 = vcombine.high %v669_v51, %v673_v52  ;;  %10158 = vmatprep.subr.bf16.mxu1 %v13586_v50  ;;  %v13449_v3 = vcombine.low %v669_v51, %v673_v52  ;;  %v15290_v50 = vcombine.high %v15277_v43, %v15277_v43 }
  0x8c   : > { %v801_v56 = vld [vmem:[%s15084_s12 + $0xee0] sm:$0xff]  ;;  %10159 = vmatpush2.bf16.msra.mxu1 %v13585_v58 }
  0x8d   : > { %v13578_v62 = vcombine.high %v797_v53, %v801_v56  ;;  %v661_v63 = vld [vmem:[%s15084_s12 + $0xa80] sm:$0xff]  ;;  %10119 = vmatprep.subr.bf16.mxu0 %v13450_v61  ;;  %v13577_v4 = vcombine.low %v797_v53, %v801_v56 }
  0x8e   : > { %v665_v0 = vld [vmem:[%s15084_s12 + $0xaa0] sm:$0xff]  ;;  %10120 = vmatpush2.bf16.msra.mxu0 %v13449_v3 }
  0x8f   : > { %v789_v1 = vld [vmem:[%s15084_s12 + $0xe80] sm:$0xff]  ;;  %v13442_v5 = vcombine.high %v661_v63, %v665_v0  ;;  %10160 = vmatprep.subr.bf16.mxu1 %v13578_v62  ;;  %v13441_v11 = vcombine.low %v661_v63, %v665_v0 }
  0x90   : > { %v793_v2 = vld [vmem:[%s15084_s12 + $0xea0] sm:$0xff]  ;;  %10161 = vmatpush2.bf16.msra.mxu1 %v13577_v4 }
  0x91   : > { %v13570_v6 = vcombine.high %v789_v1, %v793_v2  ;;  %v653_v7 = vld [vmem:[%s15084_s12 + $0xa40] sm:$0xff]  ;;  %10121 = vmatprep.subr.bf16.mxu0 %v13442_v5  ;;  %v13569_v12 = vcombine.low %v789_v1, %v793_v2 }
  0x92   : > { %v657_v8 = vld [vmem:[%s15084_s12 + $0xa60] sm:$0xff]  ;;  %10122 = vmatpush2.bf16.msra.mxu0 %v13441_v11 }
  0x93   : > { %v781_v9 = vld [vmem:[%s15084_s12 + $0xe40] sm:$0xff]  ;;  %v13434_v13 = vcombine.high %v653_v7, %v657_v8  ;;  %10162 = vmatprep.subr.bf16.mxu1 %v13570_v6  ;;  %v13433_v22 = vcombine.low %v653_v7, %v657_v8 }
  0x94   : > { %v785_v10 = vld [vmem:[%s15084_s12 + $0xe60] sm:$0xff]  ;;  %10163 = vmatpush2.bf16.msra.mxu1 %v13569_v12 }
  0x95   : > { %v13562_v14 = vcombine.high %v781_v9, %v785_v10  ;;  %v645_v15 = vld [vmem:[%s15084_s12 + $0xa00] sm:$0xff]  ;;  %10123 = vmatprep.subr.bf16.mxu0 %v13434_v13  ;;  %v13561_v24 = vcombine.low %v781_v9, %v785_v10 }
  0x96   : > { %v649_v16 = vld [vmem:[%s15084_s12 + $0xa20] sm:$0xff]  ;;  %10124 = vmatpush2.bf16.msra.mxu0 %v13433_v22 }
  0x97   : > { %v773_v18 = vld [vmem:[%s15084_s12 + $0xe00] sm:$0xff]  ;;  %v13426_v25 = vcombine.high %v645_v15, %v649_v16  ;;  %10164 = vmatprep.subr.bf16.mxu1 %v13562_v14  ;;  %v13425_v31 = vcombine.low %v645_v15, %v649_v16 }
  0x98   : > { %v777_v19 = vld [vmem:[%s15084_s12 + $0xe20] sm:$0xff]  ;;  %10165 = vmatpush2.bf16.msra.mxu1 %v13561_v24 }
  0x99   : > { %v13554_v54 = vcombine.high %v773_v18, %v777_v19  ;;  %v893_v26 = vld [vmem:[%s15084_s12 + $0x11c0] sm:$0xff]  ;;  %10125 = vmatprep.subr.bf16.mxu0 %v13426_v25  ;;  %v13553_v32 = vcombine.low %v773_v18, %v777_v19 }
  0x9a   : > { %v897_v27 = vld [vmem:[%s15084_s12 + $0x11e0] sm:$0xff]  ;;  %10126 = vmatpush2.bf16.msra.mxu0 %v13425_v31 }
  0x9b   : > { %v1021_v55 = vld [vmem:[%s15084_s12 + $0x15c0] sm:$0xff]  ;;  %v13674_v33 = vcombine.high %v893_v26, %v897_v27  ;;  %10166 = vmatprep.subr.bf16.mxu1 %v13554_v54  ;;  %v13673_v42 = vcombine.low %v893_v26, %v897_v27 }
  0x9c   : > { %v1025_v29 = vld [vmem:[%s15084_s12 + $0x15e0] sm:$0xff]  ;;  %10167 = vmatpush2.bf16.msra.mxu1 %v13553_v32 }
  0x9d   : > { %v13802_v34 = vcombine.high %v1021_v55, %v1025_v29  ;;  %v885_v35 = vld [vmem:[%s15084_s12 + $0x1180] sm:$0xff]  ;;  %10177 = vmatprep.subr.bf16.mxu0 %v13674_v33  ;;  %v13801_v44 = vcombine.low %v1021_v55, %v1025_v29  ;;  %10128 = vmatmul.mubr.bf16.vlgmr.msra.gmra.mxu0 %v15265_v37 }
  0x9e   : > { %v889_v36 = vld [vmem:[%s15084_s12 + $0x11a0] sm:$0xff]  ;;  %10178 = vmatpush1.bf16.msra.mxu0 %v13673_v42 }
  0x9f   : > { %v1013_v38 = vld [vmem:[%s15084_s12 + $0x1580] sm:$0xff]  ;;  %v13666_v45 = vcombine.high %v885_v35, %v889_v36  ;;  %10218 = vmatprep.subr.bf16.mxu1 %v13802_v34  ;;  %10169 = vmatmul.mubr.bf16.vlgmr.msra.gmra.mxu1 %v15274_v41  ;;  %v13665_v51 = vcombine.low %v885_v35, %v889_v36 }
  0xa0   : > { %v1017_v39 = vld [vmem:[%s15084_s12 + $0x15a0] sm:$0xff]  ;;  %10219 = vmatpush1.bf16.msra.mxu1 %v13801_v44  ;;  %10250 = vmatprep.mubr.bf16.mxu1 %v15290_v50 }
  0xa1   : > { %v15270_v40 = vld [vmem:[%s15079_s8 + $0x20] sm:$0xff]  ;;  %v13794_v20 = vcombine.high %v1013_v38, %v1017_v39  ;;  %10179 = vmatprep.subr.bf16.mxu0 %v13666_v45  ;;  %v13793_v52 = vcombine.low %v1013_v38, %v1017_v39 }
  0xa2   : > { %v877_v46 = vld [vmem:[%s15084_s12 + $0x1140] sm:$0xff]  ;;  %v15283_v48 = vcombine.high %v15270_v40, %v15270_v40  ;;  %10180 = vmatpush1.bf16.msra.mxu0 %v13665_v51 }
  0xa3   : > { %v881_v47 = vld [vmem:[%s15084_s12 + $0x1160] sm:$0xff]  ;;  %10220 = vmatprep.subr.bf16.mxu1 %v13794_v20 }
  0xa4   : > { %v1005_v23 = vld [vmem:[%s15084_s12 + $0x1540] sm:$0xff]  ;;  %v13658_v53 = vcombine.high %v877_v46, %v881_v47  ;;  %10209 = vmatprep.mubr.bf16.mxu0 %v15283_v48  ;;  %v13657_v63 = vcombine.low %v877_v46, %v881_v47  ;;  %10221 = vmatpush1.bf16.msra.mxu1 %v13793_v52 }
  0xa5   : > { %v1009_v49 = vld [vmem:[%s15084_s12 + $0x1560] sm:$0xff] }
  0xa6   : > { %v13786_v56 = vcombine.high %v1005_v23, %v1009_v49  ;;  %v869_v57 = vld [vmem:[%s15084_s12 + $0x1100] sm:$0xff]  ;;  %10181 = vmatprep.subr.bf16.mxu0 %v13658_v53  ;;  %v13785_v0 = vcombine.low %v1005_v23, %v1009_v49 }
  0xa7   : > { %v873_v58 = vld [vmem:[%s15084_s12 + $0x1120] sm:$0xff]  ;;  %10182 = vmatpush1.bf16.msra.mxu0 %v13657_v63 }
  0xa8   : > { %v997_v61 = vld [vmem:[%s15084_s12 + $0x1500] sm:$0xff]  ;;  %v13650_v1 = vcombine.high %v869_v57, %v873_v58  ;;  %10222 = vmatprep.subr.bf16.mxu1 %v13786_v56  ;;  %v13649_v7 = vcombine.low %v869_v57, %v873_v58 }
  0xa9   : > { %v1001_v62 = vld [vmem:[%s15084_s12 + $0x1520] sm:$0xff]  ;;  %10223 = vmatpush1.bf16.msra.mxu1 %v13785_v0 }
  0xaa   : > { %v13778_v2 = vcombine.high %v997_v61, %v1001_v62  ;;  %v861_v3 = vld [vmem:[%s15084_s12 + $0x10c0] sm:$0xff]  ;;  %10183 = vmatprep.subr.bf16.mxu0 %v13650_v1  ;;  %v13777_v8 = vcombine.low %v997_v61, %v1001_v62 }
  0xab   : > { %v865_v4 = vld [vmem:[%s15084_s12 + $0x10e0] sm:$0xff]  ;;  %10184 = vmatpush1.bf16.msra.mxu0 %v13649_v7 }
  0xac   : > { %v989_v5 = vld [vmem:[%s15084_s12 + $0x14c0] sm:$0xff]  ;;  %v13642_v9 = vcombine.high %v861_v3, %v865_v4  ;;  %10224 = vmatprep.subr.bf16.mxu1 %v13778_v2  ;;  %v13641_v15 = vcombine.low %v861_v3, %v865_v4 }
  0xad   : > { %v993_v6 = vld [vmem:[%s15084_s12 + $0x14e0] sm:$0xff]  ;;  %10225 = vmatpush1.bf16.msra.mxu1 %v13777_v8 }
  0xae   : > { %v13770_v10 = vcombine.high %v989_v5, %v993_v6  ;;  %v853_v11 = vld [vmem:[%s15084_s12 + $0x1080] sm:$0xff]  ;;  %10185 = vmatprep.subr.bf16.mxu0 %v13642_v9  ;;  %v13769_v16 = vcombine.low %v989_v5, %v993_v6 }
  0xaf   : > { %v857_v12 = vld [vmem:[%s15084_s12 + $0x10a0] sm:$0xff]  ;;  %10186 = vmatpush1.bf16.msra.mxu0 %v13641_v15 }
  0xb0   : > { %v981_v13 = vld [vmem:[%s15084_s12 + $0x1480] sm:$0xff]  ;;  %v13634_v18 = vcombine.high %v853_v11, %v857_v12  ;;  %10226 = vmatprep.subr.bf16.mxu1 %v13770_v10  ;;  %v13633_v26 = vcombine.low %v853_v11, %v857_v12 }
  0xb1   : > { %v985_v14 = vld [vmem:[%s15084_s12 + $0x14a0] sm:$0xff]  ;;  %10227 = vmatpush1.bf16.msra.mxu1 %v13769_v16 }
  0xb2   : > { %v13762_v19 = vcombine.high %v981_v13, %v985_v14  ;;  %v845_v22 = vld [vmem:[%s15084_s12 + $0x1040] sm:$0xff]  ;;  %10187 = vmatprep.subr.bf16.mxu0 %v13634_v18  ;;  %v13761_v27 = vcombine.low %v981_v13, %v985_v14 }
  0xb3   : > { %v849_v24 = vld [vmem:[%s15084_s12 + $0x1060] sm:$0xff]  ;;  %10188 = vmatpush1.bf16.msra.mxu0 %v13633_v26 }
  0xb4   : > { %v973_v25 = vld [vmem:[%s15084_s12 + $0x1440] sm:$0xff]  ;;  %v13626_v55 = vcombine.high %v845_v22, %v849_v24  ;;  %10228 = vmatprep.subr.bf16.mxu1 %v13762_v19  ;;  %v13625_v35 = vcombine.low %v845_v22, %v849_v24 }
  0xb5   : > { %v977_v54 = vld [vmem:[%s15084_s12 + $0x1460] sm:$0xff]  ;;  %10229 = vmatpush1.bf16.msra.mxu1 %v13761_v27 }
  0xb6   : > { %v13754_v29 = vcombine.high %v973_v25, %v977_v54  ;;  %v837_v31 = vld [vmem:[%s15084_s12 + $0x1000] sm:$0xff]  ;;  %10189 = vmatprep.subr.bf16.mxu0 %v13626_v55  ;;  %v13753_v36 = vcombine.low %v973_v25, %v977_v54 }
  0xb7   : > { %v841_v32 = vld [vmem:[%s15084_s12 + $0x1020] sm:$0xff]  ;;  %10190 = vmatpush1.bf16.msra.mxu0 %v13625_v35 }
  0xb8   : > { %v965_v33 = vld [vmem:[%s15084_s12 + $0x1400] sm:$0xff]  ;;  %v13618_v38 = vcombine.high %v837_v31, %v841_v32  ;;  %10230 = vmatprep.subr.bf16.mxu1 %v13754_v29  ;;  %v13617_v46 = vcombine.low %v837_v31, %v841_v32 }
  0xb9   : > { %v969_v34 = vld [vmem:[%s15084_s12 + $0x1420] sm:$0xff]  ;;  %10231 = vmatpush1.bf16.msra.mxu1 %v13753_v36 }
  0xba   : > { %v13746_v39 = vcombine.high %v965_v33, %v969_v34  ;;  %v957_v42 = vld [vmem:[%s15084_s12 + $0x13c0] sm:$0xff]  ;;  %10191 = vmatprep.subr.bf16.mxu0 %v13618_v38  ;;  %v13745_v47 = vcombine.low %v965_v33, %v969_v34 }
  0xbb   : > { %v961_v44 = vld [vmem:[%s15084_s12 + $0x13e0] sm:$0xff]  ;;  %10192 = vmatpush1.bf16.msra.mxu0 %v13617_v46 }
  0xbc   : > { %v1085_v45 = vld [vmem:[%s15084_s12 + $0x17c0] sm:$0xff]  ;;  %v13738_v23 = vcombine.high %v957_v42, %v961_v44  ;;  %10232 = vmatprep.subr.bf16.mxu1 %v13746_v39  ;;  %v13737_v57 = vcombine.low %v957_v42, %v961_v44 }
  0xbd   : > { %v1089_v20 = vld [vmem:[%s15084_s12 + $0x17e0] sm:$0xff]  ;;  %10233 = vmatpush1.bf16.msra.mxu1 %v13745_v47 }
  0xbe   : > { %v13866_v49 = vcombine.high %v1085_v45, %v1089_v20  ;;  %v949_v51 = vld [vmem:[%s15084_s12 + $0x1380] sm:$0xff]  ;;  %10193 = vmatprep.subr.bf16.mxu0 %v13738_v23  ;;  %v13865_v58 = vcombine.low %v1085_v45, %v1089_v20 }
  0xbf   : > { %v953_v52 = vld [vmem:[%s15084_s12 + $0x13a0] sm:$0xff]  ;;  %10194 = vmatpush2.bf16.msra.mxu0 %v13737_v57 }
  0xc0   : > { %v1077_v53 = vld [vmem:[%s15084_s12 + $0x1780] sm:$0xff]  ;;  %v13730_v61 = vcombine.high %v949_v51, %v953_v52  ;;  %10234 = vmatprep.subr.bf16.mxu1 %v13866_v49  ;;  %v13729_v3 = vcombine.low %v949_v51, %v953_v52 }
  0xc1   : > { %v1081_v56 = vld [vmem:[%s15084_s12 + $0x17a0] sm:$0xff]  ;;  %10235 = vmatpush2.bf16.msra.mxu1 %v13865_v58 }
  0xc2   : > { %v13858_v62 = vcombine.high %v1077_v53, %v1081_v56  ;;  %v941_v63 = vld [vmem:[%s15084_s12 + $0x1340] sm:$0xff]  ;;  %10195 = vmatprep.subr.bf16.mxu0 %v13730_v61  ;;  %v13857_v4 = vcombine.low %v1077_v53, %v1081_v56 }
  0xc3   : > { %v945_v0 = vld [vmem:[%s15084_s12 + $0x1360] sm:$0xff]  ;;  %10196 = vmatpush2.bf16.msra.mxu0 %v13729_v3 }
  0xc4   : > { %v1069_v1 = vld [vmem:[%s15084_s12 + $0x1740] sm:$0xff]  ;;  %v13722_v5 = vcombine.high %v941_v63, %v945_v0  ;;  %10236 = vmatprep.subr.bf16.mxu1 %v13858_v62  ;;  %v13721_v11 = vcombine.low %v941_v63, %v945_v0 }
  0xc5   : > { %v1073_v2 = vld [vmem:[%s15084_s12 + $0x1760] sm:$0xff]  ;;  %10237 = vmatpush2.bf16.msra.mxu1 %v13857_v4 }
  0xc6   : > { %v13850_v6 = vcombine.high %v1069_v1, %v1073_v2  ;;  %v933_v7 = vld [vmem:[%s15084_s12 + $0x1300] sm:$0xff]  ;;  %10197 = vmatprep.subr.bf16.mxu0 %v13722_v5  ;;  %v13849_v12 = vcombine.low %v1069_v1, %v1073_v2  ;;  %v15355_v5 = vcombine.low %v15270_v40, %v15270_v40 }
  0xc7   : > { %v937_v8 = vld [vmem:[%s15084_s12 + $0x1320] sm:$0xff]  ;;  %10198 = vmatpush2.bf16.msra.mxu0 %v13721_v11  ;;  %v15367_v11 = vld [vmem:[%s15079_s8 + $0x38] sm:$0xff] }
  0xc8   : > { %v1061_v9 = vld [vmem:[%s15084_s12 + $0x1700] sm:$0xff]  ;;  %v13714_v13 = vcombine.high %v933_v7, %v937_v8  ;;  %10238 = vmatprep.subr.bf16.mxu1 %v13850_v6  ;;  %v13713_v22 = vcombine.low %v933_v7, %v937_v8  ;;  %v15360_v8 = vld [vmem:[%s15079_s8 + $0x30] sm:$0xff] }
  0xc9   : > { %v1065_v10 = vld [vmem:[%s15084_s12 + $0x1720] sm:$0xff]  ;;  %10239 = vmatpush2.bf16.msra.mxu1 %v13849_v12 }
  0xca   : > { %v13842_v14 = vcombine.high %v1061_v9, %v1065_v10  ;;  %v925_v15 = vld [vmem:[%s15084_s12 + $0x12c0] sm:$0xff]  ;;  %10199 = vmatprep.subr.bf16.mxu0 %v13714_v13  ;;  %v13841_v24 = vcombine.low %v1061_v9, %v1065_v10  ;;  %v15364_v9 = vcombine.low %v15277_v43, %v15277_v43 }
  0xcb   : > { %v929_v16 = vld [vmem:[%s15084_s12 + $0x12e0] sm:$0xff]  ;;  %10200 = vmatpush2.bf16.msra.mxu0 %v13713_v22 }
  0xcc   : > { %v1053_v18 = vld [vmem:[%s15084_s12 + $0x16c0] sm:$0xff]  ;;  %v13706_v25 = vcombine.high %v925_v15, %v929_v16  ;;  %10240 = vmatprep.subr.bf16.mxu1 %v13842_v14  ;;  %v13705_v31 = vcombine.low %v925_v15, %v929_v16  ;;  %v15373_v16 = vcombine.high %v15360_v8, %v15360_v8 }
  0xcd   : > { %v1057_v19 = vld [vmem:[%s15084_s12 + $0x16e0] sm:$0xff]  ;;  %10241 = vmatpush2.bf16.msra.mxu1 %v13841_v24 }
  0xce   : > { %v13834_v54 = vcombine.high %v1053_v18, %v1057_v19  ;;  %v917_v26 = vld [vmem:[%s15084_s12 + $0x1280] sm:$0xff]  ;;  %10201 = vmatprep.subr.bf16.mxu0 %v13706_v25  ;;  %v13833_v32 = vcombine.low %v1053_v18, %v1057_v19  ;;  %v15380_v19 = vcombine.high %v15367_v11, %v15367_v11 }
  0xcf   : > { %v921_v27 = vld [vmem:[%s15084_s12 + $0x12a0] sm:$0xff]  ;;  %10202 = vmatpush2.bf16.msra.mxu0 %v13705_v31 }
  0xd0   : > { %v1045_v55 = vld [vmem:[%s15084_s12 + $0x1680] sm:$0xff]  ;;  %v13698_v33 = vcombine.high %v917_v26, %v921_v27  ;;  %10242 = vmatprep.subr.bf16.mxu1 %v13834_v54  ;;  %v13697_v42 = vcombine.low %v917_v26, %v921_v27 }
  0xd1   : > { %v1049_v29 = vld [vmem:[%s15084_s12 + $0x16a0] sm:$0xff]  ;;  %10243 = vmatpush2.bf16.msra.mxu1 %v13833_v32 }
  0xd2   : > { %v13826_v34 = vcombine.high %v1045_v55, %v1049_v29  ;;  %v909_v35 = vld [vmem:[%s15084_s12 + $0x1240] sm:$0xff]  ;;  %10203 = vmatprep.subr.bf16.mxu0 %v13698_v33  ;;  %v13825_v44 = vcombine.low %v1045_v55, %v1049_v29 }
  0xd3   : > { %v913_v36 = vld [vmem:[%s15084_s12 + $0x1260] sm:$0xff]  ;;  %10204 = vmatpush2.bf16.msra.mxu0 %v13697_v42 }
  0xd4   : > { %v1037_v38 = vld [vmem:[%s15084_s12 + $0x1640] sm:$0xff]  ;;  %v13690_v45 = vcombine.high %v909_v35, %v913_v36  ;;  %10244 = vmatprep.subr.bf16.mxu1 %v13826_v34  ;;  %v13689_v51 = vcombine.low %v909_v35, %v913_v36 }
  0xd5   : > { %v1041_v39 = vld [vmem:[%s15084_s12 + $0x1660] sm:$0xff]  ;;  %10245 = vmatpush2.bf16.msra.mxu1 %v13825_v44 }
  0xd6   : > { %v13818_v20 = vcombine.high %v1037_v38, %v1041_v39  ;;  %v901_v46 = vld [vmem:[%s15084_s12 + $0x1200] sm:$0xff]  ;;  %10205 = vmatprep.subr.bf16.mxu0 %v13690_v45  ;;  %v13817_v52 = vcombine.low %v1037_v38, %v1041_v39 }
  0xd7   : > { %v905_v47 = vld [vmem:[%s15084_s12 + $0x1220] sm:$0xff]  ;;  %10206 = vmatpush2.bf16.msra.mxu0 %v13689_v51 }
  0xd8   : > { %v1029_v23 = vld [vmem:[%s15084_s12 + $0x1600] sm:$0xff]  ;;  %v13682_v53 = vcombine.high %v901_v46, %v905_v47  ;;  %10246 = vmatprep.subr.bf16.mxu1 %v13818_v20  ;;  %v13681_v63 = vcombine.low %v901_v46, %v905_v47 }
  0xd9   : > { %v1033_v49 = vld [vmem:[%s15084_s12 + $0x1620] sm:$0xff]  ;;  %10247 = vmatpush2.bf16.msra.mxu1 %v13817_v52 }
  0xda   : > { %v13810_v56 = vcombine.high %v1029_v23, %v1033_v49  ;;  %v1149_v57 = vld [vmem:[%s15084_s12 + $0x19c0] sm:$0xff]  ;;  %10207 = vmatprep.subr.bf16.mxu0 %v13682_v53  ;;  %v13809_v0 = vcombine.low %v1029_v23, %v1033_v49 }
  0xdb   : > { %v1153_v58 = vld [vmem:[%s15084_s12 + $0x19e0] sm:$0xff]  ;;  %10208 = vmatpush2.bf16.msra.mxu0 %v13681_v63 }
  0xdc   : > { %v1277_v61 = vld [vmem:[%s15084_s12 + $0x1dc0] sm:$0xff]  ;;  %v13930_v1 = vcombine.high %v1149_v57, %v1153_v58  ;;  %10248 = vmatprep.subr.bf16.mxu1 %v13810_v56  ;;  %v13929_v10 = vcombine.low %v1149_v57, %v1153_v58 }
  0xdd   : > { %v1281_v62 = vld [vmem:[%s15084_s12 + $0x1de0] sm:$0xff]  ;;  %10249 = vmatpush2.bf16.msra.mxu1 %v13809_v0 }
  0xde   : > { %v14058_v2 = vcombine.high %v1277_v61, %v1281_v62  ;;  %v1141_v3 = vld [vmem:[%s15084_s12 + $0x1980] sm:$0xff]  ;;  %10259 = vmatprep.subr.bf16.mxu0 %v13930_v1  ;;  %v14057_v12 = vcombine.low %v1277_v61, %v1281_v62  ;;  %10210 = vmatmul.mubr.bf16.vlgmr.msra.gmra.mxu0 %v15355_v5 }
  0xdf   : > { %v1145_v4 = vld [vmem:[%s15084_s12 + $0x19a0] sm:$0xff]  ;;  %10260 = vmatpush1.bf16.msra.mxu0 %v13929_v10  ;;  %10291 = vmatprep.mubr.bf16.mxu0 %v15373_v16 }
  0xe0   : > { %v1269_v6 = vld [vmem:[%s15084_s12 + $0x1d80] sm:$0xff]  ;;  %v13922_v13 = vcombine.high %v1141_v3, %v1145_v4  ;;  %10300 = vmatprep.subr.bf16.mxu1 %v14058_v2  ;;  %10251 = vmatmul.mubr.bf16.vlgmr.msra.gmra.mxu1 %v15364_v9  ;;  %v13921_v22 = vcombine.low %v1141_v3, %v1145_v4 }
  0xe1   : > { %v1273_v7 = vld [vmem:[%s15084_s12 + $0x1da0] sm:$0xff]  ;;  %10301 = vmatpush1.bf16.msra.mxu1 %v14057_v12  ;;  %10332 = vmatprep.mubr.bf16.mxu1 %v15380_v19 }
  0xe2   : > { %v14050_v40 = vcombine.high %v1269_v6, %v1273_v7  ;;  %v1133_v14 = vld [vmem:[%s15084_s12 + $0x1940] sm:$0xff]  ;;  %10261 = vmatprep.subr.bf16.mxu0 %v13922_v13  ;;  %v14049_v24 = vcombine.low %v1269_v6, %v1273_v7 }
  0xe3   : > { %v1137_v15 = vld [vmem:[%s15084_s12 + $0x1960] sm:$0xff]  ;;  %10262 = vmatpush1.bf16.msra.mxu0 %v13921_v22 }
  0xe4   : > { %v1261_v43 = vld [vmem:[%s15084_s12 + $0x1d40] sm:$0xff]  ;;  %v13914_v25 = vcombine.high %v1133_v14, %v1137_v15  ;;  %10302 = vmatprep.subr.bf16.mxu1 %v14050_v40  ;;  %v13913_v31 = vcombine.low %v1133_v14, %v1137_v15 }
  0xe5   : > { %v1265_v18 = vld [vmem:[%s15084_s12 + $0x1d60] sm:$0xff]  ;;  %10303 = vmatpush1.bf16.msra.mxu1 %v14049_v24 }
  0xe6   : > { %v14042_v54 = vcombine.high %v1261_v43, %v1265_v18  ;;  %v1125_v26 = vld [vmem:[%s15084_s12 + $0x1900] sm:$0xff]  ;;  %10263 = vmatprep.subr.bf16.mxu0 %v13914_v25  ;;  %v14041_v32 = vcombine.low %v1261_v43, %v1265_v18 }
  0xe7   : > { %v1129_v27 = vld [vmem:[%s15084_s12 + $0x1920] sm:$0xff]  ;;  %10264 = vmatpush1.bf16.msra.mxu0 %v13913_v31 }
  0xe8   : > { %v1253_v55 = vld [vmem:[%s15084_s12 + $0x1d00] sm:$0xff]  ;;  %v13906_v33 = vcombine.high %v1125_v26, %v1129_v27  ;;  %10304 = vmatprep.subr.bf16.mxu1 %v14042_v54  ;;  %v13905_v42 = vcombine.low %v1125_v26, %v1129_v27 }
  0xe9   : > { %v1257_v29 = vld [vmem:[%s15084_s12 + $0x1d20] sm:$0xff]  ;;  %10305 = vmatpush1.bf16.msra.mxu1 %v14041_v32 }
  0xea   : > { %v14034_v34 = vcombine.high %v1253_v55, %v1257_v29  ;;  %v1117_v35 = vld [vmem:[%s15084_s12 + $0x18c0] sm:$0xff]  ;;  %10265 = vmatprep.subr.bf16.mxu0 %v13906_v33  ;;  %v14033_v44 = vcombine.low %v1253_v55, %v1257_v29 }
  0xeb   : > { %v1121_v36 = vld [vmem:[%s15084_s12 + $0x18e0] sm:$0xff]  ;;  %10266 = vmatpush1.bf16.msra.mxu0 %v13905_v42 }
  0xec   : > { %v1245_v38 = vld [vmem:[%s15084_s12 + $0x1cc0] sm:$0xff]  ;;  %v13898_v45 = vcombine.high %v1117_v35, %v1121_v36  ;;  %10306 = vmatprep.subr.bf16.mxu1 %v14034_v34  ;;  %v13897_v51 = vcombine.low %v1117_v35, %v1121_v36 }
  0xed   : > { %v1249_v39 = vld [vmem:[%s15084_s12 + $0x1ce0] sm:$0xff]  ;;  %10307 = vmatpush1.bf16.msra.mxu1 %v14033_v44 }
  0xee   : > { %v14026_v20 = vcombine.high %v1245_v38, %v1249_v39  ;;  %v1109_v46 = vld [vmem:[%s15084_s12 + $0x1880] sm:$0xff]  ;;  %10267 = vmatprep.subr.bf16.mxu0 %v13898_v45  ;;  %v14025_v52 = vcombine.low %v1245_v38, %v1249_v39 }
  0xef   : > { %v1113_v47 = vld [vmem:[%s15084_s12 + $0x18a0] sm:$0xff]  ;;  %10268 = vmatpush1.bf16.msra.mxu0 %v13897_v51 }
  0xf0   : > { %v1237_v23 = vld [vmem:[%s15084_s12 + $0x1c80] sm:$0xff]  ;;  %v13890_v53 = vcombine.high %v1109_v46, %v1113_v47  ;;  %10308 = vmatprep.subr.bf16.mxu1 %v14026_v20  ;;  %v13889_v63 = vcombine.low %v1109_v46, %v1113_v47 }
  0xf1   : > { %v1241_v49 = vld [vmem:[%s15084_s12 + $0x1ca0] sm:$0xff]  ;;  %10309 = vmatpush1.bf16.msra.mxu1 %v14025_v52 }
  0xf2   : > { %v14018_v56 = vcombine.high %v1237_v23, %v1241_v49  ;;  %v1101_v57 = vld [vmem:[%s15084_s12 + $0x1840] sm:$0xff]  ;;  %10269 = vmatprep.subr.bf16.mxu0 %v13890_v53  ;;  %v14017_v0 = vcombine.low %v1237_v23, %v1241_v49 }
  0xf3   : > { %v1105_v58 = vld [vmem:[%s15084_s12 + $0x1860] sm:$0xff]  ;;  %10270 = vmatpush1.bf16.msra.mxu0 %v13889_v63 }
  0xf4   : > { %v1229_v61 = vld [vmem:[%s15084_s12 + $0x1c40] sm:$0xff]  ;;  %v13882_v1 = vcombine.high %v1101_v57, %v1105_v58  ;;  %10310 = vmatprep.subr.bf16.mxu1 %v14018_v56  ;;  %v13881_v10 = vcombine.low %v1101_v57, %v1105_v58 }
  0xf5   : > { %v1233_v62 = vld [vmem:[%s15084_s12 + $0x1c60] sm:$0xff]  ;;  %10311 = vmatpush1.bf16.msra.mxu1 %v14017_v0 }
  0xf6   : > { %v14010_v2 = vcombine.high %v1229_v61, %v1233_v62  ;;  %v1093_v3 = vld [vmem:[%s15084_s12 + $0x1800] sm:$0xff]  ;;  %10271 = vmatprep.subr.bf16.mxu0 %v13882_v1  ;;  %v14009_v12 = vcombine.low %v1229_v61, %v1233_v62 }
  0xf7   : > { %v1097_v4 = vld [vmem:[%s15084_s12 + $0x1820] sm:$0xff]  ;;  %10272 = vmatpush1.bf16.msra.mxu0 %v13881_v10 }
  0xf8   : > { %v1221_v6 = vld [vmem:[%s15084_s12 + $0x1c00] sm:$0xff]  ;;  %v13874_v13 = vcombine.high %v1093_v3, %v1097_v4  ;;  %10312 = vmatprep.subr.bf16.mxu1 %v14010_v2  ;;  %v13873_v22 = vcombine.low %v1093_v3, %v1097_v4 }
  0xf9   : > { %v1225_v7 = vld [vmem:[%s15084_s12 + $0x1c20] sm:$0xff]  ;;  %10313 = vmatpush1.bf16.msra.mxu1 %v14009_v12 }
  0xfa   : > { %v14002_v40 = vcombine.high %v1221_v6, %v1225_v7  ;;  %v1213_v14 = vld [vmem:[%s15084_s12 + $0x1bc0] sm:$0xff]  ;;  %10273 = vmatprep.subr.bf16.mxu0 %v13874_v13  ;;  %v14001_v24 = vcombine.low %v1221_v6, %v1225_v7 }
  0xfb   : > { %v1217_v15 = vld [vmem:[%s15084_s12 + $0x1be0] sm:$0xff]  ;;  %10274 = vmatpush1.bf16.msra.mxu0 %v13873_v22 }
  0xfc   : > { %v1341_v43 = vld [vmem:[%s15084_s12 + $0x1fc0] sm:$0xff]  ;;  %v13994_v25 = vcombine.high %v1213_v14, %v1217_v15  ;;  %10314 = vmatprep.subr.bf16.mxu1 %v14002_v40  ;;  %v13993_v31 = vcombine.low %v1213_v14, %v1217_v15 }
  0xfd   : > { %v1345_v18 = vld [vmem:[%s15084_s12 + $0x1fe0] sm:$0xff]  ;;  %10315 = vmatpush1.bf16.msra.mxu1 %v14001_v24 }
  0xfe   : > { %v14122_v54 = vcombine.high %v1341_v43, %v1345_v18  ;;  %v1205_v26 = vld [vmem:[%s15084_s12 + $0x1b80] sm:$0xff]  ;;  %10275 = vmatprep.subr.bf16.mxu0 %v13994_v25  ;;  %v14121_v32 = vcombine.low %v1341_v43, %v1345_v18 }
  0xff   : > { %v1209_v27 = vld [vmem:[%s15084_s12 + $0x1ba0] sm:$0xff]  ;;  %10276 = vmatpush2.bf16.msra.mxu0 %v13993_v31 }
 0x100   : > { %v1333_v55 = vld [vmem:[%s15084_s12 + $0x1f80] sm:$0xff]  ;;  %v13986_v33 = vcombine.high %v1205_v26, %v1209_v27  ;;  %10316 = vmatprep.subr.bf16.mxu1 %v14122_v54  ;;  %v13985_v42 = vcombine.low %v1205_v26, %v1209_v27 }
 0x101   : > { %v1337_v29 = vld [vmem:[%s15084_s12 + $0x1fa0] sm:$0xff]  ;;  %10317 = vmatpush2.bf16.msra.mxu1 %v14121_v32 }
 0x102   : > { %v14114_v34 = vcombine.high %v1333_v55, %v1337_v29  ;;  %v1197_v35 = vld [vmem:[%s15084_s12 + $0x1b40] sm:$0xff]  ;;  %10277 = vmatprep.subr.bf16.mxu0 %v13986_v33  ;;  %v14113_v44 = vcombine.low %v1333_v55, %v1337_v29 }
 0x103   : > { %v1201_v36 = vld [vmem:[%s15084_s12 + $0x1b60] sm:$0xff]  ;;  %10278 = vmatpush2.bf16.msra.mxu0 %v13985_v42 }
 0x104   : > { %v1325_v38 = vld [vmem:[%s15084_s12 + $0x1f40] sm:$0xff]  ;;  %v13978_v45 = vcombine.high %v1197_v35, %v1201_v36  ;;  %10318 = vmatprep.subr.bf16.mxu1 %v14114_v34  ;;  %v13977_v51 = vcombine.low %v1197_v35, %v1201_v36 }
 0x105   : > { %v1329_v39 = vld [vmem:[%s15084_s12 + $0x1f60] sm:$0xff]  ;;  %10319 = vmatpush2.bf16.msra.mxu1 %v14113_v44 }
 0x106   : > { %v14106_v20 = vcombine.high %v1325_v38, %v1329_v39  ;;  %v1189_v46 = vld [vmem:[%s15084_s12 + $0x1b00] sm:$0xff]  ;;  %10279 = vmatprep.subr.bf16.mxu0 %v13978_v45  ;;  %v14105_v52 = vcombine.low %v1325_v38, %v1329_v39 }
 0x107   : > { %v1193_v47 = vld [vmem:[%s15084_s12 + $0x1b20] sm:$0xff]  ;;  %10280 = vmatpush2.bf16.msra.mxu0 %v13977_v51 }
 0x108   : > { %v1317_v23 = vld [vmem:[%s15084_s12 + $0x1f00] sm:$0xff]  ;;  %v13970_v53 = vcombine.high %v1189_v46, %v1193_v47  ;;  %10320 = vmatprep.subr.bf16.mxu1 %v14106_v20  ;;  %v13969_v63 = vcombine.low %v1189_v46, %v1193_v47 }
 0x109   : > { %v1321_v49 = vld [vmem:[%s15084_s12 + $0x1f20] sm:$0xff]  ;;  %10321 = vmatpush2.bf16.msra.mxu1 %v14105_v52 }
 0x10a   : > { %v14098_v56 = vcombine.high %v1317_v23, %v1321_v49  ;;  %v1181_v57 = vld [vmem:[%s15084_s12 + $0x1ac0] sm:$0xff]  ;;  %10281 = vmatprep.subr.bf16.mxu0 %v13970_v53  ;;  %v14097_v0 = vcombine.low %v1317_v23, %v1321_v49  ;;  %v15445_v23 = vcombine.low %v15360_v8, %v15360_v8  ;;  %v15454_v53 = vcombine.low %v15367_v11, %v15367_v11 }
 0x10b   : > { %v1185_v58 = vld [vmem:[%s15084_s12 + $0x1ae0] sm:$0xff]  ;;  %10282 = vmatpush2.bf16.msra.mxu0 %v13969_v63 }
 0x10c   : > { %v1309_v61 = vld [vmem:[%s15084_s12 + $0x1ec0] sm:$0xff]  ;;  %v13962_v1 = vcombine.high %v1181_v57, %v1185_v58  ;;  %10322 = vmatprep.subr.bf16.mxu1 %v14098_v56  ;;  %v13961_v10 = vcombine.low %v1181_v57, %v1185_v58  ;;  %v15457_v57 = vld [vmem:[%s15079_s8 + $0x48] sm:$0xff] }
 0x10d   : > { %v1313_v62 = vld [vmem:[%s15084_s12 + $0x1ee0] sm:$0xff]  ;;  %10323 = vmatpush2.bf16.msra.mxu1 %v14097_v0 }
 0x10e   : > { %v14090_v2 = vcombine.high %v1309_v61, %v1313_v62  ;;  %v1173_v3 = vld [vmem:[%s15084_s12 + $0x1a80] sm:$0xff]  ;;  %10283 = vmatprep.subr.bf16.mxu0 %v13962_v1  ;;  %v14089_v12 = vcombine.low %v1309_v61, %v1313_v62 }
 0x10f   : > { %v1177_v4 = vld [vmem:[%s15084_s12 + $0x1aa0] sm:$0xff]  ;;  %10284 = vmatpush2.bf16.msra.mxu0 %v13961_v10 }
 0x110   : > { %v1301_v6 = vld [vmem:[%s15084_s12 + $0x1e80] sm:$0xff]  ;;  %v13954_v13 = vcombine.high %v1173_v3, %v1177_v4  ;;  %10324 = vmatprep.subr.bf16.mxu1 %v14090_v2  ;;  %v13953_v22 = vcombine.low %v1173_v3, %v1177_v4  ;;  %v15470_v3 = vcombine.high %v15457_v57, %v15457_v57 }
 0x111   : > { %v1305_v7 = vld [vmem:[%s15084_s12 + $0x1ea0] sm:$0xff]  ;;  %10325 = vmatpush2.bf16.msra.mxu1 %v14089_v12 }
 0x112   : > { %v14082_v40 = vcombine.high %v1301_v6, %v1305_v7  ;;  %v1165_v14 = vld [vmem:[%s15084_s12 + $0x1a40] sm:$0xff]  ;;  %10285 = vmatprep.subr.bf16.mxu0 %v13954_v13  ;;  %v14081_v24 = vcombine.low %v1301_v6, %v1305_v7 }
 0x113   : > { %v1169_v15 = vld [vmem:[%s15084_s12 + $0x1a60] sm:$0xff]  ;;  %10286 = vmatpush2.bf16.msra.mxu0 %v13953_v22 }
 0x114   : > { %v1293_v43 = vld [vmem:[%s15084_s12 + $0x1e40] sm:$0xff]  ;;  %v13946_v25 = vcombine.high %v1165_v14, %v1169_v15  ;;  %10326 = vmatprep.subr.bf16.mxu1 %v14082_v40  ;;  %v13945_v31 = vcombine.low %v1165_v14, %v1169_v15 }
 0x115   : > { %v1297_v18 = vld [vmem:[%s15084_s12 + $0x1e60] sm:$0xff]  ;;  %10327 = vmatpush2.bf16.msra.mxu1 %v14081_v24 }
 0x116   : > { %v14074_v54 = vcombine.high %v1293_v43, %v1297_v18  ;;  %v1157_v26 = vld [vmem:[%s15084_s12 + $0x1a00] sm:$0xff]  ;;  %10287 = vmatprep.subr.bf16.mxu0 %v13946_v25  ;;  %v14073_v32 = vcombine.low %v1293_v43, %v1297_v18 }
 0x117   : > { %v1161_v27 = vld [vmem:[%s15084_s12 + $0x1a20] sm:$0xff]  ;;  %10288 = vmatpush2.bf16.msra.mxu0 %v13945_v31 }
 0x118   : > { %v1285_v55 = vld [vmem:[%s15084_s12 + $0x1e00] sm:$0xff]  ;;  %v13938_v33 = vcombine.high %v1157_v26, %v1161_v27  ;;  %10328 = vmatprep.subr.bf16.mxu1 %v14074_v54  ;;  %v13937_v42 = vcombine.low %v1157_v26, %v1161_v27 }
 0x119   : > { %v1289_v29 = vld [vmem:[%s15084_s12 + $0x1e20] sm:$0xff]  ;;  %10329 = vmatpush2.bf16.msra.mxu1 %v14073_v32 }
 0x11a   : > { %v14066_v34 = vcombine.high %v1285_v55, %v1289_v29  ;;  %v1405_v35 = vld [vmem:[%s15084_s12 + $0x21c0] sm:$0xff]  ;;  %10289 = vmatprep.subr.bf16.mxu0 %v13938_v33  ;;  %v14065_v44 = vcombine.low %v1285_v55, %v1289_v29 }
 0x11b   : > { %v1409_v36 = vld [vmem:[%s15084_s12 + $0x21e0] sm:$0xff]  ;;  %10290 = vmatpush2.bf16.msra.mxu0 %v13937_v42 }
 0x11c   : > { %v1533_v38 = vld [vmem:[%s15084_s12 + $0x25c0] sm:$0xff]  ;;  %v14186_v45 = vcombine.high %v1405_v35, %v1409_v36  ;;  %10330 = vmatprep.subr.bf16.mxu1 %v14066_v34  ;;  %v14185_v56 = vcombine.low %v1405_v35, %v1409_v36 }
 0x11d   : > { %v1537_v39 = vld [vmem:[%s15084_s12 + $0x25e0] sm:$0xff]  ;;  %10331 = vmatpush2.bf16.msra.mxu1 %v14065_v44  ;;  %v10047_v1 = vpop.f32.mrf.mxu0 }
 0x11e   : > { %v14314_v20 = vcombine.high %v1533_v38, %v1537_v39  ;;  %v1397_v46 = vld [vmem:[%s15084_s12 + $0x2180] sm:$0xff]  ;;  %10341 = vmatprep.subr.bf16.mxu0 %v14186_v45  ;;  %v14313_v58 = vcombine.low %v1533_v38, %v1537_v39  ;;  %10292 = vmatmul.mubr.bf16.vlgmr.msra.gmra.mxu0 %v15445_v23 }
 0x11f   : > { %v1401_v47 = vld [vmem:[%s15084_s12 + $0x21a0] sm:$0xff]  ;;  %v10088_v4 = vpop.f32.mrf.mxu1  ;;  %10342 = vmatpush1.bf16.msra.mxu0 %v14185_v56  ;;  %v10049_v10 = vpop.f32.mrf.mxu0 }
 0x120   : > { %v1525_v49 = vld [vmem:[%s15084_s12 + $0x2580] sm:$0xff]  ;;  %v14178_v61 = vcombine.high %v1397_v46, %v1401_v47  ;;  %10382 = vmatprep.subr.bf16.mxu1 %v14314_v20  ;;  %10333 = vmatmul.mubr.bf16.vlgmr.msra.gmra.mxu1 %v15454_v53  ;;  %v14177_v6 = vcombine.low %v1397_v46, %v1401_v47  ;;  %v15473_v7 = vadd.f32 %v10088_v4, %v10047_v1 }
 0x121   : > { %v1529_v51 = vld [vmem:[%s15084_s12 + $0x25a0] sm:$0xff]  ;;  %10383 = vmatpush1.bf16.msra.mxu1 %v14313_v58  ;;  %v10090_v40 = vpop.f32.mrf.mxu1  ;;  %v10051_v22 = vpop.f32.mrf.mxu0  ;;  %10414 = vmatprep.mubr.bf16.mxu1 %v15470_v3 }
 0x122   : > { %v15450_v52 = vld [vmem:[%s15079_s8 + $0x40] sm:$0xff]  ;;  %v14306_v8 = vcombine.high %v1525_v49, %v1529_v51  ;;  %10343 = vmatprep.subr.bf16.mxu0 %v14178_v61  ;;  %v14305_v12 = vcombine.low %v1525_v49, %v1529_v51  ;;  %v15478_v18 = vadd.f32 %v10090_v40, %v10049_v10 }
 0x123   : > { %v1389_v62 = vld [vmem:[%s15084_s12 + $0x2140] sm:$0xff]  ;;  %v15463_v0 = vcombine.high %v15450_v52, %v15450_v52  ;;  %v10092_v54 = vpop.f32.mrf.mxu1  ;;  %10344 = vmatpush1.bf16.msra.mxu0 %v14177_v6  ;;  %v10052_v27 = vpop.f32.mrf.mxu0 }
 0x124   : > { %v1393_v63 = vld [vmem:[%s15084_s12 + $0x2160] sm:$0xff]  ;;  %10384 = vmatprep.subr.bf16.mxu1 %v14306_v8 }
 0x125   : > { %v1517_v11 = vld [vmem:[%s15084_s12 + $0x2540] sm:$0xff]  ;;  %v14170_v13 = vcombine.high %v1389_v62, %v1393_v63  ;;  %10373 = vmatprep.mubr.bf16.mxu0 %v15463_v0  ;;  %v14169_v26 = vcombine.low %v1389_v62, %v1393_v63  ;;  %10385 = vmatpush1.bf16.msra.mxu1 %v14305_v12  ;;  %v10093_v31 = vpop.f32.mrf.mxu1 }
 0x126   : > { %v1521_v2 = vld [vmem:[%s15084_s12 + $0x2560] sm:$0xff] }
 0x127   : > { %v14298_v14 = vcombine.high %v1517_v11, %v1521_v2  ;;  %v1381_v15 = vld [vmem:[%s15084_s12 + $0x2100] sm:$0xff]  ;;  %10345 = vmatprep.subr.bf16.mxu0 %v14170_v13  ;;  %v14297_v55 = vcombine.low %v1517_v11, %v1521_v2 }
 0x128   : > { %v1385_v43 = vld [vmem:[%s15084_s12 + $0x2120] sm:$0xff]  ;;  %10346 = vmatpush1.bf16.msra.mxu0 %v14169_v26 }
 0x129   : > { %v1509_v24 = vld [vmem:[%s15084_s12 + $0x2500] sm:$0xff]  ;;  %v14162_v29 = vcombine.high %v1381_v15, %v1385_v43  ;;  %10386 = vmatprep.subr.bf16.mxu1 %v14298_v14  ;;  %v14161_v38 = vcombine.low %v1381_v15, %v1385_v43 }
 0x12a   : > { %v1513_v25 = vld [vmem:[%s15084_s12 + $0x2520] sm:$0xff]  ;;  %10387 = vmatpush1.bf16.msra.mxu1 %v14297_v55 }
 0x12b   : > { %v14290_v32 = vcombine.high %v1509_v24, %v1513_v25  ;;  %v1373_v33 = vld [vmem:[%s15084_s12 + $0x20c0] sm:$0xff]  ;;  %10347 = vmatprep.subr.bf16.mxu0 %v14162_v29  ;;  %v14289_v39 = vcombine.low %v1509_v24, %v1513_v25 }
 0x12c   : > { %v1377_v34 = vld [vmem:[%s15084_s12 + $0x20e0] sm:$0xff]  ;;  %10348 = vmatpush1.bf16.msra.mxu0 %v14161_v38 }
 0x12d   : > { %v1501_v35 = vld [vmem:[%s15084_s12 + $0x24c0] sm:$0xff]  ;;  %v14154_v42 = vcombine.high %v1373_v33, %v1377_v34  ;;  %10388 = vmatprep.subr.bf16.mxu1 %v14290_v32  ;;  %v14153_v49 = vcombine.low %v1373_v33, %v1377_v34 }
 0x12e   : > { %v1505_v36 = vld [vmem:[%s15084_s12 + $0x24e0] sm:$0xff]  ;;  %10389 = vmatpush1.bf16.msra.mxu1 %v14289_v39 }
 0x12f   : > { %v14282_v44 = vcombine.high %v1501_v35, %v1505_v36  ;;  %v1365_v45 = vld [vmem:[%s15084_s12 + $0x2080] sm:$0xff]  ;;  %10349 = vmatprep.subr.bf16.mxu0 %v14154_v42  ;;  %v14281_v51 = vcombine.low %v1501_v35, %v1505_v36 }
 0x130   : > { %v1369_v20 = vld [vmem:[%s15084_s12 + $0x20a0] sm:$0xff]  ;;  %10350 = vmatpush1.bf16.msra.mxu0 %v14153_v49 }
 0x131   : > { %v1493_v46 = vld [vmem:[%s15084_s12 + $0x2480] sm:$0xff]  ;;  %v14146_v56 = vcombine.high %v1365_v45, %v1369_v20  ;;  %10390 = vmatprep.subr.bf16.mxu1 %v14282_v44  ;;  %v14145_v1 = vcombine.low %v1365_v45, %v1369_v20 }
 0x132   : > { %v1497_v47 = vld [vmem:[%s15084_s12 + $0x24a0] sm:$0xff]  ;;  %10391 = vmatpush1.bf16.msra.mxu1 %v14281_v51 }
 0x133   : > { %v14274_v58 = vcombine.high %v1493_v46, %v1497_v47  ;;  %v1357_v61 = vld [vmem:[%s15084_s12 + $0x2040] sm:$0xff]  ;;  %10351 = vmatprep.subr.bf16.mxu0 %v14146_v56  ;;  %v14273_v11 = vcombine.low %v1493_v46, %v1497_v47 }
 0x134   : > { %v1361_v8 = vld [vmem:[%s15084_s12 + $0x2060] sm:$0xff]  ;;  %10352 = vmatpush1.bf16.msra.mxu0 %v14145_v1 }
 0x135   : > { %v1485_v62 = vld [vmem:[%s15084_s12 + $0x2440] sm:$0xff]  ;;  %v14138_v2 = vcombine.high %v1357_v61, %v1361_v8  ;;  %10392 = vmatprep.subr.bf16.mxu1 %v14274_v58  ;;  %v14137_v40 = vcombine.low %v1357_v61, %v1361_v8 }
 0x136   : > { %v1489_v63 = vld [vmem:[%s15084_s12 + $0x2460] sm:$0xff]  ;;  %10393 = vmatpush1.bf16.msra.mxu1 %v14273_v11 }
 0x137   : > { %v14266_v4 = vcombine.high %v1485_v62, %v1489_v63  ;;  %v1349_v6 = vld [vmem:[%s15084_s12 + $0x2000] sm:$0xff]  ;;  %10353 = vmatprep.subr.bf16.mxu0 %v14138_v2  ;;  %v14265_v14 = vcombine.low %v1485_v62, %v1489_v63 }
 0x138   : > { %v1353_v10 = vld [vmem:[%s15084_s12 + $0x2020] sm:$0xff]  ;;  %10354 = vmatpush1.bf16.msra.mxu0 %v14137_v40 }
 0x139   : > { %v1477_v12 = vld [vmem:[%s15084_s12 + $0x2400] sm:$0xff]  ;;  %v14130_v15 = vcombine.high %v1349_v6, %v1353_v10  ;;  %10394 = vmatprep.subr.bf16.mxu1 %v14266_v4  ;;  %v14129_v26 = vcombine.low %v1349_v6, %v1353_v10 }
 0x13a   : > { %v1481_v13 = vld [vmem:[%s15084_s12 + $0x2420] sm:$0xff]  ;;  %10395 = vmatpush1.bf16.msra.mxu1 %v14265_v14 }
 0x13b   : > { %v14258_v43 = vcombine.high %v1477_v12, %v1481_v13  ;;  %v1469_v22 = vld [vmem:[%s15084_s12 + $0x23c0] sm:$0xff]  ;;  %10355 = vmatprep.subr.bf16.mxu0 %v14130_v15  ;;  %v14257_v27 = vcombine.low %v1477_v12, %v1481_v13 }
 0x13c   : > { %v1473_v24 = vld [vmem:[%s15084_s12 + $0x23e0] sm:$0xff]  ;;  %10356 = vmatpush1.bf16.msra.mxu0 %v14129_v26 }
 0x13d   : > { %v1597_v25 = vld [vmem:[%s15084_s12 + $0x27c0] sm:$0xff]  ;;  %v14250_v55 = vcombine.high %v1469_v22, %v1473_v24  ;;  %10396 = vmatprep.subr.bf16.mxu1 %v14258_v43  ;;  %v14249_v35 = vcombine.low %v1469_v22, %v1473_v24 }
 0x13e   : > { %v1601_v54 = vld [vmem:[%s15084_s12 + $0x27e0] sm:$0xff]  ;;  %10397 = vmatpush1.bf16.msra.mxu1 %v14257_v27 }
 0x13f   : > { %v14378_v29 = vcombine.high %v1597_v25, %v1601_v54  ;;  %v1461_v31 = vld [vmem:[%s15084_s12 + $0x2380] sm:$0xff]  ;;  %10357 = vmatprep.subr.bf16.mxu0 %v14250_v55  ;;  %v14377_v36 = vcombine.low %v1597_v25, %v1601_v54 }
 0x140   : > { %v1465_v32 = vld [vmem:[%s15084_s12 + $0x23a0] sm:$0xff]  ;;  %10358 = vmatpush2.bf16.msra.mxu0 %v14249_v35 }
 0x141   : > { %v1589_v33 = vld [vmem:[%s15084_s12 + $0x2780] sm:$0xff]  ;;  %v14242_v38 = vcombine.high %v1461_v31, %v1465_v32  ;;  %10398 = vmatprep.subr.bf16.mxu1 %v14378_v29  ;;  %v14241_v46 = vcombine.low %v1461_v31, %v1465_v32 }
 0x142   : > { %v1593_v34 = vld [vmem:[%s15084_s12 + $0x27a0] sm:$0xff]  ;;  %10399 = vmatpush2.bf16.msra.mxu1 %v14377_v36 }
 0x143   : > { %v14370_v39 = vcombine.high %v1589_v33, %v1593_v34  ;;  %v1453_v42 = vld [vmem:[%s15084_s12 + $0x2340] sm:$0xff]  ;;  %10359 = vmatprep.subr.bf16.mxu0 %v14242_v38  ;;  %v14369_v47 = vcombine.low %v1589_v33, %v1593_v34 }
 0x144   : > { %v1457_v44 = vld [vmem:[%s15084_s12 + $0x2360] sm:$0xff]  ;;  %10360 = vmatpush2.bf16.msra.mxu0 %v14241_v46 }
 0x145   : > { %v1581_v45 = vld [vmem:[%s15084_s12 + $0x2740] sm:$0xff]  ;;  %v14234_v49 = vcombine.high %v1453_v42, %v1457_v44  ;;  %10400 = vmatprep.subr.bf16.mxu1 %v14370_v39  ;;  %v14233_v62 = vcombine.low %v1453_v42, %v1457_v44 }
 0x146   : > { %v1585_v20 = vld [vmem:[%s15084_s12 + $0x2760] sm:$0xff]  ;;  %10401 = vmatpush2.bf16.msra.mxu1 %v14369_v47 }
 0x147   : > { %v14362_v51 = vcombine.high %v1581_v45, %v1585_v20  ;;  %v1445_v56 = vld [vmem:[%s15084_s12 + $0x2300] sm:$0xff]  ;;  %10361 = vmatprep.subr.bf16.mxu0 %v14234_v49  ;;  %v14361_v63 = vcombine.low %v1581_v45, %v1585_v20 }
 0x148   : > { %v1449_v58 = vld [vmem:[%s15084_s12 + $0x2320] sm:$0xff]  ;;  %10362 = vmatpush2.bf16.msra.mxu0 %v14233_v62 }
 0x149   : > { %v1573_v61 = vld [vmem:[%s15084_s12 + $0x2700] sm:$0xff]  ;;  %v14226_v1 = vcombine.high %v1445_v56, %v1449_v58  ;;  %10402 = vmatprep.subr.bf16.mxu1 %v14362_v51  ;;  %v14225_v12 = vcombine.low %v1445_v56, %v1449_v58 }
 0x14a   : > { %v1577_v8 = vld [vmem:[%s15084_s12 + $0x2720] sm:$0xff]  ;;  %10403 = vmatpush2.bf16.msra.mxu1 %v14361_v63 }
 0x14b   : > { %v14354_v11 = vcombine.high %v1573_v61, %v1577_v8  ;;  %v1437_v2 = vld [vmem:[%s15084_s12 + $0x22c0] sm:$0xff]  ;;  %10363 = vmatprep.subr.bf16.mxu0 %v14226_v1  ;;  %v14353_v13 = vcombine.low %v1573_v61, %v1577_v8 }
 0x14c   : > { %v1441_v4 = vld [vmem:[%s15084_s12 + $0x22e0] sm:$0xff]  ;;  %10364 = vmatpush2.bf16.msra.mxu0 %v14225_v12  ;;  %v15548_v12 = vcombine.low %v15457_v57, %v15457_v57 }
 0x14d   : > { %v1565_v6 = vld [vmem:[%s15084_s12 + $0x26c0] sm:$0xff]  ;;  %v14218_v40 = vcombine.high %v1437_v2, %v1441_v4  ;;  %10404 = vmatprep.subr.bf16.mxu1 %v14354_v11  ;;  %v14217_v25 = vcombine.low %v1437_v2, %v1441_v4  ;;  %v15539_v2 = vcombine.low %v15450_v52, %v15450_v52 }
 0x14e   : > { %v1569_v10 = vld [vmem:[%s15084_s12 + $0x26e0] sm:$0xff]  ;;  %10405 = vmatpush2.bf16.msra.mxu1 %v14353_v13 }
 0x14f   : > { %v14346_v14 = vcombine.high %v1565_v6, %v1569_v10  ;;  %v1429_v15 = vld [vmem:[%s15084_s12 + $0x2280] sm:$0xff]  ;;  %10365 = vmatprep.subr.bf16.mxu0 %v14218_v40  ;;  %v14345_v54 = vcombine.low %v1565_v6, %v1569_v10  ;;  %v15544_v10 = vld [vmem:[%s15079_s8 + $0x50] sm:$0xff]  ;;  %v15551_v40 = vld [vmem:[%s15079_s8 + $0x58] sm:$0xff] }
 0x150   : > { %v1433_v43 = vld [vmem:[%s15084_s12 + $0x22a0] sm:$0xff]  ;;  %10366 = vmatpush2.bf16.msra.mxu0 %v14217_v25 }
 0x151   : > { %v1557_v22 = vld [vmem:[%s15084_s12 + $0x2680] sm:$0xff]  ;;  %v14210_v26 = vcombine.high %v1429_v15, %v1433_v43  ;;  %10406 = vmatprep.subr.bf16.mxu1 %v14346_v14  ;;  %v14209_v33 = vcombine.low %v1429_v15, %v1433_v43 }
 0x152   : > { %v1561_v24 = vld [vmem:[%s15084_s12 + $0x26a0] sm:$0xff]  ;;  %10407 = vmatpush2.bf16.msra.mxu1 %v14345_v54 }
 0x153   : > { %v14338_v27 = vcombine.high %v1557_v22, %v1561_v24  ;;  %v1421_v55 = vld [vmem:[%s15084_s12 + $0x2240] sm:$0xff]  ;;  %10367 = vmatprep.subr.bf16.mxu0 %v14210_v26  ;;  %v14337_v34 = vcombine.low %v1557_v22, %v1561_v24  ;;  %v15557_v24 = vcombine.high %v15544_v10, %v15544_v10  ;;  %v15564_v26 = vcombine.high %v15551_v40, %v15551_v40 }
 0x154   : > { %v1425_v29 = vld [vmem:[%s15084_s12 + $0x2260] sm:$0xff]  ;;  %10368 = vmatpush2.bf16.msra.mxu0 %v14209_v33 }
 0x155   : > { %v1549_v31 = vld [vmem:[%s15084_s12 + $0x2640] sm:$0xff]  ;;  %v14202_v35 = vcombine.high %v1421_v55, %v1425_v29  ;;  %10408 = vmatprep.subr.bf16.mxu1 %v14338_v27  ;;  %v14201_v45 = vcombine.low %v1421_v55, %v1425_v29 }
 0x156   : > { %v1553_v32 = vld [vmem:[%s15084_s12 + $0x2660] sm:$0xff]  ;;  %10409 = vmatpush2.bf16.msra.mxu1 %v14337_v34 }
 0x157   : > { %v14330_v36 = vcombine.high %v1549_v31, %v1553_v32  ;;  %v1413_v38 = vld [vmem:[%s15084_s12 + $0x2200] sm:$0xff]  ;;  %10369 = vmatprep.subr.bf16.mxu0 %v14202_v35  ;;  %v14329_v20 = vcombine.low %v1549_v31, %v1553_v32 }
 0x158   : > { %v1417_v39 = vld [vmem:[%s15084_s12 + $0x2220] sm:$0xff]  ;;  %10370 = vmatpush2.bf16.msra.mxu0 %v14201_v45 }
 0x159   : > { %v1541_v42 = vld [vmem:[%s15084_s12 + $0x2600] sm:$0xff]  ;;  %v14194_v46 = vcombine.high %v1413_v38, %v1417_v39  ;;  %10410 = vmatprep.subr.bf16.mxu1 %v14330_v36  ;;  %v14193_v61 = vcombine.low %v1413_v38, %v1417_v39 }
 0x15a   : > { %v1545_v44 = vld [vmem:[%s15084_s12 + $0x2620] sm:$0xff]  ;;  %10411 = vmatpush2.bf16.msra.mxu1 %v14329_v20 }
 0x15b   : > { %v14322_v47 = vcombine.high %v1541_v42, %v1545_v44  ;;  %v1661_v49 = vld [vmem:[%s15084_s12 + $0x29c0] sm:$0xff]  ;;  %10371 = vmatprep.subr.bf16.mxu0 %v14194_v46  ;;  %v14321_v8 = vcombine.low %v1541_v42, %v1545_v44 }
 0x15c   : > { %v1665_v51 = vld [vmem:[%s15084_s12 + $0x29e0] sm:$0xff]  ;;  %10372 = vmatpush2.bf16.msra.mxu0 %v14193_v61 }
 0x15d   : > { %v1789_v56 = vld [vmem:[%s15084_s12 + $0x2dc0] sm:$0xff]  ;;  %v14442_v62 = vcombine.high %v1661_v49, %v1665_v51  ;;  %10412 = vmatprep.subr.bf16.mxu1 %v14322_v47  ;;  %v14441_v13 = vcombine.low %v1661_v49, %v1665_v51  ;;  %v10129_v25 = vpop.f32.mrf.mxu0 }
 0x15e   : > { %v1793_v58 = vld [vmem:[%s15084_s12 + $0x2de0] sm:$0xff]  ;;  %10413 = vmatpush2.bf16.msra.mxu1 %v14321_v8  ;;  %v10130_v27 = vadd.f32 %v10129_v25, %v15473_v7 }
 0x15f   : > { %v14570_v63 = vcombine.high %v1789_v56, %v1793_v58  ;;  %v1653_v1 = vld [vmem:[%s15084_s12 + $0x2980] sm:$0xff]  ;;  %10423 = vmatprep.subr.bf16.mxu0 %v14442_v62  ;;  %v14569_v14 = vcombine.low %v1789_v56, %v1793_v58  ;;  %10374 = vmatmul.mubr.bf16.vlgmr.msra.gmra.mxu0 %v15539_v2  ;;  %v10170_v55 = vpop.f32.mrf.mxu1  ;;  %v10131_v31 = vpop.f32.mrf.mxu0 }
 0x160   : > { %v1657_v11 = vld [vmem:[%s15084_s12 + $0x29a0] sm:$0xff]  ;;  %10424 = vmatpush1.bf16.msra.mxu0 %v14441_v13  ;;  %v15568_v34 = vadd.f32 %v10170_v55, %v10130_v27  ;;  %v10132_v35 = vadd.f32 %v10131_v31, %v15478_v18  ;;  %10455 = vmatprep.mubr.bf16.mxu0 %v15557_v24 }
 0x161   : > { %v1781_v4 = vld [vmem:[%s15084_s12 + $0x2d80] sm:$0xff]  ;;  %v14434_v15 = vcombine.high %v1653_v1, %v1657_v11  ;;  %10464 = vmatprep.subr.bf16.mxu1 %v14570_v63  ;;  %10415 = vmatmul.mubr.bf16.vlgmr.msra.gmra.mxu1 %v15548_v12  ;;  %v14433_v29 = vcombine.low %v1653_v1, %v1657_v11  ;;  %v10172_v36 = vpop.f32.mrf.mxu1  ;;  %v10133_v42 = vpop.f32.mrf.mxu0 }
 0x162   : > { %v1785_v6 = vld [vmem:[%s15084_s12 + $0x2da0] sm:$0xff]  ;;  %10465 = vmatpush1.bf16.msra.mxu1 %v14569_v14  ;;  %10496 = vmatprep.mubr.bf16.mxu1 %v15564_v26  ;;  %v15577_v20 = vadd.f32 %v10172_v36, %v10132_v35 }
 0x163   : > { %v14562_v52 = vcombine.high %v1781_v4, %v1785_v6  ;;  %v1645_v43 = vld [vmem:[%s15084_s12 + $0x2940] sm:$0xff]  ;;  %10425 = vmatprep.subr.bf16.mxu0 %v14434_v15  ;;  %v14561_v32 = vcombine.low %v1781_v4, %v1785_v6  ;;  %v10174_v46 = vpop.f32.mrf.mxu1  ;;  %v10134_v47 = vpop.f32.mrf.mxu0 }
 0x164   : > { %v1649_v22 = vld [vmem:[%s15084_s12 + $0x2960] sm:$0xff]  ;;  %10426 = vmatpush1.bf16.msra.mxu0 %v14433_v29 }
 0x165   : > { %v1773_v57 = vld [vmem:[%s15084_s12 + $0x2d40] sm:$0xff]  ;;  %v14426_v33 = vcombine.high %v1645_v43, %v1649_v22  ;;  %10466 = vmatprep.subr.bf16.mxu1 %v14562_v52  ;;  %v14425_v18 = vcombine.low %v1645_v43, %v1649_v22  ;;  %v10175_v56 = vpop.f32.mrf.mxu1 }
 0x166   : > { %v1777_v54 = vld [vmem:[%s15084_s12 + $0x2d60] sm:$0xff]  ;;  %10467 = vmatpush1.bf16.msra.mxu1 %v14561_v32 }
 0x167   : > { %v14554_v7 = vcombine.high %v1773_v57, %v1777_v54  ;;  %v1637_v38 = vld [vmem:[%s15084_s12 + $0x2900] sm:$0xff]  ;;  %10427 = vmatprep.subr.bf16.mxu0 %v14426_v33  ;;  %v14553_v49 = vcombine.low %v1773_v57, %v1777_v54 }
 0x168   : > { %v1641_v39 = vld [vmem:[%s15084_s12 + $0x2920] sm:$0xff]  ;;  %10428 = vmatpush1.bf16.msra.mxu0 %v14425_v18 }
 0x169   : > { %v1765_v44 = vld [vmem:[%s15084_s12 + $0x2d00] sm:$0xff]  ;;  %v14418_v51 = vcombine.high %v1637_v38, %v1641_v39  ;;  %10468 = vmatprep.subr.bf16.mxu1 %v14554_v7  ;;  %v14417_v1 = vcombine.low %v1637_v38, %v1641_v39 }
 0x16a   : > { %v1769_v45 = vld [vmem:[%s15084_s12 + $0x2d20] sm:$0xff]  ;;  %10469 = vmatpush1.bf16.msra.mxu1 %v14553_v49 }
 0x16b   : > { %v14546_v58 = vcombine.high %v1765_v44, %v1769_v45  ;;  %v1629_v61 = vld [vmem:[%s15084_s12 + $0x28c0] sm:$0xff]  ;;  %10429 = vmatprep.subr.bf16.mxu0 %v14418_v51  ;;  %v14545_v11 = vcombine.low %v1765_v44, %v1769_v45 }
 0x16c   : > { %v1633_v8 = vld [vmem:[%s15084_s12 + $0x28e0] sm:$0xff]  ;;  %10430 = vmatpush1.bf16.msra.mxu0 %v14417_v1 }
 0x16d   : > { %v1757_v62 = vld [vmem:[%s15084_s12 + $0x2cc0] sm:$0xff]  ;;  %v14410_v4 = vcombine.high %v1629_v61, %v1633_v8  ;;  %10470 = vmatprep.subr.bf16.mxu1 %v14546_v58  ;;  %v14409_v43 = vcombine.low %v1629_v61, %v1633_v8 }
 0x16e   : > { %v1761_v63 = vld [vmem:[%s15084_s12 + $0x2ce0] sm:$0xff]  ;;  %10471 = vmatpush1.bf16.msra.mxu1 %v14545_v11 }
 0x16f   : > { %v14538_v6 = vcombine.high %v1757_v62, %v1761_v63  ;;  %v1621_v13 = vld [vmem:[%s15084_s12 + $0x2880] sm:$0xff]  ;;  %10431 = vmatprep.subr.bf16.mxu0 %v14410_v4  ;;  %v14537_v22 = vcombine.low %v1757_v62, %v1761_v63 }
 0x170   : > { %v1625_v14 = vld [vmem:[%s15084_s12 + $0x28a0] sm:$0xff]  ;;  %10432 = vmatpush1.bf16.msra.mxu0 %v14409_v43 }
 0x171   : > { %v1749_v15 = vld [vmem:[%s15084_s12 + $0x2c80] sm:$0xff]  ;;  %v14402_v25 = vcombine.high %v1621_v13, %v1625_v14  ;;  %10472 = vmatprep.subr.bf16.mxu1 %v14538_v6  ;;  %v14401_v31 = vcombine.low %v1621_v13, %v1625_v14 }
 0x172   : > { %v1753_v52 = vld [vmem:[%s15084_s12 + $0x2ca0] sm:$0xff]  ;;  %10473 = vmatpush1.bf16.msra.mxu1 %v14537_v22 }
 0x173   : > { %v14530_v57 = vcombine.high %v1749_v15, %v1753_v52  ;;  %v1613_v54 = vld [vmem:[%s15084_s12 + $0x2840] sm:$0xff]  ;;  %10433 = vmatprep.subr.bf16.mxu0 %v14402_v25  ;;  %v14529_v32 = vcombine.low %v1749_v15, %v1753_v52 }
 0x174   : > { %v1617_v27 = vld [vmem:[%s15084_s12 + $0x2860] sm:$0xff]  ;;  %10434 = vmatpush1.bf16.msra.mxu0 %v14401_v31 }
 0x175   : > { %v1741_v55 = vld [vmem:[%s15084_s12 + $0x2c40] sm:$0xff]  ;;  %v14394_v33 = vcombine.high %v1613_v54, %v1617_v27  ;;  %10474 = vmatprep.subr.bf16.mxu1 %v14530_v57  ;;  %v14393_v42 = vcombine.low %v1613_v54, %v1617_v27 }
 0x176   : > { %v1745_v29 = vld [vmem:[%s15084_s12 + $0x2c60] sm:$0xff]  ;;  %10475 = vmatpush1.bf16.msra.mxu1 %v14529_v32 }
 0x177   : > { %v14522_v35 = vcombine.high %v1741_v55, %v1745_v29  ;;  %v1605_v36 = vld [vmem:[%s15084_s12 + $0x2800] sm:$0xff]  ;;  %10435 = vmatprep.subr.bf16.mxu0 %v14394_v33  ;;  %v14521_v44 = vcombine.low %v1741_v55, %v1745_v29 }
 0x178   : > { %v1609_v7 = vld [vmem:[%s15084_s12 + $0x2820] sm:$0xff]  ;;  %10436 = vmatpush1.bf16.msra.mxu0 %v14393_v42 }
 0x179   : > { %v1733_v38 = vld [vmem:[%s15084_s12 + $0x2c00] sm:$0xff]  ;;  %v14386_v45 = vcombine.high %v1605_v36, %v1609_v7  ;;  %10476 = vmatprep.subr.bf16.mxu1 %v14522_v35  ;;  %v14385_v56 = vcombine.low %v1605_v36, %v1609_v7 }
 0x17a   : > { %v1737_v39 = vld [vmem:[%s15084_s12 + $0x2c20] sm:$0xff]  ;;  %10477 = vmatpush1.bf16.msra.mxu1 %v14521_v44 }
 0x17b   : > { %v14514_v46 = vcombine.high %v1733_v38, %v1737_v39  ;;  %v1725_v18 = vld [vmem:[%s15084_s12 + $0x2bc0] sm:$0xff]  ;;  %10437 = vmatprep.subr.bf16.mxu0 %v14386_v45  ;;  %v14513_v58 = vcombine.low %v1733_v38, %v1737_v39 }
 0x17c   : > { %v1729_v47 = vld [vmem:[%s15084_s12 + $0x2be0] sm:$0xff]  ;;  %10438 = vmatpush1.bf16.msra.mxu0 %v14385_v56 }
 0x17d   : > { %v1853_v49 = vld [vmem:[%s15084_s12 + $0x2fc0] sm:$0xff]  ;;  %v14506_v61 = vcombine.high %v1725_v18, %v1729_v47  ;;  %10478 = vmatprep.subr.bf16.mxu1 %v14514_v46  ;;  %v14505_v4 = vcombine.low %v1725_v18, %v1729_v47 }
 0x17e   : > { %v1857_v51 = vld [vmem:[%s15084_s12 + $0x2fe0] sm:$0xff]  ;;  %10479 = vmatpush1.bf16.msra.mxu1 %v14513_v58 }
 0x17f   : > { %v14634_v8 = vcombine.high %v1853_v49, %v1857_v51  ;;  %v1717_v62 = vld [vmem:[%s15084_s12 + $0x2b80] sm:$0xff]  ;;  %10439 = vmatprep.subr.bf16.mxu0 %v14506_v61  ;;  %v14633_v6 = vcombine.low %v1853_v49, %v1857_v51 }
 0x180   : > { %v1721_v63 = vld [vmem:[%s15084_s12 + $0x2ba0] sm:$0xff]  ;;  %10440 = vmatpush2.bf16.msra.mxu0 %v14505_v4 }
 0x181   : > { %v1845_v1 = vld [vmem:[%s15084_s12 + $0x2f80] sm:$0xff]  ;;  %v14498_v13 = vcombine.high %v1717_v62, %v1721_v63  ;;  %10480 = vmatprep.subr.bf16.mxu1 %v14634_v8  ;;  %v14497_v25 = vcombine.low %v1717_v62, %v1721_v63 }
 0x182   : > { %v1849_v11 = vld [vmem:[%s15084_s12 + $0x2fa0] sm:$0xff]  ;;  %10481 = vmatpush2.bf16.msra.mxu1 %v14633_v6 }
 0x183   : > { %v14626_v14 = vcombine.high %v1845_v1, %v1849_v11  ;;  %v1709_v15 = vld [vmem:[%s15084_s12 + $0x2b40] sm:$0xff]  ;;  %10441 = vmatprep.subr.bf16.mxu0 %v14498_v13  ;;  %v14625_v57 = vcombine.low %v1845_v1, %v1849_v11 }
 0x184   : > { %v1713_v52 = vld [vmem:[%s15084_s12 + $0x2b60] sm:$0xff]  ;;  %10442 = vmatpush2.bf16.msra.mxu0 %v14497_v25 }
 0x185   : > { %v1837_v43 = vld [vmem:[%s15084_s12 + $0x2f40] sm:$0xff]  ;;  %v14490_v54 = vcombine.high %v1709_v15, %v1713_v52  ;;  %10482 = vmatprep.subr.bf16.mxu1 %v14626_v14  ;;  %v14489_v33 = vcombine.low %v1709_v15, %v1713_v52 }
 0x186   : > { %v1841_v22 = vld [vmem:[%s15084_s12 + $0x2f60] sm:$0xff]  ;;  %10483 = vmatpush2.bf16.msra.mxu1 %v14625_v57 }
 0x187   : > { %v14618_v27 = vcombine.high %v1837_v43, %v1841_v22  ;;  %v1701_v55 = vld [vmem:[%s15084_s12 + $0x2b00] sm:$0xff]  ;;  %10443 = vmatprep.subr.bf16.mxu0 %v14490_v54  ;;  %v14617_v35 = vcombine.low %v1837_v43, %v1841_v22 }
 0x188   : > { %v1705_v29 = vld [vmem:[%s15084_s12 + $0x2b20] sm:$0xff]  ;;  %10444 = vmatpush2.bf16.msra.mxu0 %v14489_v33  ;;  %v382_v33 = vld [vmem:[%s15084_s12 + $0x1c8] sm:$0xff] }
 0x189   : > { %v1829_v31 = vld [vmem:[%s15084_s12 + $0x2f00] sm:$0xff]  ;;  %v14482_v36 = vcombine.high %v1701_v55, %v1705_v29  ;;  %10484 = vmatprep.subr.bf16.mxu1 %v14618_v27  ;;  %v14481_v45 = vcombine.low %v1701_v55, %v1705_v29 }
 0x18a   : > { %v1833_v32 = vld [vmem:[%s15084_s12 + $0x2f20] sm:$0xff]  ;;  %10485 = vmatpush2.bf16.msra.mxu1 %v14617_v35  ;;  %v386_v35 = vld [vmem:[%s15084_s12 + $0x1e8] sm:$0xff] }
 0x18b   : > { %v14610_v7 = vcombine.high %v1829_v31, %v1833_v32  ;;  %v1693_v38 = vld [vmem:[%s15084_s12 + $0x2ac0] sm:$0xff]  ;;  %10445 = vmatprep.subr.bf16.mxu0 %v14482_v36  ;;  %v14609_v46 = vcombine.low %v1829_v31, %v1833_v32 }
 0x18c   : > { %v1697_v39 = vld [vmem:[%s15084_s12 + $0x2ae0] sm:$0xff]  ;;  %10446 = vmatpush2.bf16.msra.mxu0 %v14481_v45  ;;  %v15635_v45 = vcombine.low %v15544_v10, %v15544_v10 }
 0x18d   : > { %v1821_v42 = vld [vmem:[%s15084_s12 + $0x2ec0] sm:$0xff]  ;;  %v14474_v18 = vcombine.high %v1693_v38, %v1697_v39  ;;  %10486 = vmatprep.subr.bf16.mxu1 %v14610_v7  ;;  %v14473_v61 = vcombine.low %v1693_v38, %v1697_v39  ;;  %v13164_v39 = vcombine.high %v382_v33, %v386_v35 }
 0x18e   : > { %v1825_v44 = vld [vmem:[%s15084_s12 + $0x2ee0] sm:$0xff]  ;;  %10487 = vmatpush2.bf16.msra.mxu1 %v14609_v46  ;;  %v374_v46 = vld [vmem:[%s15084_s12 + $0x188] sm:$0xff] }
 0x18f   : > { %v14602_v47 = vcombine.high %v1821_v42, %v1825_v44  ;;  %v1685_v49 = vld [vmem:[%s15084_s12 + $0x2a80] sm:$0xff]  ;;  %10447 = vmatprep.subr.bf16.mxu0 %v14474_v18  ;;  %v14601_v8 = vcombine.low %v1821_v42, %v1825_v44  ;;  %v378_v18 = vld [vmem:[%s15084_s12 + $0x1a8] sm:$0xff] }
 0x190   : > { %v1689_v51 = vld [vmem:[%s15084_s12 + $0x2aa0] sm:$0xff]  ;;  %10448 = vmatpush2.bf16.msra.mxu0 %v14473_v61 }
 0x191   : > { %v1813_v56 = vld [vmem:[%s15084_s12 + $0x2e80] sm:$0xff]  ;;  %v14466_v62 = vcombine.high %v1685_v49, %v1689_v51  ;;  %10488 = vmatprep.subr.bf16.mxu1 %v14602_v47  ;;  %v14465_v13 = vcombine.low %v1685_v49, %v1689_v51  ;;  %v15641_v47 = vcombine.low %v15551_v40, %v15551_v40  ;;  %v13163_v51 = vcombine.low %v382_v33, %v386_v35 }
 0x192   : > { %v1817_v58 = vld [vmem:[%s15084_s12 + $0x2ea0] sm:$0xff]  ;;  %10489 = vmatpush2.bf16.msra.mxu1 %v14601_v8 }
 0x193   : > { %v14594_v63 = vcombine.high %v1813_v56, %v1817_v58  ;;  %v1677_v1 = vld [vmem:[%s15084_s12 + $0x2a40] sm:$0xff]  ;;  %10449 = vmatprep.subr.bf16.mxu0 %v14466_v62  ;;  %v14593_v14 = vcombine.low %v1813_v56, %v1817_v58  ;;  %v13156_v58 = vcombine.high %v374_v46, %v378_v18  ;;  %v366_v62 = vld [vmem:[%s15084_s12 + $0x148] sm:$0xff] }
 0x194   : > { %v1681_v11 = vld [vmem:[%s15084_s12 + $0x2a60] sm:$0xff]  ;;  %10450 = vmatpush2.bf16.msra.mxu0 %v14465_v13 }
 0x195   : > { %v1805_v4 = vld [vmem:[%s15084_s12 + $0x2e40] sm:$0xff]  ;;  %v14458_v15 = vcombine.high %v1677_v1, %v1681_v11  ;;  %10490 = vmatprep.subr.bf16.mxu1 %v14594_v63  ;;  %v14457_v54 = vcombine.low %v1677_v1, %v1681_v11  ;;  %v370_v63 = vld [vmem:[%s15084_s12 + $0x168] sm:$0xff] }
 0x196   : > { %v1809_v6 = vld [vmem:[%s15084_s12 + $0x2e60] sm:$0xff]  ;;  %10491 = vmatpush2.bf16.msra.mxu1 %v14593_v14 }
 0x197   : > { %v14586_v52 = vcombine.high %v1805_v4, %v1809_v6  ;;  %v1669_v43 = vld [vmem:[%s15084_s12 + $0x2a00] sm:$0xff]  ;;  %10451 = vmatprep.subr.bf16.mxu0 %v14458_v15  ;;  %v14585_v27 = vcombine.low %v1805_v4, %v1809_v6  ;;  %v13155_v6 = vcombine.low %v374_v46, %v378_v18 }
 0x198   : > { %v1673_v22 = vld [vmem:[%s15084_s12 + $0x2a20] sm:$0xff]  ;;  %10452 = vmatpush2.bf16.msra.mxu0 %v14457_v54  ;;  %v358_v54 = vld [vmem:[%s15084_s12 + $0x108] sm:$0xff] }
 0x199   : > { %v1797_v25 = vld [vmem:[%s15084_s12 + $0x2e00] sm:$0xff]  ;;  %v14450_v55 = vcombine.high %v1669_v43, %v1673_v22  ;;  %10492 = vmatprep.subr.bf16.mxu1 %v14586_v52  ;;  %v14449_v36 = vcombine.low %v1669_v43, %v1673_v22 }
 0x19a   : > { %v1801_v57 = vld [vmem:[%s15084_s12 + $0x2e20] sm:$0xff]  ;;  %10493 = vmatpush2.bf16.msra.mxu1 %v14585_v27  ;;  %v362_v27 = vld [vmem:[%s15084_s12 + $0x128] sm:$0xff] }
 0x19b   : > { %v14578_v29 = vcombine.high %v1797_v25, %v1801_v57  ;;  %v1917_v31 = vld [vmem:[%s15084_s12 + $0x31c0] sm:$0xff]  ;;  %10453 = vmatprep.subr.bf16.mxu0 %v14450_v55  ;;  %v14577_v7 = vcombine.low %v1797_v25, %v1801_v57  ;;  %v15021_v25 = vmov 0   ;;  %v13139_v46 = vcombine.low %v358_v54, %v362_v27 }
 0x19c   : > { %v1921_v32 = vld [vmem:[%s15084_s12 + $0x31e0] sm:$0xff]  ;;  %10454 = vmatpush2.bf16.msra.mxu0 %v14449_v36  ;;  %v13140_v36 = vcombine.high %v358_v54, %v362_v27 }
 0x19d   : > { %v14698_v38 = vcombine.high %v1917_v31, %v1921_v32  ;;  %10494 = vmatprep.subr.bf16.mxu1 %v14578_v29  ;;  %v1909_v42 = vld [vmem:[%s15084_s12 + $0x3180] sm:$0xff]  ;;  %v14697_v49 = vcombine.low %v1917_v31, %v1921_v32  ;;  %v13147_v32 = vcombine.low %v366_v62, %v370_v63 }
 0x19e   : > { %v1913_v44 = vld [vmem:[%s15084_s12 + $0x31a0] sm:$0xff]  ;;  %10495 = vmatpush2.bf16.msra.mxu1 %v14577_v7  ;;  %v10211_v10 = vpop.f32.mrf.mxu0 }
 0x19f   : > { %10505 = vmatprep.subr.bf16.mxu0 %v14698_v38  ;;  %v14690_v56 = vcombine.high %v1909_v42, %v1913_v44  ;;  %10546 = vmatprep.subr.bf16.mxu1 %v13164_v39  ;;  %v1901_v61 = vld [vmem:[%s15084_s12 + $0x3140] sm:$0xff]  ;;  %v10212_v1 = vadd.f32 %v10211_v10, %v15568_v34  ;;  %v14689_v11 = vcombine.low %v1909_v42, %v1913_v44  ;;  %v350_v39 = vld [vmem:[%s15084_s12 + $0xc8] sm:$0xff] }
 0x1a0   : > { %v1905_v8 = vld [vmem:[%s15084_s12 + $0x3160] sm:$0xff]  ;;  %10456 = vmatmul.mubr.bf16.vlgmr.msra.gmra.mxu0 %v15635_v45  ;;  %v10252_v40 = vpop.f32.mrf.mxu1  ;;  %v10213_v4 = vpop.f32.mrf.mxu0  ;;  %v13148_v34 = vcombine.high %v366_v62, %v370_v63  ;;  %v354_v42 = vld [vmem:[%s15084_s12 + $0xe8] sm:$0xff] }
 0x1a1   : > { %10497 = vmatmul.mubr.bf16.vlgmr.msra.gmra.mxu1 %v15641_v47  ;;  %10506 = vmatpush1.bf16.msra.mxu0 %v14697_v49  ;;  %v14682_v13 = vcombine.high %v1901_v61, %v1905_v8  ;;  %v15650_v14 = vadd.f32 %v10252_v40, %v10212_v1  ;;  %v10214_v15 = vadd.f32 %v10213_v4, %v15577_v20  ;;  %v1893_v43 = vld [vmem:[%s15084_s12 + $0x3100] sm:$0xff]  ;;  %v338_v4 = vld [vmem:[%s15084_s12 + $0x68] sm:$0xff] }
 0x1a2   : > { %10547 = vmatpush1.bf16.msra.mxu1 %v13163_v51  ;;  %10507 = vmatprep.subr.bf16.mxu0 %v14690_v56  ;;  %v10254_v52 = vpop.f32.mrf.mxu1  ;;  %v1897_v22 = vld [vmem:[%s15084_s12 + $0x3120] sm:$0xff]  ;;  %v10215_v57 = vpop.f32.mrf.mxu0  ;;  %v14681_v29 = vcombine.low %v1901_v61, %v1905_v8  ;;  %v13132_v49 = vcombine.high %v350_v39, %v354_v42  ;;  %v346_v61 = vld [vmem:[%s15084_s12 + $0xa8] sm:$0xff]  ;;  %v13131_v10 = vcombine.low %v350_v39, %v354_v42 }
 0x1a3   : > { %10548 = vmatprep.subr.bf16.mxu1 %v13156_v58  ;;  %10537 = vmatprep.mubr.bf16.mxu0 %v15021_v25  ;;  %v15659_v55 = vadd.f32 %v10254_v52, %v10214_v15  ;;  %v14674_v33 = vcombine.high %v1893_v43, %v1897_v22  ;;  %v1885_v7 = vld [vmem:[%s15084_s12 + $0x30c0] sm:$0xff]  ;;  %v14673_v44 = vcombine.low %v1893_v43, %v1897_v22  ;;  %v342_v58 = vld [vmem:[%s15084_s12 + $0x88] sm:$0xff] }
 0x1a4   : > { %10578 = vmatprep.mubr.bf16.mxu1 %v15125_v59  ;;  %v10256_v20 = vpop.f32.mrf.mxu1  ;;  %v10216_v31 = vpop.f32.mrf.mxu0  ;;  %v1889_v38 = vld [vmem:[%s15084_s12 + $0x30e0] sm:$0xff]  ;;  %v13124_v63 = vcombine.high %v342_v58, %v346_v61  ;;  %v326_v22 = vld [vmem:[%s15084_s12 + $0x8] sm:$0xff] }
 0x1a5   : > { %10508 = vmatpush1.bf16.msra.mxu0 %v14689_v11  ;;  %v14666_v18 = vcombine.high %v1885_v7, %v1889_v38  ;;  %v1877_v51 = vld [vmem:[%s15084_s12 + $0x3080] sm:$0xff]  ;;  %v14665_v8 = vcombine.low %v1885_v7, %v1889_v38  ;;  %v334_v11 = vld [vmem:[%s15084_s12 + $0x48] sm:$0xff] }
 0x1a6   : > { %10549 = vmatpush1.bf16.msra.mxu1 %v13155_v6  ;;  %10509 = vmatprep.subr.bf16.mxu0 %v14682_v13  ;;  %v10257_v35 = vpop.f32.mrf.mxu1  ;;  %v1881_v56 = vld [vmem:[%s15084_s12 + $0x30a0] sm:$0xff]  ;;  %v13123_v13 = vcombine.low %v342_v58, %v346_v61  ;;  %v13116_v52 = vcombine.high %v334_v11, %v338_v4  ;;  %v330_v57 = vld [vmem:[%s15084_s12 + $0x28] sm:$0xff]  ;;  %v13115_v27 = vcombine.low %v334_v11, %v338_v4 }
 0x1a7   : > { %10550 = vmatprep.subr.bf16.mxu1 %v13148_v34  ;;  %v14658_v62 = vcombine.high %v1877_v51, %v1881_v56  ;;  %v1869_v1 = vld [vmem:[%s15084_s12 + $0x3040] sm:$0xff]  ;;  %v14657_v6 = vcombine.low %v1877_v51, %v1881_v56  ;;  %v510_v31 = vld [vmem:[%s15084_s12 + $0x5c8] sm:$0xff]  ;;  %v13107_v7 = vcombine.low %v326_v22, %v330_v57 }
 0x1a8   : > { %v1873_v40 = vld [vmem:[%s15084_s12 + $0x3060] sm:$0xff]  ;;  %v450_v35 = vld [vmem:[%s15084_s12 + $0x3e8] sm:$0xff] }
 0x1a9   : > { %10510 = vmatpush1.bf16.msra.mxu0 %v14681_v29  ;;  %v14650_v15 = vcombine.high %v1869_v1, %v1873_v40  ;;  %v1861_v34 = vld [vmem:[%s15084_s12 + $0x3000] sm:$0xff]  ;;  %v14649_v54 = vcombine.low %v1869_v1, %v1873_v40  ;;  %v13108_v29 = vcombine.high %v326_v22, %v330_v57  ;;  %v502_v42 = vld [vmem:[%s15084_s12 + $0x588] sm:$0xff] }
 0x1aa   : > { %10551 = vmatpush1.bf16.msra.mxu1 %v13147_v32  ;;  %10511 = vmatprep.subr.bf16.mxu0 %v14674_v33  ;;  %v1865_v43 = vld [vmem:[%s15084_s12 + $0x3020] sm:$0xff]  ;;  %v514_v32 = vld [vmem:[%s15084_s12 + $0x5e8] sm:$0xff] }
 0x1ab   : > { %10552 = vmatprep.subr.bf16.mxu1 %v13140_v36  ;;  %v14642_v20 = vcombine.high %v1861_v34, %v1865_v43  ;;  %v446_v33 = vld [vmem:[%s15084_s12 + $0x3c8] sm:$0xff]  ;;  %v14641_v36 = vcombine.low %v1861_v34, %v1865_v43  ;;  %v13292_v38 = vcombine.high %v510_v31, %v514_v32  ;;  %v13291_v51 = vcombine.low %v510_v31, %v514_v32 }
 0x1ac   : > { %v13228_v39 = vcombine.high %v446_v33, %v450_v35  ;;  %v13227_v56 = vcombine.low %v446_v33, %v450_v35 }
 0x1ad   : > { %10512 = vmatpush1.bf16.msra.mxu0 %v14673_v44  ;;  %v506_v44 = vld [vmem:[%s15084_s12 + $0x5a8] sm:$0xff] }
 0x1ae   : > { %10553 = vmatpush1.bf16.msra.mxu1 %v13139_v46  ;;  %10513 = vmatprep.subr.bf16.mxu0 %v14666_v18  ;;  %v14936_v46 = vld [vmem:[%s15079_s8 + $0x60] ss:$0 sps:$4 sm:$0xff]   ;;  %v438_v18 = vld [vmem:[%s15084_s12 + $0x388] sm:$0xff]  ;;  %v13284_v58 = vcombine.high %v502_v42, %v506_v44  ;;  %v13283_v1 = vcombine.low %v502_v42, %v506_v44 }
 0x1af   : > { %10554 = vmatprep.subr.bf16.mxu1 %v13132_v49  ;;  %v442_v49 = vld [vmem:[%s15084_s12 + $0x3a8] sm:$0xff] }
 0x1b0   : > { %v13220_v61 = vcombine.high %v438_v18, %v442_v49  ;;  %v13219_v40 = vcombine.low %v438_v18, %v442_v49  ;;  %v462_v49 = vld [vmem:[%s15084_s12 + $0x448] sm:$0xff] }
 0x1b1   : > { %10514 = vmatpush1.bf16.msra.mxu0 %v14665_v8  ;;  %v494_v8 = vld [vmem:[%s15084_s12 + $0x548] sm:$0xff] }
 0x1b2   : > { %10555 = vmatpush1.bf16.msra.mxu1 %v13131_v10  ;;  %10515 = vmatprep.subr.bf16.mxu0 %v14658_v62  ;;  %v498_v10 = vld [vmem:[%s15084_s12 + $0x568] sm:$0xff] }
 0x1b3   : > { %10556 = vmatprep.subr.bf16.mxu1 %v13124_v63  ;;  %v430_v62 = vld [vmem:[%s15084_s12 + $0x348] sm:$0xff]  ;;  %v13276_v11 = vcombine.high %v494_v8, %v498_v10  ;;  %v13275_v34 = vcombine.low %v494_v8, %v498_v10 }
 0x1b4   : > { %v434_v63 = vld [vmem:[%s15084_s12 + $0x368] sm:$0xff] }
 0x1b5   : > { %10516 = vmatpush1.bf16.msra.mxu0 %v14657_v6  ;;  %v13212_v4 = vcombine.high %v430_v62, %v434_v63  ;;  %v486_v6 = vld [vmem:[%s15084_s12 + $0x508] sm:$0xff]  ;;  %v13211_v43 = vcombine.low %v430_v62, %v434_v63 }
 0x1b6   : > { %10557 = vmatpush1.bf16.msra.mxu1 %v13123_v13  ;;  %10517 = vmatprep.subr.bf16.mxu0 %v14650_v15  ;;  %v490_v13 = vld [vmem:[%s15084_s12 + $0x528] sm:$0xff] }
 0x1b7   : > { %10558 = vmatprep.subr.bf16.mxu1 %v13116_v52  ;;  %v422_v15 = vld [vmem:[%s15084_s12 + $0x308] sm:$0xff]  ;;  %v13268_v22 = vcombine.high %v486_v6, %v490_v13  ;;  %v13267_v31 = vcombine.low %v486_v6, %v490_v13 }
 0x1b8   : > { %v426_v52 = vld [vmem:[%s15084_s12 + $0x328] sm:$0xff] }
 0x1b9   : > { %10518 = vmatpush1.bf16.msra.mxu0 %v14649_v54  ;;  %v13204_v57 = vcombine.high %v422_v15, %v426_v52  ;;  %v478_v54 = vld [vmem:[%s15084_s12 + $0x4c8] sm:$0xff]  ;;  %v13203_v32 = vcombine.low %v422_v15, %v426_v52 }
 0x1ba   : > { %10559 = vmatpush1.bf16.msra.mxu1 %v13115_v27  ;;  %10519 = vmatprep.subr.bf16.mxu0 %v14642_v20  ;;  %v482_v27 = vld [vmem:[%s15084_s12 + $0x4e8] sm:$0xff] }
 0x1bb   : > { %10560 = vmatprep.subr.bf16.mxu1 %v13108_v29  ;;  %v414_v20 = vld [vmem:[%s15084_s12 + $0x2c8] sm:$0xff]  ;;  %v13260_v33 = vcombine.high %v478_v54, %v482_v27  ;;  %v13259_v42 = vcombine.low %v478_v54, %v482_v27 }
 0x1bc   : > { %v418_v29 = vld [vmem:[%s15084_s12 + $0x2e8] sm:$0xff] }
 0x1bd   : > { %10520 = vmatpush1.bf16.msra.mxu0 %v14641_v36  ;;  %v13196_v35 = vcombine.high %v414_v20, %v418_v29  ;;  %v470_v36 = vld [vmem:[%s15084_s12 + $0x488] sm:$0xff]  ;;  %v13195_v44 = vcombine.low %v414_v20, %v418_v29 }
 0x1be   : > { %10561 = vmatpush1.bf16.msra.mxu1 %v13107_v7  ;;  %10587 = vmatprep.subr.bf16.mxu0 %v13292_v38  ;;  %v474_v7 = vld [vmem:[%s15084_s12 + $0x4a8] sm:$0xff] }
 0x1bf   : > { %10562 = vmatprep.subr.bf16.mxu1 %v13228_v39  ;;  %v406_v38 = vld [vmem:[%s15084_s12 + $0x288] sm:$0xff] }
 0x1c0   : > { %10538 = vmatmul.mubr.bf16.vlgmr.msra.gmra.mxu0 %v14936_v46  ;;  %v410_v39 = vld [vmem:[%s15084_s12 + $0x2a8] sm:$0xff]  ;;  %v13252_v46 = vcombine.high %v470_v36, %v474_v7 }
 0x1c1   : > { %10588 = vmatpush1.bf16.msra.mxu0 %v13291_v51  ;;  %10619 = vmatprep.mubr.bf16.mxu0 %v15129_v60  ;;  %v13188_v18 = vcombine.high %v406_v38, %v410_v39  ;;  %v466_v51 = vld [vmem:[%s15084_s12 + $0x468] sm:$0xff]  ;;  %v13187_v8 = vcombine.low %v406_v38, %v410_v39 }
 0x1c2   : > { %10563 = vmatpush2.bf16.msra.mxu1 %v13227_v56  ;;  %10589 = vmatprep.subr.bf16.mxu0 %v13284_v58  ;;  %v398_v56 = vld [vmem:[%s15084_s12 + $0x248] sm:$0xff]  ;;  %v13244_v10 = vcombine.high %v462_v49, %v466_v51 }
 0x1c3   : > { %10564 = vmatprep.subr.bf16.mxu1 %v13220_v61  ;;  %v402_v58 = vld [vmem:[%s15084_s12 + $0x268] sm:$0xff]  ;;  %v13251_v61 = vcombine.low %v470_v36, %v474_v7 }
 0x1c4   : > { %v13180_v62 = vcombine.high %v398_v56, %v402_v58  ;;  %v454_v63 = vld [vmem:[%s15084_s12 + $0x408] sm:$0xff]  ;;  %v13179_v6 = vcombine.low %v398_v56, %v402_v58 }
 0x1c5   : > { %10590 = vmatpush1.bf16.msra.mxu0 %v13283_v1  ;;  %v458_v1 = vld [vmem:[%s15084_s12 + $0x428] sm:$0xff] }
 0x1c6   : > { %10565 = vmatpush2.bf16.msra.mxu1 %v13219_v40  ;;  %10591 = vmatprep.subr.bf16.mxu0 %v13276_v11  ;;  %v390_v40 = vld [vmem:[%s15084_s12 + $0x208] sm:$0xff]  ;;  %v13236_v13 = vcombine.high %v454_v63, %v458_v1 }
 0x1c7   : > { %10566 = vmatprep.subr.bf16.mxu1 %v13212_v4  ;;  %v394_v11 = vld [vmem:[%s15084_s12 + $0x228] sm:$0xff]  ;;  %v13243_v4 = vcombine.low %v462_v49, %v466_v51 }
 0x1c8   : > { %v13172_v15 = vcombine.high %v390_v40, %v394_v11  ;;  %v574_v52 = vld [vmem:[%s15084_s12 + $0x7c8] sm:$0xff]  ;;  %v13171_v54 = vcombine.low %v390_v40, %v394_v11 }
 0x1c9   : > { %10592 = vmatpush1.bf16.msra.mxu0 %v13275_v34  ;;  %v578_v34 = vld [vmem:[%s15084_s12 + $0x7e8] sm:$0xff] }
 0x1ca   : > { %10567 = vmatpush2.bf16.msra.mxu1 %v13211_v43  ;;  %10593 = vmatprep.subr.bf16.mxu0 %v13268_v22  ;;  %v638_v43 = vld [vmem:[%s15084_s12 + $0x9c8] sm:$0xff]  ;;  %v13356_v27 = vcombine.high %v574_v52, %v578_v34 }
 0x1cb   : > { %10568 = vmatprep.subr.bf16.mxu1 %v13204_v57  ;;  %v642_v22 = vld [vmem:[%s15084_s12 + $0x9e8] sm:$0xff]  ;;  %v13235_v57 = vcombine.low %v454_v63, %v458_v1 }
 0x1cc   : > { %v13420_v20 = vcombine.high %v638_v43, %v642_v22  ;;  %v566_v29 = vld [vmem:[%s15084_s12 + $0x788] sm:$0xff]  ;;  %v13419_v36 = vcombine.low %v638_v43, %v642_v22 }
 0x1cd   : > { %10594 = vmatpush1.bf16.msra.mxu0 %v13267_v31  ;;  %v570_v31 = vld [vmem:[%s15084_s12 + $0x7a8] sm:$0xff] }
 0x1ce   : > { %10569 = vmatpush2.bf16.msra.mxu1 %v13203_v32  ;;  %10595 = vmatprep.subr.bf16.mxu0 %v13260_v33  ;;  %v630_v32 = vld [vmem:[%s15084_s12 + $0x988] sm:$0xff]  ;;  %v13348_v7 = vcombine.high %v566_v29, %v570_v31  ;;  %v13347_v56 = vcombine.low %v566_v29, %v570_v31 }
 0x1cf   : > { %10570 = vmatprep.subr.bf16.mxu1 %v13196_v35  ;;  %v634_v33 = vld [vmem:[%s15084_s12 + $0x9a8] sm:$0xff]  ;;  %v13355_v35 = vcombine.low %v574_v52, %v578_v34 }
 0x1d0   : > { %v13412_v38 = vcombine.high %v630_v32, %v634_v33  ;;  %v558_v39 = vld [vmem:[%s15084_s12 + $0x748] sm:$0xff] }
 0x1d1   : > { %10596 = vmatpush1.bf16.msra.mxu0 %v13259_v42  ;;  %v562_v42 = vld [vmem:[%s15084_s12 + $0x768] sm:$0xff] }
 0x1d2   : > { %10571 = vmatpush2.bf16.msra.mxu1 %v13195_v44  ;;  %10597 = vmatprep.subr.bf16.mxu0 %v13252_v46  ;;  %v622_v46 = vld [vmem:[%s15084_s12 + $0x948] sm:$0xff]  ;;  %v13339_v52 = vcombine.low %v558_v39, %v562_v42 }
 0x1d3   : > { %10572 = vmatprep.subr.bf16.mxu1 %v13188_v18  ;;  %v626_v18 = vld [vmem:[%s15084_s12 + $0x968] sm:$0xff] }
 0x1d4   : > { %v550_v1 = vld [vmem:[%s15084_s12 + $0x708] sm:$0xff]  ;;  %v13403_v34 = vcombine.low %v622_v46, %v626_v18 }
 0x1d5   : > { %10598 = vmatpush1.bf16.msra.mxu0 %v13251_v61  ;;  %v13411_v61 = vcombine.low %v630_v32, %v634_v33  ;;  %v554_v40 = vld [vmem:[%s15084_s12 + $0x728] sm:$0xff] }
 0x1d6   : > { %10573 = vmatpush2.bf16.msra.mxu1 %v13187_v8  ;;  %10599 = vmatprep.subr.bf16.mxu0 %v13244_v10  ;;  %v13340_v8 = vcombine.high %v558_v39, %v562_v42  ;;  %v13332_v43 = vcombine.high %v550_v1, %v554_v40  ;;  %v610_v29 = vld [vmem:[%s15084_s12 + $0x8e8] sm:$0xff]  ;;  %v13331_v31 = vcombine.low %v550_v1, %v554_v40 }
 0x1d7   : > { %10574 = vmatprep.subr.bf16.mxu1 %v13180_v62  ;;  %v602_v39 = vld [vmem:[%s15084_s12 + $0x8a8] sm:$0xff] }
 0x1d8   : > { %v522_v1 = vld [vmem:[%s15084_s12 + $0x628] sm:$0xff] }
 0x1d9   : > { %10600 = vmatpush1.bf16.msra.mxu0 %v13243_v4  ;;  %v614_v4 = vld [vmem:[%s15084_s12 + $0x908] sm:$0xff] }
 0x1da   : > { %10575 = vmatpush2.bf16.msra.mxu1 %v13179_v6  ;;  %10601 = vmatprep.subr.bf16.mxu0 %v13236_v13  ;;  %v618_v6 = vld [vmem:[%s15084_s12 + $0x928] sm:$0xff] }
 0x1db   : > { %10576 = vmatprep.subr.bf16.mxu1 %v13172_v15  ;;  %v13395_v32 = vcombine.low %v614_v4, %v618_v6  ;;  %v582_v40 = vld [vmem:[%s15084_s12 + $0x808] sm:$0xff] }
 0x1dd   : > { %10602 = vmatpush1.bf16.msra.mxu0 %v13235_v57  ;;  %v13396_v57 = vcombine.high %v614_v4, %v618_v6 }
 0x1de   : > { %10577 = vmatpush2.bf16.msra.mxu1 %v13171_v54  ;;  %10603 = vmatprep.subr.bf16.mxu0 %v13356_v27  ;;  %v10293_v44 = vpop.f32.mrf.mxu0  ;;  %v542_v54 = vld [vmem:[%s15084_s12 + $0x6c8] sm:$0xff] }
 0x1df   : > { %10628 = vmatprep.subr.bf16.mxu1 %v13420_v20  ;;  %v10294_v49 = vadd.f32 %v10293_v44, %v15650_v14  ;;  %v13404_v14 = vcombine.high %v622_v46, %v626_v18  ;;  %v546_v27 = vld [vmem:[%s15084_s12 + $0x6e8] sm:$0xff] }
 0x1e0   : > { %v10334_v51 = vpop.f32.mrf.mxu1  ;;  %v10295_v58 = vpop.f32.mrf.mxu0  ;;  %v606_v20 = vld [vmem:[%s15084_s12 + $0x8c8] sm:$0xff]  ;;  %v13324_v33 = vcombine.high %v542_v54, %v546_v27  ;;  %v13323_v42 = vcombine.low %v542_v54, %v546_v27 }
 0x1e1   : > { %10579 = vmatmul.mubr.bf16.vlgmr.msra.gmra.mxu1 %v15175_v17  ;;  %10604 = vmatpush2.bf16.msra.mxu0 %v13355_v35  ;;  %v15725_v10 = vadd.f32 %v10334_v51, %v10294_v49  ;;  %v10296_v62 = vadd.f32 %v10295_v58, %v15659_v55  ;;  %v13388_v35 = vcombine.high %v606_v20, %v610_v29  ;;  %v526_v49 = vld [vmem:[%s15084_s12 + $0x648] sm:$0xff] }
 0x1e2   : > { %10629 = vmatpush1.bf16.msra.mxu1 %v13419_v36  ;;  %10605 = vmatprep.subr.bf16.mxu0 %v13348_v7  ;;  %v10336_v63 = vpop.f32.mrf.mxu1  ;;  %v10297_v11 = vpop.f32.mrf.mxu0  ;;  %v534_v36 = vld [vmem:[%s15084_s12 + $0x688] sm:$0xff]  ;;  %v13387_v44 = vcombine.low %v606_v20, %v610_v29 }
 0x1e3   : > { %10630 = vmatprep.subr.bf16.mxu1 %v13412_v38  ;;  %10660 = vmatprep.mubr.bf16.mxu1 %v15193_v28  ;;  %v15733_v13 = vadd.f32 %v10336_v63, %v10296_v62  ;;  %v538_v7 = vld [vmem:[%s15084_s12 + $0x6a8] sm:$0xff] }
 0x1e4   : > { %v10338_v15 = vpop.f32.mrf.mxu1  ;;  %v10298_v55 = vpop.f32.mrf.mxu0  ;;  %v598_v38 = vld [vmem:[%s15084_s12 + $0x888] sm:$0xff]  ;;  %v13316_v46 = vcombine.high %v534_v36, %v538_v7 }
 0x1e5   : > { %10606 = vmatpush2.bf16.msra.mxu0 %v13347_v56  ;;  %v13380_v18 = vcombine.high %v598_v38, %v602_v39  ;;  %v530_v51 = vld [vmem:[%s15084_s12 + $0x668] sm:$0xff] }
 0x1e6   : > { %10631 = vmatpush1.bf16.msra.mxu1 %v13411_v61  ;;  %10607 = vmatprep.subr.bf16.mxu0 %v13340_v8  ;;  %v10339_v22 = vpop.f32.mrf.mxu1  ;;  %v590_v56 = vld [vmem:[%s15084_s12 + $0x848] sm:$0xff]  ;;  %v13315_v61 = vcombine.low %v534_v36, %v538_v7  ;;  %v13379_v8 = vcombine.low %v598_v38, %v602_v39  ;;  %v13308_v62 = vcombine.high %v526_v49, %v530_v51 }
 0x1e7   : > { %10632 = vmatprep.subr.bf16.mxu1 %v13404_v14  ;;  %v594_v58 = vld [vmem:[%s15084_s12 + $0x868] sm:$0xff]  ;;  %v13307_v4 = vcombine.low %v526_v49, %v530_v51 }
 0x1e8   : > { %v13372_v63 = vcombine.high %v590_v56, %v594_v58  ;;  %v518_v14 = vld [vmem:[%s15084_s12 + $0x608] sm:$0xff]  ;;  %v13371_v6 = vcombine.low %v590_v56, %v594_v58 }
 0x1e9   : > { %10608 = vmatpush2.bf16.msra.mxu0 %v13339_v52  ;;  %v586_v11 = vld [vmem:[%s15084_s12 + $0x828] sm:$0xff]  ;;  %v13300_v15 = vcombine.high %v518_v14, %v522_v1 }
 0x1ea   : > { %10633 = vmatpush1.bf16.msra.mxu1 %v13403_v34  ;;  %10609 = vmatprep.subr.bf16.mxu0 %v13332_v43  ;;  %v13364_v52 = vcombine.high %v582_v40, %v586_v11  ;;  %v766_v55 = vld [vmem:[%s15084_s12 + $0xdc8] sm:$0xff]  ;;  %v13363_v54 = vcombine.low %v582_v40, %v586_v11 }
 0x1eb   : > { %10634 = vmatprep.subr.bf16.mxu1 %v13396_v57  ;;  %v770_v34 = vld [vmem:[%s15084_s12 + $0xde8] sm:$0xff]  ;;  %v13299_v57 = vcombine.low %v518_v14, %v522_v1 }
 0x1ec   : > { %v702_v43 = vld [vmem:[%s15084_s12 + $0xbc8] sm:$0xff]  ;;  %v13548_v27 = vcombine.high %v766_v55, %v770_v34 }
 0x1ed   : > { %10610 = vmatpush2.bf16.msra.mxu0 %v13331_v31  ;;  %v706_v22 = vld [vmem:[%s15084_s12 + $0xbe8] sm:$0xff] }
 0x1ee   : > { %10635 = vmatpush1.bf16.msra.mxu1 %v13395_v32  ;;  %10611 = vmatprep.subr.bf16.mxu0 %v13324_v33  ;;  %v13484_v20 = vcombine.high %v702_v43, %v706_v22  ;;  %v758_v29 = vld [vmem:[%s15084_s12 + $0xd88] sm:$0xff]  ;;  %v13483_v36 = vcombine.low %v702_v43, %v706_v22 }
 0x1ef   : > { %10636 = vmatprep.subr.bf16.mxu1 %v13388_v35  ;;  %v762_v31 = vld [vmem:[%s15084_s12 + $0xda8] sm:$0xff]  ;;  %v13547_v35 = vcombine.low %v766_v55, %v770_v34 }
 0x1f0   : > { %v694_v32 = vld [vmem:[%s15084_s12 + $0xb88] sm:$0xff]  ;;  %v13540_v7 = vcombine.high %v758_v29, %v762_v31 }
 0x1f1   : > { %10612 = vmatpush2.bf16.msra.mxu0 %v13323_v42  ;;  %v698_v33 = vld [vmem:[%s15084_s12 + $0xba8] sm:$0xff] }
 0x1f2   : > { %10637 = vmatpush1.bf16.msra.mxu1 %v13387_v44  ;;  %10613 = vmatprep.subr.bf16.mxu0 %v13316_v46  ;;  %v13476_v38 = vcombine.high %v694_v32, %v698_v33  ;;  %v750_v39 = vld [vmem:[%s15084_s12 + $0xd48] sm:$0xff]  ;;  %v13475_v49 = vcombine.low %v694_v32, %v698_v33 }
 0x1f3   : > { %10638 = vmatprep.subr.bf16.mxu1 %v13380_v18  ;;  %v754_v42 = vld [vmem:[%s15084_s12 + $0xd68] sm:$0xff]  ;;  %v13539_v18 = vcombine.low %v758_v29, %v762_v31 }
 0x1f4   : > { %v686_v44 = vld [vmem:[%s15084_s12 + $0xb48] sm:$0xff]  ;;  %v13532_v51 = vcombine.high %v750_v39, %v754_v42 }
 0x1f5   : > { %10614 = vmatpush2.bf16.msra.mxu0 %v13315_v61  ;;  %v690_v46 = vld [vmem:[%s15084_s12 + $0xb68] sm:$0xff] }
 0x1f6   : > { %10639 = vmatpush1.bf16.msra.mxu1 %v13379_v8  ;;  %10615 = vmatprep.subr.bf16.mxu0 %v13308_v62  ;;  %v13468_v56 = vcombine.high %v686_v44, %v690_v46  ;;  %v742_v58 = vld [vmem:[%s15084_s12 + $0xd08] sm:$0xff]  ;;  %v13467_v14 = vcombine.low %v686_v44, %v690_v46 }
 0x1f7   : > { %10640 = vmatprep.subr.bf16.mxu1 %v13372_v63  ;;  %v746_v61 = vld [vmem:[%s15084_s12 + $0xd28] sm:$0xff]  ;;  %v13531_v63 = vcombine.low %v750_v39, %v754_v42 }
 0x1f8   : > { %v678_v8 = vld [vmem:[%s15084_s12 + $0xb08] sm:$0xff]  ;;  %v13524_v1 = vcombine.high %v742_v58, %v746_v61 }
 0x1f9   : > { %10616 = vmatpush2.bf16.msra.mxu0 %v13307_v4  ;;  %v682_v62 = vld [vmem:[%s15084_s12 + $0xb28] sm:$0xff] }
 0x1fa   : > { %10641 = vmatpush1.bf16.msra.mxu1 %v13371_v6  ;;  %10617 = vmatprep.subr.bf16.mxu0 %v13300_v15  ;;  %v13460_v40 = vcombine.high %v678_v8, %v682_v62  ;;  %v734_v11 = vld [vmem:[%s15084_s12 + $0xcc8] sm:$0xff]  ;;  %v13459_v55 = vcombine.low %v678_v8, %v682_v62 }
 0x1fb   : > { %10642 = vmatprep.subr.bf16.mxu1 %v13364_v52  ;;  %v738_v4 = vld [vmem:[%s15084_s12 + $0xce8] sm:$0xff]  ;;  %v13523_v52 = vcombine.low %v742_v58, %v746_v61 }
 0x1fc   : > { %v670_v6 = vld [vmem:[%s15084_s12 + $0xac8] sm:$0xff]  ;;  %v13516_v34 = vcombine.high %v734_v11, %v738_v4 }
 0x1fd   : > { %10618 = vmatpush2.bf16.msra.mxu0 %v13299_v57  ;;  %v674_v15 = vld [vmem:[%s15084_s12 + $0xae8] sm:$0xff] }
 0x1fe   : > { %10643 = vmatpush1.bf16.msra.mxu1 %v13363_v54  ;;  %10669 = vmatprep.subr.bf16.mxu0 %v13548_v27  ;;  %v13452_v43 = vcombine.high %v670_v6, %v674_v15  ;;  %v726_v22 = vld [vmem:[%s15084_s12 + $0xc88] sm:$0xff]  ;;  %v13451_v29 = vcombine.low %v670_v6, %v674_v15 }
 0x1ff   : > { %10644 = vmatprep.subr.bf16.mxu1 %v13484_v20  ;;  %v730_v57 = vld [vmem:[%s15084_s12 + $0xca8] sm:$0xff]  ;;  %v13515_v20 = vcombine.low %v734_v11, %v738_v4 }
 0x200   : > { %10620 = vmatmul.mubr.bf16.vlgmr.msra.gmra.mxu0 %v15184_v21  ;;  %v662_v54 = vld [vmem:[%s15084_s12 + $0xa88] sm:$0xff]  ;;  %v13508_v31 = vcombine.high %v726_v22, %v730_v57 }
 0x201   : > { %10670 = vmatpush1.bf16.msra.mxu0 %v13547_v35  ;;  %10701 = vmatprep.mubr.bf16.mxu0 %v15200_v30  ;;  %v666_v27 = vld [vmem:[%s15084_s12 + $0xaa8] sm:$0xff] }
 0x202   : > { %10645 = vmatpush2.bf16.msra.mxu1 %v13483_v36  ;;  %10671 = vmatprep.subr.bf16.mxu0 %v13540_v7  ;;  %v13444_v32 = vcombine.high %v662_v54, %v666_v27  ;;  %v718_v33 = vld [vmem:[%s15084_s12 + $0xc48] sm:$0xff]  ;;  %v13443_v39 = vcombine.low %v662_v54, %v666_v27 }
 0x203   : > { %10646 = vmatprep.subr.bf16.mxu1 %v13476_v38  ;;  %v722_v35 = vld [vmem:[%s15084_s12 + $0xc68] sm:$0xff]  ;;  %v13507_v38 = vcombine.low %v726_v22, %v730_v57 }
 0x204   : > { %v654_v36 = vld [vmem:[%s15084_s12 + $0xa48] sm:$0xff]  ;;  %v13500_v42 = vcombine.high %v718_v33, %v722_v35 }
 0x205   : > { %10672 = vmatpush1.bf16.msra.mxu0 %v13539_v18  ;;  %v658_v7 = vld [vmem:[%s15084_s12 + $0xa68] sm:$0xff] }
 0x206   : > { %10647 = vmatpush2.bf16.msra.mxu1 %v13475_v49  ;;  %10673 = vmatprep.subr.bf16.mxu0 %v13532_v51  ;;  %v13436_v44 = vcombine.high %v654_v36, %v658_v7  ;;  %v710_v46 = vld [vmem:[%s15084_s12 + $0xc08] sm:$0xff]  ;;  %v13435_v58 = vcombine.low %v654_v36, %v658_v7 }
 0x207   : > { %10648 = vmatprep.subr.bf16.mxu1 %v13468_v56  ;;  %v714_v18 = vld [vmem:[%s15084_s12 + $0xc28] sm:$0xff]  ;;  %v13499_v56 = vcombine.low %v718_v33, %v722_v35 }
 0x208   : > { %v646_v49 = vld [vmem:[%s15084_s12 + $0xa08] sm:$0xff]  ;;  %v13492_v61 = vcombine.high %v710_v46, %v714_v18 }
 0x209   : > { %10674 = vmatpush1.bf16.msra.mxu0 %v13531_v63  ;;  %v650_v51 = vld [vmem:[%s15084_s12 + $0xa28] sm:$0xff] }
 0x20a   : > { %10649 = vmatpush2.bf16.msra.mxu1 %v13467_v14  ;;  %10675 = vmatprep.subr.bf16.mxu0 %v13524_v1  ;;  %v13428_v8 = vcombine.high %v646_v49, %v650_v51  ;;  %v830_v62 = vld [vmem:[%s15084_s12 + $0xfc8] sm:$0xff]  ;;  %v13427_v11 = vcombine.low %v646_v49, %v650_v51 }
 0x20b   : > { %10650 = vmatprep.subr.bf16.mxu1 %v13460_v40  ;;  %v834_v63 = vld [vmem:[%s15084_s12 + $0xfe8] sm:$0xff]  ;;  %v13491_v40 = vcombine.low %v710_v46, %v714_v18 }
 0x20c   : > { %v894_v14 = vld [vmem:[%s15084_s12 + $0x11c8] sm:$0xff]  ;;  %v13612_v4 = vcombine.high %v830_v62, %v834_v63 }
 0x20d   : > { %10676 = vmatpush1.bf16.msra.mxu0 %v13523_v52  ;;  %v898_v1 = vld [vmem:[%s15084_s12 + $0x11e8] sm:$0xff] }
 0x20e   : > { %10651 = vmatpush2.bf16.msra.mxu1 %v13459_v55  ;;  %10677 = vmatprep.subr.bf16.mxu0 %v13516_v34  ;;  %v13676_v6 = vcombine.high %v894_v14, %v898_v1  ;;  %v822_v15 = vld [vmem:[%s15084_s12 + $0xf88] sm:$0xff]  ;;  %v13675_v22 = vcombine.low %v894_v14, %v898_v1 }
 0x20f   : > { %10652 = vmatprep.subr.bf16.mxu1 %v13452_v43  ;;  %v826_v52 = vld [vmem:[%s15084_s12 + $0xfa8] sm:$0xff]  ;;  %v13611_v43 = vcombine.low %v830_v62, %v834_v63 }
 0x210   : > { %v886_v55 = vld [vmem:[%s15084_s12 + $0x1188] sm:$0xff]  ;;  %v13604_v57 = vcombine.high %v822_v15, %v826_v52  ;;  %v13603_v36 = vcombine.low %v822_v15, %v826_v52 }
 0x211   : > { %10678 = vmatpush1.bf16.msra.mxu0 %v13515_v20  ;;  %v890_v34 = vld [vmem:[%s15084_s12 + $0x11a8] sm:$0xff] }
 0x212   : > { %10653 = vmatpush2.bf16.msra.mxu1 %v13451_v29  ;;  %10679 = vmatprep.subr.bf16.mxu0 %v13508_v31  ;;  %v13668_v54 = vcombine.high %v886_v55, %v890_v34  ;;  %v814_v27 = vld [vmem:[%s15084_s12 + $0xf48] sm:$0xff] }
 0x213   : > { %10654 = vmatprep.subr.bf16.mxu1 %v13444_v32  ;;  %v818_v20 = vld [vmem:[%s15084_s12 + $0xf68] sm:$0xff] }
 0x214   : > { %v878_v31 = vld [vmem:[%s15084_s12 + $0x1148] sm:$0xff]  ;;  %v13595_v62 = vcombine.low %v814_v27, %v818_v20 }
 0x215   : > { %10680 = vmatpush1.bf16.msra.mxu0 %v13507_v38  ;;  %v882_v32 = vld [vmem:[%s15084_s12 + $0x1168] sm:$0xff]  ;;  %v13667_v38 = vcombine.low %v886_v55, %v890_v34 }
 0x216   : > { %10655 = vmatpush2.bf16.msra.mxu1 %v13443_v39  ;;  %10681 = vmatprep.subr.bf16.mxu0 %v13500_v42  ;;  %v13596_v39 = vcombine.high %v814_v27, %v818_v20  ;;  %v806_v18 = vld [vmem:[%s15084_s12 + $0xf08] sm:$0xff]  ;;  %v13659_v63 = vcombine.low %v878_v31, %v882_v32 }
 0x217   : > { %10656 = vmatprep.subr.bf16.mxu1 %v13436_v44  ;;  %v810_v49 = vld [vmem:[%s15084_s12 + $0xf28] sm:$0xff] }
 0x218   : > { %v13588_v14 = vcombine.high %v806_v18, %v810_v49  ;;  %v866_v15 = vld [vmem:[%s15084_s12 + $0x10e8] sm:$0xff]  ;;  %v13587_v52 = vcombine.low %v806_v18, %v810_v49 }
 0x219   : > { %10682 = vmatpush1.bf16.msra.mxu0 %v13499_v56  ;;  %v870_v56 = vld [vmem:[%s15084_s12 + $0x1108] sm:$0xff] }
 0x21a   : > { %10657 = vmatpush2.bf16.msra.mxu1 %v13435_v58  ;;  %10683 = vmatprep.subr.bf16.mxu0 %v13492_v61  ;;  %v874_v58 = vld [vmem:[%s15084_s12 + $0x1128] sm:$0xff] }
 0x21b   : > { %10658 = vmatprep.subr.bf16.mxu1 %v13428_v8  ;;  %v13651_v55 = vcombine.low %v870_v56, %v874_v58  ;;  %v858_v27 = vld [vmem:[%s15084_s12 + $0x10a8] sm:$0xff] }
 0x21c   : > { %v778_v18 = vld [vmem:[%s15084_s12 + $0xe28] sm:$0xff] }
 0x21d   : > { %10684 = vmatpush1.bf16.msra.mxu0 %v13491_v40  ;;  %v13652_v40 = vcombine.high %v870_v56, %v874_v58  ;;  %v838_v49 = vld [vmem:[%s15084_s12 + $0x1008] sm:$0xff] }
 0x21e   : > { %10659 = vmatpush2.bf16.msra.mxu1 %v13427_v11  ;;  %10685 = vmatprep.subr.bf16.mxu0 %v13612_v4  ;;  %v798_v11 = vld [vmem:[%s15084_s12 + $0xec8] sm:$0xff] }
 0x21f   : > { %10710 = vmatprep.subr.bf16.mxu1 %v13676_v6  ;;  %v10375_v29 = vpop.f32.mrf.mxu0  ;;  %v802_v4 = vld [vmem:[%s15084_s12 + $0xee8] sm:$0xff] }
 0x220   : > { %v10376_v33 = vadd.f32 %v10375_v29, %v15725_v10  ;;  %v13660_v10 = vcombine.high %v878_v31, %v882_v32  ;;  %v862_v6 = vld [vmem:[%s15084_s12 + $0x10c8] sm:$0xff]  ;;  %v13580_v34 = vcombine.high %v798_v11, %v802_v4  ;;  %v13579_v20 = vcombine.low %v798_v11, %v802_v4 }
 0x221   : > { %v10416_v35 = vpop.f32.mrf.mxu1  ;;  %10661 = vmatmul.mubr.bf16.vlgmr.msra.gmra.mxu1 %v15265_v37  ;;  %10686 = vmatpush2.bf16.msra.mxu0 %v13611_v43  ;;  %v10377_v7 = vpop.f32.mrf.mxu0  ;;  %v13644_v43 = vcombine.high %v862_v6, %v866_v15  ;;  %v13643_v29 = vcombine.low %v862_v6, %v866_v15  ;;  %v1014_v15 = vld [vmem:[%s15084_s12 + $0x1588] sm:$0xff] }
 0x222   : > { %10711 = vmatpush1.bf16.msra.mxu1 %v13675_v22  ;;  %10687 = vmatprep.subr.bf16.mxu0 %v13604_v57  ;;  %v15799_v42 = vadd.f32 %v10416_v35, %v10376_v33  ;;  %v10378_v44 = vadd.f32 %v10377_v7, %v15733_v13  ;;  %v790_v22 = vld [vmem:[%s15084_s12 + $0xe88] sm:$0xff] }
 0x223   : > { %v10418_v46 = vpop.f32.mrf.mxu1  ;;  %10712 = vmatprep.subr.bf16.mxu1 %v13668_v54  ;;  %10742 = vmatprep.mubr.bf16.mxu1 %v15283_v48  ;;  %v10379_v51 = vpop.f32.mrf.mxu0  ;;  %v794_v57 = vld [vmem:[%s15084_s12 + $0xea8] sm:$0xff] }
 0x224   : > { %v15807_v61 = vadd.f32 %v10418_v46, %v10378_v44  ;;  %v854_v54 = vld [vmem:[%s15084_s12 + $0x1088] sm:$0xff]  ;;  %v13572_v31 = vcombine.high %v790_v22, %v794_v57 }
 0x225   : > { %v10420_v8 = vpop.f32.mrf.mxu1  ;;  %10688 = vmatpush2.bf16.msra.mxu0 %v13603_v36  ;;  %v10380_v13 = vpop.f32.mrf.mxu0  ;;  %v13636_v32 = vcombine.high %v854_v54, %v858_v27  ;;  %v782_v33 = vld [vmem:[%s15084_s12 + $0xe48] sm:$0xff] }
 0x226   : > { %10713 = vmatpush1.bf16.msra.mxu1 %v13667_v38  ;;  %10689 = vmatprep.subr.bf16.mxu0 %v13596_v39  ;;  %v786_v35 = vld [vmem:[%s15084_s12 + $0xe68] sm:$0xff]  ;;  %v13571_v38 = vcombine.low %v790_v22, %v794_v57  ;;  %v13635_v39 = vcombine.low %v854_v54, %v858_v27 }
 0x227   : > { %v10421_v1 = vpop.f32.mrf.mxu1  ;;  %10714 = vmatprep.subr.bf16.mxu1 %v13660_v10  ;;  %v846_v36 = vld [vmem:[%s15084_s12 + $0x1048] sm:$0xff]  ;;  %v13564_v44 = vcombine.high %v782_v33, %v786_v35  ;;  %v13563_v56 = vcombine.low %v782_v33, %v786_v35 }
 0x228   : > { %v850_v7 = vld [vmem:[%s15084_s12 + $0x1068] sm:$0xff] }
 0x229   : > { %10690 = vmatpush2.bf16.msra.mxu0 %v13595_v62  ;;  %v13628_v46 = vcombine.high %v846_v36, %v850_v7  ;;  %v774_v10 = vld [vmem:[%s15084_s12 + $0xe08] sm:$0xff]  ;;  %v13627_v58 = vcombine.low %v846_v36, %v850_v7 }
 0x22a   : > { %10715 = vmatpush1.bf16.msra.mxu1 %v13659_v63  ;;  %10691 = vmatprep.subr.bf16.mxu0 %v13588_v14  ;;  %v842_v51 = vld [vmem:[%s15084_s12 + $0x1028] sm:$0xff]  ;;  %v13556_v8 = vcombine.high %v774_v10, %v778_v18 }
 0x22b   : > { %10716 = vmatprep.subr.bf16.mxu1 %v13652_v40  ;;  %v13620_v62 = vcombine.high %v838_v49, %v842_v51  ;;  %v1022_v13 = vld [vmem:[%s15084_s12 + $0x15c8] sm:$0xff]  ;;  %v13555_v40 = vcombine.low %v774_v10, %v778_v18  ;;  %v13619_v11 = vcombine.low %v838_v49, %v842_v51 }
 0x22c   : > { %v1026_v63 = vld [vmem:[%s15084_s12 + $0x15e8] sm:$0xff] }
 0x22d   : > { %10692 = vmatpush2.bf16.msra.mxu0 %v13587_v52  ;;  %v958_v14 = vld [vmem:[%s15084_s12 + $0x13c8] sm:$0xff]  ;;  %v13804_v4 = vcombine.high %v1022_v13, %v1026_v63 }
 0x22e   : > { %10717 = vmatpush1.bf16.msra.mxu1 %v13651_v55  ;;  %10693 = vmatprep.subr.bf16.mxu0 %v13580_v34  ;;  %v962_v1 = vld [vmem:[%s15084_s12 + $0x13e8] sm:$0xff] }
 0x22f   : > { %10718 = vmatprep.subr.bf16.mxu1 %v13644_v43  ;;  %v13740_v6 = vcombine.high %v958_v14, %v962_v1  ;;  %v1018_v52 = vld [vmem:[%s15084_s12 + $0x15a8] sm:$0xff]  ;;  %v13803_v43 = vcombine.low %v1022_v13, %v1026_v63  ;;  %v13739_v22 = vcombine.low %v958_v14, %v962_v1 }
 0x230   : > { %v950_v55 = vld [vmem:[%s15084_s12 + $0x1388] sm:$0xff]  ;;  %v13796_v57 = vcombine.high %v1014_v15, %v1018_v52 }
 0x231   : > { %10694 = vmatpush2.bf16.msra.mxu0 %v13579_v20  ;;  %v954_v34 = vld [vmem:[%s15084_s12 + $0x13a8] sm:$0xff] }
 0x232   : > { %10719 = vmatpush1.bf16.msra.mxu1 %v13643_v29  ;;  %10695 = vmatprep.subr.bf16.mxu0 %v13572_v31  ;;  %v13732_v54 = vcombine.high %v950_v55, %v954_v34  ;;  %v1006_v27 = vld [vmem:[%s15084_s12 + $0x1548] sm:$0xff]  ;;  %v13731_v33 = vcombine.low %v950_v55, %v954_v34 }
 0x233   : > { %10720 = vmatprep.subr.bf16.mxu1 %v13636_v32  ;;  %v1010_v20 = vld [vmem:[%s15084_s12 + $0x1568] sm:$0xff]  ;;  %v13795_v32 = vcombine.low %v1014_v15, %v1018_v52 }
 0x234   : > { %v942_v29 = vld [vmem:[%s15084_s12 + $0x1348] sm:$0xff]  ;;  %v13788_v35 = vcombine.high %v1006_v27, %v1010_v20 }
 0x235   : > { %10696 = vmatpush2.bf16.msra.mxu0 %v13571_v38  ;;  %v946_v31 = vld [vmem:[%s15084_s12 + $0x1368] sm:$0xff] }
 0x236   : > { %10721 = vmatpush1.bf16.msra.mxu1 %v13635_v39  ;;  %10697 = vmatprep.subr.bf16.mxu0 %v13564_v44  ;;  %v13724_v36 = vcombine.high %v942_v29, %v946_v31  ;;  %v998_v7 = vld [vmem:[%s15084_s12 + $0x1508] sm:$0xff]  ;;  %v13723_v10 = vcombine.low %v942_v29, %v946_v31 }
 0x237   : > { %10722 = vmatprep.subr.bf16.mxu1 %v13628_v46  ;;  %v1002_v38 = vld [vmem:[%s15084_s12 + $0x1528] sm:$0xff]  ;;  %v13787_v46 = vcombine.low %v1006_v27, %v1010_v20 }
 0x238   : > { %v934_v39 = vld [vmem:[%s15084_s12 + $0x1308] sm:$0xff]  ;;  %v13780_v18 = vcombine.high %v998_v7, %v1002_v38 }
 0x239   : > { %10698 = vmatpush2.bf16.msra.mxu0 %v13563_v56  ;;  %v938_v44 = vld [vmem:[%s15084_s12 + $0x1328] sm:$0xff] }
 0x23a   : > { %10723 = vmatpush1.bf16.msra.mxu1 %v13627_v58  ;;  %10699 = vmatprep.subr.bf16.mxu0 %v13556_v8  ;;  %v13716_v49 = vcombine.high %v934_v39, %v938_v44  ;;  %v990_v51 = vld [vmem:[%s15084_s12 + $0x14c8] sm:$0xff]  ;;  %v13715_v13 = vcombine.low %v934_v39, %v938_v44 }
 0x23b   : > { %10724 = vmatprep.subr.bf16.mxu1 %v13620_v62  ;;  %v994_v56 = vld [vmem:[%s15084_s12 + $0x14e8] sm:$0xff]  ;;  %v13779_v62 = vcombine.low %v998_v7, %v1002_v38 }
 0x23c   : > { %v926_v58 = vld [vmem:[%s15084_s12 + $0x12c8] sm:$0xff]  ;;  %v13772_v63 = vcombine.high %v990_v51, %v994_v56 }
 0x23d   : > { %10700 = vmatpush2.bf16.msra.mxu0 %v13555_v40  ;;  %v930_v8 = vld [vmem:[%s15084_s12 + $0x12e8] sm:$0xff] }
 0x23e   : > { %10725 = vmatpush1.bf16.msra.mxu1 %v13619_v11  ;;  %10751 = vmatprep.subr.bf16.mxu0 %v13804_v4  ;;  %v13708_v14 = vcombine.high %v926_v58, %v930_v8  ;;  %v982_v1 = vld [vmem:[%s15084_s12 + $0x1488] sm:$0xff]  ;;  %v13707_v15 = vcombine.low %v926_v58, %v930_v8 }
 0x23f   : > { %10726 = vmatprep.subr.bf16.mxu1 %v13740_v6  ;;  %v986_v40 = vld [vmem:[%s15084_s12 + $0x14a8] sm:$0xff]  ;;  %v13771_v6 = vcombine.low %v990_v51, %v994_v56 }
 0x240   : > { %10702 = vmatmul.mubr.bf16.vlgmr.msra.gmra.mxu0 %v15274_v41  ;;  %v918_v11 = vld [vmem:[%s15084_s12 + $0x1288] sm:$0xff]  ;;  %v13764_v52 = vcombine.high %v982_v1, %v986_v40 }
 0x241   : > { %10752 = vmatpush1.bf16.msra.mxu0 %v13803_v43  ;;  %10783 = vmatprep.mubr.bf16.mxu0 %v15290_v50  ;;  %v922_v4 = vld [vmem:[%s15084_s12 + $0x12a8] sm:$0xff] }
 0x242   : > { %10727 = vmatpush2.bf16.msra.mxu1 %v13739_v22  ;;  %10753 = vmatprep.subr.bf16.mxu0 %v13796_v57  ;;  %v13700_v55 = vcombine.high %v918_v11, %v922_v4  ;;  %v974_v34 = vld [vmem:[%s15084_s12 + $0x1448] sm:$0xff]  ;;  %v13699_v27 = vcombine.low %v918_v11, %v922_v4 }
 0x243   : > { %10728 = vmatprep.subr.bf16.mxu1 %v13732_v54  ;;  %v978_v43 = vld [vmem:[%s15084_s12 + $0x1468] sm:$0xff]  ;;  %v13763_v54 = vcombine.low %v982_v1, %v986_v40 }
 0x244   : > { %v910_v22 = vld [vmem:[%s15084_s12 + $0x1248] sm:$0xff]  ;;  %v13756_v20 = vcombine.high %v974_v34, %v978_v43 }
 0x245   : > { %10754 = vmatpush1.bf16.msra.mxu0 %v13795_v32  ;;  %v914_v57 = vld [vmem:[%s15084_s12 + $0x1268] sm:$0xff] }
 0x246   : > { %10729 = vmatpush2.bf16.msra.mxu1 %v13731_v33  ;;  %10755 = vmatprep.subr.bf16.mxu0 %v13788_v35  ;;  %v13692_v29 = vcombine.high %v910_v22, %v914_v57  ;;  %v966_v31 = vld [vmem:[%s15084_s12 + $0x1408] sm:$0xff]  ;;  %v13691_v7 = vcombine.low %v910_v22, %v914_v57 }
 0x247   : > { %10730 = vmatprep.subr.bf16.mxu1 %v13724_v36  ;;  %v970_v32 = vld [vmem:[%s15084_s12 + $0x1428] sm:$0xff]  ;;  %v13755_v36 = vcombine.low %v974_v34, %v978_v43 }
 0x248   : > { %v902_v33 = vld [vmem:[%s15084_s12 + $0x1208] sm:$0xff]  ;;  %v13748_v38 = vcombine.high %v966_v31, %v970_v32 }
 0x249   : > { %10756 = vmatpush1.bf16.msra.mxu0 %v13787_v46  ;;  %v906_v35 = vld [vmem:[%s15084_s12 + $0x1228] sm:$0xff] }
 0x24a   : > { %10731 = vmatpush2.bf16.msra.mxu1 %v13723_v10  ;;  %10757 = vmatprep.subr.bf16.mxu0 %v13780_v18  ;;  %v13684_v39 = vcombine.high %v902_v33, %v906_v35  ;;  %v1086_v44 = vld [vmem:[%s15084_s12 + $0x17c8] sm:$0xff]  ;;  %v13683_v51 = vcombine.low %v902_v33, %v906_v35 }
 0x24b   : > { %10732 = vmatprep.subr.bf16.mxu1 %v13716_v49  ;;  %v1090_v46 = vld [vmem:[%s15084_s12 + $0x17e8] sm:$0xff]  ;;  %v13747_v49 = vcombine.low %v966_v31, %v970_v32 }
 0x24c   : > { %v1150_v10 = vld [vmem:[%s15084_s12 + $0x19c8] sm:$0xff]  ;;  %v13868_v56 = vcombine.high %v1086_v44, %v1090_v46 }
 0x24d   : > { %10758 = vmatpush1.bf16.msra.mxu0 %v13779_v62  ;;  %v1154_v18 = vld [vmem:[%s15084_s12 + $0x19e8] sm:$0xff] }
 0x24e   : > { %10733 = vmatpush2.bf16.msra.mxu1 %v13715_v13  ;;  %10759 = vmatprep.subr.bf16.mxu0 %v13772_v63  ;;  %v13932_v58 = vcombine.high %v1150_v10, %v1154_v18  ;;  %v1078_v8 = vld [vmem:[%s15084_s12 + $0x1788] sm:$0xff]  ;;  %v13931_v1 = vcombine.low %v1150_v10, %v1154_v18 }
 0x24f   : > { %10734 = vmatprep.subr.bf16.mxu1 %v13708_v14  ;;  %v1082_v62 = vld [vmem:[%s15084_s12 + $0x17a8] sm:$0xff]  ;;  %v13867_v14 = vcombine.low %v1086_v44, %v1090_v46 }
 0x250   : > { %v1142_v13 = vld [vmem:[%s15084_s12 + $0x1988] sm:$0xff]  ;;  %v13860_v40 = vcombine.high %v1078_v8, %v1082_v62  ;;  %v13859_v43 = vcombine.low %v1078_v8, %v1082_v62 }
 0x251   : > { %10760 = vmatpush1.bf16.msra.mxu0 %v13771_v6  ;;  %v1146_v63 = vld [vmem:[%s15084_s12 + $0x19a8] sm:$0xff] }
 0x252   : > { %10735 = vmatpush2.bf16.msra.mxu1 %v13707_v15  ;;  %10761 = vmatprep.subr.bf16.mxu0 %v13764_v52  ;;  %v13924_v11 = vcombine.high %v1142_v13, %v1146_v63  ;;  %v1070_v4 = vld [vmem:[%s15084_s12 + $0x1748] sm:$0xff]  ;;  %v13923_v57 = vcombine.low %v1142_v13, %v1146_v63 }
 0x253   : > { %10736 = vmatprep.subr.bf16.mxu1 %v13700_v55  ;;  %v1074_v6 = vld [vmem:[%s15084_s12 + $0x1768] sm:$0xff] }
 0x254   : > { %v1134_v52 = vld [vmem:[%s15084_s12 + $0x1948] sm:$0xff] }
 0x255   : > { %10762 = vmatpush1.bf16.msra.mxu0 %v13763_v54  ;;  %v1138_v55 = vld [vmem:[%s15084_s12 + $0x1968] sm:$0xff]  ;;  %v13852_v54 = vcombine.high %v1070_v4, %v1074_v6 }
 0x256   : > { %10737 = vmatpush2.bf16.msra.mxu1 %v13699_v27  ;;  %10763 = vmatprep.subr.bf16.mxu0 %v13756_v20  ;;  %v13916_v20 = vcombine.high %v1134_v52, %v1138_v55  ;;  %v1066_v31 = vld [vmem:[%s15084_s12 + $0x1728] sm:$0xff] }
 0x257   : > { %10738 = vmatprep.subr.bf16.mxu1 %v13692_v29  ;;  %v1062_v29 = vld [vmem:[%s15084_s12 + $0x1708] sm:$0xff] }
 0x258   : > { %v1126_v33 = vld [vmem:[%s15084_s12 + $0x1908] sm:$0xff]  ;;  %v13844_v44 = vcombine.high %v1062_v29, %v1066_v31 }
 0x259   : > { %10764 = vmatpush1.bf16.msra.mxu0 %v13755_v36  ;;  %v1130_v35 = vld [vmem:[%s15084_s12 + $0x1928] sm:$0xff] }
 0x25a   : > { %10739 = vmatpush2.bf16.msra.mxu1 %v13691_v7  ;;  %10765 = vmatprep.subr.bf16.mxu0 %v13748_v38  ;;  %v13851_v7 = vcombine.low %v1070_v4, %v1074_v6  ;;  %v13908_v10 = vcombine.high %v1126_v33, %v1130_v35  ;;  %v1054_v18 = vld [vmem:[%s15084_s12 + $0x16c8] sm:$0xff]  ;;  %v13907_v8 = vcombine.low %v1126_v33, %v1130_v35 }
 0x25b   : > { %10740 = vmatprep.subr.bf16.mxu1 %v13684_v39  ;;  %v13915_v39 = vcombine.low %v1134_v52, %v1138_v55  ;;  %v1046_v63 = vld [vmem:[%s15084_s12 + $0x1688] sm:$0xff] }
 0x25c   : > { %v1038_v55 = vld [vmem:[%s15084_s12 + $0x1648] sm:$0xff] }
 0x25d   : > { %10766 = vmatpush1.bf16.msra.mxu0 %v13747_v49  ;;  %v1058_v49 = vld [vmem:[%s15084_s12 + $0x16e8] sm:$0xff] }
 0x25e   : > { %10741 = vmatpush2.bf16.msra.mxu1 %v13683_v51  ;;  %10767 = vmatprep.subr.bf16.mxu0 %v13868_v56  ;;  %v1118_v51 = vld [vmem:[%s15084_s12 + $0x18c8] sm:$0xff]  ;;  %v13836_v62 = vcombine.high %v1054_v18, %v1058_v49 }
 0x25f   : > { %10792 = vmatprep.subr.bf16.mxu1 %v13932_v58  ;;  %v1122_v56 = vld [vmem:[%s15084_s12 + $0x18e8] sm:$0xff]  ;;  %v13843_v58 = vcombine.low %v1062_v29, %v1066_v31 }
 0x260   : > { %v15869_v15 = vpop.f32.mrf.mxu0  ;;  %v13900_v13 = vcombine.high %v1118_v51, %v1122_v56  ;;  %v13899_v4 = vcombine.low %v1118_v51, %v1122_v56  ;;  %v1030_v33 = vld [vmem:[%s15084_s12 + $0x1608] sm:$0xff] }
 0x261   : > { %v15873_v34 = vpop.f32.mrf.mxu1  ;;  %10743 = vmatmul.mubr.bf16.vlgmr.msra.gmra.mxu1 %v15355_v5  ;;  %10768 = vmatpush2.bf16.msra.mxu0 %v13867_v14  ;;  %v1050_v14 = vld [vmem:[%s15084_s12 + $0x16a8] sm:$0xff] }
 0x262   : > { %10793 = vmatpush1.bf16.msra.mxu1 %v13931_v1  ;;  %v15876_v22 = vpop.f32.mrf.mxu0  ;;  %10769 = vmatprep.subr.bf16.mxu0 %v13860_v40  ;;  %v1110_v1 = vld [vmem:[%s15084_s12 + $0x1888] sm:$0xff]  ;;  %v13828_v6 = vcombine.high %v1046_v63, %v1050_v14 }
 0x263   : > { %v15878_v27 = vpop.f32.mrf.mxu1  ;;  %10794 = vmatprep.subr.bf16.mxu1 %v13924_v11  ;;  %10824 = vmatprep.mubr.bf16.mxu1 %v15373_v16  ;;  %v1114_v40 = vld [vmem:[%s15084_s12 + $0x18a8] sm:$0xff]  ;;  %v13835_v11 = vcombine.low %v1054_v18, %v1058_v49 }
 0x264   : > { %v10461_v32 = vpop.f32.mrf.mxu0  ;;  %v13892_v52 = vcombine.high %v1110_v1, %v1114_v40  ;;  %v13891_v29 = vcombine.low %v1110_v1, %v1114_v40  ;;  %v1034_v35 = vld [vmem:[%s15084_s12 + $0x1628] sm:$0xff] }
 0x265   : > { %v10502_v36 = vpop.f32.mrf.mxu1  ;;  %10770 = vmatpush2.bf16.msra.mxu0 %v13859_v43  ;;  %v1042_v43 = vld [vmem:[%s15084_s12 + $0x1668] sm:$0xff]  ;;  %v13811_v56 = vcombine.low %v1030_v33, %v1034_v35 }
 0x266   : > { %10795 = vmatpush1.bf16.msra.mxu1 %v13923_v57  ;;  %v10462_v38 = vpop.f32.mrf.mxu0  ;;  %10771 = vmatprep.subr.bf16.mxu0 %v13852_v54  ;;  %v1102_v57 = vld [vmem:[%s15084_s12 + $0x1848] sm:$0xff]  ;;  %v13820_v31 = vcombine.high %v1038_v55, %v1042_v43 }
 0x267   : > { %v10503_v46 = vpop.f32.mrf.mxu1  ;;  %10796 = vmatprep.subr.bf16.mxu1 %v13916_v20  ;;  %v1106_v54 = vld [vmem:[%s15084_s12 + $0x1868] sm:$0xff]  ;;  %v13827_v20 = vcombine.low %v1046_v63, %v1050_v14  ;;  %v13819_v38 = vcombine.low %v1038_v55, %v1042_v43 }
 0x268   : > { %v13884_v32 = vcombine.high %v1102_v57, %v1106_v54  ;;  %v1094_v36 = vld [vmem:[%s15084_s12 + $0x1808] sm:$0xff] }
 0x269   : > { %10772 = vmatpush2.bf16.msra.mxu0 %v13851_v7  ;;  %v1098_v7 = vld [vmem:[%s15084_s12 + $0x1828] sm:$0xff] }
 0x26a   : > { %10797 = vmatpush1.bf16.msra.mxu1 %v13915_v39  ;;  %10773 = vmatprep.subr.bf16.mxu0 %v13844_v44  ;;  %v13883_v39 = vcombine.low %v1102_v57, %v1106_v54  ;;  %v13812_v44 = vcombine.high %v1030_v33, %v1034_v35  ;;  %v13876_v46 = vcombine.high %v1094_v36, %v1098_v7  ;;  %v1282_v18 = vld [vmem:[%s15084_s12 + $0x1de8] sm:$0xff]  ;;  %v304_v57 = vld [vmem:[#allocation2 + $0x30] sm:$0xff] }
 0x26b   : > { %10798 = vmatprep.subr.bf16.mxu1 %v13908_v10  ;;  %v1278_v10 = vld [vmem:[%s15084_s12 + $0x1dc8] sm:$0xff] }
 0x26c   : > { %v1214_v49 = vld [vmem:[%s15084_s12 + $0x1bc8] sm:$0xff] }
 0x26d   : > { %10774 = vmatpush2.bf16.msra.mxu0 %v13843_v58  ;;  %v1218_v51 = vld [vmem:[%s15084_s12 + $0x1be8] sm:$0xff]  ;;  %v13875_v58 = vcombine.low %v1094_v36, %v1098_v7 }
 0x26e   : > { %10799 = vmatpush1.bf16.msra.mxu1 %v13907_v8  ;;  %10775 = vmatprep.subr.bf16.mxu0 %v13836_v62  ;;  %v14060_v8 = vcombine.high %v1278_v10, %v1282_v18  ;;  %v10458_v62 = vadd.f32 %v15869_v15, %v15799_v42  ;;  %v1270_v63 = vld [vmem:[%s15084_s12 + $0x1d88] sm:$0xff] }
 0x26f   : > { %10800 = vmatprep.subr.bf16.mxu1 %v13900_v13  ;;  %v13996_v13 = vcombine.high %v1214_v49, %v1218_v51  ;;  %v1274_v14 = vld [vmem:[%s15084_s12 + $0x1da8] sm:$0xff] }
 0x270   : > { %v1206_v1 = vld [vmem:[%s15084_s12 + $0x1b88] sm:$0xff]  ;;  %v10499_v42 = vadd.f32 %v15873_v34, %v10458_v62  ;;  %v305_v34 = vld [vmem:[#allocation2] sm:$0xff] }
 0x271   : > { %10776 = vmatpush2.bf16.msra.mxu0 %v13835_v11  ;;  %v1210_v40 = vld [vmem:[%s15084_s12 + $0x1ba8] sm:$0xff]  ;;  %v10460_v11 = vadd.f32 %v15876_v22, %v15807_v61 }
 0x272   : > { %10801 = vmatpush1.bf16.msra.mxu1 %v13899_v4  ;;  %10777 = vmatprep.subr.bf16.mxu0 %v13828_v6  ;;  %v14059_v4 = vcombine.low %v1278_v10, %v1282_v18  ;;  %v13995_v6 = vcombine.low %v1214_v49, %v1218_v51  ;;  %v13988_v15 = vcombine.high %v1206_v1, %v1210_v40  ;;  %v1262_v55 = vld [vmem:[%s15084_s12 + $0x1d48] sm:$0xff] }
 0x273   : > { %10802 = vmatprep.subr.bf16.mxu1 %v13892_v52  ;;  %v14052_v52 = vcombine.high %v1270_v63, %v1274_v14  ;;  %v1266_v43 = vld [vmem:[%s15084_s12 + $0x1d68] sm:$0xff]  ;;  %v10501_v61 = vadd.f32 %v15878_v27, %v10460_v11  ;;  %v13987_v33 = vcombine.low %v1206_v1, %v1210_v40 }
 0x274   : > { %v14044_v35 = vcombine.high %v1262_v55, %v1266_v43  ;;  %v1258_v27 = vld [vmem:[%s15084_s12 + $0x1d28] sm:$0xff]  ;;  %v14043_v49 = vcombine.low %v1262_v55, %v1266_v43 }
 0x275   : > { %10778 = vmatpush2.bf16.msra.mxu0 %v13827_v20  ;;  %v1198_v20 = vld [vmem:[%s15084_s12 + $0x1b48] sm:$0xff] }
 0x276   : > { %10803 = vmatpush1.bf16.msra.mxu1 %v13891_v29  ;;  %10779 = vmatprep.subr.bf16.mxu0 %v13820_v31  ;;  %v1202_v29 = vld [vmem:[%s15084_s12 + $0x1b68] sm:$0xff]  ;;  %v14051_v31 = vcombine.low %v1270_v63, %v1274_v14 }
 0x277   : > { %10804 = vmatprep.subr.bf16.mxu1 %v13884_v32  ;;  %v1194_v10 = vld [vmem:[%s15084_s12 + $0x1b28] sm:$0xff] }
 0x278   : > { %v1246_v62 = vld [vmem:[%s15084_s12 + $0x1cc8] sm:$0xff] }
 0x279   : > { %10780 = vmatpush2.bf16.msra.mxu0 %v13819_v38  ;;  %v13980_v38 = vcombine.high %v1198_v20, %v1202_v29  ;;  %v1182_v63 = vld [vmem:[%s15084_s12 + $0x1ac8] sm:$0xff] }
 0x27a   : > { %10805 = vmatpush1.bf16.msra.mxu1 %v13883_v39  ;;  %10781 = vmatprep.subr.bf16.mxu0 %v13812_v44  ;;  %v1254_v39 = vld [vmem:[%s15084_s12 + $0x1d08] sm:$0xff] }
 0x27b   : > { %10806 = vmatprep.subr.bf16.mxu1 %v13876_v46  ;;  %v1190_v46 = vld [vmem:[%s15084_s12 + $0x1b08] sm:$0xff]  ;;  %v14035_v1 = vcombine.low %v1254_v39, %v1258_v27 }
 0x27c   : > { %v1186_v14 = vld [vmem:[%s15084_s12 + $0x1ae8] sm:$0xff]  ;;  %v13971_v40 = vcombine.low %v1190_v46, %v1194_v10 }
 0x27d   : > { %10782 = vmatpush2.bf16.msra.mxu0 %v13811_v56  ;;  %v13979_v56 = vcombine.low %v1198_v20, %v1202_v29  ;;  %v13963_v43 = vcombine.low %v1182_v63, %v1186_v14  ;;  %v1230_v20 = vld [vmem:[%s15084_s12 + $0x1c48] sm:$0xff] }
 0x27e   : > { %10807 = vmatpush1.bf16.msra.mxu1 %v13875_v58  ;;  %10833 = vmatprep.subr.bf16.mxu0 %v14060_v8  ;;  %v14036_v58 = vcombine.high %v1254_v39, %v1258_v27  ;;  %v13972_v8 = vcombine.high %v1190_v46, %v1194_v10  ;;  %v1234_v29 = vld [vmem:[%s15084_s12 + $0x1c68] sm:$0xff] }
 0x27f   : > { %10808 = vmatprep.subr.bf16.mxu1 %v13996_v13  ;;  %v1250_v13 = vld [vmem:[%s15084_s12 + $0x1ce8] sm:$0xff]  ;;  %v14011_v39 = vcombine.low %v1230_v20, %v1234_v29 }
 0x280   : > { %v10539_v54 = vpop.f32.mrf.mxu0  ;;  %10784 = vmatmul.mubr.bf16.vlgmr.msra.gmra.mxu0 %v15364_v9  ;;  %v14028_v11 = vcombine.high %v1246_v62, %v1250_v13  ;;  %v14027_v55 = vcombine.low %v1246_v62, %v1250_v13  ;;  %v1342_v10 = vld [vmem:[%s15084_s12 + $0x1fc8] sm:$0xff] }
 0x281   : > { %v10540_v22 = vadd.f32 %v10539_v54, %v10499_v42  ;;  %10834 = vmatpush1.bf16.msra.mxu0 %v14059_v4  ;;  %10865 = vmatprep.mubr.bf16.mxu0 %v15380_v19  ;;  %v13964_v4 = vcombine.high %v1182_v63, %v1186_v14  ;;  %v1174_v42 = vld [vmem:[%s15084_s12 + $0x1a88] sm:$0xff] }
 0x282   : > { %10809 = vmatpush2.bf16.msra.mxu1 %v13995_v6  ;;  %v10541_v32 = vpop.f32.mrf.mxu0  ;;  %10835 = vmatprep.subr.bf16.mxu0 %v14052_v52  ;;  %v1238_v6 = vld [vmem:[%s15084_s12 + $0x1c88] sm:$0xff] }
 0x283   : > { %v12145_v36 = vadd.f32 %v10540_v22, %v304_v57  ;;  %v10542_v7 = vadd.f32 %v10541_v32, %v10501_v61  ;;  %10810 = vmatprep.subr.bf16.mxu1 %v13988_v15  ;;  %v1242_v52 = vld [vmem:[%s15084_s12 + $0x1ca8] sm:$0xff]  ;;  %v14012_v32 = vcombine.high %v1230_v20, %v1234_v29 }
 0x284   : > { %v10543_v44 = vpop.f32.mrf.mxu0  ;;  %v1178_v15 = vld [vmem:[%s15084_s12 + $0x1aa8] sm:$0xff]  ;;  %v14020_v57 = vcombine.high %v1238_v6, %v1242_v52 }
 0x285   : > { %12153 = vst [vmem:[#allocation2 + $0x30] sm:$0xff] %v12145_v36  ;;  %v12146_v18 = vadd.f32 %v10542_v7, %v305_v34  ;;  %10836 = vmatpush1.bf16.msra.mxu0 %v14051_v31  ;;  %v13956_v54 = vcombine.high %v1174_v42, %v1178_v15  ;;  %v1166_v61 = vld [vmem:[%s15084_s12 + $0x1a48] sm:$0xff]  ;;  %v14019_v31 = vcombine.low %v1238_v6, %v1242_v52 }
 0x286   : > { %10811 = vmatpush2.bf16.msra.mxu1 %v13987_v33  ;;  %v10544_v51 = vpop.f32.mrf.mxu0  ;;  %10837 = vmatprep.subr.bf16.mxu0 %v14044_v35  ;;  %v1170_v22 = vld [vmem:[%s15084_s12 + $0x1a68] sm:$0xff]  ;;  %v13955_v34 = vcombine.low %v1174_v42, %v1178_v15 }
 0x287   : > { %12154 = vst [vmem:[#allocation2] sm:$0xff] %v12146_v18  ;;  %10812 = vmatprep.subr.bf16.mxu1 %v13980_v38  ;;  %v13948_v33 = vcombine.high %v1166_v61, %v1170_v22  ;;  %v1222_v35 = vld [vmem:[%s15084_s12 + $0x1c08] sm:$0xff]  ;;  %v13947_v27 = vcombine.low %v1166_v61, %v1170_v22 }
 0x288   : > { %v1226_v36 = vld [vmem:[%s15084_s12 + $0x1c28] sm:$0xff] }
 0x289   : > { %10838 = vmatpush1.bf16.msra.mxu0 %v14043_v49  ;;  %v1158_v7 = vld [vmem:[%s15084_s12 + $0x1a08] sm:$0xff]  ;;  %v14004_v44 = vcombine.high %v1222_v35, %v1226_v36 }
 0x28a   : > { %10813 = vmatpush2.bf16.msra.mxu1 %v13979_v56  ;;  %10839 = vmatprep.subr.bf16.mxu0 %v14036_v58  ;;  %v1162_v38 = vld [vmem:[%s15084_s12 + $0x1a28] sm:$0xff]  ;;  %v14003_v56 = vcombine.low %v1222_v35, %v1226_v36 }
 0x28b   : > { %10814 = vmatprep.subr.bf16.mxu1 %v13972_v8  ;;  %v13940_v46 = vcombine.high %v1158_v7, %v1162_v38  ;;  %v1346_v18 = vld [vmem:[%s15084_s12 + $0x1fe8] sm:$0xff]  ;;  %v13939_v58 = vcombine.low %v1158_v7, %v1162_v38 }
 0x28c   : > { %v1406_v49 = vld [vmem:[%s15084_s12 + $0x21c8] sm:$0xff]  ;;  %v14124_v8 = vcombine.high %v1342_v10, %v1346_v18 }
 0x28d   : > { %10840 = vmatpush1.bf16.msra.mxu0 %v14035_v1  ;;  %v1410_v51 = vld [vmem:[%s15084_s12 + $0x21e8] sm:$0xff] }
 0x28e   : > { %10815 = vmatpush2.bf16.msra.mxu1 %v13971_v40  ;;  %10841 = vmatprep.subr.bf16.mxu0 %v14028_v11  ;;  %v14188_v62 = vcombine.high %v1406_v49, %v1410_v51  ;;  %v1334_v13 = vld [vmem:[%s15084_s12 + $0x1f88] sm:$0xff]  ;;  %v14123_v40 = vcombine.low %v1342_v10, %v1346_v18  ;;  %v14187_v11 = vcombine.low %v1406_v49, %v1410_v51 }
 0x28f   : > { %10816 = vmatprep.subr.bf16.mxu1 %v13964_v4  ;;  %v1338_v63 = vld [vmem:[%s15084_s12 + $0x1fa8] sm:$0xff] }
 0x290   : > { %v1398_v14 = vld [vmem:[%s15084_s12 + $0x2188] sm:$0xff]  ;;  %v14116_v4 = vcombine.high %v1334_v13, %v1338_v63 }
 0x291   : > { %10842 = vmatpush1.bf16.msra.mxu0 %v14027_v55  ;;  %v1402_v1 = vld [vmem:[%s15084_s12 + $0x21a8] sm:$0xff] }
 0x292   : > { %10817 = vmatpush2.bf16.msra.mxu1 %v13963_v43  ;;  %10843 = vmatprep.subr.bf16.mxu0 %v14020_v57  ;;  %v14180_v6 = vcombine.high %v1398_v14, %v1402_v1  ;;  %v1326_v52 = vld [vmem:[%s15084_s12 + $0x1f48] sm:$0xff]  ;;  %v14115_v57 = vcombine.low %v1334_v13, %v1338_v63 }
 0x293   : > { %10818 = vmatprep.subr.bf16.mxu1 %v13956_v54  ;;  %v1330_v42 = vld [vmem:[%s15084_s12 + $0x1f68] sm:$0xff]  ;;  %v14179_v54 = vcombine.low %v1398_v14, %v1402_v1 }
 0x294   : > { %v1390_v15 = vld [vmem:[%s15084_s12 + $0x2148] sm:$0xff]  ;;  %v14108_v20 = vcombine.high %v1326_v52, %v1330_v42  ;;  %v14107_v35 = vcombine.low %v1326_v52, %v1330_v42 }
 0x295   : > { %10844 = vmatpush1.bf16.msra.mxu0 %v14019_v31  ;;  %v1394_v55 = vld [vmem:[%s15084_s12 + $0x2168] sm:$0xff] }
 0x296   : > { %10819 = vmatpush2.bf16.msra.mxu1 %v13955_v34  ;;  %10845 = vmatprep.subr.bf16.mxu0 %v14012_v32  ;;  %v14172_v61 = vcombine.high %v1390_v15, %v1394_v55  ;;  %v1318_v22 = vld [vmem:[%s15084_s12 + $0x1f08] sm:$0xff]  ;;  %v14171_v36 = vcombine.low %v1390_v15, %v1394_v55 }
 0x297   : > { %10820 = vmatprep.subr.bf16.mxu1 %v13948_v33  ;;  %v1322_v31 = vld [vmem:[%s15084_s12 + $0x1f28] sm:$0xff] }
 0x298   : > { %v1382_v34 = vld [vmem:[%s15084_s12 + $0x2108] sm:$0xff]  ;;  %v14100_v7 = vcombine.high %v1318_v22, %v1322_v31  ;;  %v14099_v18 = vcombine.low %v1318_v22, %v1322_v31 }
 0x299   : > { %10846 = vmatpush1.bf16.msra.mxu0 %v14011_v39  ;;  %v1386_v32 = vld [vmem:[%s15084_s12 + $0x2128] sm:$0xff] }
 0x29a   : > { %10821 = vmatpush2.bf16.msra.mxu1 %v13947_v27  ;;  %10847 = vmatprep.subr.bf16.mxu0 %v14004_v44  ;;  %v14164_v39 = vcombine.high %v1382_v34, %v1386_v32  ;;  %v1310_v27 = vld [vmem:[%s15084_s12 + $0x1ec8] sm:$0xff]  ;;  %v14163_v49 = vcombine.low %v1382_v34, %v1386_v32 }
 0x29b   : > { %10822 = vmatprep.subr.bf16.mxu1 %v13940_v46  ;;  %v1314_v44 = vld [vmem:[%s15084_s12 + $0x1ee8] sm:$0xff] }
 0x29c   : > { %v1374_v46 = vld [vmem:[%s15084_s12 + $0x20c8] sm:$0xff]  ;;  %v14092_v51 = vcombine.high %v1310_v27, %v1314_v44  ;;  %v14091_v63 = vcombine.low %v1310_v27, %v1314_v44 }
 0x29d   : > { %10848 = vmatpush1.bf16.msra.mxu0 %v14003_v56  ;;  %v1378_v10 = vld [vmem:[%s15084_s12 + $0x20e8] sm:$0xff] }
 0x29e   : > { %10823 = vmatpush2.bf16.msra.mxu1 %v13939_v58  ;;  %10849 = vmatprep.subr.bf16.mxu0 %v14124_v8  ;;  %v14156_v56 = vcombine.high %v1374_v46, %v1378_v10  ;;  %v1302_v58 = vld [vmem:[%s15084_s12 + $0x1e88] sm:$0xff]  ;;  %v14155_v14 = vcombine.low %v1374_v46, %v1378_v10 }
 0x29f   : > { %10874 = vmatprep.subr.bf16.mxu1 %v14188_v62  ;;  %v1306_v8 = vld [vmem:[%s15084_s12 + $0x1ea8] sm:$0xff] }
 0x2a0   : > { %v1366_v62 = vld [vmem:[%s15084_s12 + $0x2088] sm:$0xff]  ;;  %v14084_v1 = vcombine.high %v1302_v58, %v1306_v8  ;;  %v14083_v42 = vcombine.low %v1302_v58, %v1306_v8 }
 0x2a1   : > { %v15953_v43 = vpop.f32.mrf.mxu1  ;;  %10825 = vmatmul.mubr.bf16.vlgmr.msra.gmra.mxu1 %v15445_v23  ;;  %10850 = vmatpush2.bf16.msra.mxu0 %v14123_v40  ;;  %v1370_v13 = vld [vmem:[%s15084_s12 + $0x20a8] sm:$0xff] }
 0x2a2   : > { %10875 = vmatpush1.bf16.msra.mxu1 %v14187_v11  ;;  %10851 = vmatprep.subr.bf16.mxu0 %v14116_v4  ;;  %v14148_v40 = vcombine.high %v1366_v62, %v1370_v13  ;;  %v1294_v11 = vld [vmem:[%s15084_s12 + $0x1e48] sm:$0xff]  ;;  %v14147_v15 = vcombine.low %v1366_v62, %v1370_v13 }
 0x2a3   : > { %v15956_v29 = vpop.f32.mrf.mxu1  ;;  %10876 = vmatprep.subr.bf16.mxu1 %v14180_v6  ;;  %10906 = vmatprep.mubr.bf16.mxu1 %v15463_v0  ;;  %v1298_v4 = vld [vmem:[%s15084_s12 + $0x1e68] sm:$0xff] }
 0x2a4   : > { %v1358_v6 = vld [vmem:[%s15084_s12 + $0x2048] sm:$0xff]  ;;  %v14076_v55 = vcombine.high %v1294_v11, %v1298_v4  ;;  %v14075_v31 = vcombine.low %v1294_v11, %v1298_v4 }
 0x2a5   : > { %v10584_v33 = vpop.f32.mrf.mxu1  ;;  %10852 = vmatpush2.bf16.msra.mxu0 %v14115_v57  ;;  %v1362_v52 = vld [vmem:[%s15084_s12 + $0x2068] sm:$0xff] }
 0x2a6   : > { %10877 = vmatpush1.bf16.msra.mxu1 %v14179_v54  ;;  %10853 = vmatprep.subr.bf16.mxu0 %v14108_v20  ;;  %v14140_v57 = vcombine.high %v1358_v6, %v1362_v52  ;;  %v1286_v54 = vld [vmem:[%s15084_s12 + $0x1e08] sm:$0xff]  ;;  %v14139_v34 = vcombine.low %v1358_v6, %v1362_v52 }
 0x2a7   : > { %v10585_v38 = vpop.f32.mrf.mxu1  ;;  %10878 = vmatprep.subr.bf16.mxu1 %v14172_v61  ;;  %v1290_v20 = vld [vmem:[%s15084_s12 + $0x1e28] sm:$0xff] }
 0x2a8   : > { %v1350_v61 = vld [vmem:[%s15084_s12 + $0x2008] sm:$0xff]  ;;  %v14068_v32 = vcombine.high %v1286_v54, %v1290_v20 }
 0x2a9   : > { %10854 = vmatpush2.bf16.msra.mxu0 %v14107_v35  ;;  %v1354_v22 = vld [vmem:[%s15084_s12 + $0x2028] sm:$0xff] }
 0x2aa   : > { %10879 = vmatpush1.bf16.msra.mxu1 %v14171_v36  ;;  %10855 = vmatprep.subr.bf16.mxu0 %v14100_v7  ;;  %v14132_v33 = vcombine.high %v1350_v61, %v1354_v22  ;;  %v1534_v35 = vld [vmem:[%s15084_s12 + $0x25c8] sm:$0xff]  ;;  %v14131_v27 = vcombine.low %v1350_v61, %v1354_v22 }
 0x2ab   : > { %10880 = vmatprep.subr.bf16.mxu1 %v14164_v39  ;;  %v1538_v36 = vld [vmem:[%s15084_s12 + $0x25e8] sm:$0xff]  ;;  %v14067_v39 = vcombine.low %v1286_v54, %v1290_v20 }
 0x2ac   : > { %v1470_v7 = vld [vmem:[%s15084_s12 + $0x23c8] sm:$0xff]  ;;  %v14316_v44 = vcombine.high %v1534_v35, %v1538_v36 }
 0x2ad   : > { %10856 = vmatpush2.bf16.msra.mxu0 %v14099_v18  ;;  %v1474_v38 = vld [vmem:[%s15084_s12 + $0x23e8] sm:$0xff] }
 0x2ae   : > { %10881 = vmatpush1.bf16.msra.mxu1 %v14163_v49  ;;  %10857 = vmatprep.subr.bf16.mxu0 %v14092_v51  ;;  %v14252_v46 = vcombine.high %v1470_v7, %v1474_v38  ;;  %v1526_v10 = vld [vmem:[%s15084_s12 + $0x2588] sm:$0xff]  ;;  %v14251_v58 = vcombine.low %v1470_v7, %v1474_v38 }
 0x2af   : > { %10882 = vmatprep.subr.bf16.mxu1 %v14156_v56  ;;  %v1530_v18 = vld [vmem:[%s15084_s12 + $0x25a8] sm:$0xff]  ;;  %v14315_v56 = vcombine.low %v1534_v35, %v1538_v36 }
 0x2b0   : > { %v1462_v49 = vld [vmem:[%s15084_s12 + $0x2388] sm:$0xff]  ;;  %v14308_v8 = vcombine.high %v1526_v10, %v1530_v18  ;;  %v14307_v4 = vcombine.low %v1526_v10, %v1530_v18 }
 0x2b1   : > { %10858 = vmatpush2.bf16.msra.mxu0 %v14091_v63  ;;  %v1466_v51 = vld [vmem:[%s15084_s12 + $0x23a8] sm:$0xff] }
 0x2b2   : > { %10883 = vmatpush1.bf16.msra.mxu1 %v14155_v14  ;;  %10859 = vmatprep.subr.bf16.mxu0 %v14084_v1  ;;  %v14244_v62 = vcombine.high %v1462_v49, %v1466_v51  ;;  %v1518_v13 = vld [vmem:[%s15084_s12 + $0x2548] sm:$0xff]  ;;  %v14243_v52 = vcombine.low %v1462_v49, %v1466_v51 }
 0x2b3   : > { %10884 = vmatprep.subr.bf16.mxu1 %v14148_v40  ;;  %v1522_v63 = vld [vmem:[%s15084_s12 + $0x2568] sm:$0xff] }
 0x2b4   : > { %v1454_v1 = vld [vmem:[%s15084_s12 + $0x2348] sm:$0xff]  ;;  %v14299_v22 = vcombine.low %v1518_v13, %v1522_v63 }
 0x2b5   : > { %10860 = vmatpush2.bf16.msra.mxu0 %v14083_v42  ;;  %v1458_v40 = vld [vmem:[%s15084_s12 + $0x2368] sm:$0xff]  ;;  %v14300_v42 = vcombine.high %v1518_v13, %v1522_v63 }
 0x2b6   : > { %10885 = vmatpush1.bf16.msra.mxu1 %v14147_v15  ;;  %10861 = vmatprep.subr.bf16.mxu0 %v14076_v55  ;;  %v14236_v55 = vcombine.high %v1454_v1, %v1458_v40  ;;  %v1446_v20 = vld [vmem:[%s15084_s12 + $0x2308] sm:$0xff] }
 0x2b7   : > { %10886 = vmatprep.subr.bf16.mxu1 %v14140_v57  ;;  %v1510_v57 = vld [vmem:[%s15084_s12 + $0x2508] sm:$0xff] }
 0x2b8   : > { %v1450_v61 = vld [vmem:[%s15084_s12 + $0x2328] sm:$0xff] }
 0x2b9   : > { %10862 = vmatpush2.bf16.msra.mxu0 %v14075_v31  ;;  %v1506_v35 = vld [vmem:[%s15084_s12 + $0x24e8] sm:$0xff] }
 0x2ba   : > { %10887 = vmatpush1.bf16.msra.mxu1 %v14139_v34  ;;  %10863 = vmatprep.subr.bf16.mxu0 %v14068_v32  ;;  %v14235_v34 = vcombine.low %v1454_v1, %v1458_v40  ;;  %v14228_v32 = vcombine.high %v1446_v20, %v1450_v61  ;;  %v1438_v36 = vld [vmem:[%s15084_s12 + $0x22c8] sm:$0xff] }
 0x2bb   : > { %10888 = vmatprep.subr.bf16.mxu1 %v14132_v33  ;;  %v1502_v33 = vld [vmem:[%s15084_s12 + $0x24c8] sm:$0xff] }
 0x2bc   : > { %v1442_v7 = vld [vmem:[%s15084_s12 + $0x22e8] sm:$0xff]  ;;  %v14283_v51 = vcombine.low %v1502_v33, %v1506_v35 }
 0x2bd   : > { %10864 = vmatpush2.bf16.msra.mxu0 %v14067_v39  ;;  %v14227_v39 = vcombine.low %v1446_v20, %v1450_v61  ;;  %v1498_v10 = vld [vmem:[%s15084_s12 + $0x24a8] sm:$0xff] }
 0x2be   : > { %10889 = vmatpush1.bf16.msra.mxu1 %v14131_v27  ;;  %10915 = vmatprep.subr.bf16.mxu0 %v14316_v44  ;;  %v14284_v27 = vcombine.high %v1502_v33, %v1506_v35  ;;  %v14220_v44 = vcombine.high %v1438_v36, %v1442_v7  ;;  %v1430_v18 = vld [vmem:[%s15084_s12 + $0x2288] sm:$0xff] }
 0x2bf   : > { %10890 = vmatprep.subr.bf16.mxu1 %v14252_v46  ;;  %v1494_v46 = vld [vmem:[%s15084_s12 + $0x2488] sm:$0xff] }
 0x2c0   : > { %v10621_v14 = vpop.f32.mrf.mxu0  ;;  %10866 = vmatmul.mubr.bf16.vlgmr.msra.gmra.mxu0 %v15454_v53  ;;  %v1434_v49 = vld [vmem:[%s15084_s12 + $0x22a8] sm:$0xff]  ;;  %v14275_v1 = vcombine.low %v1494_v46, %v1498_v10 }
 0x2c1   : > { %v15993_v11 = vadd.f32 %v10621_v14, %v15953_v43  ;;  %10916 = vmatpush1.bf16.msra.mxu0 %v14315_v56  ;;  %10947 = vmatprep.mubr.bf16.mxu0 %v15470_v3  ;;  %v1514_v43 = vld [vmem:[%s15084_s12 + $0x2528] sm:$0xff]  ;;  %v14219_v56 = vcombine.low %v1438_v36, %v1442_v7  ;;  %v14211_v40 = vcombine.low %v1430_v18, %v1434_v49 }
 0x2c2   : > { %10891 = vmatpush2.bf16.msra.mxu1 %v14251_v58  ;;  %v10623_v6 = vpop.f32.mrf.mxu0  ;;  %10917 = vmatprep.subr.bf16.mxu0 %v14308_v8  ;;  %v14291_v38 = vcombine.low %v1510_v57, %v1514_v43  ;;  %v14276_v58 = vcombine.high %v1494_v46, %v1498_v10  ;;  %v14212_v8 = vcombine.high %v1430_v18, %v1434_v49  ;;  %v1490_v13 = vld [vmem:[%s15084_s12 + $0x2468] sm:$0xff] }
 0x2c3   : > { %v15997_v15 = vadd.f32 %v10623_v6, %v15956_v29  ;;  %10892 = vmatprep.subr.bf16.mxu1 %v14244_v62  ;;  %v14292_v29 = vcombine.high %v1510_v57, %v1514_v43  ;;  %v1486_v62 = vld [vmem:[%s15084_s12 + $0x2448] sm:$0xff] }
 0x2c4   : > { %v10625_v54 = vpop.f32.mrf.mxu0  ;;  %v1422_v63 = vld [vmem:[%s15084_s12 + $0x2248] sm:$0xff]  ;;  %v14267_v43 = vcombine.low %v1486_v62, %v1490_v13 }
 0x2c5   : > { %10918 = vmatpush1.bf16.msra.mxu0 %v14307_v4  ;;  %v1426_v14 = vld [vmem:[%s15084_s12 + $0x2268] sm:$0xff]  ;;  %v14268_v4 = vcombine.high %v1486_v62, %v1490_v13 }
 0x2c6   : > { %10893 = vmatpush2.bf16.msra.mxu1 %v14243_v52  ;;  %v10626_v31 = vpop.f32.mrf.mxu0  ;;  %10919 = vmatprep.subr.bf16.mxu0 %v14300_v42  ;;  %v14204_v6 = vcombine.high %v1422_v63, %v1426_v14  ;;  %v1478_v52 = vld [vmem:[%s15084_s12 + $0x2408] sm:$0xff]  ;;  %v14203_v54 = vcombine.low %v1422_v63, %v1426_v14 }
 0x2c7   : > { %10894 = vmatprep.subr.bf16.mxu1 %v14236_v55  ;;  %v1482_v42 = vld [vmem:[%s15084_s12 + $0x2428] sm:$0xff] }
 0x2c8   : > { %v1414_v55 = vld [vmem:[%s15084_s12 + $0x2208] sm:$0xff]  ;;  %v14260_v20 = vcombine.high %v1478_v52, %v1482_v42 }
 0x2c9   : > { %10920 = vmatpush1.bf16.msra.mxu0 %v14299_v22  ;;  %v1418_v57 = vld [vmem:[%s15084_s12 + $0x2228] sm:$0xff] }
 0x2ca   : > { %10895 = vmatpush2.bf16.msra.mxu1 %v14235_v34  ;;  %10921 = vmatprep.subr.bf16.mxu0 %v14292_v29  ;;  %v14196_v61 = vcombine.high %v1414_v55, %v1418_v57  ;;  %v1598_v22 = vld [vmem:[%s15084_s12 + $0x27c8] sm:$0xff]  ;;  %v14195_v33 = vcombine.low %v1414_v55, %v1418_v57 }
 0x2cb   : > { %10896 = vmatprep.subr.bf16.mxu1 %v14228_v32  ;;  %v1602_v31 = vld [vmem:[%s15084_s12 + $0x27e8] sm:$0xff]  ;;  %v14259_v32 = vcombine.low %v1478_v52, %v1482_v42 }
 0x2cc   : > { %v1662_v34 = vld [vmem:[%s15084_s12 + $0x29c8] sm:$0xff]  ;;  %v14380_v35 = vcombine.high %v1598_v22, %v1602_v31 }
 0x2cd   : > { %10922 = vmatpush1.bf16.msra.mxu0 %v14291_v38  ;;  %v1666_v29 = vld [vmem:[%s15084_s12 + $0x29e8] sm:$0xff] }
 0x2ce   : > { %10897 = vmatpush2.bf16.msra.mxu1 %v14227_v39  ;;  %10923 = vmatprep.subr.bf16.mxu0 %v14284_v27  ;;  %v14444_v36 = vcombine.high %v1662_v34, %v1666_v29  ;;  %v1590_v7 = vld [vmem:[%s15084_s12 + $0x2788] sm:$0xff]  ;;  %v14443_v46 = vcombine.low %v1662_v34, %v1666_v29 }
 0x2cf   : > { %10898 = vmatprep.subr.bf16.mxu1 %v14220_v44  ;;  %v1594_v38 = vld [vmem:[%s15084_s12 + $0x27a8] sm:$0xff]  ;;  %v14379_v44 = vcombine.low %v1598_v22, %v1602_v31 }
 0x2d0   : > { %v1654_v39 = vld [vmem:[%s15084_s12 + $0x2988] sm:$0xff]  ;;  %v14372_v10 = vcombine.high %v1590_v7, %v1594_v38  ;;  %v14371_v62 = vcombine.low %v1590_v7, %v1594_v38 }
 0x2d1   : > { %10924 = vmatpush1.bf16.msra.mxu0 %v14283_v51  ;;  %v1658_v27 = vld [vmem:[%s15084_s12 + $0x29a8] sm:$0xff] }
 0x2d2   : > { %10899 = vmatpush2.bf16.msra.mxu1 %v14219_v56  ;;  %10925 = vmatprep.subr.bf16.mxu0 %v14276_v58  ;;  %v14436_v18 = vcombine.high %v1654_v39, %v1658_v27  ;;  %v1582_v49 = vld [vmem:[%s15084_s12 + $0x2748] sm:$0xff]  ;;  %v14435_v63 = vcombine.low %v1654_v39, %v1658_v27 }
 0x2d3   : > { %10900 = vmatprep.subr.bf16.mxu1 %v14212_v8  ;;  %v1586_v51 = vld [vmem:[%s15084_s12 + $0x2768] sm:$0xff] }
 0x2d4   : > { %v1646_v56 = vld [vmem:[%s15084_s12 + $0x2948] sm:$0xff]  ;;  %v14364_v14 = vcombine.high %v1582_v49, %v1586_v51  ;;  %v14363_v57 = vcombine.low %v1582_v49, %v1586_v51 }
 0x2d5   : > { %10926 = vmatpush1.bf16.msra.mxu0 %v14275_v1  ;;  %v1650_v58 = vld [vmem:[%s15084_s12 + $0x2968] sm:$0xff] }
 0x2d6   : > { %10901 = vmatpush2.bf16.msra.mxu1 %v14211_v40  ;;  %10927 = vmatprep.subr.bf16.mxu0 %v14268_v4  ;;  %v14428_v40 = vcombine.high %v1646_v56, %v1650_v58  ;;  %v1574_v4 = vld [vmem:[%s15084_s12 + $0x2708] sm:$0xff] }
 0x2d7   : > { %10902 = vmatprep.subr.bf16.mxu1 %v14204_v6  ;;  %v1578_v6 = vld [vmem:[%s15084_s12 + $0x2728] sm:$0xff] }
 0x2d8   : > { %v1642_v42 = vld [vmem:[%s15084_s12 + $0x2928] sm:$0xff]  ;;  %v14355_v29 = vcombine.low %v1574_v4, %v1578_v6 }
 0x2d9   : > { %10928 = vmatpush1.bf16.msra.mxu0 %v14267_v43  ;;  %v14427_v43 = vcombine.low %v1646_v56, %v1650_v58  ;;  %v1566_v22 = vld [vmem:[%s15084_s12 + $0x26c8] sm:$0xff] }
 0x2da   : > { %10903 = vmatpush2.bf16.msra.mxu1 %v14203_v54  ;;  %10929 = vmatprep.subr.bf16.mxu0 %v14260_v20  ;;  %v14356_v54 = vcombine.high %v1574_v4, %v1578_v6  ;;  %v1630_v31 = vld [vmem:[%s15084_s12 + $0x28c8] sm:$0xff] }
 0x2db   : > { %10904 = vmatprep.subr.bf16.mxu1 %v14196_v61  ;;  %v1634_v34 = vld [vmem:[%s15084_s12 + $0x28e8] sm:$0xff] }
 0x2dc   : > { %v1562_v7 = vld [vmem:[%s15084_s12 + $0x26a8] sm:$0xff] }
 0x2dd   : > { %10930 = vmatpush1.bf16.msra.mxu0 %v14259_v32  ;;  %v1622_v38 = vld [vmem:[%s15084_s12 + $0x2888] sm:$0xff] }
 0x2de   : > { %10905 = vmatpush2.bf16.msra.mxu1 %v14195_v33  ;;  %10931 = vmatprep.subr.bf16.mxu0 %v14380_v35  ;;  %v14412_v35 = vcombine.high %v1630_v31, %v1634_v34  ;;  %v1626_v39 = vld [vmem:[%s15084_s12 + $0x28a8] sm:$0xff] }
 0x2df   : > { %10956 = vmatprep.subr.bf16.mxu1 %v14444_v36  ;;  %v1558_v36 = vld [vmem:[%s15084_s12 + $0x2688] sm:$0xff] }
 0x2e0   : > { %v1554_v49 = vld [vmem:[%s15084_s12 + $0x2668] sm:$0xff]  ;;  %v14339_v58 = vcombine.low %v1558_v36, %v1562_v7 }
 0x2e1   : > { %v10662_v8 = vpop.f32.mrf.mxu1  ;;  %10907 = vmatmul.mubr.bf16.vlgmr.msra.gmra.mxu1 %v15539_v2  ;;  %10932 = vmatpush2.bf16.msra.mxu0 %v14379_v44  ;;  %v14411_v44 = vcombine.low %v1630_v31, %v1634_v34  ;;  %v1614_v51 = vld [vmem:[%s15084_s12 + $0x2848] sm:$0xff] }
 0x2e2   : > { %v16033_v13 = vadd.f32 %v10662_v8, %v15993_v11  ;;  %10957 = vmatpush1.bf16.msra.mxu1 %v14443_v46  ;;  %10933 = vmatprep.subr.bf16.mxu0 %v14372_v10  ;;  %v1638_v11 = vld [vmem:[%s15084_s12 + $0x2908] sm:$0xff]  ;;  %v14340_v46 = vcombine.high %v1558_v36, %v1562_v7  ;;  %v14404_v10 = vcombine.high %v1622_v38, %v1626_v39 }
 0x2e3   : > { %v10664_v1 = vpop.f32.mrf.mxu1  ;;  %10958 = vmatprep.subr.bf16.mxu1 %v14436_v18  ;;  %10988 = vmatprep.mubr.bf16.mxu1 %v15557_v24  ;;  %v14420_v61 = vcombine.high %v1638_v11, %v1642_v42  ;;  %v14419_v32 = vcombine.low %v1638_v11, %v1642_v42  ;;  %v1550_v18 = vld [vmem:[%s15084_s12 + $0x2648] sm:$0xff]  ;;  %v14403_v8 = vcombine.low %v1622_v38, %v1626_v39 }
 0x2e4   : > { %v16039_v52 = vadd.f32 %v10664_v1, %v15997_v15  ;;  %v1570_v15 = vld [vmem:[%s15084_s12 + $0x26e8] sm:$0xff]  ;;  %v14331_v6 = vcombine.low %v1550_v18, %v1554_v49 }
 0x2e5   : > { %v10666_v55 = vpop.f32.mrf.mxu1  ;;  %10934 = vmatpush2.bf16.msra.mxu0 %v14371_v62  ;;  %v14348_v33 = vcombine.high %v1566_v22, %v1570_v15  ;;  %v14347_v27 = vcombine.low %v1566_v22, %v1570_v15  ;;  %v1618_v56 = vld [vmem:[%s15084_s12 + $0x2868] sm:$0xff]  ;;  %v14332_v62 = vcombine.high %v1550_v18, %v1554_v49 }
 0x2e6   : > { %10959 = vmatpush1.bf16.msra.mxu1 %v14435_v63  ;;  %10935 = vmatprep.subr.bf16.mxu0 %v14364_v14  ;;  %v14396_v63 = vcombine.high %v1614_v51, %v1618_v56  ;;  %v1542_v14 = vld [vmem:[%s15084_s12 + $0x2608] sm:$0xff]  ;;  %v14395_v11 = vcombine.low %v1614_v51, %v1618_v56 }
 0x2e7   : > { %v10667_v20 = vpop.f32.mrf.mxu1  ;;  %10960 = vmatprep.subr.bf16.mxu1 %v14428_v40  ;;  %v1546_v1 = vld [vmem:[%s15084_s12 + $0x2628] sm:$0xff] }
 0x2e8   : > { %v1606_v40 = vld [vmem:[%s15084_s12 + $0x2808] sm:$0xff]  ;;  %v14324_v42 = vcombine.high %v1542_v14, %v1546_v1 }
 0x2e9   : > { %10936 = vmatpush2.bf16.msra.mxu0 %v14363_v57  ;;  %v1610_v4 = vld [vmem:[%s15084_s12 + $0x2828] sm:$0xff] }
 0x2ea   : > { %10961 = vmatpush1.bf16.msra.mxu1 %v14427_v43  ;;  %10937 = vmatprep.subr.bf16.mxu0 %v14356_v54  ;;  %v14388_v55 = vcombine.high %v1606_v40, %v1610_v4  ;;  %v1790_v57 = vld [vmem:[%s15084_s12 + $0x2dc8] sm:$0xff]  ;;  %v14387_v22 = vcombine.low %v1606_v40, %v1610_v4 }
 0x2eb   : > { %10962 = vmatprep.subr.bf16.mxu1 %v14420_v61  ;;  %v1794_v43 = vld [vmem:[%s15084_s12 + $0x2de8] sm:$0xff]  ;;  %v14323_v61 = vcombine.low %v1542_v14, %v1546_v1 }
 0x2ec   : > { %v1726_v54 = vld [vmem:[%s15084_s12 + $0x2bc8] sm:$0xff]  ;;  %v14572_v15 = vcombine.high %v1790_v57, %v1794_v43 }
 0x2ed   : > { %10938 = vmatpush2.bf16.msra.mxu0 %v14355_v29  ;;  %v1730_v20 = vld [vmem:[%s15084_s12 + $0x2be8] sm:$0xff] }
 0x2ee   : > { %10963 = vmatpush1.bf16.msra.mxu1 %v14419_v32  ;;  %10939 = vmatprep.subr.bf16.mxu0 %v14348_v33  ;;  %v14508_v31 = vcombine.high %v1726_v54, %v1730_v20  ;;  %v1782_v34 = vld [vmem:[%s15084_s12 + $0x2d88] sm:$0xff]  ;;  %v14507_v36 = vcombine.low %v1726_v54, %v1730_v20 }
 0x2ef   : > { %10964 = vmatprep.subr.bf16.mxu1 %v14412_v35  ;;  %v1786_v29 = vld [vmem:[%s15084_s12 + $0x2da8] sm:$0xff]  ;;  %v14571_v35 = vcombine.low %v1790_v57, %v1794_v43 }
 0x2f0   : > { %v1718_v32 = vld [vmem:[%s15084_s12 + $0x2b88] sm:$0xff]  ;;  %v14564_v7 = vcombine.high %v1782_v34, %v1786_v29  ;;  %v14563_v49 = vcombine.low %v1782_v34, %v1786_v29 }
 0x2f1   : > { %10940 = vmatpush2.bf16.msra.mxu0 %v14347_v27  ;;  %v1722_v33 = vld [vmem:[%s15084_s12 + $0x2ba8] sm:$0xff] }
 0x2f2   : > { %10965 = vmatpush1.bf16.msra.mxu1 %v14411_v44  ;;  %10941 = vmatprep.subr.bf16.mxu0 %v14340_v46  ;;  %v14500_v38 = vcombine.high %v1718_v32, %v1722_v33  ;;  %v1774_v39 = vld [vmem:[%s15084_s12 + $0x2d48] sm:$0xff]  ;;  %v14499_v56 = vcombine.low %v1718_v32, %v1722_v33 }
 0x2f3   : > { %10966 = vmatprep.subr.bf16.mxu1 %v14404_v10  ;;  %v1778_v27 = vld [vmem:[%s15084_s12 + $0x2d68] sm:$0xff] }
 0x2f4   : > { %v1710_v46 = vld [vmem:[%s15084_s12 + $0x2b48] sm:$0xff]  ;;  %v14555_v4 = vcombine.low %v1774_v39, %v1778_v27 }
 0x2f5   : > { %10942 = vmatpush2.bf16.msra.mxu0 %v14339_v58  ;;  %v1714_v10 = vld [vmem:[%s15084_s12 + $0x2b68] sm:$0xff]  ;;  %v14556_v58 = vcombine.high %v1774_v39, %v1778_v27 }
 0x2f6   : > { %10967 = vmatpush1.bf16.msra.mxu1 %v14403_v8  ;;  %10943 = vmatprep.subr.bf16.mxu0 %v14332_v62  ;;  %v14492_v62 = vcombine.high %v1710_v46, %v1714_v10  ;;  %v1702_v1 = vld [vmem:[%s15084_s12 + $0x2b08] sm:$0xff] }
 0x2f7   : > { %10968 = vmatprep.subr.bf16.mxu1 %v14396_v63  ;;  %v1766_v63 = vld [vmem:[%s15084_s12 + $0x2d08] sm:$0xff] }
 0x2f8   : > { %v1706_v40 = vld [vmem:[%s15084_s12 + $0x2b28] sm:$0xff] }
 0x2f9   : > { %10944 = vmatpush2.bf16.msra.mxu0 %v14331_v6  ;;  %v1762_v57 = vld [vmem:[%s15084_s12 + $0x2ce8] sm:$0xff] }
 0x2fa   : > { %10969 = vmatpush1.bf16.msra.mxu1 %v14395_v11  ;;  %10945 = vmatprep.subr.bf16.mxu0 %v14324_v42  ;;  %v14491_v11 = vcombine.low %v1710_v46, %v1714_v10  ;;  %v14484_v42 = vcombine.high %v1702_v1, %v1706_v40  ;;  %v1694_v43 = vld [vmem:[%s15084_s12 + $0x2ac8] sm:$0xff] }
 0x2fb   : > { %10970 = vmatprep.subr.bf16.mxu1 %v14388_v55  ;;  %v1758_v55 = vld [vmem:[%s15084_s12 + $0x2cc8] sm:$0xff] }
 0x2fc   : > { %v1698_v54 = vld [vmem:[%s15084_s12 + $0x2ae8] sm:$0xff]  ;;  %v14539_v33 = vcombine.low %v1758_v55, %v1762_v57 }
 0x2fd   : > { %10946 = vmatpush2.bf16.msra.mxu0 %v14323_v61  ;;  %v14483_v61 = vcombine.low %v1702_v1, %v1706_v40  ;;  %v1754_v34 = vld [vmem:[%s15084_s12 + $0x2ca8] sm:$0xff] }
 0x2fe   : > { %10971 = vmatpush1.bf16.msra.mxu1 %v14387_v22  ;;  %10997 = vmatprep.subr.bf16.mxu0 %v14572_v15  ;;  %v14540_v22 = vcombine.high %v1758_v55, %v1762_v57  ;;  %v14476_v15 = vcombine.high %v1694_v43, %v1698_v54  ;;  %v1686_v29 = vld [vmem:[%s15084_s12 + $0x2a88] sm:$0xff] }
 0x2ff   : > { %10972 = vmatprep.subr.bf16.mxu1 %v14508_v31  ;;  %v1750_v31 = vld [vmem:[%s15084_s12 + $0x2c88] sm:$0xff] }
 0x300   : > { %v10703_v44 = vpop.f32.mrf.mxu0  ;;  %10948 = vmatmul.mubr.bf16.vlgmr.msra.gmra.mxu0 %v15548_v12  ;;  %v1690_v32 = vld [vmem:[%s15084_s12 + $0x2aa8] sm:$0xff]  ;;  %v14531_v46 = vcombine.low %v1750_v31, %v1754_v34 }
 0x301   : > { %v16073_v18 = vadd.f32 %v10703_v44, %v16033_v13  ;;  %10998 = vmatpush1.bf16.msra.mxu0 %v14571_v35  ;;  %11029 = vmatprep.mubr.bf16.mxu0 %v15564_v26  ;;  %v1770_v13 = vld [vmem:[%s15084_s12 + $0x2d28] sm:$0xff]  ;;  %v14475_v35 = vcombine.low %v1694_v43, %v1698_v54  ;;  %v14467_v10 = vcombine.low %v1686_v29, %v1690_v32 }
 0x302   : > { %10973 = vmatpush2.bf16.msra.mxu1 %v14507_v36  ;;  %v10705_v51 = vpop.f32.mrf.mxu0  ;;  %10999 = vmatprep.subr.bf16.mxu0 %v14564_v7  ;;  %v14547_v20 = vcombine.low %v1766_v63, %v1770_v13  ;;  %v14532_v36 = vcombine.high %v1750_v31, %v1754_v34  ;;  %v14468_v7 = vcombine.high %v1686_v29, %v1690_v32  ;;  %v1746_v39 = vld [vmem:[%s15084_s12 + $0x2c68] sm:$0xff] }
 0x303   : > { %v16077_v8 = vadd.f32 %v10705_v51, %v16039_v52  ;;  %10974 = vmatprep.subr.bf16.mxu1 %v14500_v38  ;;  %v14548_v52 = vcombine.high %v1766_v63, %v1770_v13  ;;  %v1742_v38 = vld [vmem:[%s15084_s12 + $0x2c48] sm:$0xff] }
 0x304   : > { %v10707_v14 = vpop.f32.mrf.mxu0  ;;  %v1678_v27 = vld [vmem:[%s15084_s12 + $0x2a48] sm:$0xff]  ;;  %v14523_v13 = vcombine.low %v1742_v38, %v1746_v39 }
 0x305   : > { %11000 = vmatpush1.bf16.msra.mxu0 %v14563_v49  ;;  %v1682_v44 = vld [vmem:[%s15084_s12 + $0x2a68] sm:$0xff]  ;;  %v14524_v49 = vcombine.high %v1742_v38, %v1746_v39 }
 0x306   : > { %10975 = vmatpush2.bf16.msra.mxu1 %v14499_v56  ;;  %v10708_v6 = vpop.f32.mrf.mxu0  ;;  %11001 = vmatprep.subr.bf16.mxu0 %v14556_v58  ;;  %v14460_v51 = vcombine.high %v1678_v27, %v1682_v44  ;;  %v1734_v56 = vld [vmem:[%s15084_s12 + $0x2c08] sm:$0xff]  ;;  %v14459_v14 = vcombine.low %v1678_v27, %v1682_v44 }
 0x307   : > { %10976 = vmatprep.subr.bf16.mxu1 %v14492_v62  ;;  %v1738_v58 = vld [vmem:[%s15084_s12 + $0x2c28] sm:$0xff] }
 0x308   : > { %v1670_v62 = vld [vmem:[%s15084_s12 + $0x2a08] sm:$0xff]  ;;  %v14516_v1 = vcombine.high %v1734_v56, %v1738_v58 }
 0x309   : > { %11002 = vmatpush1.bf16.msra.mxu0 %v14555_v4  ;;  %v1674_v63 = vld [vmem:[%s15084_s12 + $0x2a28] sm:$0xff] }
 0x30a   : > { %10977 = vmatpush2.bf16.msra.mxu1 %v14491_v11  ;;  %11003 = vmatprep.subr.bf16.mxu0 %v14548_v52  ;;  %v14452_v40 = vcombine.high %v1670_v62, %v1674_v63  ;;  %v1854_v4 = vld [vmem:[%s15084_s12 + $0x2fc8] sm:$0xff]  ;;  %v14451_v55 = vcombine.low %v1670_v62, %v1674_v63 }
 0x30b   : > { %10978 = vmatprep.subr.bf16.mxu1 %v14484_v42  ;;  %v1858_v6 = vld [vmem:[%s15084_s12 + $0x2fe8] sm:$0xff]  ;;  %v14515_v42 = vcombine.low %v1734_v56, %v1738_v58 }
 0x30c   : > { %v1918_v11 = vld [vmem:[%s15084_s12 + $0x31c8] sm:$0xff]  ;;  %v14636_v57 = vcombine.high %v1854_v4, %v1858_v6 }
 0x30d   : > { %11004 = vmatpush1.bf16.msra.mxu0 %v14547_v20  ;;  %v1922_v52 = vld [vmem:[%s15084_s12 + $0x31e8] sm:$0xff] }
 0x30e   : > { %10979 = vmatpush2.bf16.msra.mxu1 %v14483_v61  ;;  %11005 = vmatprep.subr.bf16.mxu0 %v14540_v22  ;;  %v14700_v43 = vcombine.high %v1918_v11, %v1922_v52  ;;  %v1846_v54 = vld [vmem:[%s15084_s12 + $0x2f88] sm:$0xff]  ;;  %v14699_v31 = vcombine.low %v1918_v11, %v1922_v52 }
 0x30f   : > { %10980 = vmatprep.subr.bf16.mxu1 %v14476_v15  ;;  %v1850_v20 = vld [vmem:[%s15084_s12 + $0x2fa8] sm:$0xff]  ;;  %v14635_v15 = vcombine.low %v1854_v4, %v1858_v6 }
 0x310   : > { %v1910_v61 = vld [vmem:[%s15084_s12 + $0x3188] sm:$0xff]  ;;  %v14628_v34 = vcombine.high %v1846_v54, %v1850_v20  ;;  %v14627_v38 = vcombine.low %v1846_v54, %v1850_v20 }
 0x311   : > { %11006 = vmatpush1.bf16.msra.mxu0 %v14539_v33  ;;  %v1914_v22 = vld [vmem:[%s15084_s12 + $0x31a8] sm:$0xff] }
 0x312   : > { %10981 = vmatpush2.bf16.msra.mxu1 %v14475_v35  ;;  %11007 = vmatprep.subr.bf16.mxu0 %v14532_v36  ;;  %v14692_v29 = vcombine.high %v1910_v61, %v1914_v22  ;;  %v1838_v32 = vld [vmem:[%s15084_s12 + $0x2f48] sm:$0xff]  ;;  %v14691_v27 = vcombine.low %v1910_v61, %v1914_v22 }
 0x313   : > { %10982 = vmatprep.subr.bf16.mxu1 %v14468_v7  ;;  %v1842_v33 = vld [vmem:[%s15084_s12 + $0x2f68] sm:$0xff] }
 0x314   : > { %v1902_v35 = vld [vmem:[%s15084_s12 + $0x3148] sm:$0xff]  ;;  %v14620_v44 = vcombine.high %v1838_v32, %v1842_v33  ;;  %v14619_v63 = vcombine.low %v1838_v32, %v1842_v33 }
 0x315   : > { %11008 = vmatpush1.bf16.msra.mxu0 %v14531_v46  ;;  %v1906_v36 = vld [vmem:[%s15084_s12 + $0x3168] sm:$0xff] }
 0x316   : > { %10983 = vmatpush2.bf16.msra.mxu1 %v14467_v10  ;;  %11009 = vmatprep.subr.bf16.mxu0 %v14524_v49  ;;  %v14684_v10 = vcombine.high %v1902_v35, %v1906_v36  ;;  %v1830_v49 = vld [vmem:[%s15084_s12 + $0x2f08] sm:$0xff] }
 0x317   : > { %10984 = vmatprep.subr.bf16.mxu1 %v14460_v51  ;;  %v1834_v51 = vld [vmem:[%s15084_s12 + $0x2f28] sm:$0xff] }
 0x318   : > { %v1898_v58 = vld [vmem:[%s15084_s12 + $0x3128] sm:$0xff]  ;;  %v14611_v52 = vcombine.low %v1830_v49, %v1834_v51 }
 0x319   : > { %11010 = vmatpush1.bf16.msra.mxu0 %v14523_v13  ;;  %v14683_v13 = vcombine.low %v1902_v35, %v1906_v36  ;;  %v1822_v4 = vld [vmem:[%s15084_s12 + $0x2ec8] sm:$0xff] }
 0x31a   : > { %10985 = vmatpush2.bf16.msra.mxu1 %v14459_v14  ;;  %11011 = vmatprep.subr.bf16.mxu0 %v14516_v1  ;;  %v14612_v14 = vcombine.high %v1830_v49, %v1834_v51  ;;  %v1886_v6 = vld [vmem:[%s15084_s12 + $0x30c8] sm:$0xff] }
 0x31b   : > { %10986 = vmatprep.subr.bf16.mxu1 %v14452_v40  ;;  %v1890_v11 = vld [vmem:[%s15084_s12 + $0x30e8] sm:$0xff] }
 0x31c   : > { %v1818_v54 = vld [vmem:[%s15084_s12 + $0x2ea8] sm:$0xff] }
 0x31d   : > { %11012 = vmatpush1.bf16.msra.mxu0 %v14515_v42  ;;  %v1878_v20 = vld [vmem:[%s15084_s12 + $0x3088] sm:$0xff] }
 0x31e   : > { %10987 = vmatpush2.bf16.msra.mxu1 %v14451_v55  ;;  %11013 = vmatprep.subr.bf16.mxu0 %v14636_v57  ;;  %v14668_v57 = vcombine.high %v1886_v6, %v1890_v11  ;;  %v1882_v61 = vld [vmem:[%s15084_s12 + $0x30a8] sm:$0xff] }
 0x31f   : > { %11038 = vmatprep.subr.bf16.mxu1 %v14700_v43  ;;  %v1814_v43 = vld [vmem:[%s15084_s12 + $0x2e88] sm:$0xff] }
 0x320   : > { %v1810_v32 = vld [vmem:[%s15084_s12 + $0x2e68] sm:$0xff]  ;;  %v14595_v36 = vcombine.low %v1814_v43, %v1818_v54 }
 0x321   : > { %v10744_v7 = vpop.f32.mrf.mxu1  ;;  %10989 = vmatmul.mubr.bf16.vlgmr.msra.gmra.mxu1 %v15635_v45  ;;  %11014 = vmatpush2.bf16.msra.mxu0 %v14635_v15  ;;  %v14667_v15 = vcombine.low %v1886_v6, %v1890_v11  ;;  %v1870_v33 = vld [vmem:[%s15084_s12 + $0x3048] sm:$0xff]  ;;  %v375_v11 = vld [vmem:[%s15084_s12 + $0x190] sm:$0xff] }
 0x322   : > { %v16113_v39 = vadd.f32 %v10744_v7, %v16073_v18  ;;  %11039 = vmatpush1.bf16.msra.mxu1 %v14699_v31  ;;  %11015 = vmatprep.subr.bf16.mxu0 %v14628_v34  ;;  %v1894_v18 = vld [vmem:[%s15084_s12 + $0x3108] sm:$0xff]  ;;  %v14596_v31 = vcombine.high %v1814_v43, %v1818_v54  ;;  %v14660_v34 = vcombine.high %v1878_v20, %v1882_v61 }
 0x323   : > { %v10746_v46 = vpop.f32.mrf.mxu1  ;;  %11040 = vmatprep.subr.bf16.mxu1 %v14692_v29  ;;  %11070 = vmatprep.mubr.bf16.mxu1 %v15021_v25  ;;  %v14676_v40 = vcombine.high %v1894_v18, %v1898_v58  ;;  %v14675_v42 = vcombine.low %v1894_v18, %v1898_v58  ;;  %v1806_v29 = vld [vmem:[%s15084_s12 + $0x2e48] sm:$0xff]  ;;  %v14659_v7 = vcombine.low %v1878_v20, %v1882_v61  ;;  %v367_v61 = vld [vmem:[%s15084_s12 + $0x150] sm:$0xff] }
 0x324   : > { %v16119_v56 = vadd.f32 %v10746_v46, %v16077_v8  ;;  %v1826_v8 = vld [vmem:[%s15084_s12 + $0x2ee8] sm:$0xff]  ;;  %v14587_v51 = vcombine.low %v1806_v29, %v1810_v32 }
 0x325   : > { %v10748_v62 = vpop.f32.mrf.mxu1  ;;  %11016 = vmatpush2.bf16.msra.mxu0 %v14627_v38  ;;  %v14604_v55 = vcombine.high %v1822_v4, %v1826_v8  ;;  %v14603_v22 = vcombine.low %v1822_v4, %v1826_v8  ;;  %v1874_v35 = vld [vmem:[%s15084_s12 + $0x3068] sm:$0xff]  ;;  %v14588_v38 = vcombine.high %v1806_v29, %v1810_v32  ;;  %v14937_v32 = vld [vmem:[%s15079_s8 + $0x60] ss:$0 sps:$4 sm:$0xff]  }
 0x326   : > { %11041 = vmatpush1.bf16.msra.mxu1 %v14691_v27  ;;  %11017 = vmatprep.subr.bf16.mxu0 %v14620_v44  ;;  %v14652_v27 = vcombine.high %v1870_v33, %v1874_v35  ;;  %v1798_v44 = vld [vmem:[%s15084_s12 + $0x2e08] sm:$0xff]  ;;  %v14651_v18 = vcombine.low %v1870_v33, %v1874_v35 }
 0x327   : > { %v10749_v1 = vpop.f32.mrf.mxu1  ;;  %11042 = vmatprep.subr.bf16.mxu1 %v14684_v10  ;;  %v1802_v46 = vld [vmem:[%s15084_s12 + $0x2e28] sm:$0xff] }
 0x328   : > { %v1862_v10 = vld [vmem:[%s15084_s12 + $0x3008] sm:$0xff]  ;;  %v14580_v58 = vcombine.high %v1798_v44, %v1802_v46  ;;  %v515_v1 = vld [vmem:[%s15084_s12 + $0x5f0] sm:$0xff] }
 0x329   : > { %11018 = vmatpush2.bf16.msra.mxu0 %v14619_v63  ;;  %v1866_v49 = vld [vmem:[%s15084_s12 + $0x3028] sm:$0xff]  ;;  %v383_v63 = vld [vmem:[%s15084_s12 + $0x1d0] sm:$0xff] }
 0x32a   : > { %11043 = vmatpush1.bf16.msra.mxu1 %v14683_v13  ;;  %11019 = vmatprep.subr.bf16.mxu0 %v14612_v14  ;;  %v14644_v62 = vcombine.high %v1862_v10, %v1866_v49  ;;  %v387_v13 = vld [vmem:[%s15084_s12 + $0x1f0] sm:$0xff]  ;;  %v14643_v4 = vcombine.low %v1862_v10, %v1866_v49 }
 0x32b   : > { %11044 = vmatprep.subr.bf16.mxu1 %v14676_v40  ;;  %v511_v14 = vld [vmem:[%s15084_s12 + $0x5d0] sm:$0xff]  ;;  %v14579_v40 = vcombine.low %v1798_v44, %v1802_v46  ;;  %v13166_v8 = vcombine.high %v383_v63, %v387_v13 }
 0x32c   : > { %v13294_v6 = vcombine.high %v511_v14, %v515_v1  ;;  %v13293_v43 = vcombine.low %v511_v14, %v515_v1  ;;  %v359_v44 = vld [vmem:[%s15084_s12 + $0x110] sm:$0xff] }
 0x32d   : > { %11020 = vmatpush2.bf16.msra.mxu0 %v14611_v52  ;;  %v379_v52 = vld [vmem:[%s15084_s12 + $0x1b0] sm:$0xff] }
 0x32e   : > { %11045 = vmatpush1.bf16.msra.mxu1 %v14675_v42  ;;  %11021 = vmatprep.subr.bf16.mxu0 %v14604_v55  ;;  %v503_v42 = vld [vmem:[%s15084_s12 + $0x590] sm:$0xff]  ;;  %v13158_v54 = vcombine.high %v375_v11, %v379_v52  ;;  %v13157_v33 = vcombine.low %v375_v11, %v379_v52 }
 0x32f   : > { %11046 = vmatprep.subr.bf16.mxu1 %v14668_v57  ;;  %v507_v55 = vld [vmem:[%s15084_s12 + $0x5b0] sm:$0xff]  ;;  %v13165_v57 = vcombine.low %v383_v63, %v387_v13 }
 0x330   : > { %v13286_v20 = vcombine.high %v503_v42, %v507_v55  ;;  %v487_v10 = vld [vmem:[%s15084_s12 + $0x510] sm:$0xff] }
 0x331   : > { %11022 = vmatpush2.bf16.msra.mxu0 %v14603_v22  ;;  %v371_v22 = vld [vmem:[%s15084_s12 + $0x170] sm:$0xff] }
 0x332   : > { %11047 = vmatpush1.bf16.msra.mxu1 %v14667_v15  ;;  %11023 = vmatprep.subr.bf16.mxu0 %v14596_v31  ;;  %v495_v31 = vld [vmem:[%s15084_s12 + $0x550] sm:$0xff] }
 0x333   : > { %11048 = vmatprep.subr.bf16.mxu1 %v14660_v34  ;;  %v499_v34 = vld [vmem:[%s15084_s12 + $0x570] sm:$0xff] }
 0x334   : > { %v491_v49 = vld [vmem:[%s15084_s12 + $0x530] sm:$0xff] }
 0x335   : > { %11024 = vmatpush2.bf16.msra.mxu0 %v14595_v36  ;;  %v13285_v36 = vcombine.low %v503_v42, %v507_v55  ;;  %v351_v63 = vld [vmem:[%s15084_s12 + $0xd0] sm:$0xff] }
 0x336   : > { %11049 = vmatpush1.bf16.msra.mxu1 %v14659_v7  ;;  %11025 = vmatprep.subr.bf16.mxu0 %v14588_v38  ;;  %v13150_v7 = vcombine.high %v367_v61, %v371_v22  ;;  %v355_v13 = vld [vmem:[%s15084_s12 + $0xf0] sm:$0xff] }
 0x337   : > { %11050 = vmatprep.subr.bf16.mxu1 %v14652_v27  ;;  %v13278_v27 = vcombine.high %v495_v31, %v499_v34  ;;  %v479_v14 = vld [vmem:[%s15084_s12 + $0x4d0] sm:$0xff] }
 0x338   : > { %v483_v1 = vld [vmem:[%s15084_s12 + $0x4f0] sm:$0xff] }
 0x339   : > { %11026 = vmatpush2.bf16.msra.mxu0 %v14587_v51  ;;  %v13149_v51 = vcombine.low %v367_v61, %v371_v22  ;;  %v343_v11 = vld [vmem:[%s15084_s12 + $0x90] sm:$0xff] }
 0x33a   : > { %11051 = vmatpush1.bf16.msra.mxu1 %v14651_v18  ;;  %11027 = vmatprep.subr.bf16.mxu0 %v14580_v58  ;;  %v13277_v18 = vcombine.low %v495_v31, %v499_v34  ;;  %v347_v52 = vld [vmem:[%s15084_s12 + $0xb0] sm:$0xff] }
 0x33b   : > { %11052 = vmatprep.subr.bf16.mxu1 %v14644_v62  ;;  %v13270_v62 = vcombine.high %v487_v10, %v491_v49  ;;  %v471_v42 = vld [vmem:[%s15084_s12 + $0x490] sm:$0xff]  ;;  %v13125_v34 = vcombine.low %v343_v11, %v347_v52 }
 0x33c   : > { %v475_v55 = vld [vmem:[%s15084_s12 + $0x4b0] sm:$0xff] }
 0x33d   : > { %11028 = vmatpush2.bf16.msra.mxu0 %v14579_v40  ;;  %v335_v61 = vld [vmem:[%s15084_s12 + $0x50] sm:$0xff] }
 0x33e   : > { %11053 = vmatpush1.bf16.msra.mxu1 %v14643_v4  ;;  %11079 = vmatprep.subr.bf16.mxu0 %v13166_v8  ;;  %v13269_v4 = vcombine.low %v487_v10, %v491_v49  ;;  %v13134_v8 = vcombine.high %v351_v63, %v355_v13  ;;  %v339_v22 = vld [vmem:[%s15084_s12 + $0x70] sm:$0xff] }
 0x33f   : > { %11120 = vmatprep.subr.bf16.mxu1 %v13294_v6  ;;  %v13262_v6 = vcombine.high %v479_v14, %v483_v1  ;;  %v467_v31 = vld [vmem:[%s15084_s12 + $0x470] sm:$0xff] }
 0x340   : > { %v10785_v15 = vpop.f32.mrf.mxu0  ;;  %11030 = vmatmul.mubr.bf16.vlgmr.msra.gmra.mxu0 %v15641_v47 }
 0x341   : > { %v16153_v29 = vadd.f32 %v10785_v15, %v16113_v39  ;;  %11071 = vmatmul.mubr.bf16.vlgmr.msra.gmra.mxu1 %v14937_v32  ;;  %11080 = vmatpush1.bf16.msra.mxu0 %v13165_v57  ;;  %v363_v39 = vld [vmem:[%s15084_s12 + $0x130] sm:$0xff]  ;;  %v13133_v57 = vcombine.low %v351_v63, %v355_v13  ;;  %v13253_v32 = vcombine.low %v471_v42, %v475_v55 }
 0x342   : > { %11121 = vmatpush1.bf16.msra.mxu1 %v13293_v43  ;;  %v10787_v35 = vpop.f32.mrf.mxu0  ;;  %11081 = vmatprep.subr.bf16.mxu0 %v13158_v54  ;;  %v13142_v58 = vcombine.high %v359_v44, %v363_v39  ;;  %v13141_v40 = vcombine.low %v359_v44, %v363_v39  ;;  %v13261_v43 = vcombine.low %v479_v14, %v483_v1  ;;  %v463_v15 = vld [vmem:[%s15084_s12 + $0x450] sm:$0xff] }
 0x343   : > { %v16157_v38 = vadd.f32 %v10787_v35, %v16119_v56  ;;  %11122 = vmatprep.subr.bf16.mxu1 %v13286_v20  ;;  %11111 = vmatprep.mubr.bf16.mxu0 %v15125_v59  ;;  %v13126_v54 = vcombine.high %v343_v11, %v347_v52  ;;  %v13254_v20 = vcombine.high %v471_v42, %v475_v55  ;;  %v459_v44 = vld [vmem:[%s15084_s12 + $0x430] sm:$0xff] }
 0x344   : > { %v10789_v46 = vpop.f32.mrf.mxu0  ;;  %11152 = vmatprep.mubr.bf16.mxu1 %v15129_v60  ;;  %v13246_v35 = vcombine.high %v463_v15, %v467_v31  ;;  %v13117_v39 = vcombine.low %v335_v61, %v339_v22  ;;  %v439_v1 = vld [vmem:[%s15084_s12 + $0x390] sm:$0xff] }
 0x345   : > { %11082 = vmatpush1.bf16.msra.mxu0 %v13157_v33  ;;  %v13118_v33 = vcombine.high %v335_v61, %v339_v22  ;;  %v13245_v46 = vcombine.low %v463_v15, %v467_v31  ;;  %v431_v55 = vld [vmem:[%s15084_s12 + $0x350] sm:$0xff] }
 0x346   : > { %11123 = vmatpush1.bf16.msra.mxu1 %v13285_v36  ;;  %v10790_v56 = vpop.f32.mrf.mxu0  ;;  %11083 = vmatprep.subr.bf16.mxu0 %v13150_v7  ;;  %v327_v36 = vld [vmem:[%s15084_s12 + $0x10] sm:$0xff] }
 0x347   : > { %11124 = vmatprep.subr.bf16.mxu1 %v13278_v27  ;;  %v331_v7 = vld [vmem:[%s15084_s12 + $0x30] sm:$0xff] }
 0x348   : > { %v455_v27 = vld [vmem:[%s15084_s12 + $0x410] sm:$0xff]  ;;  %v13110_v10 = vcombine.high %v327_v36, %v331_v7 }
 0x349   : > { %11084 = vmatpush1.bf16.msra.mxu0 %v13149_v51  ;;  %v13238_v49 = vcombine.high %v455_v27, %v459_v44  ;;  %v447_v51 = vld [vmem:[%s15084_s12 + $0x3d0] sm:$0xff]  ;;  %v13237_v63 = vcombine.low %v455_v27, %v459_v44 }
 0x34a   : > { %11125 = vmatpush1.bf16.msra.mxu1 %v13277_v18  ;;  %11085 = vmatprep.subr.bf16.mxu0 %v13142_v58  ;;  %v451_v56 = vld [vmem:[%s15084_s12 + $0x3f0] sm:$0xff] }
 0x34b   : > { %11126 = vmatprep.subr.bf16.mxu1 %v13270_v62  ;;  %v575_v18 = vld [vmem:[%s15084_s12 + $0x7d0] sm:$0xff]  ;;  %v13109_v62 = vcombine.low %v327_v36, %v331_v7  ;;  %v13230_v13 = vcombine.high %v447_v51, %v451_v56 }
 0x34c   : > { %v579_v58 = vld [vmem:[%s15084_s12 + $0x7f0] sm:$0xff] }
 0x34d   : > { %11086 = vmatpush1.bf16.msra.mxu0 %v13141_v40  ;;  %v13358_v14 = vcombine.high %v575_v18, %v579_v58  ;;  %v443_v40 = vld [vmem:[%s15084_s12 + $0x3b0] sm:$0xff]  ;;  %v13357_v11 = vcombine.low %v575_v18, %v579_v58 }
 0x34e   : > { %11127 = vmatpush1.bf16.msra.mxu1 %v13269_v4  ;;  %11087 = vmatprep.subr.bf16.mxu0 %v13134_v8  ;;  %v567_v4 = vld [vmem:[%s15084_s12 + $0x790] sm:$0xff]  ;;  %v13222_v52 = vcombine.high %v439_v1, %v443_v40  ;;  %v13221_v61 = vcombine.low %v439_v1, %v443_v40 }
 0x34f   : > { %11128 = vmatprep.subr.bf16.mxu1 %v13262_v6  ;;  %v571_v8 = vld [vmem:[%s15084_s12 + $0x7b0] sm:$0xff]  ;;  %v13229_v6 = vcombine.low %v447_v51, %v451_v56 }
 0x350   : > { %v13350_v42 = vcombine.high %v567_v4, %v571_v8  ;;  %v13349_v15 = vcombine.low %v567_v4, %v571_v8  ;;  %v551_v7 = vld [vmem:[%s15084_s12 + $0x710] sm:$0xff] }
 0x351   : > { %11088 = vmatpush1.bf16.msra.mxu0 %v13133_v57  ;;  %v435_v57 = vld [vmem:[%s15084_s12 + $0x370] sm:$0xff] }
 0x352   : > { %11129 = vmatpush1.bf16.msra.mxu1 %v13261_v43  ;;  %11089 = vmatprep.subr.bf16.mxu0 %v13126_v54  ;;  %v559_v43 = vld [vmem:[%s15084_s12 + $0x750] sm:$0xff]  ;;  %v13214_v31 = vcombine.high %v431_v55, %v435_v57  ;;  %v13213_v44 = vcombine.low %v431_v55, %v435_v57 }
 0x353   : > { %11130 = vmatprep.subr.bf16.mxu1 %v13254_v20  ;;  %v563_v54 = vld [vmem:[%s15084_s12 + $0x770] sm:$0xff] }
 0x354   : > { %v555_v27 = vld [vmem:[%s15084_s12 + $0x730] sm:$0xff] }
 0x355   : > { %11090 = vmatpush1.bf16.msra.mxu0 %v13125_v34  ;;  %v415_v51 = vld [vmem:[%s15084_s12 + $0x2d0] sm:$0xff] }
 0x356   : > { %11131 = vmatpush1.bf16.msra.mxu1 %v13253_v32  ;;  %11091 = vmatprep.subr.bf16.mxu0 %v13118_v33  ;;  %v13342_v32 = vcombine.high %v559_v43, %v563_v54  ;;  %v423_v33 = vld [vmem:[%s15084_s12 + $0x310] sm:$0xff] }
 0x357   : > { %11132 = vmatprep.subr.bf16.mxu1 %v13246_v35  ;;  %v427_v35 = vld [vmem:[%s15084_s12 + $0x330] sm:$0xff] }
 0x358   : > { %v543_v56 = vld [vmem:[%s15084_s12 + $0x6d0] sm:$0xff]  ;;  %v13205_v58 = vcombine.low %v423_v33, %v427_v35 }
 0x359   : > { %11092 = vmatpush1.bf16.msra.mxu0 %v13117_v39  ;;  %v13341_v39 = vcombine.low %v559_v43, %v563_v54  ;;  %v547_v18 = vld [vmem:[%s15084_s12 + $0x6f0] sm:$0xff] }
 0x35a   : > { %11133 = vmatpush1.bf16.msra.mxu1 %v13245_v46  ;;  %11093 = vmatprep.subr.bf16.mxu0 %v13110_v10  ;;  %v13206_v46 = vcombine.high %v423_v33, %v427_v35  ;;  %v411_v1 = vld [vmem:[%s15084_s12 + $0x2b0] sm:$0xff] }
 0x35b   : > { %11134 = vmatprep.subr.bf16.mxu1 %v13238_v49  ;;  %v13334_v49 = vcombine.high %v551_v7, %v555_v27  ;;  %v535_v40 = vld [vmem:[%s15084_s12 + $0x690] sm:$0xff] }
 0x35c   : > { %v539_v4 = vld [vmem:[%s15084_s12 + $0x6b0] sm:$0xff] }
 0x35d   : > { %11094 = vmatpush1.bf16.msra.mxu0 %v13109_v62  ;;  %v13333_v62 = vcombine.low %v551_v7, %v555_v27  ;;  %v403_v55 = vld [vmem:[%s15084_s12 + $0x270] sm:$0xff] }
 0x35e   : > { %11135 = vmatpush1.bf16.msra.mxu1 %v13237_v63  ;;  %11095 = vmatprep.subr.bf16.mxu0 %v13230_v13  ;;  %v13326_v13 = vcombine.high %v543_v56, %v547_v18  ;;  %v527_v57 = vld [vmem:[%s15084_s12 + $0x650] sm:$0xff] }
 0x35f   : > { %11136 = vmatprep.subr.bf16.mxu1 %v13358_v14  ;;  %v407_v14 = vld [vmem:[%s15084_s12 + $0x290] sm:$0xff] }
 0x360   : > { %v531_v43 = vld [vmem:[%s15084_s12 + $0x670] sm:$0xff]  ;;  %v13189_v54 = vcombine.low %v407_v14, %v411_v1 }
 0x361   : > { %v10826_v20 = vpop.f32.mrf.mxu1  ;;  %11096 = vmatpush2.bf16.msra.mxu0 %v13229_v6  ;;  %v13325_v6 = vcombine.low %v543_v56, %v547_v18  ;;  %v523_v33 = vld [vmem:[%s15084_s12 + $0x630] sm:$0xff]  ;;  %v13309_v7 = vcombine.low %v527_v57, %v531_v43 }
 0x362   : > { %v16194_v22 = vadd.f32 %v10826_v20, %v16153_v29  ;;  %11137 = vmatpush2.bf16.msra.mxu1 %v13357_v11  ;;  %11097 = vmatprep.subr.bf16.mxu0 %v13222_v52  ;;  %v13190_v11 = vcombine.high %v407_v14, %v411_v1  ;;  %v13318_v52 = vcombine.high %v535_v40, %v539_v4  ;;  %v631_v18 = vld [vmem:[%s15084_s12 + $0x990] sm:$0xff] }
 0x363   : > { %v10828_v34 = vpop.f32.mrf.mxu1  ;;  %11138 = vmatprep.subr.bf16.mxu1 %v13350_v42  ;;  %v399_v42 = vld [vmem:[%s15084_s12 + $0x250] sm:$0xff]  ;;  %v13317_v20 = vcombine.low %v535_v40, %v539_v4 }
 0x364   : > { %v16199_v36 = vadd.f32 %v10828_v34, %v16157_v38  ;;  %v419_v38 = vld [vmem:[%s15084_s12 + $0x2f0] sm:$0xff]  ;;  %v13181_v35 = vcombine.low %v399_v42, %v403_v55 }
 0x365   : > { %v10830_v29 = vpop.f32.mrf.mxu1  ;;  %11098 = vmatpush2.bf16.msra.mxu0 %v13221_v61  ;;  %v13198_v63 = vcombine.high %v415_v51, %v419_v38  ;;  %v13197_v8 = vcombine.low %v415_v51, %v419_v38  ;;  %v13182_v61 = vcombine.high %v399_v42, %v403_v55  ;;  %v395_v34 = vld [vmem:[%s15084_s12 + $0x230] sm:$0xff] }
 0x366   : > { %11139 = vmatpush2.bf16.msra.mxu1 %v13349_v15  ;;  %11099 = vmatprep.subr.bf16.mxu0 %v13214_v31  ;;  %v13310_v15 = vcombine.high %v527_v57, %v531_v43  ;;  %v391_v31 = vld [vmem:[%s15084_s12 + $0x210] sm:$0xff] }
 0x367   : > { %v10831_v10 = vpop.f32.mrf.mxu1  ;;  %11140 = vmatprep.subr.bf16.mxu1 %v13342_v32  ;;  %v519_v32 = vld [vmem:[%s15084_s12 + $0x610] sm:$0xff]  ;;  %v13174_v27 = vcombine.high %v391_v31, %v395_v34 }
 0x368   : > { %v13302_v29 = vcombine.high %v519_v32, %v523_v33  ;;  %v771_v10 = vld [vmem:[%s15084_s12 + $0xdf0] sm:$0xff]  ;;  %v13301_v51 = vcombine.low %v519_v32, %v523_v33 }
 0x369   : > { %11100 = vmatpush2.bf16.msra.mxu0 %v13213_v44  ;;  %v639_v44 = vld [vmem:[%s15084_s12 + $0x9d0] sm:$0xff] }
 0x36a   : > { %11141 = vmatpush2.bf16.msra.mxu1 %v13341_v39  ;;  %11101 = vmatprep.subr.bf16.mxu0 %v13206_v46  ;;  %v643_v39 = vld [vmem:[%s15084_s12 + $0x9f0] sm:$0xff] }
 0x36b   : > { %11142 = vmatprep.subr.bf16.mxu1 %v13334_v49  ;;  %v767_v46 = vld [vmem:[%s15084_s12 + $0xdd0] sm:$0xff]  ;;  %v13173_v49 = vcombine.low %v391_v31, %v395_v34  ;;  %v13422_v38 = vcombine.high %v639_v44, %v643_v39 }
 0x36c   : > { %v13550_v56 = vcombine.high %v767_v46, %v771_v10  ;;  %v13549_v14 = vcombine.low %v767_v46, %v771_v10  ;;  %v623_v4 = vld [vmem:[%s15084_s12 + $0x950] sm:$0xff] }
 0x36d   : > { %11102 = vmatpush2.bf16.msra.mxu0 %v13205_v58  ;;  %v635_v58 = vld [vmem:[%s15084_s12 + $0x9b0] sm:$0xff] }
 0x36e   : > { %11143 = vmatpush2.bf16.msra.mxu1 %v13333_v62  ;;  %11103 = vmatprep.subr.bf16.mxu0 %v13198_v63  ;;  %v759_v62 = vld [vmem:[%s15084_s12 + $0xd90] sm:$0xff]  ;;  %v13414_v1 = vcombine.high %v631_v18, %v635_v58  ;;  %v13413_v55 = vcombine.low %v631_v18, %v635_v58 }
 0x36f   : > { %11144 = vmatprep.subr.bf16.mxu1 %v13326_v13  ;;  %v763_v63 = vld [vmem:[%s15084_s12 + $0xdb0] sm:$0xff]  ;;  %v13421_v13 = vcombine.low %v639_v44, %v643_v39 }
 0x370   : > { %v13542_v40 = vcombine.high %v759_v62, %v763_v63  ;;  %v13541_v43 = vcombine.low %v759_v62, %v763_v63  ;;  %v743_v34 = vld [vmem:[%s15084_s12 + $0xd10] sm:$0xff] }
 0x371   : > { %11104 = vmatpush2.bf16.msra.mxu0 %v13197_v8  ;;  %v627_v8 = vld [vmem:[%s15084_s12 + $0x970] sm:$0xff] }
 0x372   : > { %11145 = vmatpush2.bf16.msra.mxu1 %v13325_v6  ;;  %11105 = vmatprep.subr.bf16.mxu0 %v13190_v11  ;;  %v751_v11 = vld [vmem:[%s15084_s12 + $0xd50] sm:$0xff]  ;;  %v13405_v33 = vcombine.low %v623_v4, %v627_v8 }
 0x373   : > { %11146 = vmatprep.subr.bf16.mxu1 %v13318_v52  ;;  %v755_v52 = vld [vmem:[%s15084_s12 + $0xd70] sm:$0xff] }
 0x374   : > { %v747_v32 = vld [vmem:[%s15084_s12 + $0xd30] sm:$0xff] }
 0x375   : > { %11106 = vmatpush2.bf16.msra.mxu0 %v13189_v54  ;;  %v13406_v54 = vcombine.high %v623_v4, %v627_v8  ;;  %v611_v44 = vld [vmem:[%s15084_s12 + $0x8f0] sm:$0xff] }
 0x376   : > { %11147 = vmatpush2.bf16.msra.mxu1 %v13317_v20  ;;  %11107 = vmatprep.subr.bf16.mxu0 %v13182_v61  ;;  %v13534_v61 = vcombine.high %v751_v11, %v755_v52  ;;  %v735_v39 = vld [vmem:[%s15084_s12 + $0xcd0] sm:$0xff] }
 0x377   : > { %11148 = vmatprep.subr.bf16.mxu1 %v13310_v15  ;;  %v615_v15 = vld [vmem:[%s15084_s12 + $0x910] sm:$0xff] }
 0x378   : > { %v739_v46 = vld [vmem:[%s15084_s12 + $0xcf0] sm:$0xff] }
 0x379   : > { %11108 = vmatpush2.bf16.msra.mxu0 %v13181_v35  ;;  %v13533_v35 = vcombine.low %v751_v11, %v755_v52  ;;  %v603_v18 = vld [vmem:[%s15084_s12 + $0x8b0] sm:$0xff] }
 0x37a   : > { %11149 = vmatpush2.bf16.msra.mxu1 %v13309_v7  ;;  %11109 = vmatprep.subr.bf16.mxu0 %v13174_v27  ;;  %v13526_v27 = vcombine.high %v743_v34, %v747_v32  ;;  %v727_v58 = vld [vmem:[%s15084_s12 + $0xc90] sm:$0xff] }
 0x37b   : > { %11150 = vmatprep.subr.bf16.mxu1 %v13302_v29  ;;  %v607_v29 = vld [vmem:[%s15084_s12 + $0x8d0] sm:$0xff] }
 0x37c   : > { %v731_v62 = vld [vmem:[%s15084_s12 + $0xcb0] sm:$0xff]  ;;  %v13389_v63 = vcombine.low %v607_v29, %v611_v44 }
 0x37d   : > { %11110 = vmatpush2.bf16.msra.mxu0 %v13173_v49  ;;  %v13525_v49 = vcombine.low %v743_v34, %v747_v32  ;;  %v595_v4 = vld [vmem:[%s15084_s12 + $0x870] sm:$0xff]  ;;  %v13509_v52 = vcombine.low %v727_v58, %v731_v62 }
 0x37e   : > { %11151 = vmatpush2.bf16.msra.mxu1 %v13301_v51  ;;  %11161 = vmatprep.subr.bf16.mxu0 %v13422_v38  ;;  %v13390_v51 = vcombine.high %v607_v29, %v611_v44  ;;  %v13518_v38 = vcombine.high %v735_v39, %v739_v46  ;;  %v719_v8 = vld [vmem:[%s15084_s12 + $0xc50] sm:$0xff] }
 0x37f   : > { %11202 = vmatprep.subr.bf16.mxu1 %v13550_v56  ;;  %v599_v56 = vld [vmem:[%s15084_s12 + $0x890] sm:$0xff] }
 0x380   : > { %v10867_v6 = vpop.f32.mrf.mxu0  ;;  %11112 = vmatmul.mubr.bf16.vlgmr.msra.gmra.mxu0 %v15175_v17  ;;  %v13381_v11 = vcombine.low %v599_v56, %v603_v18 }
 0x381   : > { %v16233_v42 = vadd.f32 %v10867_v6, %v16194_v22  ;;  %11153 = vmatmul.mubr.bf16.vlgmr.msra.gmra.mxu1 %v15184_v21  ;;  %11162 = vmatpush1.bf16.msra.mxu0 %v13421_v13  ;;  %v619_v22 = vld [vmem:[%s15084_s12 + $0x930] sm:$0xff]  ;;  %v13517_v13 = vcombine.low %v735_v39, %v739_v46 }
 0x382   : > { %11203 = vmatpush1.bf16.msra.mxu1 %v13549_v14  ;;  %v10869_v57 = vpop.f32.mrf.mxu0  ;;  %11163 = vmatprep.subr.bf16.mxu0 %v13414_v1  ;;  %v13398_v7 = vcombine.high %v615_v15, %v619_v22  ;;  %v13397_v10 = vcombine.low %v615_v15, %v619_v22  ;;  %v13382_v14 = vcombine.high %v599_v56, %v603_v18  ;;  %v723_v6 = vld [vmem:[%s15084_s12 + $0xc70] sm:$0xff] }
 0x383   : > { %v16237_v20 = vadd.f32 %v10869_v57, %v16199_v36  ;;  %11204 = vmatprep.subr.bf16.mxu1 %v13542_v40  ;;  %11193 = vmatprep.mubr.bf16.mxu0 %v15193_v28  ;;  %v13510_v1 = vcombine.high %v727_v58, %v731_v62  ;;  %v591_v40 = vld [vmem:[%s15084_s12 + $0x850] sm:$0xff]  ;;  %v13502_v57 = vcombine.high %v719_v8, %v723_v6 }
 0x384   : > { %v10871_v31 = vpop.f32.mrf.mxu0  ;;  %11234 = vmatprep.mubr.bf16.mxu1 %v15200_v30  ;;  %v715_v15 = vld [vmem:[%s15084_s12 + $0xc30] sm:$0xff]  ;;  %v13373_v22 = vcombine.low %v591_v40, %v595_v4 }
 0x385   : > { %11164 = vmatpush1.bf16.msra.mxu0 %v13413_v55  ;;  %v13374_v55 = vcombine.high %v591_v40, %v595_v4  ;;  %v13501_v31 = vcombine.low %v719_v8, %v723_v6  ;;  %v695_v46 = vld [vmem:[%s15084_s12 + $0xb90] sm:$0xff] }
 0x386   : > { %11205 = vmatpush1.bf16.msra.mxu1 %v13541_v43  ;;  %v10872_v36 = vpop.f32.mrf.mxu0  ;;  %11165 = vmatprep.subr.bf16.mxu0 %v13406_v54  ;;  %v583_v43 = vld [vmem:[%s15084_s12 + $0x810] sm:$0xff] }
 0x387   : > { %11206 = vmatprep.subr.bf16.mxu1 %v13534_v61  ;;  %v587_v54 = vld [vmem:[%s15084_s12 + $0x830] sm:$0xff] }
 0x388   : > { %v711_v61 = vld [vmem:[%s15084_s12 + $0xc10] sm:$0xff]  ;;  %v13366_v34 = vcombine.high %v583_v43, %v587_v54 }
 0x389   : > { %11166 = vmatpush1.bf16.msra.mxu0 %v13405_v33  ;;  %v13494_v32 = vcombine.high %v711_v61, %v715_v15  ;;  %v703_v33 = vld [vmem:[%s15084_s12 + $0xbd0] sm:$0xff]  ;;  %v13493_v29 = vcombine.low %v711_v61, %v715_v15 }
 0x38a   : > { %11207 = vmatpush1.bf16.msra.mxu1 %v13533_v35  ;;  %11167 = vmatprep.subr.bf16.mxu0 %v13398_v7  ;;  %v707_v36 = vld [vmem:[%s15084_s12 + $0xbf0] sm:$0xff] }
 0x38b   : > { %11208 = vmatprep.subr.bf16.mxu1 %v13526_v27  ;;  %v831_v35 = vld [vmem:[%s15084_s12 + $0xfd0] sm:$0xff]  ;;  %v13365_v27 = vcombine.low %v583_v43, %v587_v54  ;;  %v13486_v44 = vcombine.high %v703_v33, %v707_v36 }
 0x38c   : > { %v835_v7 = vld [vmem:[%s15084_s12 + $0xff0] sm:$0xff] }
 0x38d   : > { %11168 = vmatpush1.bf16.msra.mxu0 %v13397_v10  ;;  %v13614_v39 = vcombine.high %v831_v35, %v835_v7  ;;  %v699_v10 = vld [vmem:[%s15084_s12 + $0xbb0] sm:$0xff]  ;;  %v13613_v56 = vcombine.low %v831_v35, %v835_v7 }
 0x38e   : > { %11209 = vmatpush1.bf16.msra.mxu1 %v13525_v49  ;;  %11169 = vmatprep.subr.bf16.mxu0 %v13390_v51  ;;  %v823_v49 = vld [vmem:[%s15084_s12 + $0xf90] sm:$0xff]  ;;  %v13478_v18 = vcombine.high %v695_v46, %v699_v10  ;;  %v13477_v40 = vcombine.low %v695_v46, %v699_v10 }
 0x38f   : > { %11210 = vmatprep.subr.bf16.mxu1 %v13518_v38  ;;  %v827_v51 = vld [vmem:[%s15084_s12 + $0xfb0] sm:$0xff]  ;;  %v13485_v38 = vcombine.low %v703_v33, %v707_v36 }
 0x390   : > { %v13606_v58 = vcombine.high %v823_v49, %v827_v51  ;;  %v687_v62 = vld [vmem:[%s15084_s12 + $0xb50] sm:$0xff]  ;;  %v13605_v8 = vcombine.low %v823_v49, %v827_v51 }
 0x391   : > { %11170 = vmatpush1.bf16.msra.mxu0 %v13389_v63  ;;  %v691_v63 = vld [vmem:[%s15084_s12 + $0xb70] sm:$0xff] }
 0x392   : > { %11211 = vmatpush1.bf16.msra.mxu1 %v13517_v13  ;;  %11171 = vmatprep.subr.bf16.mxu0 %v13382_v14  ;;  %v815_v13 = vld [vmem:[%s15084_s12 + $0xf50] sm:$0xff]  ;;  %v13470_v6 = vcombine.high %v687_v62, %v691_v63  ;;  %v13469_v15 = vcombine.low %v687_v62, %v691_v63 }
 0x393   : > { %11212 = vmatprep.subr.bf16.mxu1 %v13510_v1  ;;  %v819_v14 = vld [vmem:[%s15084_s12 + $0xf70] sm:$0xff] }
 0x394   : > { %v807_v54 = vld [vmem:[%s15084_s12 + $0xf10] sm:$0xff] }
 0x395   : > { %11172 = vmatpush1.bf16.msra.mxu0 %v13381_v11  ;;  %v811_v61 = vld [vmem:[%s15084_s12 + $0xf30] sm:$0xff] }
 0x396   : > { %11213 = vmatpush1.bf16.msra.mxu1 %v13509_v52  ;;  %11173 = vmatprep.subr.bf16.mxu0 %v13374_v55  ;;  %v13598_v52 = vcombine.high %v815_v13, %v819_v14  ;;  %v679_v55 = vld [vmem:[%s15084_s12 + $0xb10] sm:$0xff] }
 0x397   : > { %11214 = vmatprep.subr.bf16.mxu1 %v13502_v57  ;;  %v683_v57 = vld [vmem:[%s15084_s12 + $0xb30] sm:$0xff] }
 0x398   : > { %v671_v33 = vld [vmem:[%s15084_s12 + $0xad0] sm:$0xff]  ;;  %v13461_v7 = vcombine.low %v679_v55, %v683_v57 }
 0x399   : > { %11174 = vmatpush1.bf16.msra.mxu0 %v13373_v22  ;;  %v13597_v22 = vcombine.low %v815_v13, %v819_v14  ;;  %v799_v36 = vld [vmem:[%s15084_s12 + $0xed0] sm:$0xff] }
 0x39a   : > { %11215 = vmatpush1.bf16.msra.mxu1 %v13501_v31  ;;  %11175 = vmatprep.subr.bf16.mxu0 %v13366_v34  ;;  %v13462_v31 = vcombine.high %v679_v55, %v683_v57  ;;  %v803_v35 = vld [vmem:[%s15084_s12 + $0xef0] sm:$0xff] }
 0x39b   : > { %11216 = vmatprep.subr.bf16.mxu1 %v13494_v32  ;;  %v13590_v32 = vcombine.high %v807_v54, %v811_v61  ;;  %v667_v46 = vld [vmem:[%s15084_s12 + $0xab0] sm:$0xff] }
 0x39c   : > { %v791_v10 = vld [vmem:[%s15084_s12 + $0xe90] sm:$0xff] }
 0x39d   : > { %11176 = vmatpush1.bf16.msra.mxu0 %v13365_v27  ;;  %v13589_v27 = vcombine.low %v807_v54, %v811_v61  ;;  %v795_v49 = vld [vmem:[%s15084_s12 + $0xeb0] sm:$0xff] }
 0x39e   : > { %11217 = vmatpush1.bf16.msra.mxu1 %v13493_v29  ;;  %11177 = vmatprep.subr.bf16.mxu0 %v13486_v44  ;;  %v13582_v44 = vcombine.high %v799_v36, %v803_v35  ;;  %v659_v62 = vld [vmem:[%s15084_s12 + $0xa70] sm:$0xff] }
 0x39f   : > { %11218 = vmatprep.subr.bf16.mxu1 %v13614_v39  ;;  %v663_v39 = vld [vmem:[%s15084_s12 + $0xa90] sm:$0xff] }
 0x3a0   : > { %v783_v63 = vld [vmem:[%s15084_s12 + $0xe50] sm:$0xff]  ;;  %v13445_v14 = vcombine.low %v663_v39, %v667_v46 }
 0x3a1   : > { %v10908_v1 = vpop.f32.mrf.mxu1  ;;  %11178 = vmatpush2.bf16.msra.mxu0 %v13485_v38  ;;  %v13581_v38 = vcombine.low %v799_v36, %v803_v35  ;;  %v787_v13 = vld [vmem:[%s15084_s12 + $0xe70] sm:$0xff] }
 0x3a2   : > { %v16274_v4 = vadd.f32 %v10908_v1, %v16233_v42  ;;  %11219 = vmatpush2.bf16.msra.mxu1 %v13613_v56  ;;  %11179 = vmatprep.subr.bf16.mxu0 %v13478_v18  ;;  %v13446_v56 = vcombine.high %v663_v39, %v667_v46  ;;  %v13574_v18 = vcombine.high %v791_v10, %v795_v49  ;;  %v779_v55 = vld [vmem:[%s15084_s12 + $0xe30] sm:$0xff] }
 0x3a3   : > { %v10910_v11 = vpop.f32.mrf.mxu1  ;;  %11220 = vmatprep.subr.bf16.mxu1 %v13606_v58  ;;  %v655_v58 = vld [vmem:[%s15084_s12 + $0xa50] sm:$0xff]  ;;  %v13573_v1 = vcombine.low %v791_v10, %v795_v49  ;;  %v13565_v54 = vcombine.low %v783_v63, %v787_v13 }
 0x3a4   : > { %v16279_v43 = vadd.f32 %v10910_v11, %v16237_v20  ;;  %v675_v20 = vld [vmem:[%s15084_s12 + $0xaf0] sm:$0xff]  ;;  %v13437_v57 = vcombine.low %v655_v58, %v659_v62 }
 0x3a5   : > { %v10912_v42 = vpop.f32.mrf.mxu1  ;;  %11180 = vmatpush2.bf16.msra.mxu0 %v13477_v40  ;;  %v13454_v29 = vcombine.high %v671_v33, %v675_v20  ;;  %v13453_v51 = vcombine.low %v671_v33, %v675_v20  ;;  %v13438_v40 = vcombine.high %v655_v58, %v659_v62  ;;  %v651_v11 = vld [vmem:[%s15084_s12 + $0xa30] sm:$0xff] }
 0x3a6   : > { %11221 = vmatpush2.bf16.msra.mxu1 %v13605_v8  ;;  %11181 = vmatprep.subr.bf16.mxu0 %v13470_v6  ;;  %v13566_v8 = vcombine.high %v783_v63, %v787_v13  ;;  %v647_v6 = vld [vmem:[%s15084_s12 + $0xa10] sm:$0xff] }
 0x3a7   : > { %v10913_v34 = vpop.f32.mrf.mxu1  ;;  %11222 = vmatprep.subr.bf16.mxu1 %v13598_v52  ;;  %v775_v52 = vld [vmem:[%s15084_s12 + $0xe10] sm:$0xff]  ;;  %v13430_v61 = vcombine.high %v647_v6, %v651_v11 }
 0x3a8   : > { %v13558_v42 = vcombine.high %v775_v52, %v779_v55  ;;  %v1027_v34 = vld [vmem:[%s15084_s12 + $0x15f0] sm:$0xff]  ;;  %v13557_v33 = vcombine.low %v775_v52, %v779_v55 }
 0x3a9   : > { %11182 = vmatpush2.bf16.msra.mxu0 %v13469_v15  ;;  %v895_v15 = vld [vmem:[%s15084_s12 + $0x11d0] sm:$0xff] }
 0x3aa   : > { %11223 = vmatpush2.bf16.msra.mxu1 %v13597_v22  ;;  %11183 = vmatprep.subr.bf16.mxu0 %v13462_v31  ;;  %v899_v22 = vld [vmem:[%s15084_s12 + $0x11f0] sm:$0xff] }
 0x3ab   : > { %11224 = vmatprep.subr.bf16.mxu1 %v13590_v32  ;;  %v1023_v31 = vld [vmem:[%s15084_s12 + $0x15d0] sm:$0xff]  ;;  %v13429_v32 = vcombine.low %v647_v6, %v651_v11  ;;  %v13678_v20 = vcombine.high %v895_v15, %v899_v22 }
 0x3ac   : > { %v13806_v36 = vcombine.high %v1023_v31, %v1027_v34  ;;  %v887_v35 = vld [vmem:[%s15084_s12 + $0x1190] sm:$0xff]  ;;  %v13805_v39 = vcombine.low %v1023_v31, %v1027_v34 }
 0x3ad   : > { %11184 = vmatpush2.bf16.msra.mxu0 %v13461_v7  ;;  %v891_v7 = vld [vmem:[%s15084_s12 + $0x11b0] sm:$0xff] }
 0x3ae   : > { %11225 = vmatpush2.bf16.msra.mxu1 %v13589_v27  ;;  %11185 = vmatprep.subr.bf16.mxu0 %v13454_v29  ;;  %v1015_v27 = vld [vmem:[%s15084_s12 + $0x1590] sm:$0xff]  ;;  %v13670_v46 = vcombine.high %v887_v35, %v891_v7  ;;  %v13669_v58 = vcombine.low %v887_v35, %v891_v7 }
 0x3af   : > { %11226 = vmatprep.subr.bf16.mxu1 %v13582_v44  ;;  %v1019_v29 = vld [vmem:[%s15084_s12 + $0x15b0] sm:$0xff]  ;;  %v13677_v44 = vcombine.low %v895_v15, %v899_v22 }
 0x3b0   : > { %v13798_v10 = vcombine.high %v1015_v27, %v1019_v29  ;;  %v879_v49 = vld [vmem:[%s15084_s12 + $0x1150] sm:$0xff]  ;;  %v13797_v63 = vcombine.low %v1015_v27, %v1019_v29 }
 0x3b1   : > { %11186 = vmatpush2.bf16.msra.mxu0 %v13453_v51  ;;  %v883_v51 = vld [vmem:[%s15084_s12 + $0x1170] sm:$0xff] }
 0x3b2   : > { %11227 = vmatpush2.bf16.msra.mxu1 %v13581_v38  ;;  %11187 = vmatprep.subr.bf16.mxu0 %v13446_v56  ;;  %v1007_v56 = vld [vmem:[%s15084_s12 + $0x1550] sm:$0xff]  ;;  %v13662_v13 = vcombine.high %v879_v49, %v883_v51  ;;  %v13661_v52 = vcombine.low %v879_v49, %v883_v51 }
 0x3b3   : > { %11228 = vmatprep.subr.bf16.mxu1 %v13574_v18  ;;  %v1011_v18 = vld [vmem:[%s15084_s12 + $0x1570] sm:$0xff] }
 0x3b4   : > { %v999_v6 = vld [vmem:[%s15084_s12 + $0x1510] sm:$0xff] }
 0x3b5   : > { %11188 = vmatpush2.bf16.msra.mxu0 %v13445_v14  ;;  %v13790_v14 = vcombine.high %v1007_v56, %v1011_v18  ;;  %v1003_v11 = vld [vmem:[%s15084_s12 + $0x1530] sm:$0xff] }
 0x3b6   : > { %11229 = vmatpush2.bf16.msra.mxu1 %v13573_v1  ;;  %11189 = vmatprep.subr.bf16.mxu0 %v13438_v40  ;;  %v871_v1 = vld [vmem:[%s15084_s12 + $0x1110] sm:$0xff] }
 0x3b7   : > { %11230 = vmatprep.subr.bf16.mxu1 %v13566_v8  ;;  %v875_v40 = vld [vmem:[%s15084_s12 + $0x1130] sm:$0xff] }
 0x3b8   : > { %v867_v15 = vld [vmem:[%s15084_s12 + $0x10f0] sm:$0xff]  ;;  %v13653_v34 = vcombine.low %v871_v1, %v875_v40 }
 0x3b9   : > { %11190 = vmatpush2.bf16.msra.mxu0 %v13437_v57  ;;  %v13789_v57 = vcombine.low %v1007_v56, %v1011_v18  ;;  %v991_v22 = vld [vmem:[%s15084_s12 + $0x14d0] sm:$0xff] }
 0x3ba   : > { %11231 = vmatpush2.bf16.msra.mxu1 %v13565_v54  ;;  %11191 = vmatprep.subr.bf16.mxu0 %v13430_v61  ;;  %v13654_v54 = vcombine.high %v871_v1, %v875_v40  ;;  %v13782_v61 = vcombine.high %v999_v6, %v1003_v11  ;;  %v995_v31 = vld [vmem:[%s15084_s12 + $0x14f0] sm:$0xff] }
 0x3bb   : > { %11232 = vmatprep.subr.bf16.mxu1 %v13558_v42  ;;  %v863_v42 = vld [vmem:[%s15084_s12 + $0x10d0] sm:$0xff] }
 0x3bc   : > { %v859_v35 = vld [vmem:[%s15084_s12 + $0x10b0] sm:$0xff]  ;;  %v13645_v29 = vcombine.low %v863_v42, %v867_v15 }
 0x3bd   : > { %11192 = vmatpush2.bf16.msra.mxu0 %v13429_v32  ;;  %v13781_v32 = vcombine.low %v999_v6, %v1003_v11  ;;  %v983_v7 = vld [vmem:[%s15084_s12 + $0x1490] sm:$0xff] }
 0x3be   : > { %11233 = vmatpush2.bf16.msra.mxu1 %v13557_v33  ;;  %11243 = vmatprep.subr.bf16.mxu0 %v13678_v20  ;;  %v13646_v33 = vcombine.high %v863_v42, %v867_v15  ;;  %v13774_v20 = vcombine.high %v991_v22, %v995_v31  ;;  %v987_v27 = vld [vmem:[%s15084_s12 + $0x14b0] sm:$0xff] }
 0x3bf   : > { %11284 = vmatprep.subr.bf16.mxu1 %v13806_v36  ;;  %v855_v36 = vld [vmem:[%s15084_s12 + $0x1090] sm:$0xff] }
 0x3c0   : > { %v16309_v38 = vpop.f32.mrf.mxu0  ;;  %11194 = vmatmul.mubr.bf16.vlgmr.msra.gmra.mxu0 %v15265_v37  ;;  %v851_v49 = vld [vmem:[%s15084_s12 + $0x1070] sm:$0xff]  ;;  %v13637_v18 = vcombine.low %v855_v36, %v859_v35 }
 0x3c1   : > { %11235 = vmatmul.mubr.bf16.vlgmr.msra.gmra.mxu1 %v15274_v41  ;;  %11244 = vmatpush1.bf16.msra.mxu0 %v13677_v44  ;;  %v13773_v44 = vcombine.low %v991_v22, %v995_v31  ;;  %v975_v51 = vld [vmem:[%s15084_s12 + $0x1450] sm:$0xff] }
 0x3c2   : > { %11285 = vmatpush1.bf16.msra.mxu1 %v13805_v39  ;;  %v16315_v62 = vpop.f32.mrf.mxu0  ;;  %11245 = vmatprep.subr.bf16.mxu0 %v13670_v46  ;;  %v13638_v39 = vcombine.high %v855_v36, %v859_v35  ;;  %v13766_v46 = vcombine.high %v983_v7, %v987_v27  ;;  %v979_v56 = vld [vmem:[%s15084_s12 + $0x1470] sm:$0xff] }
 0x3c3   : > { %11286 = vmatprep.subr.bf16.mxu1 %v13798_v10  ;;  %11275 = vmatprep.mubr.bf16.mxu0 %v15283_v48  ;;  %v847_v10 = vld [vmem:[%s15084_s12 + $0x1050] sm:$0xff]  ;;  %v13757_v11 = vcombine.low %v975_v51, %v979_v56 }
 0x3c4   : > { %v10953_v8 = vpop.f32.mrf.mxu0  ;;  %11316 = vmatprep.mubr.bf16.mxu1 %v15290_v50  ;;  %v843_v1 = vld [vmem:[%s15084_s12 + $0x1030] sm:$0xff]  ;;  %v13629_v6 = vcombine.low %v847_v10, %v851_v49 }
 0x3c5   : > { %11246 = vmatpush1.bf16.msra.mxu0 %v13669_v58  ;;  %v13765_v58 = vcombine.low %v983_v7, %v987_v27  ;;  %v967_v40 = vld [vmem:[%s15084_s12 + $0x1410] sm:$0xff] }
 0x3c6   : > { %11287 = vmatpush1.bf16.msra.mxu1 %v13797_v63  ;;  %v10954_v55 = vpop.f32.mrf.mxu0  ;;  %11247 = vmatprep.subr.bf16.mxu0 %v13662_v13  ;;  %v13630_v63 = vcombine.high %v847_v10, %v851_v49  ;;  %v13758_v13 = vcombine.high %v975_v51, %v979_v56  ;;  %v971_v8 = vld [vmem:[%s15084_s12 + $0x1430] sm:$0xff] }
 0x3c7   : > { %11288 = vmatprep.subr.bf16.mxu1 %v13790_v14  ;;  %v839_v14 = vld [vmem:[%s15084_s12 + $0x1010] sm:$0xff]  ;;  %v13750_v55 = vcombine.high %v967_v40, %v971_v8  ;;  %v13749_v22 = vcombine.low %v967_v40, %v971_v8 }
 0x3c8   : > { %v1091_v42 = vld [vmem:[%s15084_s12 + $0x17f0] sm:$0xff]  ;;  %v13621_v15 = vcombine.low %v839_v14, %v843_v1 }
 0x3c9   : > { %11248 = vmatpush1.bf16.msra.mxu0 %v13661_v52  ;;  %v13622_v52 = vcombine.high %v839_v14, %v843_v1  ;;  %v1083_v36 = vld [vmem:[%s15084_s12 + $0x17b0] sm:$0xff] }
 0x3ca   : > { %11289 = vmatpush1.bf16.msra.mxu1 %v13789_v57  ;;  %11249 = vmatprep.subr.bf16.mxu0 %v13654_v54  ;;  %v959_v57 = vld [vmem:[%s15084_s12 + $0x13d0] sm:$0xff] }
 0x3cb   : > { %11290 = vmatprep.subr.bf16.mxu1 %v13782_v61  ;;  %v963_v54 = vld [vmem:[%s15084_s12 + $0x13f0] sm:$0xff] }
 0x3cc   : > { %v1087_v61 = vld [vmem:[%s15084_s12 + $0x17d0] sm:$0xff]  ;;  %v13742_v31 = vcombine.high %v959_v57, %v963_v54  ;;  %v13741_v35 = vcombine.low %v959_v57, %v963_v54 }
 0x3cd   : > { %11250 = vmatpush1.bf16.msra.mxu0 %v13653_v34  ;;  %v13870_v34 = vcombine.high %v1087_v61, %v1091_v42  ;;  %v13869_v7 = vcombine.low %v1087_v61, %v1091_v42  ;;  %v1075_v10 = vld [vmem:[%s15084_s12 + $0x1770] sm:$0xff] }
 0x3ce   : > { %11291 = vmatpush1.bf16.msra.mxu1 %v13781_v32  ;;  %11251 = vmatprep.subr.bf16.mxu0 %v13646_v33  ;;  %v951_v32 = vld [vmem:[%s15084_s12 + $0x1390] sm:$0xff] }
 0x3cf   : > { %11292 = vmatprep.subr.bf16.mxu1 %v13774_v20  ;;  %v955_v33 = vld [vmem:[%s15084_s12 + $0x13b0] sm:$0xff] }
 0x3d0   : > { %v1079_v20 = vld [vmem:[%s15084_s12 + $0x1790] sm:$0xff]  ;;  %v13734_v27 = vcombine.high %v951_v32, %v955_v33  ;;  %v13733_v51 = vcombine.low %v951_v32, %v955_v33 }
 0x3d1   : > { %11252 = vmatpush1.bf16.msra.mxu0 %v13645_v29  ;;  %v13862_v29 = vcombine.high %v1079_v20, %v1083_v36  ;;  %v13861_v56 = vcombine.low %v1079_v20, %v1083_v36  ;;  %v939_v14 = vld [vmem:[%s15084_s12 + $0x1330] sm:$0xff] }
 0x3d2   : > { %11293 = vmatpush1.bf16.msra.mxu1 %v13773_v44  ;;  %11253 = vmatprep.subr.bf16.mxu0 %v13638_v39  ;;  %v943_v44 = vld [vmem:[%s15084_s12 + $0x1350] sm:$0xff] }
 0x3d3   : > { %11294 = vmatprep.subr.bf16.mxu1 %v13766_v46  ;;  %v947_v39 = vld [vmem:[%s15084_s12 + $0x1370] sm:$0xff] }
 0x3d4   : > { %v1071_v46 = vld [vmem:[%s15084_s12 + $0x1750] sm:$0xff] }
 0x3d5   : > { %11254 = vmatpush1.bf16.msra.mxu0 %v13637_v18  ;;  %v13726_v18 = vcombine.high %v943_v44, %v947_v39  ;;  %v1063_v1 = vld [vmem:[%s15084_s12 + $0x1710] sm:$0xff] }
 0x3d6   : > { %11295 = vmatpush1.bf16.msra.mxu1 %v13765_v58  ;;  %11255 = vmatprep.subr.bf16.mxu0 %v13630_v63  ;;  %v13854_v63 = vcombine.high %v1071_v46, %v1075_v10  ;;  %v1067_v40 = vld [vmem:[%s15084_s12 + $0x1730] sm:$0xff] }
 0x3d7   : > { %11296 = vmatprep.subr.bf16.mxu1 %v13758_v13  ;;  %v935_v13 = vld [vmem:[%s15084_s12 + $0x1310] sm:$0xff]  ;;  %v13846_v57 = vcombine.high %v1063_v1, %v1067_v40 }
 0x3d8   : > { %v927_v54 = vld [vmem:[%s15084_s12 + $0x12d0] sm:$0xff] }
 0x3d9   : > { %11256 = vmatpush1.bf16.msra.mxu0 %v13629_v6  ;;  %v13725_v6 = vcombine.low %v943_v44, %v947_v39  ;;  %v931_v61 = vld [vmem:[%s15084_s12 + $0x12f0] sm:$0xff] }
 0x3da   : > { %11297 = vmatpush1.bf16.msra.mxu1 %v13757_v11  ;;  %11257 = vmatprep.subr.bf16.mxu0 %v13622_v52  ;;  %v13853_v11 = vcombine.low %v1071_v46, %v1075_v10  ;;  %v13718_v52 = vcombine.high %v935_v13, %v939_v14  ;;  %v1055_v42 = vld [vmem:[%s15084_s12 + $0x16d0] sm:$0xff] }
 0x3db   : > { %11298 = vmatprep.subr.bf16.mxu1 %v13750_v55  ;;  %v919_v33 = vld [vmem:[%s15084_s12 + $0x1290] sm:$0xff] }
 0x3dc   : > { %v923_v20 = vld [vmem:[%s15084_s12 + $0x12b0] sm:$0xff] }
 0x3dd   : > { %11258 = vmatpush1.bf16.msra.mxu0 %v13621_v15  ;;  %v1059_v15 = vld [vmem:[%s15084_s12 + $0x16f0] sm:$0xff] }
 0x3de   : > { %11299 = vmatpush1.bf16.msra.mxu1 %v13749_v22  ;;  %11259 = vmatprep.subr.bf16.mxu0 %v13742_v31  ;;  %v13717_v22 = vcombine.low %v935_v13, %v939_v14  ;;  %v13845_v31 = vcombine.low %v1063_v1, %v1067_v40  ;;  %v13838_v32 = vcombine.high %v1055_v42, %v1059_v15  ;;  %v1047_v36 = vld [vmem:[%s15084_s12 + $0x1690] sm:$0xff] }
 0x3df   : > { %11300 = vmatprep.subr.bf16.mxu1 %v13870_v34  ;;  %v13710_v34 = vcombine.high %v927_v54, %v931_v61  ;;  %v911_v39 = vld [vmem:[%s15084_s12 + $0x1250] sm:$0xff] }
 0x3e0   : > { %v915_v46 = vld [vmem:[%s15084_s12 + $0x1270] sm:$0xff] }
 0x3e1   : > { %v16351_v49 = vpop.f32.mrf.mxu1  ;;  %11260 = vmatpush2.bf16.msra.mxu0 %v13741_v35  ;;  %v1051_v35 = vld [vmem:[%s15084_s12 + $0x16b0] sm:$0xff] }
 0x3e2   : > { %11301 = vmatpush2.bf16.msra.mxu1 %v13869_v7  ;;  %11261 = vmatprep.subr.bf16.mxu0 %v13734_v27  ;;  %v13709_v7 = vcombine.low %v927_v54, %v931_v61  ;;  %v13837_v27 = vcombine.low %v1055_v42, %v1059_v15  ;;  %v13830_v44 = vcombine.high %v1047_v36, %v1051_v35  ;;  %v1039_v10 = vld [vmem:[%s15084_s12 + $0x1650] sm:$0xff] }
 0x3e3   : > { %v16353_v58 = vpop.f32.mrf.mxu1  ;;  %11302 = vmatprep.subr.bf16.mxu1 %v13862_v29  ;;  %v13702_v29 = vcombine.high %v919_v33, %v923_v20  ;;  %v903_v14 = vld [vmem:[%s15084_s12 + $0x1210] sm:$0xff] }
 0x3e4   : > { %v907_v1 = vld [vmem:[%s15084_s12 + $0x1230] sm:$0xff] }
 0x3e5   : > { %v10994_v8 = vpop.f32.mrf.mxu1  ;;  %11262 = vmatpush2.bf16.msra.mxu0 %v13733_v51  ;;  %v1043_v51 = vld [vmem:[%s15084_s12 + $0x1670] sm:$0xff]  ;;  %v13685_v15 = vcombine.low %v903_v14, %v907_v1 }
 0x3e6   : > { %11303 = vmatpush2.bf16.msra.mxu1 %v13861_v56  ;;  %11263 = vmatprep.subr.bf16.mxu0 %v13726_v18  ;;  %v13701_v56 = vcombine.low %v919_v33, %v923_v20  ;;  %v13829_v18 = vcombine.low %v1047_v36, %v1051_v35  ;;  %v13822_v13 = vcombine.high %v1039_v10, %v1043_v51  ;;  %v1031_v40 = vld [vmem:[%s15084_s12 + $0x1610] sm:$0xff] }
 0x3e7   : > { %v10995_v55 = vpop.f32.mrf.mxu1  ;;  %11304 = vmatprep.subr.bf16.mxu1 %v13854_v63  ;;  %v13694_v63 = vcombine.high %v911_v39, %v915_v46  ;;  %v1035_v8 = vld [vmem:[%s15084_s12 + $0x1630] sm:$0xff]  ;;  %v10950_v35 = vadd.f32 %v16309_v38, %v16274_v4 }
 0x3e8   : > { %v13814_v55 = vcombine.high %v1031_v40, %v1035_v8  ;;  %v1155_v54 = vld [vmem:[%s15084_s12 + $0x19f0] sm:$0xff] }
 0x3e9   : > { %11264 = vmatpush2.bf16.msra.mxu0 %v13725_v6  ;;  %v13693_v6 = vcombine.low %v911_v39, %v915_v46  ;;  %v1279_v61 = vld [vmem:[%s15084_s12 + $0x1dd0] sm:$0xff]  ;;  %v10991_v39 = vadd.f32 %v16351_v49, %v10950_v35 }
 0x3ea   : > { %11305 = vmatpush2.bf16.msra.mxu1 %v13853_v11  ;;  %11265 = vmatprep.subr.bf16.mxu0 %v13718_v52  ;;  %v13821_v11 = vcombine.low %v1039_v10, %v1043_v51  ;;  %v13686_v52 = vcombine.high %v903_v14, %v907_v1  ;;  %v1283_v42 = vld [vmem:[%s15084_s12 + $0x1df0] sm:$0xff] }
 0x3eb   : > { %11306 = vmatprep.subr.bf16.mxu1 %v13846_v57  ;;  %v1151_v57 = vld [vmem:[%s15084_s12 + $0x19d0] sm:$0xff] }
 0x3ec   : > { %v1147_v33 = vld [vmem:[%s15084_s12 + $0x19b0] sm:$0xff] }
 0x3ed   : > { %11266 = vmatpush2.bf16.msra.mxu0 %v13717_v22  ;;  %v13813_v22 = vcombine.low %v1031_v40, %v1035_v8  ;;  %v1271_v20 = vld [vmem:[%s15084_s12 + $0x1d90] sm:$0xff] }
 0x3ee   : > { %11307 = vmatpush2.bf16.msra.mxu1 %v13845_v31  ;;  %11267 = vmatprep.subr.bf16.mxu0 %v13710_v34  ;;  %v13934_v31 = vcombine.high %v1151_v57, %v1155_v54  ;;  %v14062_v34 = vcombine.high %v1279_v61, %v1283_v42  ;;  %v1275_v36 = vld [vmem:[%s15084_s12 + $0x1db0] sm:$0xff] }
 0x3ef   : > { %11308 = vmatprep.subr.bf16.mxu1 %v13838_v32  ;;  %v1143_v32 = vld [vmem:[%s15084_s12 + $0x1990] sm:$0xff]  ;;  %v14054_v46 = vcombine.high %v1271_v20, %v1275_v36  ;;  %v14053_v14 = vcombine.low %v1271_v20, %v1275_v36 }
 0x3f0   : > { %v1135_v10 = vld [vmem:[%s15084_s12 + $0x1950] sm:$0xff] }
 0x3f1   : > { %11268 = vmatpush2.bf16.msra.mxu0 %v13709_v7  ;;  %v13933_v7 = vcombine.low %v1151_v57, %v1155_v54  ;;  %v1139_v51 = vld [vmem:[%s15084_s12 + $0x1970] sm:$0xff] }
 0x3f2   : > { %11309 = vmatpush2.bf16.msra.mxu1 %v13837_v27  ;;  %11269 = vmatprep.subr.bf16.mxu0 %v13702_v29  ;;  %v14061_v27 = vcombine.low %v1279_v61, %v1283_v42  ;;  %v13926_v29 = vcombine.high %v1143_v32, %v1147_v33  ;;  %v1263_v4 = vld [vmem:[%s15084_s12 + $0x1d50] sm:$0xff]  ;;  %v13918_v1 = vcombine.high %v1135_v10, %v1139_v51 }
 0x3f3   : > { %11310 = vmatprep.subr.bf16.mxu1 %v13830_v44  ;;  %v10952_v44 = vadd.f32 %v16315_v62, %v16279_v43  ;;  %v1267_v38 = vld [vmem:[%s15084_s12 + $0x1d70] sm:$0xff]  ;;  %v13925_v43 = vcombine.low %v1143_v32, %v1147_v33  ;;  %v306_v62 = vld [vmem:[#allocation2 + $0x18] sm:$0xff] }
 0x3f4   : > { %v1255_v54 = vld [vmem:[%s15084_s12 + $0x1d10] sm:$0xff]  ;;  %v14045_v32 = vcombine.low %v1263_v4, %v1267_v38 }
 0x3f5   : > { %11270 = vmatpush2.bf16.msra.mxu0 %v13701_v56  ;;  %v1259_v61 = vld [vmem:[%s15084_s12 + $0x1d30] sm:$0xff] }
 0x3f6   : > { %11311 = vmatpush2.bf16.msra.mxu1 %v13829_v18  ;;  %11271 = vmatprep.subr.bf16.mxu0 %v13694_v63  ;;  %v10993_v18 = vadd.f32 %v16353_v58, %v10952_v44  ;;  %v14046_v58 = vcombine.high %v1263_v4, %v1267_v38  ;;  %v14038_v35 = vcombine.high %v1255_v54, %v1259_v61  ;;  %v1251_v44 = vld [vmem:[%s15084_s12 + $0x1cf0] sm:$0xff] }
 0x3f7   : > { %11312 = vmatprep.subr.bf16.mxu1 %v13822_v13  ;;  %v1115_v4 = vld [vmem:[%s15084_s12 + $0x18b0] sm:$0xff] }
 0x3f8   : > { %v1239_v38 = vld [vmem:[%s15084_s12 + $0x1c90] sm:$0xff] }
 0x3f9   : > { %11272 = vmatpush2.bf16.msra.mxu0 %v13693_v6 }
 0x3fa   : > { %11313 = vmatpush2.bf16.msra.mxu1 %v13821_v11  ;;  %11273 = vmatprep.subr.bf16.mxu0 %v13686_v52  ;;  %v1127_v11 = vld [vmem:[%s15084_s12 + $0x1910] sm:$0xff] }
 0x3fb   : > { %11314 = vmatprep.subr.bf16.mxu1 %v13814_v55  ;;  %v1131_v52 = vld [vmem:[%s15084_s12 + $0x1930] sm:$0xff] }
 0x3fc   : > { %v307_v55 = vld [vmem:[#allocation2 + $0x10] sm:$0xff]  ;;  %v13910_v33 = vcombine.high %v1127_v11, %v1131_v52 }
 0x3fd   : > { %11274 = vmatpush2.bf16.msra.mxu0 %v13685_v15 }
 0x3fe   : > { %11315 = vmatpush2.bf16.msra.mxu1 %v13813_v22  ;;  %11325 = vmatprep.subr.bf16.mxu0 %v13934_v31  ;;  %v13917_v31 = vcombine.low %v1135_v10, %v1139_v51 }
 0x3ff   : > { %11366 = vmatprep.subr.bf16.mxu1 %v14062_v34 }
 0x400   : > { %v11031_v56 = vpop.f32.mrf.mxu0  ;;  %11276 = vmatmul.mubr.bf16.vlgmr.msra.gmra.mxu0 %v15355_v5 }
 0x401   : > { %v11032_v63 = vadd.f32 %v11031_v56, %v10991_v39  ;;  %v11072_v13 = vpop.f32.mrf.mxu1  ;;  %11317 = vmatmul.mubr.bf16.vlgmr.msra.gmra.mxu1 %v15364_v9  ;;  %11326 = vmatpush1.bf16.msra.mxu0 %v13933_v7  ;;  %v1119_v7 = vld [vmem:[%s15084_s12 + $0x18d0] sm:$0xff]  ;;  %v13909_v39 = vcombine.low %v1127_v11, %v1131_v52 }
 0x402   : > { %11367 = vmatpush1.bf16.msra.mxu1 %v14061_v27  ;;  %v11033_v49 = vpop.f32.mrf.mxu0  ;;  %11327 = vmatprep.subr.bf16.mxu0 %v13926_v29  ;;  %v1123_v27 = vld [vmem:[%s15084_s12 + $0x18f0] sm:$0xff] }
 0x403   : > { %v11073_v40 = vadd.f32 %v11072_v13, %v11032_v63  ;;  %v11034_v8 = vadd.f32 %v11033_v49, %v10993_v18  ;;  %v11074_v6 = vpop.f32.mrf.mxu1  ;;  %11368 = vmatprep.subr.bf16.mxu1 %v14054_v46  ;;  %11357 = vmatprep.mubr.bf16.mxu0 %v15373_v16  ;;  %v1247_v29 = vld [vmem:[%s15084_s12 + $0x1cd0] sm:$0xff]  ;;  %v14037_v46 = vcombine.low %v1255_v54, %v1259_v61 }
 0x404   : > { %v11035_v57 = vpop.f32.mrf.mxu0  ;;  %11398 = vmatprep.mubr.bf16.mxu1 %v15380_v19  ;;  %v13902_v10 = vcombine.high %v1119_v7, %v1123_v27  ;;  %v14030_v51 = vcombine.high %v1247_v29, %v1251_v44  ;;  %v1111_v56 = vld [vmem:[%s15084_s12 + $0x1890] sm:$0xff]  ;;  %v13901_v63 = vcombine.low %v1119_v7, %v1123_v27  ;;  %v14029_v13 = vcombine.low %v1247_v29, %v1251_v44 }
 0x405   : > { %v12147_v42 = vadd.f32 %v11073_v40, %v306_v62  ;;  %v11075_v15 = vadd.f32 %v11074_v6, %v11034_v8  ;;  %v11076_v22 = vpop.f32.mrf.mxu1  ;;  %11328 = vmatpush1.bf16.msra.mxu0 %v13925_v43  ;;  %v1243_v18 = vld [vmem:[%s15084_s12 + $0x1cb0] sm:$0xff]  ;;  %v13894_v43 = vcombine.high %v1111_v56, %v1115_v4  ;;  %v13893_v8 = vcombine.low %v1111_v56, %v1115_v4 }
 0x406   : > { %11369 = vmatpush1.bf16.msra.mxu1 %v14053_v14  ;;  %v11036_v34 = vpop.f32.mrf.mxu0  ;;  %11329 = vmatprep.subr.bf16.mxu0 %v13918_v1  ;;  %v14022_v62 = vcombine.high %v1239_v38, %v1243_v18  ;;  %v1103_v49 = vld [vmem:[%s15084_s12 + $0x1850] sm:$0xff]  ;;  %v14021_v6 = vcombine.low %v1239_v38, %v1243_v18 }
 0x407   : > { %12155 = vst [vmem:[#allocation2 + $0x18] sm:$0xff] %v12147_v42  ;;  %v12148_v20 = vadd.f32 %v11075_v15, %v307_v55  ;;  %v11077_v36 = vpop.f32.mrf.mxu1  ;;  %11370 = vmatprep.subr.bf16.mxu1 %v14046_v58  ;;  %v1107_v14 = vld [vmem:[%s15084_s12 + $0x1870] sm:$0xff] }
 0x408   : > { %v1231_v1 = vld [vmem:[%s15084_s12 + $0x1c50] sm:$0xff]  ;;  %v13886_v58 = vcombine.high %v1103_v49, %v1107_v14  ;;  %v13885_v61 = vcombine.low %v1103_v49, %v1107_v14 }
 0x409   : > { %12156 = vst [vmem:[#allocation2 + $0x10] sm:$0xff] %v12148_v20  ;;  %11330 = vmatpush1.bf16.msra.mxu0 %v13917_v31  ;;  %v1235_v40 = vld [vmem:[%s15084_s12 + $0x1c70] sm:$0xff] }
 0x40a   : > { %11371 = vmatpush1.bf16.msra.mxu1 %v14045_v32  ;;  %11331 = vmatprep.subr.bf16.mxu0 %v13910_v33  ;;  %v14014_v11 = vcombine.high %v1231_v1, %v1235_v40  ;;  %v1095_v52 = vld [vmem:[%s15084_s12 + $0x1810] sm:$0xff]  ;;  %v14013_v42 = vcombine.low %v1231_v1, %v1235_v40 }
 0x40b   : > { %11372 = vmatprep.subr.bf16.mxu1 %v14038_v35  ;;  %v1099_v55 = vld [vmem:[%s15084_s12 + $0x1830] sm:$0xff] }
 0x40c   : > { %v1223_v57 = vld [vmem:[%s15084_s12 + $0x1c10] sm:$0xff]  ;;  %v13878_v15 = vcombine.high %v1095_v52, %v1099_v55  ;;  %v13877_v20 = vcombine.low %v1095_v52, %v1099_v55 }
 0x40d   : > { %11332 = vmatpush1.bf16.msra.mxu0 %v13909_v39  ;;  %v1227_v54 = vld [vmem:[%s15084_s12 + $0x1c30] sm:$0xff] }
 0x40e   : > { %11373 = vmatpush1.bf16.msra.mxu1 %v14037_v46  ;;  %11333 = vmatprep.subr.bf16.mxu0 %v13902_v10  ;;  %v14006_v22 = vcombine.high %v1223_v57, %v1227_v54  ;;  %v1215_v31 = vld [vmem:[%s15084_s12 + $0x1bd0] sm:$0xff]  ;;  %v14005_v36 = vcombine.low %v1223_v57, %v1227_v54 }
 0x40f   : > { %11374 = vmatprep.subr.bf16.mxu1 %v14030_v51  ;;  %v1219_v34 = vld [vmem:[%s15084_s12 + $0x1bf0] sm:$0xff] }
 0x410   : > { %v1343_v32 = vld [vmem:[%s15084_s12 + $0x1fd0] sm:$0xff]  ;;  %v13998_v35 = vcombine.high %v1215_v31, %v1219_v34  ;;  %v13997_v46 = vcombine.low %v1215_v31, %v1219_v34 }
 0x411   : > { %11334 = vmatpush1.bf16.msra.mxu0 %v13901_v63  ;;  %v1347_v33 = vld [vmem:[%s15084_s12 + $0x1ff0] sm:$0xff] }
 0x412   : > { %11375 = vmatpush1.bf16.msra.mxu1 %v14029_v13  ;;  %11335 = vmatprep.subr.bf16.mxu0 %v13894_v43  ;;  %v14126_v7 = vcombine.high %v1343_v32, %v1347_v33  ;;  %v1207_v27 = vld [vmem:[%s15084_s12 + $0x1b90] sm:$0xff]  ;;  %v14125_v10 = vcombine.low %v1343_v32, %v1347_v33 }
 0x413   : > { %11376 = vmatprep.subr.bf16.mxu1 %v14022_v62  ;;  %v1211_v29 = vld [vmem:[%s15084_s12 + $0x1bb0] sm:$0xff] }
 0x414   : > { %v1335_v44 = vld [vmem:[%s15084_s12 + $0x1f90] sm:$0xff]  ;;  %v13990_v51 = vcombine.high %v1207_v27, %v1211_v29  ;;  %v13989_v13 = vcombine.low %v1207_v27, %v1211_v29 }
 0x415   : > { %11336 = vmatpush1.bf16.msra.mxu0 %v13893_v8  ;;  %v1339_v39 = vld [vmem:[%s15084_s12 + $0x1fb0] sm:$0xff] }
 0x416   : > { %11377 = vmatpush1.bf16.msra.mxu1 %v14021_v6  ;;  %11337 = vmatprep.subr.bf16.mxu0 %v13886_v58  ;;  %v14118_v56 = vcombine.high %v1335_v44, %v1339_v39  ;;  %v1199_v4 = vld [vmem:[%s15084_s12 + $0x1b50] sm:$0xff]  ;;  %v14117_v43 = vcombine.low %v1335_v44, %v1339_v39 }
 0x417   : > { %11378 = vmatprep.subr.bf16.mxu1 %v14014_v11  ;;  %v1203_v38 = vld [vmem:[%s15084_s12 + $0x1b70] sm:$0xff] }
 0x418   : > { %v1327_v18 = vld [vmem:[%s15084_s12 + $0x1f50] sm:$0xff]  ;;  %v13982_v62 = vcombine.high %v1199_v4, %v1203_v38  ;;  %v13981_v6 = vcombine.low %v1199_v4, %v1203_v38 }
 0x419   : > { %11338 = vmatpush1.bf16.msra.mxu0 %v13885_v61  ;;  %v1331_v63 = vld [vmem:[%s15084_s12 + $0x1f70] sm:$0xff] }
 0x41a   : > { %11379 = vmatpush1.bf16.msra.mxu1 %v14013_v42  ;;  %11339 = vmatprep.subr.bf16.mxu0 %v13878_v15  ;;  %v14110_v49 = vcombine.high %v1327_v18, %v1331_v63  ;;  %v1191_v14 = vld [vmem:[%s15084_s12 + $0x1b10] sm:$0xff]  ;;  %v14109_v58 = vcombine.low %v1327_v18, %v1331_v63 }
 0x41b   : > { %11380 = vmatprep.subr.bf16.mxu1 %v14006_v22  ;;  %v1195_v1 = vld [vmem:[%s15084_s12 + $0x1b30] sm:$0xff] }
 0x41c   : > { %v1319_v40 = vld [vmem:[%s15084_s12 + $0x1f10] sm:$0xff]  ;;  %v13974_v11 = vcombine.high %v1191_v14, %v1195_v1  ;;  %v13973_v42 = vcombine.low %v1191_v14, %v1195_v1 }
 0x41d   : > { %11340 = vmatpush1.bf16.msra.mxu0 %v13877_v20  ;;  %v1323_v8 = vld [vmem:[%s15084_s12 + $0x1f30] sm:$0xff] }
 0x41e   : > { %11381 = vmatpush1.bf16.msra.mxu1 %v14005_v36  ;;  %11341 = vmatprep.subr.bf16.mxu0 %v13998_v35  ;;  %v14102_v52 = vcombine.high %v1319_v40, %v1323_v8  ;;  %v1183_v55 = vld [vmem:[%s15084_s12 + $0x1ad0] sm:$0xff]  ;;  %v14101_v15 = vcombine.low %v1319_v40, %v1323_v8 }
 0x41f   : > { %11382 = vmatprep.subr.bf16.mxu1 %v14126_v7  ;;  %v1187_v57 = vld [vmem:[%s15084_s12 + $0x1af0] sm:$0xff] }
 0x420   : > { %v1311_v54 = vld [vmem:[%s15084_s12 + $0x1ed0] sm:$0xff]  ;;  %v13966_v22 = vcombine.high %v1183_v55, %v1187_v57  ;;  %v13965_v36 = vcombine.low %v1183_v55, %v1187_v57 }
 0x421   : > { %11342 = vmatpush2.bf16.msra.mxu0 %v13997_v46  ;;  %v1315_v61 = vld [vmem:[%s15084_s12 + $0x1ef0] sm:$0xff] }
 0x422   : > { %11383 = vmatpush2.bf16.msra.mxu1 %v14125_v10  ;;  %11343 = vmatprep.subr.bf16.mxu0 %v13990_v51  ;;  %v14094_v31 = vcombine.high %v1311_v54, %v1315_v61  ;;  %v1175_v34 = vld [vmem:[%s15084_s12 + $0x1a90] sm:$0xff]  ;;  %v14093_v35 = vcombine.low %v1311_v54, %v1315_v61 }
 0x423   : > { %11384 = vmatprep.subr.bf16.mxu1 %v14118_v56  ;;  %v1179_v32 = vld [vmem:[%s15084_s12 + $0x1ab0] sm:$0xff] }
 0x424   : > { %v1303_v33 = vld [vmem:[%s15084_s12 + $0x1e90] sm:$0xff]  ;;  %v13958_v7 = vcombine.high %v1175_v34, %v1179_v32  ;;  %v13957_v10 = vcombine.low %v1175_v34, %v1179_v32 }
 0x425   : > { %11344 = vmatpush2.bf16.msra.mxu0 %v13989_v13  ;;  %v1307_v20 = vld [vmem:[%s15084_s12 + $0x1eb0] sm:$0xff] }
 0x426   : > { %11385 = vmatpush2.bf16.msra.mxu1 %v14117_v43  ;;  %11345 = vmatprep.subr.bf16.mxu0 %v13982_v62  ;;  %v14086_v27 = vcombine.high %v1303_v33, %v1307_v20  ;;  %v1167_v29 = vld [vmem:[%s15084_s12 + $0x1a50] sm:$0xff]  ;;  %v14085_v51 = vcombine.low %v1303_v33, %v1307_v20 }
 0x427   : > { %11386 = vmatprep.subr.bf16.mxu1 %v14110_v49  ;;  %v1171_v44 = vld [vmem:[%s15084_s12 + $0x1a70] sm:$0xff] }
 0x428   : > { %v1295_v39 = vld [vmem:[%s15084_s12 + $0x1e50] sm:$0xff]  ;;  %v13950_v56 = vcombine.high %v1167_v29, %v1171_v44  ;;  %v13949_v43 = vcombine.low %v1167_v29, %v1171_v44 }
 0x429   : > { %11346 = vmatpush2.bf16.msra.mxu0 %v13981_v6  ;;  %v1299_v46 = vld [vmem:[%s15084_s12 + $0x1e70] sm:$0xff] }
 0x42a   : > { %11387 = vmatpush2.bf16.msra.mxu1 %v14109_v58  ;;  %11347 = vmatprep.subr.bf16.mxu0 %v13974_v11  ;;  %v14078_v4 = vcombine.high %v1295_v39, %v1299_v46  ;;  %v1159_v38 = vld [vmem:[%s15084_s12 + $0x1a10] sm:$0xff]  ;;  %v14077_v62 = vcombine.low %v1295_v39, %v1299_v46 }
 0x42b   : > { %11388 = vmatprep.subr.bf16.mxu1 %v14102_v52  ;;  %v1163_v18 = vld [vmem:[%s15084_s12 + $0x1a30] sm:$0xff] }
 0x42c   : > { %v1287_v63 = vld [vmem:[%s15084_s12 + $0x1e10] sm:$0xff]  ;;  %v13942_v49 = vcombine.high %v1159_v38, %v1163_v18  ;;  %v13941_v58 = vcombine.low %v1159_v38, %v1163_v18 }
 0x42d   : > { %11348 = vmatpush2.bf16.msra.mxu0 %v13973_v42  ;;  %v1291_v13 = vld [vmem:[%s15084_s12 + $0x1e30] sm:$0xff] }
 0x42e   : > { %11389 = vmatpush2.bf16.msra.mxu1 %v14101_v15  ;;  %11349 = vmatprep.subr.bf16.mxu0 %v13966_v22  ;;  %v14070_v14 = vcombine.high %v1287_v63, %v1291_v13  ;;  %v1407_v1 = vld [vmem:[%s15084_s12 + $0x21d0] sm:$0xff]  ;;  %v14069_v11 = vcombine.low %v1287_v63, %v1291_v13 }
 0x42f   : > { %11390 = vmatprep.subr.bf16.mxu1 %v14094_v31  ;;  %v1411_v40 = vld [vmem:[%s15084_s12 + $0x21f0] sm:$0xff] }
 0x430   : > { %v1535_v8 = vld [vmem:[%s15084_s12 + $0x25d0] sm:$0xff]  ;;  %v14190_v52 = vcombine.high %v1407_v1, %v1411_v40  ;;  %v14189_v15 = vcombine.low %v1407_v1, %v1411_v40 }
 0x431   : > { %11350 = vmatpush2.bf16.msra.mxu0 %v13965_v36  ;;  %v1539_v6 = vld [vmem:[%s15084_s12 + $0x25f0] sm:$0xff] }
 0x432   : > { %11391 = vmatpush2.bf16.msra.mxu1 %v14093_v35  ;;  %11351 = vmatprep.subr.bf16.mxu0 %v13958_v7  ;;  %v14318_v55 = vcombine.high %v1535_v8, %v1539_v6  ;;  %v1399_v57 = vld [vmem:[%s15084_s12 + $0x2190] sm:$0xff]  ;;  %v14317_v22 = vcombine.low %v1535_v8, %v1539_v6 }
 0x433   : > { %11392 = vmatprep.subr.bf16.mxu1 %v14086_v27  ;;  %v1403_v54 = vld [vmem:[%s15084_s12 + $0x21b0] sm:$0xff] }
 0x434   : > { %v1527_v61 = vld [vmem:[%s15084_s12 + $0x2590] sm:$0xff]  ;;  %v14182_v31 = vcombine.high %v1399_v57, %v1403_v54  ;;  %v14181_v27 = vcombine.low %v1399_v57, %v1403_v54 }
 0x435   : > { %11352 = vmatpush2.bf16.msra.mxu0 %v13957_v10  ;;  %v1531_v42 = vld [vmem:[%s15084_s12 + $0x25b0] sm:$0xff] }
 0x436   : > { %11393 = vmatpush2.bf16.msra.mxu1 %v14085_v51  ;;  %11353 = vmatprep.subr.bf16.mxu0 %v13950_v56  ;;  %v14310_v34 = vcombine.high %v1527_v61, %v1531_v42  ;;  %v1391_v32 = vld [vmem:[%s15084_s12 + $0x2150] sm:$0xff]  ;;  %v14309_v39 = vcombine.low %v1527_v61, %v1531_v42 }
 0x437   : > { %11394 = vmatprep.subr.bf16.mxu1 %v14078_v4  ;;  %v1395_v33 = vld [vmem:[%s15084_s12 + $0x2170] sm:$0xff] }
 0x438   : > { %v1519_v36 = vld [vmem:[%s15084_s12 + $0x2550] sm:$0xff]  ;;  %v14174_v46 = vcombine.high %v1391_v32, %v1395_v33 }
 0x439   : > { %11354 = vmatpush2.bf16.msra.mxu0 %v13949_v43  ;;  %v1523_v35 = vld [vmem:[%s15084_s12 + $0x2570] sm:$0xff] }
 0x43a   : > { %11395 = vmatpush2.bf16.msra.mxu1 %v14077_v62  ;;  %11355 = vmatprep.subr.bf16.mxu0 %v13942_v49  ;;  %v14302_v51 = vcombine.high %v1519_v36, %v1523_v35  ;;  %v1383_v56 = vld [vmem:[%s15084_s12 + $0x2110] sm:$0xff]  ;;  %v14173_v62 = vcombine.low %v1391_v32, %v1395_v33 }
 0x43b   : > { %11396 = vmatprep.subr.bf16.mxu1 %v14070_v14  ;;  %v1387_v4 = vld [vmem:[%s15084_s12 + $0x2130] sm:$0xff]  ;;  %v14301_v14 = vcombine.low %v1519_v36, %v1523_v35 }
 0x43c   : > { %v1511_v63 = vld [vmem:[%s15084_s12 + $0x2510] sm:$0xff]  ;;  %v14166_v1 = vcombine.high %v1383_v56, %v1387_v4 }
 0x43d   : > { %11356 = vmatpush2.bf16.msra.mxu0 %v13941_v58  ;;  %v1515_v13 = vld [vmem:[%s15084_s12 + $0x2530] sm:$0xff] }
 0x43e   : > { %11397 = vmatpush2.bf16.msra.mxu1 %v14069_v11  ;;  %11407 = vmatprep.subr.bf16.mxu0 %v14190_v52  ;;  %v14294_v8 = vcombine.high %v1511_v63, %v1515_v13  ;;  %v1375_v6 = vld [vmem:[%s15084_s12 + $0x20d0] sm:$0xff]  ;;  %v14293_v57 = vcombine.low %v1511_v63, %v1515_v13 }
 0x43f   : > { %11448 = vmatprep.subr.bf16.mxu1 %v14318_v55  ;;  %v1379_v58 = vld [vmem:[%s15084_s12 + $0x20f0] sm:$0xff]  ;;  %v14165_v55 = vcombine.low %v1383_v56, %v1387_v4 }
 0x440   : > { %v11113_v20 = vpop.f32.mrf.mxu0  ;;  %11358 = vmatmul.mubr.bf16.vlgmr.msra.gmra.mxu0 %v15445_v23  ;;  %v1503_v11 = vld [vmem:[%s15084_s12 + $0x24d0] sm:$0xff]  ;;  %v14158_v54 = vcombine.high %v1375_v6, %v1379_v58 }
 0x441   : > { %v11154_v7 = vpop.f32.mrf.mxu1  ;;  %11399 = vmatmul.mubr.bf16.vlgmr.msra.gmra.mxu1 %v15454_v53  ;;  %11408 = vmatpush1.bf16.msra.mxu0 %v14189_v15  ;;  %v1507_v52 = vld [vmem:[%s15084_s12 + $0x24f0] sm:$0xff] }
 0x442   : > { %v16463_v29 = vadd.f32 %v11154_v7, %v11113_v20  ;;  %11449 = vmatpush1.bf16.msra.mxu1 %v14317_v22  ;;  %v11115_v44 = vpop.f32.mrf.mxu0  ;;  %11409 = vmatprep.subr.bf16.mxu0 %v14182_v31  ;;  %v14286_v61 = vcombine.high %v1503_v11, %v1507_v52  ;;  %v1367_v42 = vld [vmem:[%s15084_s12 + $0x2090] sm:$0xff]  ;;  %v14285_v32 = vcombine.low %v1503_v11, %v1507_v52 }
 0x443   : > { %v11156_v10 = vpop.f32.mrf.mxu1  ;;  %11450 = vmatprep.subr.bf16.mxu1 %v14310_v34  ;;  %11439 = vmatprep.mubr.bf16.mxu0 %v15463_v0  ;;  %v1371_v15 = vld [vmem:[%s15084_s12 + $0x20b0] sm:$0xff]  ;;  %v14157_v34 = vcombine.low %v1375_v6, %v1379_v58 }
 0x444   : > { %v16468_v38 = vadd.f32 %v11156_v10, %v11115_v44  ;;  %v11117_v18 = vpop.f32.mrf.mxu0  ;;  %11480 = vmatprep.mubr.bf16.mxu1 %v15470_v3  ;;  %v1495_v22 = vld [vmem:[%s15084_s12 + $0x2490] sm:$0xff]  ;;  %v14150_v33 = vcombine.high %v1367_v42, %v1371_v15  ;;  %v14149_v44 = vcombine.low %v1367_v42, %v1371_v15 }
 0x445   : > { %v11158_v43 = vpop.f32.mrf.mxu1  ;;  %11410 = vmatpush1.bf16.msra.mxu0 %v14181_v27  ;;  %v1499_v31 = vld [vmem:[%s15084_s12 + $0x24b0] sm:$0xff] }
 0x446   : > { %11451 = vmatpush1.bf16.msra.mxu1 %v14309_v39  ;;  %v11118_v49 = vpop.f32.mrf.mxu0  ;;  %11411 = vmatprep.subr.bf16.mxu0 %v14174_v46  ;;  %v14278_v20 = vcombine.high %v1495_v22, %v1499_v31  ;;  %v1359_v36 = vld [vmem:[%s15084_s12 + $0x2050] sm:$0xff]  ;;  %v14277_v39 = vcombine.low %v1495_v22, %v1499_v31 }
 0x447   : > { %v11159_v40 = vpop.f32.mrf.mxu1  ;;  %11452 = vmatprep.subr.bf16.mxu1 %v14302_v51  ;;  %v1363_v35 = vld [vmem:[%s15084_s12 + $0x2070] sm:$0xff] }
 0x448   : > { %v1487_v7 = vld [vmem:[%s15084_s12 + $0x2450] sm:$0xff]  ;;  %v14142_v46 = vcombine.high %v1359_v36, %v1363_v35  ;;  %v14141_v63 = vcombine.low %v1359_v36, %v1363_v35 }
 0x449   : > { %11412 = vmatpush1.bf16.msra.mxu0 %v14173_v62  ;;  %v1491_v27 = vld [vmem:[%s15084_s12 + $0x2470] sm:$0xff] }
 0x44a   : > { %11453 = vmatpush1.bf16.msra.mxu1 %v14301_v14  ;;  %11413 = vmatprep.subr.bf16.mxu0 %v14166_v1  ;;  %v14270_v10 = vcombine.high %v1487_v7, %v1491_v27  ;;  %v1351_v51 = vld [vmem:[%s15084_s12 + $0x2010] sm:$0xff]  ;;  %v14269_v13 = vcombine.low %v1487_v7, %v1491_v27 }
 0x44b   : > { %11454 = vmatprep.subr.bf16.mxu1 %v14294_v8  ;;  %v1355_v56 = vld [vmem:[%s15084_s12 + $0x2030] sm:$0xff] }
 0x44c   : > { %v1479_v4 = vld [vmem:[%s15084_s12 + $0x2410] sm:$0xff]  ;;  %v14134_v43 = vcombine.high %v1351_v51, %v1355_v56  ;;  %v14133_v8 = vcombine.low %v1351_v51, %v1355_v56 }
 0x44d   : > { %11414 = vmatpush1.bf16.msra.mxu0 %v14165_v55  ;;  %v1483_v18 = vld [vmem:[%s15084_s12 + $0x2430] sm:$0xff] }
 0x44e   : > { %11455 = vmatpush1.bf16.msra.mxu1 %v14293_v57  ;;  %11415 = vmatprep.subr.bf16.mxu0 %v14158_v54  ;;  %v14262_v62 = vcombine.high %v1479_v4, %v1483_v18  ;;  %v1471_v49 = vld [vmem:[%s15084_s12 + $0x23d0] sm:$0xff]  ;;  %v14261_v6 = vcombine.low %v1479_v4, %v1483_v18 }
 0x44f   : > { %11456 = vmatprep.subr.bf16.mxu1 %v14286_v61  ;;  %v1475_v14 = vld [vmem:[%s15084_s12 + $0x23f0] sm:$0xff] }
 0x450   : > { %v1599_v1 = vld [vmem:[%s15084_s12 + $0x27d0] sm:$0xff]  ;;  %v14254_v58 = vcombine.high %v1471_v49, %v1475_v14  ;;  %v14253_v61 = vcombine.low %v1471_v49, %v1475_v14 }
 0x451   : > { %11416 = vmatpush1.bf16.msra.mxu0 %v14157_v34  ;;  %v1603_v40 = vld [vmem:[%s15084_s12 + $0x27f0] sm:$0xff] }
 0x452   : > { %11457 = vmatpush1.bf16.msra.mxu1 %v14285_v32  ;;  %11417 = vmatprep.subr.bf16.mxu0 %v14150_v33  ;;  %v14382_v11 = vcombine.high %v1599_v1, %v1603_v40  ;;  %v1463_v52 = vld [vmem:[%s15084_s12 + $0x2390] sm:$0xff]  ;;  %v14381_v42 = vcombine.low %v1599_v1, %v1603_v40 }
 0x453   : > { %11458 = vmatprep.subr.bf16.mxu1 %v14278_v20  ;;  %v1467_v55 = vld [vmem:[%s15084_s12 + $0x23b0] sm:$0xff] }
 0x454   : > { %v1591_v57 = vld [vmem:[%s15084_s12 + $0x2790] sm:$0xff]  ;;  %v14246_v15 = vcombine.high %v1463_v52, %v1467_v55  ;;  %v14245_v20 = vcombine.low %v1463_v52, %v1467_v55 }
 0x455   : > { %11418 = vmatpush1.bf16.msra.mxu0 %v14149_v44  ;;  %v1595_v54 = vld [vmem:[%s15084_s12 + $0x27b0] sm:$0xff] }
 0x456   : > { %11459 = vmatpush1.bf16.msra.mxu1 %v14277_v39  ;;  %11419 = vmatprep.subr.bf16.mxu0 %v14142_v46  ;;  %v14374_v22 = vcombine.high %v1591_v57, %v1595_v54  ;;  %v1455_v31 = vld [vmem:[%s15084_s12 + $0x2350] sm:$0xff]  ;;  %v14373_v36 = vcombine.low %v1591_v57, %v1595_v54 }
 0x457   : > { %11460 = vmatprep.subr.bf16.mxu1 %v14270_v10  ;;  %v1459_v34 = vld [vmem:[%s15084_s12 + $0x2370] sm:$0xff] }
 0x458   : > { %v1583_v32 = vld [vmem:[%s15084_s12 + $0x2750] sm:$0xff]  ;;  %v14238_v35 = vcombine.high %v1455_v31, %v1459_v34  ;;  %v14237_v10 = vcombine.low %v1455_v31, %v1459_v34 }
 0x459   : > { %11420 = vmatpush1.bf16.msra.mxu0 %v14141_v63  ;;  %v1587_v33 = vld [vmem:[%s15084_s12 + $0x2770] sm:$0xff] }
 0x45a   : > { %11461 = vmatpush1.bf16.msra.mxu1 %v14269_v13  ;;  %11421 = vmatprep.subr.bf16.mxu0 %v14134_v43  ;;  %v14366_v7 = vcombine.high %v1583_v32, %v1587_v33  ;;  %v1447_v27 = vld [vmem:[%s15084_s12 + $0x2310] sm:$0xff]  ;;  %v14365_v51 = vcombine.low %v1583_v32, %v1587_v33 }
 0x45b   : > { %11462 = vmatprep.subr.bf16.mxu1 %v14262_v62  ;;  %v1451_v44 = vld [vmem:[%s15084_s12 + $0x2330] sm:$0xff] }
 0x45c   : > { %v1575_v39 = vld [vmem:[%s15084_s12 + $0x2710] sm:$0xff]  ;;  %v14230_v56 = vcombine.high %v1447_v27, %v1451_v44  ;;  %v14229_v62 = vcombine.low %v1447_v27, %v1451_v44 }
 0x45d   : > { %11422 = vmatpush1.bf16.msra.mxu0 %v14133_v8  ;;  %v1579_v46 = vld [vmem:[%s15084_s12 + $0x2730] sm:$0xff] }
 0x45e   : > { %11463 = vmatpush1.bf16.msra.mxu1 %v14261_v6  ;;  %11423 = vmatprep.subr.bf16.mxu0 %v14254_v58  ;;  %v14358_v4 = vcombine.high %v1575_v39, %v1579_v46  ;;  %v1439_v18 = vld [vmem:[%s15084_s12 + $0x22d0] sm:$0xff]  ;;  %v14357_v49 = vcombine.low %v1575_v39, %v1579_v46 }
 0x45f   : > { %11464 = vmatprep.subr.bf16.mxu1 %v14382_v11  ;;  %v1443_v63 = vld [vmem:[%s15084_s12 + $0x22f0] sm:$0xff] }
 0x460   : > { %v1567_v13 = vld [vmem:[%s15084_s12 + $0x26d0] sm:$0xff]  ;;  %v14222_v14 = vcombine.high %v1439_v18, %v1443_v63  ;;  %v14221_v11 = vcombine.low %v1439_v18, %v1443_v63 }
 0x461   : > { %11424 = vmatpush2.bf16.msra.mxu0 %v14253_v61  ;;  %v1571_v43 = vld [vmem:[%s15084_s12 + $0x26f0] sm:$0xff] }
 0x462   : > { %11465 = vmatpush2.bf16.msra.mxu1 %v14381_v42  ;;  %11425 = vmatprep.subr.bf16.mxu0 %v14246_v15  ;;  %v14350_v1 = vcombine.high %v1567_v13, %v1571_v43  ;;  %v1431_v40 = vld [vmem:[%s15084_s12 + $0x2290] sm:$0xff]  ;;  %v14349_v52 = vcombine.low %v1567_v13, %v1571_v43 }
 0x463   : > { %11466 = vmatprep.subr.bf16.mxu1 %v14374_v22  ;;  %v1435_v8 = vld [vmem:[%s15084_s12 + $0x22b0] sm:$0xff] }
 0x464   : > { %v1559_v6 = vld [vmem:[%s15084_s12 + $0x2690] sm:$0xff]  ;;  %v14214_v55 = vcombine.high %v1431_v40, %v1435_v8  ;;  %v14213_v22 = vcombine.low %v1431_v40, %v1435_v8 }
 0x465   : > { %11426 = vmatpush2.bf16.msra.mxu0 %v14245_v20  ;;  %v1563_v58 = vld [vmem:[%s15084_s12 + $0x26b0] sm:$0xff] }
 0x466   : > { %11467 = vmatpush2.bf16.msra.mxu1 %v14373_v36  ;;  %11427 = vmatprep.subr.bf16.mxu0 %v14238_v35  ;;  %v14342_v57 = vcombine.high %v1559_v6, %v1563_v58  ;;  %v1423_v54 = vld [vmem:[%s15084_s12 + $0x2250] sm:$0xff]  ;;  %v14341_v31 = vcombine.low %v1559_v6, %v1563_v58 }
 0x467   : > { %11468 = vmatprep.subr.bf16.mxu1 %v14366_v7  ;;  %v1427_v61 = vld [vmem:[%s15084_s12 + $0x2270] sm:$0xff] }
 0x468   : > { %v1551_v42 = vld [vmem:[%s15084_s12 + $0x2650] sm:$0xff]  ;;  %v14206_v34 = vcombine.high %v1423_v54, %v1427_v61  ;;  %v14205_v7 = vcombine.low %v1423_v54, %v1427_v61 }
 0x469   : > { %11428 = vmatpush2.bf16.msra.mxu0 %v14237_v10  ;;  %v1555_v15 = vld [vmem:[%s15084_s12 + $0x2670] sm:$0xff] }
 0x46a   : > { %11469 = vmatpush2.bf16.msra.mxu1 %v14365_v51  ;;  %11429 = vmatprep.subr.bf16.mxu0 %v14230_v56  ;;  %v14334_v32 = vcombine.high %v1551_v42, %v1555_v15  ;;  %v1415_v33 = vld [vmem:[%s15084_s12 + $0x2210] sm:$0xff]  ;;  %v14333_v27 = vcombine.low %v1551_v42, %v1555_v15 }
 0x46b   : > { %11470 = vmatprep.subr.bf16.mxu1 %v14358_v4  ;;  %v1419_v20 = vld [vmem:[%s15084_s12 + $0x2230] sm:$0xff] }
 0x46c   : > { %v1543_v36 = vld [vmem:[%s15084_s12 + $0x2610] sm:$0xff]  ;;  %v14198_v44 = vcombine.high %v1415_v33, %v1419_v20  ;;  %v14197_v4 = vcombine.low %v1415_v33, %v1419_v20 }
 0x46d   : > { %11430 = vmatpush2.bf16.msra.mxu0 %v14229_v62  ;;  %v1547_v35 = vld [vmem:[%s15084_s12 + $0x2630] sm:$0xff] }
 0x46e   : > { %11471 = vmatpush2.bf16.msra.mxu1 %v14357_v49  ;;  %11431 = vmatprep.subr.bf16.mxu0 %v14222_v14  ;;  %v14326_v39 = vcombine.high %v1543_v36, %v1547_v35  ;;  %v1663_v46 = vld [vmem:[%s15084_s12 + $0x29d0] sm:$0xff]  ;;  %v14325_v18 = vcombine.low %v1543_v36, %v1547_v35 }
 0x46f   : > { %11472 = vmatprep.subr.bf16.mxu1 %v14350_v1  ;;  %v1667_v10 = vld [vmem:[%s15084_s12 + $0x29f0] sm:$0xff] }
 0x470   : > { %v1791_v51 = vld [vmem:[%s15084_s12 + $0x2dd0] sm:$0xff]  ;;  %v14446_v63 = vcombine.high %v1663_v46, %v1667_v10  ;;  %v14445_v1 = vcombine.low %v1663_v46, %v1667_v10 }
 0x471   : > { %11432 = vmatpush2.bf16.msra.mxu0 %v14221_v11  ;;  %v1795_v56 = vld [vmem:[%s15084_s12 + $0x2df0] sm:$0xff] }
 0x472   : > { %11473 = vmatpush2.bf16.msra.mxu1 %v14349_v52  ;;  %11433 = vmatprep.subr.bf16.mxu0 %v14214_v55  ;;  %v14574_v13 = vcombine.high %v1791_v51, %v1795_v56  ;;  %v1655_v43 = vld [vmem:[%s15084_s12 + $0x2990] sm:$0xff]  ;;  %v14573_v40 = vcombine.low %v1791_v51, %v1795_v56 }
 0x473   : > { %11474 = vmatprep.subr.bf16.mxu1 %v14342_v57  ;;  %v1659_v62 = vld [vmem:[%s15084_s12 + $0x29b0] sm:$0xff] }
 0x474   : > { %v1783_v49 = vld [vmem:[%s15084_s12 + $0x2d90] sm:$0xff]  ;;  %v14438_v8 = vcombine.high %v1655_v43, %v1659_v62  ;;  %v14437_v42 = vcombine.low %v1655_v43, %v1659_v62 }
 0x475   : > { %11434 = vmatpush2.bf16.msra.mxu0 %v14213_v22  ;;  %v1787_v14 = vld [vmem:[%s15084_s12 + $0x2db0] sm:$0xff] }
 0x476   : > { %11475 = vmatpush2.bf16.msra.mxu1 %v14341_v31  ;;  %11435 = vmatprep.subr.bf16.mxu0 %v14206_v34  ;;  %v14566_v6 = vcombine.high %v1783_v49, %v1787_v14  ;;  %v1647_v58 = vld [vmem:[%s15084_s12 + $0x2950] sm:$0xff]  ;;  %v14565_v22 = vcombine.low %v1783_v49, %v1787_v14 }
 0x477   : > { %11476 = vmatprep.subr.bf16.mxu1 %v14334_v32  ;;  %v1651_v11 = vld [vmem:[%s15084_s12 + $0x2970] sm:$0xff] }
 0x478   : > { %v1775_v55 = vld [vmem:[%s15084_s12 + $0x2d50] sm:$0xff]  ;;  %v14430_v31 = vcombine.high %v1647_v58, %v1651_v11 }
 0x479   : > { %11436 = vmatpush2.bf16.msra.mxu0 %v14205_v7  ;;  %v1779_v57 = vld [vmem:[%s15084_s12 + $0x2d70] sm:$0xff] }
 0x47a   : > { %11477 = vmatpush2.bf16.msra.mxu1 %v14333_v27  ;;  %11437 = vmatprep.subr.bf16.mxu0 %v14198_v44  ;;  %v1639_v20 = vld [vmem:[%s15084_s12 + $0x2910] sm:$0xff]  ;;  %v14557_v10 = vcombine.low %v1775_v55, %v1779_v57 }
 0x47b   : > { %11478 = vmatprep.subr.bf16.mxu1 %v14326_v39  ;;  %v1643_v36 = vld [vmem:[%s15084_s12 + $0x2930] sm:$0xff] }
 0x47c   : > { %v1767_v7 = vld [vmem:[%s15084_s12 + $0x2d10] sm:$0xff]  ;;  %v14422_v51 = vcombine.high %v1639_v20, %v1643_v36  ;;  %v14421_v62 = vcombine.low %v1639_v20, %v1643_v36 }
 0x47d   : > { %11438 = vmatpush2.bf16.msra.mxu0 %v14197_v4  ;;  %v1771_v27 = vld [vmem:[%s15084_s12 + $0x2d30] sm:$0xff] }
 0x47e   : > { %11479 = vmatpush2.bf16.msra.mxu1 %v14325_v18  ;;  %11489 = vmatprep.subr.bf16.mxu0 %v14446_v63  ;;  %v14550_v4 = vcombine.high %v1767_v7, %v1771_v27  ;;  %v1631_v18 = vld [vmem:[%s15084_s12 + $0x28d0] sm:$0xff]  ;;  %v14549_v49 = vcombine.low %v1767_v7, %v1771_v27 }
 0x47f   : > { %11530 = vmatprep.subr.bf16.mxu1 %v14574_v13  ;;  %v1635_v63 = vld [vmem:[%s15084_s12 + $0x28f0] sm:$0xff] }
 0x480   : > { %v11195_v52 = vpop.f32.mrf.mxu0  ;;  %11440 = vmatmul.mubr.bf16.vlgmr.msra.gmra.mxu0 %v15539_v2  ;;  %v1759_v13 = vld [vmem:[%s15084_s12 + $0x2cd0] sm:$0xff]  ;;  %v14414_v14 = vcombine.high %v1631_v18, %v1635_v63 }
 0x481   : > { %v11196_v54 = vadd.f32 %v11195_v52, %v16463_v29  ;;  %v11236_v61 = vpop.f32.mrf.mxu1  ;;  %11481 = vmatmul.mubr.bf16.vlgmr.msra.gmra.mxu1 %v15548_v12  ;;  %11490 = vmatpush1.bf16.msra.mxu0 %v14445_v1  ;;  %v14558_v29 = vcombine.high %v1775_v55, %v1779_v57  ;;  %v1763_v43 = vld [vmem:[%s15084_s12 + $0x2cf0] sm:$0xff] }
 0x482   : > { %11531 = vmatpush1.bf16.msra.mxu1 %v14573_v40  ;;  %v11197_v15 = vpop.f32.mrf.mxu0  ;;  %11491 = vmatprep.subr.bf16.mxu0 %v14438_v8  ;;  %v14542_v1 = vcombine.high %v1759_v13, %v1763_v43  ;;  %v1623_v40 = vld [vmem:[%s15084_s12 + $0x2890] sm:$0xff]  ;;  %v14541_v52 = vcombine.low %v1759_v13, %v1763_v43 }
 0x483   : > { %v16536_v34 = vadd.f32 %v11236_v61, %v11196_v54  ;;  %v11198_v32 = vadd.f32 %v11197_v15, %v16468_v38  ;;  %v11238_v33 = vpop.f32.mrf.mxu1  ;;  %11532 = vmatprep.subr.bf16.mxu1 %v14566_v6  ;;  %11521 = vmatprep.mubr.bf16.mxu0 %v15557_v24  ;;  %v14429_v38 = vcombine.low %v1647_v58, %v1651_v11  ;;  %v1627_v8 = vld [vmem:[%s15084_s12 + $0x28b0] sm:$0xff] }
 0x484   : > { %v11199_v35 = vpop.f32.mrf.mxu0  ;;  %11562 = vmatprep.mubr.bf16.mxu1 %v15564_v26  ;;  %v1751_v6 = vld [vmem:[%s15084_s12 + $0x2c90] sm:$0xff]  ;;  %v14413_v11 = vcombine.low %v1631_v18, %v1635_v63  ;;  %v14406_v55 = vcombine.high %v1623_v40, %v1627_v8 }
 0x485   : > { %v16545_v44 = vadd.f32 %v11238_v33, %v11198_v32  ;;  %v11240_v39 = vpop.f32.mrf.mxu1  ;;  %11492 = vmatpush1.bf16.msra.mxu0 %v14437_v42  ;;  %v1755_v58 = vld [vmem:[%s15084_s12 + $0x2cb0] sm:$0xff] }
 0x486   : > { %11533 = vmatpush1.bf16.msra.mxu1 %v14565_v22  ;;  %v11200_v46 = vpop.f32.mrf.mxu0  ;;  %11493 = vmatprep.subr.bf16.mxu0 %v14430_v31  ;;  %v14534_v57 = vcombine.high %v1751_v6, %v1755_v58  ;;  %v1615_v54 = vld [vmem:[%s15084_s12 + $0x2850] sm:$0xff]  ;;  %v14405_v22 = vcombine.low %v1623_v40, %v1627_v8  ;;  %v14533_v31 = vcombine.low %v1751_v6, %v1755_v58 }
 0x487   : > { %v11241_v56 = vpop.f32.mrf.mxu1  ;;  %11534 = vmatprep.subr.bf16.mxu1 %v14558_v29  ;;  %v1619_v61 = vld [vmem:[%s15084_s12 + $0x2870] sm:$0xff] }
 0x488   : > { %v1743_v42 = vld [vmem:[%s15084_s12 + $0x2c50] sm:$0xff]  ;;  %v14398_v32 = vcombine.high %v1615_v54, %v1619_v61  ;;  %v14397_v7 = vcombine.low %v1615_v54, %v1619_v61 }
 0x489   : > { %11494 = vmatpush1.bf16.msra.mxu0 %v14429_v38  ;;  %v1747_v15 = vld [vmem:[%s15084_s12 + $0x2c70] sm:$0xff] }
 0x48a   : > { %11535 = vmatpush1.bf16.msra.mxu1 %v14557_v10  ;;  %11495 = vmatprep.subr.bf16.mxu0 %v14422_v51  ;;  %v14526_v33 = vcombine.high %v1743_v42, %v1747_v15  ;;  %v1607_v29 = vld [vmem:[%s15084_s12 + $0x2810] sm:$0xff]  ;;  %v14525_v27 = vcombine.low %v1743_v42, %v1747_v15 }
 0x48b   : > { %11536 = vmatprep.subr.bf16.mxu1 %v14550_v4  ;;  %v1611_v20 = vld [vmem:[%s15084_s12 + $0x2830] sm:$0xff] }
 0x48c   : > { %v1735_v36 = vld [vmem:[%s15084_s12 + $0x2c10] sm:$0xff]  ;;  %v14390_v39 = vcombine.high %v1607_v29, %v1611_v20  ;;  %v14389_v4 = vcombine.low %v1607_v29, %v1611_v20 }
 0x48d   : > { %11496 = vmatpush1.bf16.msra.mxu0 %v14421_v62  ;;  %v1739_v35 = vld [vmem:[%s15084_s12 + $0x2c30] sm:$0xff] }
 0x48e   : > { %11537 = vmatpush1.bf16.msra.mxu1 %v14549_v49  ;;  %11497 = vmatprep.subr.bf16.mxu0 %v14414_v14  ;;  %v14518_v38 = vcombine.high %v1735_v36, %v1739_v35  ;;  %v1727_v46 = vld [vmem:[%s15084_s12 + $0x2bd0] sm:$0xff]  ;;  %v14517_v18 = vcombine.low %v1735_v36, %v1739_v35 }
 0x48f   : > { %11538 = vmatprep.subr.bf16.mxu1 %v14542_v1  ;;  %v1731_v10 = vld [vmem:[%s15084_s12 + $0x2bf0] sm:$0xff] }
 0x490   : > { %v1855_v51 = vld [vmem:[%s15084_s12 + $0x2fd0] sm:$0xff]  ;;  %v14510_v63 = vcombine.high %v1727_v46, %v1731_v10  ;;  %v14509_v1 = vcombine.low %v1727_v46, %v1731_v10 }
 0x491   : > { %11498 = vmatpush1.bf16.msra.mxu0 %v14413_v11  ;;  %v1859_v56 = vld [vmem:[%s15084_s12 + $0x2ff0] sm:$0xff] }
 0x492   : > { %11539 = vmatpush1.bf16.msra.mxu1 %v14541_v52  ;;  %11499 = vmatprep.subr.bf16.mxu0 %v14406_v55  ;;  %v14638_v13 = vcombine.high %v1855_v51, %v1859_v56  ;;  %v1719_v43 = vld [vmem:[%s15084_s12 + $0x2b90] sm:$0xff]  ;;  %v14637_v40 = vcombine.low %v1855_v51, %v1859_v56 }
 0x493   : > { %11540 = vmatprep.subr.bf16.mxu1 %v14534_v57  ;;  %v1723_v62 = vld [vmem:[%s15084_s12 + $0x2bb0] sm:$0xff] }
 0x494   : > { %v1847_v49 = vld [vmem:[%s15084_s12 + $0x2f90] sm:$0xff]  ;;  %v14502_v8 = vcombine.high %v1719_v43, %v1723_v62  ;;  %v14501_v57 = vcombine.low %v1719_v43, %v1723_v62 }
 0x495   : > { %11500 = vmatpush1.bf16.msra.mxu0 %v14405_v22  ;;  %v1851_v14 = vld [vmem:[%s15084_s12 + $0x2fb0] sm:$0xff] }
 0x496   : > { %11541 = vmatpush1.bf16.msra.mxu1 %v14533_v31  ;;  %11501 = vmatprep.subr.bf16.mxu0 %v14398_v32  ;;  %v14630_v6 = vcombine.high %v1847_v49, %v1851_v14  ;;  %v1711_v58 = vld [vmem:[%s15084_s12 + $0x2b50] sm:$0xff]  ;;  %v14629_v54 = vcombine.low %v1847_v49, %v1851_v14 }
 0x497   : > { %11542 = vmatprep.subr.bf16.mxu1 %v14526_v33  ;;  %v1715_v11 = vld [vmem:[%s15084_s12 + $0x2b70] sm:$0xff] }
 0x498   : > { %v1839_v52 = vld [vmem:[%s15084_s12 + $0x2f50] sm:$0xff]  ;;  %v14494_v61 = vcombine.high %v1711_v58, %v1715_v11  ;;  %v14493_v33 = vcombine.low %v1711_v58, %v1715_v11 }
 0x499   : > { %11502 = vmatpush1.bf16.msra.mxu0 %v14397_v7  ;;  %v1843_v55 = vld [vmem:[%s15084_s12 + $0x2f70] sm:$0xff] }
 0x49a   : > { %11543 = vmatpush1.bf16.msra.mxu1 %v14525_v27  ;;  %11503 = vmatprep.subr.bf16.mxu0 %v14390_v39  ;;  %v14622_v42 = vcombine.high %v1839_v52, %v1843_v55  ;;  %v1703_v15 = vld [vmem:[%s15084_s12 + $0x2b10] sm:$0xff]  ;;  %v14621_v29 = vcombine.low %v1839_v52, %v1843_v55 }
 0x49b   : > { %11544 = vmatprep.subr.bf16.mxu1 %v14518_v38  ;;  %v1707_v22 = vld [vmem:[%s15084_s12 + $0x2b30] sm:$0xff] }
 0x49c   : > { %v1831_v31 = vld [vmem:[%s15084_s12 + $0x2f10] sm:$0xff]  ;;  %v14486_v20 = vcombine.high %v1703_v15, %v1707_v22  ;;  %v14485_v38 = vcombine.low %v1703_v15, %v1707_v22 }
 0x49d   : > { %11504 = vmatpush1.bf16.msra.mxu0 %v14389_v4  ;;  %v1835_v32 = vld [vmem:[%s15084_s12 + $0x2f30] sm:$0xff] }
 0x49e   : > { %11545 = vmatpush1.bf16.msra.mxu1 %v14517_v18  ;;  %11505 = vmatprep.subr.bf16.mxu0 %v14510_v63  ;;  %v14614_v36 = vcombine.high %v1831_v31, %v1835_v32  ;;  %v1695_v35 = vld [vmem:[%s15084_s12 + $0x2ad0] sm:$0xff]  ;;  %v14613_v46 = vcombine.low %v1831_v31, %v1835_v32 }
 0x49f   : > { %11546 = vmatprep.subr.bf16.mxu1 %v14638_v13  ;;  %v1699_v7 = vld [vmem:[%s15084_s12 + $0x2af0] sm:$0xff] }
 0x4a0   : > { %v1823_v27 = vld [vmem:[%s15084_s12 + $0x2ed0] sm:$0xff]  ;;  %v14478_v10 = vcombine.high %v1695_v35, %v1699_v7  ;;  %v14477_v13 = vcombine.low %v1695_v35, %v1699_v7 }
 0x4a1   : > { %11506 = vmatpush2.bf16.msra.mxu0 %v14509_v1  ;;  %v1827_v39 = vld [vmem:[%s15084_s12 + $0x2ef0] sm:$0xff] }
 0x4a2   : > { %11547 = vmatpush2.bf16.msra.mxu1 %v14637_v40  ;;  %11507 = vmatprep.subr.bf16.mxu0 %v14502_v8  ;;  %v14606_v51 = vcombine.high %v1823_v27, %v1827_v39  ;;  %v1687_v56 = vld [vmem:[%s15084_s12 + $0x2a90] sm:$0xff]  ;;  %v14605_v43 = vcombine.low %v1823_v27, %v1827_v39 }
 0x4a3   : > { %11548 = vmatprep.subr.bf16.mxu1 %v14630_v6  ;;  %v1691_v4 = vld [vmem:[%s15084_s12 + $0x2ab0] sm:$0xff] }
 0x4a4   : > { %v1815_v18 = vld [vmem:[%s15084_s12 + $0x2e90] sm:$0xff]  ;;  %v14470_v62 = vcombine.high %v1687_v56, %v1691_v4  ;;  %v14469_v6 = vcombine.low %v1687_v56, %v1691_v4 }
 0x4a5   : > { %11508 = vmatpush2.bf16.msra.mxu0 %v14501_v57  ;;  %v1819_v63 = vld [vmem:[%s15084_s12 + $0x2eb0] sm:$0xff] }
 0x4a6   : > { %11549 = vmatpush2.bf16.msra.mxu1 %v14629_v54  ;;  %11509 = vmatprep.subr.bf16.mxu0 %v14494_v61  ;;  %v14598_v49 = vcombine.high %v1815_v18, %v1819_v63  ;;  %v1679_v14 = vld [vmem:[%s15084_s12 + $0x2a50] sm:$0xff]  ;;  %v14597_v58 = vcombine.low %v1815_v18, %v1819_v63 }
 0x4a7   : > { %11550 = vmatprep.subr.bf16.mxu1 %v14622_v42  ;;  %v1683_v1 = vld [vmem:[%s15084_s12 + $0x2a70] sm:$0xff] }
 0x4a8   : > { %v1807_v40 = vld [vmem:[%s15084_s12 + $0x2e50] sm:$0xff]  ;;  %v14462_v11 = vcombine.high %v1679_v14, %v1683_v1  ;;  %v14461_v42 = vcombine.low %v1679_v14, %v1683_v1 }
 0x4a9   : > { %11510 = vmatpush2.bf16.msra.mxu0 %v14493_v33  ;;  %v1811_v8 = vld [vmem:[%s15084_s12 + $0x2e70] sm:$0xff] }
 0x4aa   : > { %11551 = vmatpush2.bf16.msra.mxu1 %v14621_v29  ;;  %11511 = vmatprep.subr.bf16.mxu0 %v14486_v20  ;;  %v14590_v52 = vcombine.high %v1807_v40, %v1811_v8  ;;  %v1671_v55 = vld [vmem:[%s15084_s12 + $0x2a10] sm:$0xff]  ;;  %v14589_v15 = vcombine.low %v1807_v40, %v1811_v8  ;;  %v384_v29 = vld [vmem:[%s15084_s12 + $0x1d8] sm:$0xff] }
 0x4ab   : > { %11552 = vmatprep.subr.bf16.mxu1 %v14614_v36  ;;  %v1675_v57 = vld [vmem:[%s15084_s12 + $0x2a30] sm:$0xff]  ;;  %v388_v20 = vld [vmem:[%s15084_s12 + $0x1f8] sm:$0xff] }
 0x4ac   : > { %v1799_v54 = vld [vmem:[%s15084_s12 + $0x2e10] sm:$0xff]  ;;  %v14454_v22 = vcombine.high %v1671_v55, %v1675_v57  ;;  %v14453_v36 = vcombine.low %v1671_v55, %v1675_v57  ;;  %v13168_v27 = vcombine.high %v384_v29, %v388_v20  ;;  %v13167_v56 = vcombine.low %v384_v29, %v388_v20 }
 0x4ad   : > { %11512 = vmatpush2.bf16.msra.mxu0 %v14485_v38  ;;  %v1803_v61 = vld [vmem:[%s15084_s12 + $0x2e30] sm:$0xff] }
 0x4ae   : > { %11553 = vmatpush2.bf16.msra.mxu1 %v14613_v46  ;;  %11513 = vmatprep.subr.bf16.mxu0 %v14478_v10  ;;  %v14582_v31 = vcombine.high %v1799_v54, %v1803_v61  ;;  %v1919_v32 = vld [vmem:[%s15084_s12 + $0x31d0] sm:$0xff]  ;;  %v14581_v35 = vcombine.low %v1799_v54, %v1803_v61  ;;  %v376_v46 = vld [vmem:[%s15084_s12 + $0x198] sm:$0xff] }
 0x4af   : > { %11554 = vmatprep.subr.bf16.mxu1 %v14606_v51  ;;  %v1923_v33 = vld [vmem:[%s15084_s12 + $0x31f0] sm:$0xff]  ;;  %v380_v10 = vld [vmem:[%s15084_s12 + $0x1b8] sm:$0xff] }
 0x4b0   : > { %v14702_v7 = vcombine.high %v1919_v32, %v1923_v33  ;;  %v1911_v39 = vld [vmem:[%s15084_s12 + $0x3190] sm:$0xff]  ;;  %v14701_v51 = vcombine.low %v1919_v32, %v1923_v33  ;;  %v13160_v18 = vcombine.high %v376_v46, %v380_v10 }
 0x4b1   : > { %11514 = vmatpush2.bf16.msra.mxu0 %v14477_v13  ;;  %v1915_v38 = vld [vmem:[%s15084_s12 + $0x31b0] sm:$0xff] }
 0x4b2   : > { %11555 = vmatpush2.bf16.msra.mxu1 %v14605_v43  ;;  %11515 = vmatprep.subr.bf16.mxu0 %v14470_v62  ;;  %v14694_v4 = vcombine.high %v1911_v39, %v1915_v38  ;;  %v1903_v63 = vld [vmem:[%s15084_s12 + $0x3150] sm:$0xff]  ;;  %v368_v62 = vld [vmem:[%s15084_s12 + $0x158] sm:$0xff]  ;;  %v14693_v40 = vcombine.low %v1911_v39, %v1915_v38 }
 0x4b3   : > { %11556 = vmatprep.subr.bf16.mxu1 %v14598_v49  ;;  %v1907_v13 = vld [vmem:[%s15084_s12 + $0x3170] sm:$0xff]  ;;  %v372_v49 = vld [vmem:[%s15084_s12 + $0x178] sm:$0xff] }
 0x4b4   : > { %v1895_v57 = vld [vmem:[%s15084_s12 + $0x3110] sm:$0xff]  ;;  %v13151_v33 = vcombine.low %v368_v62, %v372_v49 }
 0x4b5   : > { %11516 = vmatpush2.bf16.msra.mxu0 %v14469_v6  ;;  %v13159_v6 = vcombine.low %v376_v46, %v380_v10  ;;  %v1899_v54 = vld [vmem:[%s15084_s12 + $0x3130] sm:$0xff] }
 0x4b6   : > { %11557 = vmatpush2.bf16.msra.mxu1 %v14597_v58  ;;  %11517 = vmatprep.subr.bf16.mxu0 %v14462_v11  ;;  %v14686_v58 = vcombine.high %v1903_v63, %v1907_v13  ;;  %v14678_v29 = vcombine.high %v1895_v57, %v1899_v54  ;;  %v14677_v39 = vcombine.low %v1895_v57, %v1899_v54  ;;  %v328_v57 = vld [vmem:[%s15084_s12 + $0x18] sm:$0xff] }
 0x4b7   : > { %11558 = vmatprep.subr.bf16.mxu1 %v14590_v52  ;;  %v332_v54 = vld [vmem:[%s15084_s12 + $0x38] sm:$0xff] }
 0x4b9   : > { %11518 = vmatpush2.bf16.msra.mxu0 %v14461_v42  ;;  %v360_v42 = vld [vmem:[%s15084_s12 + $0x118] sm:$0xff] }
 0x4ba   : > { %11559 = vmatpush2.bf16.msra.mxu1 %v14589_v15  ;;  %11519 = vmatprep.subr.bf16.mxu0 %v14454_v22  ;;  %v364_v15 = vld [vmem:[%s15084_s12 + $0x138] sm:$0xff] }
 0x4bb   : > { %11560 = vmatprep.subr.bf16.mxu1 %v14582_v31  ;;  %v13143_v38 = vcombine.low %v360_v42, %v364_v15 }
 0x4bd   : > { %11520 = vmatpush2.bf16.msra.mxu0 %v14453_v36  ;;  %v13144_v36 = vcombine.high %v360_v42, %v364_v15 }
 0x4be   : > { %11561 = vmatpush2.bf16.msra.mxu1 %v14581_v35  ;;  %11571 = vmatprep.subr.bf16.mxu0 %v14702_v7  ;;  %v1887_v35 = vld [vmem:[%s15084_s12 + $0x30d0] sm:$0xff]  ;;  %v352_v7 = vld [vmem:[%s15084_s12 + $0xd8] sm:$0xff] }
 0x4bf   : > { %11612 = vmatprep.subr.bf16.mxu1 %v13168_v27  ;;  %v356_v27 = vld [vmem:[%s15084_s12 + $0xf8] sm:$0xff] }
 0x4c0   : > { %v11277_v43 = vpop.f32.mrf.mxu0  ;;  %11522 = vmatmul.mubr.bf16.vlgmr.msra.gmra.mxu0 %v15635_v45  ;;  %v13136_v10 = vcombine.high %v352_v7, %v356_v27 }
 0x4c1   : > { %v11278_v14 = vadd.f32 %v11277_v43, %v16536_v34  ;;  %v11318_v1 = vpop.f32.mrf.mxu1  ;;  %11563 = vmatmul.mubr.bf16.vlgmr.msra.gmra.mxu1 %v15641_v47  ;;  %11572 = vmatpush1.bf16.msra.mxu0 %v14701_v51  ;;  %v13152_v34 = vcombine.high %v368_v62, %v372_v49  ;;  %v1879_v51 = vld [vmem:[%s15084_s12 + $0x3090] sm:$0xff] }
 0x4c2   : > { %11613 = vmatpush1.bf16.msra.mxu1 %v13167_v56  ;;  %v11279_v8 = vpop.f32.mrf.mxu0  ;;  %11573 = vmatprep.subr.bf16.mxu0 %v14694_v4  ;;  %v1883_v56 = vld [vmem:[%s15084_s12 + $0x30b0] sm:$0xff]  ;;  %v344_v4 = vld [vmem:[%s15084_s12 + $0x98] sm:$0xff] }
 0x4c3   : > { %v16610_v11 = vadd.f32 %v11318_v1, %v11278_v14  ;;  %v11280_v52 = vadd.f32 %v11279_v8, %v16545_v44  ;;  %v11320_v55 = vpop.f32.mrf.mxu1  ;;  %11614 = vmatprep.subr.bf16.mxu1 %v13160_v18  ;;  %11603 = vmatprep.mubr.bf16.mxu0 %v15021_v25  ;;  %v14685_v44 = vcombine.low %v1903_v63, %v1907_v13  ;;  %v348_v18 = vld [vmem:[%s15084_s12 + $0xb8] sm:$0xff]  ;;  %v1871_v49 = vld [vmem:[%s15084_s12 + $0x3050] sm:$0xff] }
 0x4c4   : > { %v11281_v61 = vpop.f32.mrf.mxu0  ;;  %11644 = vmatprep.mubr.bf16.mxu1 %v15125_v59  ;;  %v1891_v59 = vld [vmem:[%s15084_s12 + $0x30f0] sm:$0xff]  ;;  %v13135_v13 = vcombine.low %v352_v7, %v356_v27  ;;  %v14662_v43 = vcombine.high %v1879_v51, %v1883_v56  ;;  %v13128_v62 = vcombine.high %v344_v4, %v348_v18  ;;  %v336_v1 = vld [vmem:[%s15084_s12 + $0x58] sm:$0xff]  ;;  %v14661_v8 = vcombine.low %v1879_v51, %v1883_v56 }
 0x4c5   : > { %v16619_v22 = vadd.f32 %v11320_v55, %v11280_v52  ;;  %v11322_v31 = vpop.f32.mrf.mxu1  ;;  %11574 = vmatpush1.bf16.msra.mxu0 %v14693_v40  ;;  %v14670_v46 = vcombine.high %v1887_v35, %v1891_v59  ;;  %v14669_v63 = vcombine.low %v1887_v35, %v1891_v59  ;;  %v1875_v14 = vld [vmem:[%s15084_s12 + $0x3070] sm:$0xff]  ;;  %v340_v40 = vld [vmem:[%s15084_s12 + $0x78] sm:$0xff] }
 0x4c6   : > { %11615 = vmatpush1.bf16.msra.mxu1 %v13159_v6  ;;  %v11282_v32 = vpop.f32.mrf.mxu0  ;;  %11575 = vmatprep.subr.bf16.mxu0 %v14686_v58  ;;  %v13127_v6 = vcombine.low %v344_v4, %v348_v18  ;;  %v14654_v58 = vcombine.high %v1871_v49, %v1875_v14  ;;  %v13120_v52 = vcombine.high %v336_v1, %v340_v40  ;;  %v1863_v55 = vld [vmem:[%s15084_s12 + $0x3010] sm:$0xff]  ;;  %v504_v7 = vld [vmem:[%s15084_s12 + $0x598] sm:$0xff] }
 0x4c7   : > { %v11323_v20 = vpop.f32.mrf.mxu1  ;;  %11616 = vmatprep.subr.bf16.mxu1 %v13152_v34  ;;  %v1867_v34 = vld [vmem:[%s15084_s12 + $0x3030] sm:$0xff]  ;;  %v14653_v61 = vcombine.low %v1871_v49, %v1875_v14  ;;  %v13119_v42 = vcombine.low %v336_v1, %v340_v40  ;;  %v13112_v31 = vcombine.high %v328_v57, %v332_v54  ;;  %v516_v32 = vld [vmem:[%s15084_s12 + $0x5f8] sm:$0xff] }
 0x4c8   : > { %v14646_v15 = vcombine.high %v1863_v55, %v1867_v34  ;;  %v14645_v20 = vcombine.low %v1863_v55, %v1867_v34  ;;  %v508_v27 = vld [vmem:[%s15084_s12 + $0x5b8] sm:$0xff] }
 0x4c9   : > { %11576 = vmatpush1.bf16.msra.mxu0 %v14685_v44  ;;  %v512_v44 = vld [vmem:[%s15084_s12 + $0x5d8] sm:$0xff]  ;;  %v13288_v51 = vcombine.high %v504_v7, %v508_v27 }
 0x4ca   : > { %11617 = vmatpush1.bf16.msra.mxu1 %v13151_v33  ;;  %11577 = vmatprep.subr.bf16.mxu0 %v14678_v29  ;;  %v448_v33 = vld [vmem:[%s15084_s12 + $0x3d8] sm:$0xff]  ;;  %v13296_v35 = vcombine.high %v512_v44, %v516_v32 }
 0x4cb   : > { %11618 = vmatprep.subr.bf16.mxu1 %v13144_v36  ;;  %v452_v29 = vld [vmem:[%s15084_s12 + $0x3f8] sm:$0xff]  ;;  %v13111_v36 = vcombine.low %v328_v57, %v332_v54 }
 0x4cc   : > { %v13232_v59 = vcombine.high %v448_v33, %v452_v29  ;;  %v496_v4 = vld [vmem:[%s15084_s12 + $0x558] sm:$0xff] }
 0x4cd   : > { %11578 = vmatpush1.bf16.msra.mxu0 %v14677_v39  ;;  %v440_v39 = vld [vmem:[%s15084_s12 + $0x398] sm:$0xff] }
 0x4ce   : > { %11619 = vmatpush1.bf16.msra.mxu1 %v13143_v38  ;;  %11579 = vmatprep.subr.bf16.mxu0 %v14670_v46  ;;  %v444_v38 = vld [vmem:[%s15084_s12 + $0x3b8] sm:$0xff]  ;;  %v13295_v46 = vcombine.low %v512_v44, %v516_v32 }
 0x4cf   : > { %11620 = vmatprep.subr.bf16.mxu1 %v13136_v10  ;;  %v13231_v10 = vcombine.low %v448_v33, %v452_v29  ;;  %v13224_v56 = vcombine.high %v440_v39, %v444_v38  ;;  %v500_v18 = vld [vmem:[%s15084_s12 + $0x578] sm:$0xff]  ;;  %v13223_v49 = vcombine.low %v440_v39, %v444_v38 }
 0x4d0   : > { %v13280_v14 = vcombine.high %v496_v4, %v500_v18  ;;  %v488_v40 = vld [vmem:[%s15084_s12 + $0x518] sm:$0xff] }
 0x4d1   : > { %11580 = vmatpush1.bf16.msra.mxu0 %v14669_v63  ;;  %v14938_v63 = vld [vmem:[%s15079_s8 + $0x60] ss:$0 sps:$4 sm:$0xff]   ;;  %v480_v57 = vld [vmem:[%s15084_s12 + $0x4d8] sm:$0xff] }
 0x4d2   : > { %11621 = vmatpush1.bf16.msra.mxu1 %v13135_v13  ;;  %11581 = vmatprep.subr.bf16.mxu0 %v14662_v43  ;;  %v432_v13 = vld [vmem:[%s15084_s12 + $0x358] sm:$0xff] }
 0x4d3   : > { %11622 = vmatprep.subr.bf16.mxu1 %v13128_v62  ;;  %v436_v43 = vld [vmem:[%s15084_s12 + $0x378] sm:$0xff]  ;;  %v13287_v62 = vcombine.low %v504_v7, %v508_v27 }
 0x4d4   : > { %v13216_v1 = vcombine.high %v432_v13, %v436_v43  ;;  %v13215_v55 = vcombine.low %v432_v13, %v436_v43  ;;  %v484_v54 = vld [vmem:[%s15084_s12 + $0x4f8] sm:$0xff] }
 0x4d5   : > { %11582 = vmatpush1.bf16.msra.mxu0 %v14661_v8  ;;  %v492_v8 = vld [vmem:[%s15084_s12 + $0x538] sm:$0xff]  ;;  %v13264_v44 = vcombine.high %v480_v57, %v484_v54 }
 0x4d6   : > { %11623 = vmatpush1.bf16.msra.mxu1 %v13127_v6  ;;  %11583 = vmatprep.subr.bf16.mxu0 %v14654_v58  ;;  %v424_v6 = vld [vmem:[%s15084_s12 + $0x318] sm:$0xff] }
 0x4d7   : > { %11624 = vmatprep.subr.bf16.mxu1 %v13120_v52  ;;  %v428_v58 = vld [vmem:[%s15084_s12 + $0x338] sm:$0xff]  ;;  %v13279_v52 = vcombine.low %v496_v4, %v500_v18 }
 0x4d8   : > { %v13208_v34 = vcombine.high %v424_v6, %v428_v58  ;;  %v472_v33 = vld [vmem:[%s15084_s12 + $0x498] sm:$0xff] }
 0x4d9   : > { %11584 = vmatpush1.bf16.msra.mxu0 %v14653_v61  ;;  %v416_v61 = vld [vmem:[%s15084_s12 + $0x2d8] sm:$0xff] }
 0x4da   : > { %11625 = vmatpush1.bf16.msra.mxu1 %v13119_v42  ;;  %11585 = vmatprep.subr.bf16.mxu0 %v14646_v15  ;;  %v420_v42 = vld [vmem:[%s15084_s12 + $0x2f8] sm:$0xff]  ;;  %v13271_v15 = vcombine.low %v488_v40, %v492_v8 }
 0x4db   : > { %11626 = vmatprep.subr.bf16.mxu1 %v13112_v31  ;;  %v13207_v31 = vcombine.low %v424_v6, %v428_v58  ;;  %v13200_v32 = vcombine.high %v416_v61, %v420_v42  ;;  %v476_v29 = vld [vmem:[%s15084_s12 + $0x4b8] sm:$0xff] }
 0x4dc   : > { %v13256_v7 = vcombine.high %v472_v33, %v476_v29  ;;  %v464_v39 = vld [vmem:[%s15084_s12 + $0x458] sm:$0xff] }
 0x4dd   : > { %11586 = vmatpush1.bf16.msra.mxu0 %v14645_v20  ;;  %v408_v20 = vld [vmem:[%s15084_s12 + $0x298] sm:$0xff] }
 0x4de   : > { %11627 = vmatpush1.bf16.msra.mxu1 %v13111_v36  ;;  %11653 = vmatprep.subr.bf16.mxu0 %v13296_v35  ;;  %v412_v36 = vld [vmem:[%s15084_s12 + $0x2b8] sm:$0xff]  ;;  %v13263_v35 = vcombine.low %v480_v57, %v484_v54 }
 0x4df   : > { %11628 = vmatprep.subr.bf16.mxu1 %v13232_v59  ;;  %v13199_v59 = vcombine.low %v416_v61, %v420_v42  ;;  %v13192_v27 = vcombine.high %v408_v20, %v412_v36  ;;  %v468_v38 = vld [vmem:[%s15084_s12 + $0x478] sm:$0xff] }
 0x4e0   : > { %11604 = vmatmul.mubr.bf16.vlgmr.msra.gmra.mxu0 %v14938_v63  ;;  %v13248_v4 = vcombine.high %v464_v39, %v468_v38  ;;  %v456_v63 = vld [vmem:[%s15084_s12 + $0x418] sm:$0xff] }
 0x4e1   : > { %11654 = vmatpush1.bf16.msra.mxu0 %v13295_v46  ;;  %11685 = vmatprep.mubr.bf16.mxu0 %v15129_v60  ;;  %v13272_v60 = vcombine.high %v488_v40, %v492_v8  ;;  %v400_v46 = vld [vmem:[%s15084_s12 + $0x258] sm:$0xff] }
 0x4e2   : > { %11629 = vmatpush2.bf16.msra.mxu1 %v13231_v10  ;;  %11655 = vmatprep.subr.bf16.mxu0 %v13288_v51  ;;  %v404_v10 = vld [vmem:[%s15084_s12 + $0x278] sm:$0xff]  ;;  %v13255_v51 = vcombine.low %v472_v33, %v476_v29 }
 0x4e3   : > { %11630 = vmatprep.subr.bf16.mxu1 %v13224_v56  ;;  %v13191_v56 = vcombine.low %v408_v20, %v412_v36  ;;  %v13184_v18 = vcombine.high %v400_v46, %v404_v10  ;;  %v460_v13 = vld [vmem:[%s15084_s12 + $0x438] sm:$0xff] }
 0x4e4   : > { %v392_v43 = vld [vmem:[%s15084_s12 + $0x218] sm:$0xff] }
 0x4e5   : > { %11656 = vmatpush1.bf16.msra.mxu0 %v13287_v62  ;;  %v396_v62 = vld [vmem:[%s15084_s12 + $0x238] sm:$0xff] }
 0x4e6   : > { %11631 = vmatpush2.bf16.msra.mxu1 %v13223_v49  ;;  %11657 = vmatprep.subr.bf16.mxu0 %v13280_v14  ;;  %v13247_v49 = vcombine.low %v464_v39, %v468_v38  ;;  %v13183_v14 = vcombine.low %v400_v46, %v404_v10  ;;  %v13176_v40 = vcombine.high %v392_v43, %v396_v62  ;;  %v576_v8 = vld [vmem:[%s15084_s12 + $0x7d8] sm:$0xff] }
 0x4e7   : > { %11632 = vmatprep.subr.bf16.mxu1 %v13216_v1  ;;  %v13240_v1 = vcombine.high %v456_v63, %v460_v13  ;;  %v580_v6 = vld [vmem:[%s15084_s12 + $0x7f8] sm:$0xff] }
 0x4e8   : > { %v640_v58 = vld [vmem:[%s15084_s12 + $0x9d8] sm:$0xff] }
 0x4e9   : > { %11658 = vmatpush1.bf16.msra.mxu0 %v13279_v52  ;;  %v644_v52 = vld [vmem:[%s15084_s12 + $0x9f8] sm:$0xff] }
 0x4ea   : > { %11633 = vmatpush2.bf16.msra.mxu1 %v13215_v55  ;;  %11659 = vmatprep.subr.bf16.mxu0 %v13272_v60  ;;  %v13239_v55 = vcombine.low %v456_v63, %v460_v13  ;;  %v13175_v60 = vcombine.low %v392_v43, %v396_v62  ;;  %v13424_v57 = vcombine.high %v640_v58, %v644_v52  ;;  %v568_v54 = vld [vmem:[%s15084_s12 + $0x798] sm:$0xff] }
 0x4eb   : > { %11634 = vmatprep.subr.bf16.mxu1 %v13208_v34  ;;  %v13360_v34 = vcombine.high %v576_v8, %v580_v6  ;;  %v572_v61 = vld [vmem:[%s15084_s12 + $0x7b8] sm:$0xff] }
 0x4ec   : > { %v632_v42 = vld [vmem:[%s15084_s12 + $0x998] sm:$0xff]  ;;  %v13351_v39 = vcombine.low %v568_v54, %v572_v61 }
 0x4ed   : > { %11660 = vmatpush1.bf16.msra.mxu0 %v13271_v15  ;;  %v636_v15 = vld [vmem:[%s15084_s12 + $0x9b8] sm:$0xff] }
 0x4ee   : > { %11635 = vmatpush2.bf16.msra.mxu1 %v13207_v31  ;;  %11661 = vmatprep.subr.bf16.mxu0 %v13264_v44  ;;  %v13359_v31 = vcombine.low %v576_v8, %v580_v6  ;;  %v13423_v44 = vcombine.low %v640_v58, %v644_v52  ;;  %v13416_v33 = vcombine.high %v632_v42, %v636_v15  ;;  %v560_v29 = vld [vmem:[%s15084_s12 + $0x758] sm:$0xff] }
 0x4ef   : > { %11636 = vmatprep.subr.bf16.mxu1 %v13200_v32  ;;  %v13352_v32 = vcombine.high %v568_v54, %v572_v61  ;;  %v564_v20 = vld [vmem:[%s15084_s12 + $0x778] sm:$0xff]  ;;  %v13415_v46 = vcombine.low %v632_v42, %v636_v15 }
 0x4f0   : > { %v13344_v10 = vcombine.high %v560_v29, %v564_v20  ;;  %v556_v63 = vld [vmem:[%s15084_s12 + $0x738] sm:$0xff] }
 0x4f1   : > { %11662 = vmatpush1.bf16.msra.mxu0 %v13263_v35  ;;  %v624_v35 = vld [vmem:[%s15084_s12 + $0x958] sm:$0xff] }
 0x4f2   : > { %11637 = vmatpush2.bf16.msra.mxu1 %v13199_v59  ;;  %11663 = vmatprep.subr.bf16.mxu0 %v13256_v7  ;;  %v628_v59 = vld [vmem:[%s15084_s12 + $0x978] sm:$0xff] }
 0x4f3   : > { %11638 = vmatprep.subr.bf16.mxu1 %v13192_v27  ;;  %v616_v13 = vld [vmem:[%s15084_s12 + $0x918] sm:$0xff] }
 0x4f4   : > { %v620_v43 = vld [vmem:[%s15084_s12 + $0x938] sm:$0xff] }
 0x4f5   : > { %11664 = vmatpush1.bf16.msra.mxu0 %v13255_v51  ;;  %v544_v6 = vld [vmem:[%s15084_s12 + $0x6d8] sm:$0xff] }
 0x4f6   : > { %11639 = vmatpush2.bf16.msra.mxu1 %v13191_v56  ;;  %11665 = vmatprep.subr.bf16.mxu0 %v13248_v4  ;;  %v548_v58 = vld [vmem:[%s15084_s12 + $0x6f8] sm:$0xff] }
 0x4f7   : > { %11640 = vmatprep.subr.bf16.mxu1 %v13184_v18  ;;  %v552_v18 = vld [vmem:[%s15084_s12 + $0x718] sm:$0xff] }
 0x4f8   : > { %v608_v52 = vld [vmem:[%s15084_s12 + $0x8d8] sm:$0xff] }
 0x4f9   : > { %11666 = vmatpush1.bf16.msra.mxu0 %v13247_v49  ;;  %v536_v61 = vld [vmem:[%s15084_s12 + $0x698] sm:$0xff] }
 0x4fa   : > { %11641 = vmatpush2.bf16.msra.mxu1 %v13183_v14  ;;  %11667 = vmatprep.subr.bf16.mxu0 %v13240_v1  ;;  %v13343_v14 = vcombine.low %v560_v29, %v564_v20  ;;  %v13407_v1 = vcombine.low %v624_v35, %v628_v59  ;;  %v540_v42 = vld [vmem:[%s15084_s12 + $0x6b8] sm:$0xff] }
 0x4fb   : > { %11642 = vmatprep.subr.bf16.mxu1 %v13176_v40  ;;  %v13336_v40 = vcombine.high %v552_v18, %v556_v63  ;;  %v600_v15 = vld [vmem:[%s15084_s12 + $0x898] sm:$0xff] }
 0x4fc   : > { %v528_v20 = vld [vmem:[%s15084_s12 + $0x658] sm:$0xff] }
 0x4fd   : > { %11668 = vmatpush1.bf16.msra.mxu0 %v13239_v55  ;;  %v612_v55 = vld [vmem:[%s15084_s12 + $0x8f8] sm:$0xff] }
 0x4fe   : > { %11643 = vmatpush2.bf16.msra.mxu1 %v13175_v60  ;;  %11669 = vmatprep.subr.bf16.mxu0 %v13360_v34  ;;  %v13335_v60 = vcombine.low %v552_v18, %v556_v63  ;;  %v13399_v34 = vcombine.low %v616_v13, %v620_v43  ;;  %v13392_v54 = vcombine.high %v608_v52, %v612_v55 }
 0x4ff   : > { %11694 = vmatprep.subr.bf16.mxu1 %v13424_v57  ;;  %v13328_v57 = vcombine.high %v544_v6, %v548_v58 }
 0x500   : > { %v11359_v36 = vpop.f32.mrf.mxu0 }
 0x501   : > { %v11360_v7 = vadd.f32 %v11359_v36, %v16610_v11  ;;  %v11400_v27 = vpop.f32.mrf.mxu1  ;;  %11645 = vmatmul.mubr.bf16.vlgmr.msra.gmra.mxu1 %v15175_v17  ;;  %11670 = vmatpush2.bf16.msra.mxu0 %v13359_v31  ;;  %v13408_v11 = vcombine.high %v624_v35, %v628_v59  ;;  %v604_v31 = vld [vmem:[%s15084_s12 + $0x8b8] sm:$0xff] }
 0x502   : > { %11695 = vmatpush1.bf16.msra.mxu1 %v13423_v44  ;;  %v11361_v38 = vpop.f32.mrf.mxu0  ;;  %11671 = vmatprep.subr.bf16.mxu0 %v13352_v32  ;;  %v13327_v44 = vcombine.low %v544_v6, %v548_v58  ;;  %v13391_v32 = vcombine.low %v608_v52, %v612_v55  ;;  %v13384_v29 = vcombine.high %v600_v15, %v604_v31  ;;  %v532_v36 = vld [vmem:[%s15084_s12 + $0x678] sm:$0xff] }
 0x503   : > { %v16685_v51 = vadd.f32 %v11400_v27, %v11360_v7  ;;  %v11362_v56 = vadd.f32 %v11361_v38, %v16619_v22  ;;  %v11402_v4 = vpop.f32.mrf.mxu1  ;;  %11696 = vmatprep.subr.bf16.mxu1 %v13416_v33  ;;  %11726 = vmatprep.mubr.bf16.mxu1 %v15193_v28  ;;  %v13400_v28 = vcombine.high %v616_v13, %v620_v43  ;;  %v592_v35 = vld [vmem:[%s15084_s12 + $0x858] sm:$0xff] }
 0x504   : > { %v11363_v17 = vpop.f32.mrf.mxu0  ;;  %v13320_v33 = vcombine.high %v536_v61, %v540_v42  ;;  %v596_v59 = vld [vmem:[%s15084_s12 + $0x878] sm:$0xff]  ;;  %v13319_v7 = vcombine.low %v536_v61, %v540_v42  ;;  %v13383_v27 = vcombine.low %v600_v15, %v604_v31 }
 0x505   : > { %v16693_v62 = vadd.f32 %v11402_v4, %v11362_v56  ;;  %v11404_v49 = vpop.f32.mrf.mxu1  ;;  %11672 = vmatpush2.bf16.msra.mxu0 %v13351_v39  ;;  %v13312_v39 = vcombine.high %v528_v20, %v532_v36  ;;  %v13376_v38 = vcombine.high %v592_v35, %v596_v59  ;;  %v584_v56 = vld [vmem:[%s15084_s12 + $0x818] sm:$0xff]  ;;  %v13375_v18 = vcombine.low %v592_v35, %v596_v59 }
 0x506   : > { %11697 = vmatpush1.bf16.msra.mxu1 %v13415_v46  ;;  %v11364_v22 = vpop.f32.mrf.mxu0  ;;  %11673 = vmatprep.subr.bf16.mxu0 %v13344_v10  ;;  %v520_v46 = vld [vmem:[%s15084_s12 + $0x618] sm:$0xff] }
 0x507   : > { %v11405_v8 = vpop.f32.mrf.mxu1  ;;  %11698 = vmatprep.subr.bf16.mxu1 %v13408_v11  ;;  %v524_v10 = vld [vmem:[%s15084_s12 + $0x638] sm:$0xff]  ;;  %v13311_v11 = vcombine.low %v528_v20, %v532_v36 }
 0x508   : > { %v588_v4 = vld [vmem:[%s15084_s12 + $0x838] sm:$0xff]  ;;  %v13304_v63 = vcombine.high %v520_v46, %v524_v10  ;;  %v13303_v22 = vcombine.low %v520_v46, %v524_v10 }
 0x509   : > { %11674 = vmatpush2.bf16.msra.mxu0 %v13343_v14  ;;  %v13368_v17 = vcombine.high %v584_v56, %v588_v4  ;;  %v768_v13 = vld [vmem:[%s15084_s12 + $0xdd8] sm:$0xff] }
 0x50a   : > { %11699 = vmatpush1.bf16.msra.mxu1 %v13407_v1  ;;  %11675 = vmatprep.subr.bf16.mxu0 %v13336_v40  ;;  %v772_v43 = vld [vmem:[%s15084_s12 + $0xdf8] sm:$0xff]  ;;  %v13367_v1 = vcombine.low %v584_v56, %v588_v4 }
 0x50b   : > { %11700 = vmatprep.subr.bf16.mxu1 %v13400_v28  ;;  %v704_v49 = vld [vmem:[%s15084_s12 + $0xbd8] sm:$0xff]  ;;  %v13552_v40 = vcombine.high %v768_v13, %v772_v43  ;;  %v13551_v55 = vcombine.low %v768_v13, %v772_v43 }
 0x50c   : > { %v708_v14 = vld [vmem:[%s15084_s12 + $0xbf8] sm:$0xff] }
 0x50d   : > { %11676 = vmatpush2.bf16.msra.mxu0 %v13335_v60  ;;  %v13488_v8 = vcombine.high %v704_v49, %v708_v14  ;;  %v760_v28 = vld [vmem:[%s15084_s12 + $0xd98] sm:$0xff]  ;;  %v13487_v60 = vcombine.low %v704_v49, %v708_v14 }
 0x50e   : > { %11701 = vmatpush1.bf16.msra.mxu1 %v13399_v34  ;;  %11677 = vmatprep.subr.bf16.mxu0 %v13328_v57  ;;  %v764_v6 = vld [vmem:[%s15084_s12 + $0xdb8] sm:$0xff] }
 0x50f   : > { %11702 = vmatprep.subr.bf16.mxu1 %v13392_v54  ;;  %v696_v58 = vld [vmem:[%s15084_s12 + $0xb98] sm:$0xff]  ;;  %v13544_v34 = vcombine.high %v760_v28, %v764_v6  ;;  %v13543_v31 = vcombine.low %v760_v28, %v764_v6 }
 0x510   : > { %v700_v52 = vld [vmem:[%s15084_s12 + $0xbb8] sm:$0xff] }
 0x511   : > { %11678 = vmatpush2.bf16.msra.mxu0 %v13327_v44  ;;  %v13480_v57 = vcombine.high %v696_v58, %v700_v52  ;;  %v752_v54 = vld [vmem:[%s15084_s12 + $0xd58] sm:$0xff]  ;;  %v13479_v44 = vcombine.low %v696_v58, %v700_v52 }
 0x512   : > { %11703 = vmatpush1.bf16.msra.mxu1 %v13391_v32  ;;  %11679 = vmatprep.subr.bf16.mxu0 %v13320_v33  ;;  %v756_v61 = vld [vmem:[%s15084_s12 + $0xd78] sm:$0xff] }
 0x513   : > { %11704 = vmatprep.subr.bf16.mxu1 %v13384_v29  ;;  %v688_v42 = vld [vmem:[%s15084_s12 + $0xb58] sm:$0xff]  ;;  %v13536_v32 = vcombine.high %v752_v54, %v756_v61  ;;  %v13535_v35 = vcombine.low %v752_v54, %v756_v61 }
 0x514   : > { %v692_v15 = vld [vmem:[%s15084_s12 + $0xb78] sm:$0xff] }
 0x515   : > { %11680 = vmatpush2.bf16.msra.mxu0 %v13319_v7  ;;  %v13472_v33 = vcombine.high %v688_v42, %v692_v15  ;;  %v744_v29 = vld [vmem:[%s15084_s12 + $0xd18] sm:$0xff]  ;;  %v13471_v59 = vcombine.low %v688_v42, %v692_v15 }
 0x516   : > { %11705 = vmatpush1.bf16.msra.mxu1 %v13383_v27  ;;  %11681 = vmatprep.subr.bf16.mxu0 %v13312_v39  ;;  %v748_v20 = vld [vmem:[%s15084_s12 + $0xd38] sm:$0xff] }
 0x517   : > { %11706 = vmatprep.subr.bf16.mxu1 %v13376_v38  ;;  %v680_v36 = vld [vmem:[%s15084_s12 + $0xb18] sm:$0xff]  ;;  %v13527_v10 = vcombine.low %v744_v29, %v748_v20 }
 0x518   : > { %v736_v27 = vld [vmem:[%s15084_s12 + $0xcd8] sm:$0xff] }
 0x519   : > { %11682 = vmatpush2.bf16.msra.mxu0 %v13311_v11  ;;  %v740_v39 = vld [vmem:[%s15084_s12 + $0xcf8] sm:$0xff] }
 0x51a   : > { %11707 = vmatpush1.bf16.msra.mxu1 %v13375_v18  ;;  %11683 = vmatprep.subr.bf16.mxu0 %v13304_v63  ;;  %v672_v38 = vld [vmem:[%s15084_s12 + $0xad8] sm:$0xff]  ;;  %v13520_v4 = vcombine.high %v736_v27, %v740_v39  ;;  %v13519_v43 = vcombine.low %v736_v27, %v740_v39 }
 0x51b   : > { %11708 = vmatprep.subr.bf16.mxu1 %v13368_v17  ;;  %v676_v46 = vld [vmem:[%s15084_s12 + $0xaf8] sm:$0xff] }
 0x51c   : > { %v13456_v11 = vcombine.high %v672_v38, %v676_v46  ;;  %v728_v18 = vld [vmem:[%s15084_s12 + $0xc98] sm:$0xff]  ;;  %v13455_v49 = vcombine.low %v672_v38, %v676_v46 }
 0x51d   : > { %11684 = vmatpush2.bf16.msra.mxu0 %v13303_v22  ;;  %v732_v63 = vld [vmem:[%s15084_s12 + $0xcb8] sm:$0xff] }
 0x51e   : > { %11709 = vmatpush1.bf16.msra.mxu1 %v13367_v1  ;;  %11735 = vmatprep.subr.bf16.mxu0 %v13552_v40  ;;  %v664_v17 = vld [vmem:[%s15084_s12 + $0xa98] sm:$0xff]  ;;  %v13512_v14 = vcombine.high %v728_v18, %v732_v63  ;;  %v13511_v6 = vcombine.low %v728_v18, %v732_v63 }
 0x51f   : > { %11710 = vmatprep.subr.bf16.mxu1 %v13488_v8  ;;  %v668_v13 = vld [vmem:[%s15084_s12 + $0xab8] sm:$0xff] }
 0x520   : > { %11686 = vmatmul.mubr.bf16.vlgmr.msra.gmra.mxu0 %v15184_v21  ;;  %v684_v21 = vld [vmem:[%s15084_s12 + $0xb38] sm:$0xff]  ;;  %v13448_v22 = vcombine.high %v664_v17, %v668_v13  ;;  %v13447_v58 = vcombine.low %v664_v17, %v668_v13 }
 0x521   : > { %11736 = vmatpush1.bf16.msra.mxu0 %v13551_v55  ;;  %11767 = vmatprep.mubr.bf16.mxu0 %v15200_v30  ;;  %v13528_v30 = vcombine.high %v744_v29, %v748_v20  ;;  %v13464_v7 = vcombine.high %v680_v36, %v684_v21  ;;  %v13463_v56 = vcombine.low %v680_v36, %v684_v21  ;;  %v720_v1 = vld [vmem:[%s15084_s12 + $0xc58] sm:$0xff] }
 0x522   : > { %11711 = vmatpush2.bf16.msra.mxu1 %v13487_v60  ;;  %11737 = vmatprep.subr.bf16.mxu0 %v13544_v34  ;;  %v724_v40 = vld [vmem:[%s15084_s12 + $0xc78] sm:$0xff] }
 0x523   : > { %11712 = vmatprep.subr.bf16.mxu1 %v13480_v57  ;;  %v656_v8 = vld [vmem:[%s15084_s12 + $0xa58] sm:$0xff]  ;;  %v13504_v52 = vcombine.high %v720_v1, %v724_v40  ;;  %v13503_v61 = vcombine.low %v720_v1, %v724_v40 }
 0x524   : > { %v660_v28 = vld [vmem:[%s15084_s12 + $0xa78] sm:$0xff] }
 0x525   : > { %11738 = vmatpush1.bf16.msra.mxu0 %v13543_v31  ;;  %v13440_v55 = vcombine.high %v656_v8, %v660_v28  ;;  %v712_v60 = vld [vmem:[%s15084_s12 + $0xc18] sm:$0xff]  ;;  %v13439_v42 = vcombine.low %v656_v8, %v660_v28 }
 0x526   : > { %11713 = vmatpush2.bf16.msra.mxu1 %v13479_v44  ;;  %11739 = vmatprep.subr.bf16.mxu0 %v13536_v32  ;;  %v716_v34 = vld [vmem:[%s15084_s12 + $0xc38] sm:$0xff] }
 0x527   : > { %11714 = vmatprep.subr.bf16.mxu1 %v13472_v33  ;;  %v648_v57 = vld [vmem:[%s15084_s12 + $0xa18] sm:$0xff]  ;;  %v13496_v15 = vcombine.high %v712_v60, %v716_v34  ;;  %v13495_v20 = vcombine.low %v712_v60, %v716_v34 }
 0x528   : > { %v652_v54 = vld [vmem:[%s15084_s12 + $0xa38] sm:$0xff] }
 0x529   : > { %11740 = vmatpush1.bf16.msra.mxu0 %v13535_v35  ;;  %v13432_v31 = vcombine.high %v648_v57, %v652_v54  ;;  %v832_v44 = vld [vmem:[%s15084_s12 + $0xfd8] sm:$0xff]  ;;  %v13431_v36 = vcombine.low %v648_v57, %v652_v54 }
 0x52a   : > { %11715 = vmatpush2.bf16.msra.mxu1 %v13471_v59  ;;  %11741 = vmatprep.subr.bf16.mxu0 %v13528_v30  ;;  %v836_v32 = vld [vmem:[%s15084_s12 + $0xff8] sm:$0xff] }
 0x52b   : > { %11716 = vmatprep.subr.bf16.mxu1 %v13464_v7  ;;  %v896_v33 = vld [vmem:[%s15084_s12 + $0x11d8] sm:$0xff]  ;;  %v13616_v21 = vcombine.high %v832_v44, %v836_v32  ;;  %v13615_v39 = vcombine.low %v832_v44, %v836_v32 }
 0x52c   : > { %v900_v29 = vld [vmem:[%s15084_s12 + $0x11f8] sm:$0xff] }
 0x52d   : > { %11742 = vmatpush1.bf16.msra.mxu0 %v13527_v10  ;;  %v13680_v35 = vcombine.high %v896_v33, %v900_v29  ;;  %v824_v59 = vld [vmem:[%s15084_s12 + $0xf98] sm:$0xff]  ;;  %v13679_v38 = vcombine.low %v896_v33, %v900_v29 }
 0x52e   : > { %11717 = vmatpush2.bf16.msra.mxu1 %v13463_v56  ;;  %11743 = vmatprep.subr.bf16.mxu0 %v13520_v4  ;;  %v828_v30 = vld [vmem:[%s15084_s12 + $0xfb8] sm:$0xff] }
 0x52f   : > { %11718 = vmatprep.subr.bf16.mxu1 %v13456_v11  ;;  %v888_v7 = vld [vmem:[%s15084_s12 + $0x1198] sm:$0xff]  ;;  %v13608_v46 = vcombine.high %v824_v59, %v828_v30 }
 0x530   : > { %v892_v27 = vld [vmem:[%s15084_s12 + $0x11b8] sm:$0xff] }
 0x531   : > { %11744 = vmatpush1.bf16.msra.mxu0 %v13519_v43  ;;  %v13672_v10 = vcombine.high %v888_v7, %v892_v27  ;;  %v816_v56 = vld [vmem:[%s15084_s12 + $0xf58] sm:$0xff]  ;;  %v13607_v43 = vcombine.low %v824_v59, %v828_v30 }
 0x532   : > { %11719 = vmatpush2.bf16.msra.mxu1 %v13455_v49  ;;  %11745 = vmatprep.subr.bf16.mxu0 %v13512_v14  ;;  %v820_v4 = vld [vmem:[%s15084_s12 + $0xf78] sm:$0xff]  ;;  %v13671_v14 = vcombine.low %v888_v7, %v892_v27 }
 0x533   : > { %11720 = vmatprep.subr.bf16.mxu1 %v13448_v22  ;;  %v880_v18 = vld [vmem:[%s15084_s12 + $0x1158] sm:$0xff]  ;;  %v13600_v22 = vcombine.high %v816_v56, %v820_v4  ;;  %v13599_v34 = vcombine.low %v816_v56, %v820_v4 }
 0x534   : > { %v884_v63 = vld [vmem:[%s15084_s12 + $0x1178] sm:$0xff] }
 0x535   : > { %11746 = vmatpush1.bf16.msra.mxu0 %v13511_v6  ;;  %v808_v28 = vld [vmem:[%s15084_s12 + $0xf18] sm:$0xff]  ;;  %v13663_v57 = vcombine.low %v880_v18, %v884_v63 }
 0x536   : > { %11721 = vmatpush2.bf16.msra.mxu1 %v13447_v58  ;;  %11747 = vmatprep.subr.bf16.mxu0 %v13504_v52  ;;  %v812_v6 = vld [vmem:[%s15084_s12 + $0xf38] sm:$0xff] }
 0x537   : > { %11722 = vmatprep.subr.bf16.mxu1 %v13440_v55  ;;  %v872_v58 = vld [vmem:[%s15084_s12 + $0x1118] sm:$0xff]  ;;  %v13592_v54 = vcombine.high %v808_v28, %v812_v6  ;;  %v13591_v32 = vcombine.low %v808_v28, %v812_v6 }
 0x538   : > { %v876_v52 = vld [vmem:[%s15084_s12 + $0x1138] sm:$0xff] }
 0x539   : > { %11748 = vmatpush1.bf16.msra.mxu0 %v13503_v61  ;;  %v868_v44 = vld [vmem:[%s15084_s12 + $0x10f8] sm:$0xff]  ;;  %v13655_v33 = vcombine.low %v872_v58, %v876_v52 }
 0x53a   : > { %11723 = vmatpush2.bf16.msra.mxu1 %v13439_v42  ;;  %11749 = vmatprep.subr.bf16.mxu0 %v13496_v15  ;;  %v800_v42 = vld [vmem:[%s15084_s12 + $0xed8] sm:$0xff] }
 0x53b   : > { %11724 = vmatprep.subr.bf16.mxu1 %v13432_v31  ;;  %v804_v15 = vld [vmem:[%s15084_s12 + $0xef8] sm:$0xff] }
 0x53c   : > { %v864_v31 = vld [vmem:[%s15084_s12 + $0x10d8] sm:$0xff]  ;;  %v13584_v29 = vcombine.high %v800_v42, %v804_v15  ;;  %v13583_v30 = vcombine.low %v800_v42, %v804_v15 }
 0x53d   : > { %11750 = vmatpush1.bf16.msra.mxu0 %v13495_v20  ;;  %v13648_v20 = vcombine.high %v864_v31, %v868_v44  ;;  %v860_v59 = vld [vmem:[%s15084_s12 + $0x10b8] sm:$0xff]  ;;  %v13647_v7 = vcombine.low %v864_v31, %v868_v44 }
 0x53e   : > { %11725 = vmatpush2.bf16.msra.mxu1 %v13431_v36  ;;  %11751 = vmatprep.subr.bf16.mxu0 %v13616_v21  ;;  %v792_v36 = vld [vmem:[%s15084_s12 + $0xe98] sm:$0xff] }
 0x53f   : > { %11776 = vmatprep.subr.bf16.mxu1 %v13680_v35  ;;  %v796_v21 = vld [vmem:[%s15084_s12 + $0xeb8] sm:$0xff] }
 0x540   : > { %v11441_v11 = vpop.f32.mrf.mxu0  ;;  %v856_v35 = vld [vmem:[%s15084_s12 + $0x1098] sm:$0xff]  ;;  %v13576_v27 = vcombine.high %v792_v36, %v796_v21  ;;  %v13575_v4 = vcombine.low %v792_v36, %v796_v21 }
 0x541   : > { %v11442_v17 = vadd.f32 %v11441_v11, %v16685_v51  ;;  %v11482_v13 = vpop.f32.mrf.mxu1  ;;  %11727 = vmatmul.mubr.bf16.vlgmr.msra.gmra.mxu1 %v15265_v37  ;;  %11752 = vmatpush2.bf16.msra.mxu0 %v13615_v39  ;;  %v13664_v51 = vcombine.high %v880_v18, %v884_v63  ;;  %v13640_v39 = vcombine.high %v856_v35, %v860_v59  ;;  %v852_v56 = vld [vmem:[%s15084_s12 + $0x1078] sm:$0xff] }
 0x542   : > { %11777 = vmatpush1.bf16.msra.mxu1 %v13679_v38  ;;  %v11443_v49 = vpop.f32.mrf.mxu0  ;;  %11753 = vmatprep.subr.bf16.mxu0 %v13608_v46  ;;  %v784_v38 = vld [vmem:[%s15084_s12 + $0xe58] sm:$0xff]  ;;  %v13639_v11 = vcombine.low %v856_v35, %v860_v59 }
 0x543   : > { %v16759_v1 = vadd.f32 %v11482_v13, %v11442_v17  ;;  %v11444_v40 = vadd.f32 %v11443_v49, %v16693_v62  ;;  %v11484_v8 = vpop.f32.mrf.mxu1  ;;  %11778 = vmatprep.subr.bf16.mxu1 %v13672_v10  ;;  %11808 = vmatprep.mubr.bf16.mxu1 %v15283_v48  ;;  %v13656_v48 = vcombine.high %v872_v58, %v876_v52  ;;  %v788_v46 = vld [vmem:[%s15084_s12 + $0xe78] sm:$0xff] }
 0x544   : > { %v11445_v37 = vpop.f32.mrf.mxu0  ;;  %v848_v10 = vld [vmem:[%s15084_s12 + $0x1058] sm:$0xff]  ;;  %v13568_v18 = vcombine.high %v784_v38, %v788_v46 }
 0x545   : > { %v16767_v55 = vadd.f32 %v11484_v8, %v11444_v40  ;;  %v11486_v60 = vpop.f32.mrf.mxu1  ;;  %11754 = vmatpush2.bf16.msra.mxu0 %v13607_v43  ;;  %v13632_v63 = vcombine.high %v848_v10, %v852_v56  ;;  %v776_v17 = vld [vmem:[%s15084_s12 + $0xe18] sm:$0xff] }
 0x546   : > { %11779 = vmatpush1.bf16.msra.mxu1 %v13671_v14  ;;  %v11446_v62 = vpop.f32.mrf.mxu0  ;;  %11755 = vmatprep.subr.bf16.mxu0 %v13600_v22  ;;  %v780_v13 = vld [vmem:[%s15084_s12 + $0xe38] sm:$0xff]  ;;  %v13567_v14 = vcombine.low %v784_v38, %v788_v46  ;;  %v13631_v22 = vcombine.low %v848_v10, %v852_v56 }
 0x547   : > { %v11487_v61 = vpop.f32.mrf.mxu1  ;;  %11780 = vmatprep.subr.bf16.mxu1 %v13664_v51  ;;  %v840_v43 = vld [vmem:[%s15084_s12 + $0x1018] sm:$0xff]  ;;  %v13560_v40 = vcombine.high %v776_v17, %v780_v13  ;;  %v13559_v58 = vcombine.low %v776_v17, %v780_v13 }
 0x548   : > { %v844_v49 = vld [vmem:[%s15084_s12 + $0x1038] sm:$0xff] }
 0x549   : > { %11756 = vmatpush2.bf16.msra.mxu0 %v13599_v34  ;;  %v13624_v8 = vcombine.high %v840_v43, %v844_v49  ;;  %v1024_v51 = vld [vmem:[%s15084_s12 + $0x15d8] sm:$0xff]  ;;  %v13623_v52 = vcombine.low %v840_v43, %v844_v49 }
 0x54a   : > { %11781 = vmatpush1.bf16.msra.mxu1 %v13663_v57  ;;  %11757 = vmatprep.subr.bf16.mxu0 %v13592_v54  ;;  %v1028_v28 = vld [vmem:[%s15084_s12 + $0x15f8] sm:$0xff] }
 0x54b   : > { %11782 = vmatprep.subr.bf16.mxu1 %v13656_v48  ;;  %v960_v6 = vld [vmem:[%s15084_s12 + $0x13d8] sm:$0xff]  ;;  %v13808_v60 = vcombine.high %v1024_v51, %v1028_v28  ;;  %v13807_v48 = vcombine.low %v1024_v51, %v1028_v28 }
 0x54c   : > { %v964_v37 = vld [vmem:[%s15084_s12 + $0x13f8] sm:$0xff] }
 0x54d   : > { %11758 = vmatpush2.bf16.msra.mxu0 %v13591_v32  ;;  %v13744_v34 = vcombine.high %v960_v6, %v964_v37  ;;  %v1016_v62 = vld [vmem:[%s15084_s12 + $0x1598] sm:$0xff]  ;;  %v13743_v42 = vcombine.low %v960_v6, %v964_v37 }
 0x54e   : > { %11783 = vmatpush1.bf16.msra.mxu1 %v13655_v33  ;;  %11759 = vmatprep.subr.bf16.mxu0 %v13584_v29  ;;  %v1020_v57 = vld [vmem:[%s15084_s12 + $0x15b8] sm:$0xff] }
 0x54f   : > { %11784 = vmatprep.subr.bf16.mxu1 %v13648_v20  ;;  %v952_v54 = vld [vmem:[%s15084_s12 + $0x1398] sm:$0xff]  ;;  %v13800_v15 = vcombine.high %v1016_v62, %v1020_v57  ;;  %v13799_v20 = vcombine.low %v1016_v62, %v1020_v57 }
 0x550   : > { %v956_v61 = vld [vmem:[%s15084_s12 + $0x13b8] sm:$0xff] }
 0x551   : > { %11760 = vmatpush2.bf16.msra.mxu0 %v13583_v30  ;;  %v13736_v31 = vcombine.high %v952_v54, %v956_v61  ;;  %v1008_v44 = vld [vmem:[%s15084_s12 + $0x1558] sm:$0xff]  ;;  %v13735_v36 = vcombine.low %v952_v54, %v956_v61 }
 0x552   : > { %11785 = vmatpush1.bf16.msra.mxu1 %v13647_v7  ;;  %11761 = vmatprep.subr.bf16.mxu0 %v13576_v27  ;;  %v1012_v32 = vld [vmem:[%s15084_s12 + $0x1578] sm:$0xff] }
 0x553   : > { %11786 = vmatprep.subr.bf16.mxu1 %v13640_v39  ;;  %v944_v33 = vld [vmem:[%s15084_s12 + $0x1358] sm:$0xff]  ;;  %v13792_v21 = vcombine.high %v1008_v44, %v1012_v32  ;;  %v13791_v27 = vcombine.low %v1008_v44, %v1012_v32 }
 0x554   : > { %v948_v29 = vld [vmem:[%s15084_s12 + $0x1378] sm:$0xff] }
 0x555   : > { %11762 = vmatpush2.bf16.msra.mxu0 %v13575_v4  ;;  %v13728_v35 = vcombine.high %v944_v33, %v948_v29  ;;  %v1000_v59 = vld [vmem:[%s15084_s12 + $0x1518] sm:$0xff]  ;;  %v13727_v39 = vcombine.low %v944_v33, %v948_v29 }
 0x556   : > { %11787 = vmatpush1.bf16.msra.mxu1 %v13639_v11  ;;  %11763 = vmatprep.subr.bf16.mxu0 %v13568_v18  ;;  %v1004_v30 = vld [vmem:[%s15084_s12 + $0x1538] sm:$0xff] }
 0x557   : > { %11788 = vmatprep.subr.bf16.mxu1 %v13632_v63  ;;  %v936_v7 = vld [vmem:[%s15084_s12 + $0x1318] sm:$0xff]  ;;  %v13783_v11 = vcombine.low %v1000_v59, %v1004_v30 }
 0x558   : > { %v992_v46 = vld [vmem:[%s15084_s12 + $0x14d8] sm:$0xff] }
 0x559   : > { %11764 = vmatpush2.bf16.msra.mxu0 %v13567_v14  ;;  %v996_v10 = vld [vmem:[%s15084_s12 + $0x14f8] sm:$0xff] }
 0x55a   : > { %11789 = vmatpush1.bf16.msra.mxu1 %v13631_v22  ;;  %11765 = vmatprep.subr.bf16.mxu0 %v13560_v40  ;;  %v928_v56 = vld [vmem:[%s15084_s12 + $0x12d8] sm:$0xff]  ;;  %v13776_v63 = vcombine.high %v992_v46, %v996_v10  ;;  %v13775_v22 = vcombine.low %v992_v46, %v996_v10 }
 0x55b   : > { %11790 = vmatprep.subr.bf16.mxu1 %v13624_v8  ;;  %v932_v4 = vld [vmem:[%s15084_s12 + $0x12f8] sm:$0xff] }
 0x55c   : > { %v13712_v17 = vcombine.high %v928_v56, %v932_v4  ;;  %v984_v13 = vld [vmem:[%s15084_s12 + $0x1498] sm:$0xff]  ;;  %v13711_v40 = vcombine.low %v928_v56, %v932_v4 }
 0x55d   : > { %11766 = vmatpush2.bf16.msra.mxu0 %v13559_v58  ;;  %v988_v43 = vld [vmem:[%s15084_s12 + $0x14b8] sm:$0xff] }
 0x55e   : > { %11791 = vmatpush1.bf16.msra.mxu1 %v13623_v52  ;;  %11817 = vmatprep.subr.bf16.mxu0 %v13808_v60  ;;  %v920_v49 = vld [vmem:[%s15084_s12 + $0x1298] sm:$0xff]  ;;  %v13768_v8 = vcombine.high %v984_v13, %v988_v43  ;;  %v13767_v52 = vcombine.low %v984_v13, %v988_v43 }
 0x55f   : > { %11792 = vmatprep.subr.bf16.mxu1 %v13744_v34  ;;  %v924_v14 = vld [vmem:[%s15084_s12 + $0x12b8] sm:$0xff] }
 0x560   : > { %11768 = vmatmul.mubr.bf16.vlgmr.msra.gmra.mxu0 %v15274_v41  ;;  %v940_v41 = vld [vmem:[%s15084_s12 + $0x1338] sm:$0xff]  ;;  %v13704_v51 = vcombine.high %v920_v49, %v924_v14  ;;  %v13703_v60 = vcombine.low %v920_v49, %v924_v14 }
 0x561   : > { %11818 = vmatpush1.bf16.msra.mxu0 %v13807_v48  ;;  %11849 = vmatprep.mubr.bf16.mxu0 %v15290_v50  ;;  %v13784_v50 = vcombine.high %v1000_v59, %v1004_v30  ;;  %v13720_v38 = vcombine.high %v936_v7, %v940_v41  ;;  %v13719_v18 = vcombine.low %v936_v7, %v940_v41  ;;  %v976_v28 = vld [vmem:[%s15084_s12 + $0x1458] sm:$0xff] }
 0x562   : > { %11793 = vmatpush2.bf16.msra.mxu1 %v13743_v42  ;;  %11819 = vmatprep.subr.bf16.mxu0 %v13800_v15  ;;  %v980_v6 = vld [vmem:[%s15084_s12 + $0x1478] sm:$0xff] }
 0x563   : > { %11794 = vmatprep.subr.bf16.mxu1 %v13736_v31  ;;  %v912_v37 = vld [vmem:[%s15084_s12 + $0x1258] sm:$0xff]  ;;  %v13760_v34 = vcombine.high %v976_v28, %v980_v6  ;;  %v13759_v42 = vcombine.low %v976_v28, %v980_v6 }
 0x564   : > { %v916_v58 = vld [vmem:[%s15084_s12 + $0x1278] sm:$0xff] }
 0x565   : > { %11820 = vmatpush1.bf16.msra.mxu0 %v13799_v20  ;;  %v13696_v62 = vcombine.high %v912_v37, %v916_v58  ;;  %v968_v57 = vld [vmem:[%s15084_s12 + $0x1418] sm:$0xff]  ;;  %v13695_v15 = vcombine.low %v912_v37, %v916_v58 }
 0x566   : > { %11795 = vmatpush2.bf16.msra.mxu1 %v13735_v36  ;;  %11821 = vmatprep.subr.bf16.mxu0 %v13792_v21  ;;  %v972_v54 = vld [vmem:[%s15084_s12 + $0x1438] sm:$0xff] }
 0x567   : > { %11796 = vmatprep.subr.bf16.mxu1 %v13728_v35  ;;  %v904_v61 = vld [vmem:[%s15084_s12 + $0x1218] sm:$0xff]  ;;  %v13752_v31 = vcombine.high %v968_v57, %v972_v54  ;;  %v13751_v36 = vcombine.low %v968_v57, %v972_v54 }
 0x568   : > { %v908_v48 = vld [vmem:[%s15084_s12 + $0x1238] sm:$0xff] }
 0x569   : > { %11822 = vmatpush1.bf16.msra.mxu0 %v13791_v27  ;;  %v13688_v44 = vcombine.high %v904_v61, %v908_v48  ;;  %v1088_v32 = vld [vmem:[%s15084_s12 + $0x17d8] sm:$0xff]  ;;  %v13687_v21 = vcombine.low %v904_v61, %v908_v48 }
 0x56a   : > { %11797 = vmatpush2.bf16.msra.mxu1 %v13727_v39  ;;  %11823 = vmatprep.subr.bf16.mxu0 %v13784_v50  ;;  %v1092_v33 = vld [vmem:[%s15084_s12 + $0x17f8] sm:$0xff] }
 0x56b   : > { %11798 = vmatprep.subr.bf16.mxu1 %v13720_v38  ;;  %v1152_v29 = vld [vmem:[%s15084_s12 + $0x19d8] sm:$0xff]  ;;  %v13872_v35 = vcombine.high %v1088_v32, %v1092_v33  ;;  %v13871_v39 = vcombine.low %v1088_v32, %v1092_v33 }
 0x56c   : > { %v1156_v20 = vld [vmem:[%s15084_s12 + $0x19f8] sm:$0xff] }
 0x56d   : > { %11824 = vmatpush1.bf16.msra.mxu0 %v13783_v11  ;;  %v13936_v59 = vcombine.high %v1152_v29, %v1156_v20  ;;  %v1080_v30 = vld [vmem:[%s15084_s12 + $0x1798] sm:$0xff]  ;;  %v13935_v50 = vcombine.low %v1152_v29, %v1156_v20 }
 0x56e   : > { %11799 = vmatpush2.bf16.msra.mxu1 %v13719_v18  ;;  %11825 = vmatprep.subr.bf16.mxu0 %v13776_v63  ;;  %v1084_v7 = vld [vmem:[%s15084_s12 + $0x17b8] sm:$0xff] }
 0x56f   : > { %11800 = vmatprep.subr.bf16.mxu1 %v13712_v17  ;;  %v1144_v41 = vld [vmem:[%s15084_s12 + $0x1998] sm:$0xff]  ;;  %v13864_v38 = vcombine.high %v1080_v30, %v1084_v7  ;;  %v13863_v17 = vcombine.low %v1080_v30, %v1084_v7 }
 0x570   : > { %v1148_v27 = vld [vmem:[%s15084_s12 + $0x19b8] sm:$0xff] }
 0x571   : > { %11826 = vmatpush1.bf16.msra.mxu0 %v13775_v22  ;;  %v13928_v46 = vcombine.high %v1144_v41, %v1148_v27  ;;  %v1072_v10 = vld [vmem:[%s15084_s12 + $0x1758] sm:$0xff]  ;;  %v13927_v43 = vcombine.low %v1144_v41, %v1148_v27 }
 0x572   : > { %11801 = vmatpush2.bf16.msra.mxu1 %v13711_v40  ;;  %11827 = vmatprep.subr.bf16.mxu0 %v13768_v8  ;;  %v1076_v56 = vld [vmem:[%s15084_s12 + $0x1778] sm:$0xff] }
 0x573   : > { %11802 = vmatprep.subr.bf16.mxu1 %v13704_v51  ;;  %v1136_v11 = vld [vmem:[%s15084_s12 + $0x1958] sm:$0xff]  ;;  %v13856_v49 = vcombine.high %v1072_v10, %v1076_v56  ;;  %v13855_v37 = vcombine.low %v1072_v10, %v1076_v56 }
 0x574   : > { %v1140_v18 = vld [vmem:[%s15084_s12 + $0x1978] sm:$0xff] }
 0x575   : > { %11828 = vmatpush1.bf16.msra.mxu0 %v13767_v52  ;;  %v13920_v22 = vcombine.high %v1136_v11, %v1140_v18  ;;  %v1064_v40 = vld [vmem:[%s15084_s12 + $0x1718] sm:$0xff]  ;;  %v13919_v52 = vcombine.low %v1136_v11, %v1140_v18 }
 0x576   : > { %11803 = vmatpush2.bf16.msra.mxu1 %v13703_v60  ;;  %11829 = vmatprep.subr.bf16.mxu0 %v13760_v34  ;;  %v1068_v8 = vld [vmem:[%s15084_s12 + $0x1738] sm:$0xff] }
 0x577   : > { %11804 = vmatprep.subr.bf16.mxu1 %v13696_v62  ;;  %v1128_v51 = vld [vmem:[%s15084_s12 + $0x1918] sm:$0xff]  ;;  %v13848_v60 = vcombine.high %v1064_v40, %v1068_v8  ;;  %v13847_v48 = vcombine.low %v1064_v40, %v1068_v8 }
 0x578   : > { %v1132_v28 = vld [vmem:[%s15084_s12 + $0x1938] sm:$0xff] }
 0x579   : > { %11830 = vmatpush1.bf16.msra.mxu0 %v13759_v42  ;;  %v1056_v62 = vld [vmem:[%s15084_s12 + $0x16d8] sm:$0xff]  ;;  %v13911_v42 = vcombine.low %v1128_v51, %v1132_v28 }
 0x57a   : > { %11805 = vmatpush2.bf16.msra.mxu1 %v13695_v15  ;;  %11831 = vmatprep.subr.bf16.mxu0 %v13752_v31  ;;  %v1060_v57 = vld [vmem:[%s15084_s12 + $0x16f8] sm:$0xff] }
 0x57b   : > { %11806 = vmatprep.subr.bf16.mxu1 %v13688_v44  ;;  %v1120_v54 = vld [vmem:[%s15084_s12 + $0x18d8] sm:$0xff]  ;;  %v13840_v15 = vcombine.high %v1056_v62, %v1060_v57  ;;  %v13839_v20 = vcombine.low %v1056_v62, %v1060_v57 }
 0x57c   : > { %v1124_v61 = vld [vmem:[%s15084_s12 + $0x18f8] sm:$0xff] }
 0x57d   : > { %11832 = vmatpush1.bf16.msra.mxu0 %v13751_v36  ;;  %v13904_v31 = vcombine.high %v1120_v54, %v1124_v61  ;;  %v1048_v44 = vld [vmem:[%s15084_s12 + $0x1698] sm:$0xff]  ;;  %v13903_v36 = vcombine.low %v1120_v54, %v1124_v61 }
 0x57e   : > { %11807 = vmatpush2.bf16.msra.mxu1 %v13687_v21  ;;  %11833 = vmatprep.subr.bf16.mxu0 %v13872_v35  ;;  %v1052_v32 = vld [vmem:[%s15084_s12 + $0x16b8] sm:$0xff] }
 0x57f   : > { %11858 = vmatprep.subr.bf16.mxu1 %v13936_v59  ;;  %v1112_v33 = vld [vmem:[%s15084_s12 + $0x1898] sm:$0xff]  ;;  %v13832_v21 = vcombine.high %v1048_v44, %v1052_v32  ;;  %v13831_v27 = vcombine.low %v1048_v44, %v1052_v32 }
 0x580   : > { %v16829_v4 = vpop.f32.mrf.mxu0  ;;  %v1116_v29 = vld [vmem:[%s15084_s12 + $0x18b8] sm:$0xff] }
 0x581   : > { %v16833_v63 = vpop.f32.mrf.mxu1  ;;  %11809 = vmatmul.mubr.bf16.vlgmr.msra.gmra.mxu1 %v15355_v5  ;;  %11834 = vmatpush2.bf16.msra.mxu0 %v13871_v39  ;;  %v13896_v35 = vcombine.high %v1112_v33, %v1116_v29  ;;  %v1040_v59 = vld [vmem:[%s15084_s12 + $0x1658] sm:$0xff]  ;;  %v13895_v39 = vcombine.low %v1112_v33, %v1116_v29 }
 0x582   : > { %11859 = vmatpush1.bf16.msra.mxu1 %v13935_v50  ;;  %v16836_v13 = vpop.f32.mrf.mxu0  ;;  %11835 = vmatprep.subr.bf16.mxu0 %v13864_v38  ;;  %v1044_v30 = vld [vmem:[%s15084_s12 + $0x1678] sm:$0xff] }
 0x583   : > { %v16838_v14 = vpop.f32.mrf.mxu1  ;;  %11860 = vmatprep.subr.bf16.mxu1 %v13928_v46  ;;  %11890 = vmatprep.mubr.bf16.mxu1 %v15373_v16  ;;  %v13912_v16 = vcombine.high %v1128_v51, %v1132_v28  ;;  %v1104_v7 = vld [vmem:[%s15084_s12 + $0x1858] sm:$0xff]  ;;  %v13824_v50 = vcombine.high %v1040_v59, %v1044_v30  ;;  %v13823_v18 = vcombine.low %v1040_v59, %v1044_v30 }
 0x584   : > { %v11527_v5 = vpop.f32.mrf.mxu0  ;;  %v1108_v41 = vld [vmem:[%s15084_s12 + $0x1878] sm:$0xff]  ;;  %v11526_v62 = vadd.f32 %v16836_v13, %v16767_v55 }
 0x585   : > { %v11568_v6 = vpop.f32.mrf.mxu1  ;;  %11836 = vmatpush2.bf16.msra.mxu0 %v13863_v17  ;;  %v13888_v38 = vcombine.high %v1104_v7, %v1108_v41  ;;  %v1032_v46 = vld [vmem:[%s15084_s12 + $0x1618] sm:$0xff]  ;;  %v13887_v17 = vcombine.low %v1104_v7, %v1108_v41 }
 0x586   : > { %11861 = vmatpush1.bf16.msra.mxu1 %v13927_v43  ;;  %v11528_v58 = vpop.f32.mrf.mxu0  ;;  %11837 = vmatprep.subr.bf16.mxu0 %v13856_v49  ;;  %v1036_v10 = vld [vmem:[%s15084_s12 + $0x1638] sm:$0xff]  ;;  %v11567_v55 = vadd.f32 %v16838_v14, %v11526_v62 }
 0x587   : > { %v11569_v34 = vpop.f32.mrf.mxu1  ;;  %11862 = vmatprep.subr.bf16.mxu1 %v13920_v22  ;;  %v1096_v56 = vld [vmem:[%s15084_s12 + $0x1818] sm:$0xff]  ;;  %v13816_v43 = vcombine.high %v1032_v46, %v1036_v10  ;;  %v13815_v51 = vcombine.low %v1032_v46, %v1036_v10 }
 0x588   : > { %v1100_v11 = vld [vmem:[%s15084_s12 + $0x1838] sm:$0xff] }
 0x589   : > { %11838 = vmatpush2.bf16.msra.mxu0 %v13855_v37  ;;  %v13880_v49 = vcombine.high %v1096_v56, %v1100_v11  ;;  %v1280_v22 = vld [vmem:[%s15084_s12 + $0x1dd8] sm:$0xff]  ;;  %v13879_v28 = vcombine.low %v1096_v56, %v1100_v11  ;;  %v11524_v37 = vadd.f32 %v16829_v4, %v16759_v1 }
 0x58a   : > { %11863 = vmatpush1.bf16.msra.mxu1 %v13919_v52  ;;  %11839 = vmatprep.subr.bf16.mxu0 %v13848_v60  ;;  %v1284_v40 = vld [vmem:[%s15084_s12 + $0x1df8] sm:$0xff] }
 0x58b   : > { %11864 = vmatprep.subr.bf16.mxu1 %v13912_v16  ;;  %v1216_v8 = vld [vmem:[%s15084_s12 + $0x1bd8] sm:$0xff]  ;;  %v14064_v6 = vcombine.high %v1280_v22, %v1284_v40  ;;  %v14063_v57 = vcombine.low %v1280_v22, %v1284_v40  ;;  %v11565_v1 = vadd.f32 %v16833_v63, %v11524_v37  ;;  %v309_v63 = vld [vmem:[#allocation2 + $0x20] sm:$0xff] }
 0x58c   : > { %v1220_v5 = vld [vmem:[%s15084_s12 + $0x1bf8] sm:$0xff] }
 0x58d   : > { %11840 = vmatpush2.bf16.msra.mxu0 %v13847_v48  ;;  %v14000_v58 = vcombine.high %v1216_v8, %v1220_v5  ;;  %v1272_v52 = vld [vmem:[%s15084_s12 + $0x1d98] sm:$0xff]  ;;  %v13999_v54 = vcombine.low %v1216_v8, %v1220_v5 }
 0x58e   : > { %11865 = vmatpush1.bf16.msra.mxu1 %v13911_v42  ;;  %11841 = vmatprep.subr.bf16.mxu0 %v13840_v15  ;;  %v1276_v60 = vld [vmem:[%s15084_s12 + $0x1db8] sm:$0xff]  ;;  %v308_v15 = vld [vmem:[#allocation2 + $0x8] sm:$0xff] }
 0x58f   : > { %11866 = vmatprep.subr.bf16.mxu1 %v13904_v31  ;;  %v1208_v34 = vld [vmem:[%s15084_s12 + $0x1b98] sm:$0xff]  ;;  %v14056_v61 = vcombine.high %v1272_v52, %v1276_v60  ;;  %v14055_v33 = vcombine.low %v1272_v52, %v1276_v60 }
 0x590   : > { %v1212_v16 = vld [vmem:[%s15084_s12 + $0x1bb8] sm:$0xff] }
 0x591   : > { %11842 = vmatpush2.bf16.msra.mxu0 %v13839_v20  ;;  %v13992_v4 = vcombine.high %v1208_v34, %v1212_v16  ;;  %v1264_v48 = vld [vmem:[%s15084_s12 + $0x1d58] sm:$0xff]  ;;  %v13991_v20 = vcombine.low %v1208_v34, %v1212_v16 }
 0x592   : > { %11867 = vmatpush1.bf16.msra.mxu1 %v13903_v36  ;;  %11843 = vmatprep.subr.bf16.mxu0 %v13832_v21  ;;  %v1268_v42 = vld [vmem:[%s15084_s12 + $0x1d78] sm:$0xff] }
 0x593   : > { %11868 = vmatprep.subr.bf16.mxu1 %v13896_v35  ;;  %v1200_v44 = vld [vmem:[%s15084_s12 + $0x1b58] sm:$0xff]  ;;  %v14048_v36 = vcombine.high %v1264_v48, %v1268_v42 }
 0x594   : > { %v1204_v32 = vld [vmem:[%s15084_s12 + $0x1b78] sm:$0xff] }
 0x595   : > { %11844 = vmatpush2.bf16.msra.mxu0 %v13831_v27  ;;  %v13984_v35 = vcombine.high %v1200_v44, %v1204_v32  ;;  %v1256_v59 = vld [vmem:[%s15084_s12 + $0x1d18] sm:$0xff]  ;;  %v14047_v27 = vcombine.low %v1264_v48, %v1268_v42 }
 0x596   : > { %11869 = vmatpush1.bf16.msra.mxu1 %v13895_v39  ;;  %11845 = vmatprep.subr.bf16.mxu0 %v13824_v50  ;;  %v1260_v14 = vld [vmem:[%s15084_s12 + $0x1d38] sm:$0xff]  ;;  %v13983_v50 = vcombine.low %v1200_v44, %v1204_v32 }
 0x597   : > { %11870 = vmatprep.subr.bf16.mxu1 %v13888_v38  ;;  %v1192_v7 = vld [vmem:[%s15084_s12 + $0x1b18] sm:$0xff]  ;;  %v14040_v38 = vcombine.high %v1256_v59, %v1260_v14 }
 0x598   : > { %v1196_v41 = vld [vmem:[%s15084_s12 + $0x1b38] sm:$0xff] }
 0x599   : > { %11846 = vmatpush2.bf16.msra.mxu0 %v13823_v18  ;;  %v13976_v46 = vcombine.high %v1192_v7, %v1196_v41  ;;  %v1248_v10 = vld [vmem:[%s15084_s12 + $0x1cd8] sm:$0xff] }
 0x59a   : > { %11871 = vmatpush1.bf16.msra.mxu1 %v13887_v17  ;;  %11847 = vmatprep.subr.bf16.mxu0 %v13816_v43  ;;  %v1252_v56 = vld [vmem:[%s15084_s12 + $0x1cf8] sm:$0xff]  ;;  %v14039_v17 = vcombine.low %v1256_v59, %v1260_v14  ;;  %v13975_v43 = vcombine.low %v1192_v7, %v1196_v41 }
 0x59b   : > { %11872 = vmatprep.subr.bf16.mxu1 %v13880_v49  ;;  %v1184_v11 = vld [vmem:[%s15084_s12 + $0x1ad8] sm:$0xff]  ;;  %v14032_v49 = vcombine.high %v1248_v10, %v1252_v56 }
 0x59c   : > { %v1188_v18 = vld [vmem:[%s15084_s12 + $0x1af8] sm:$0xff] }
 0x59d   : > { %11848 = vmatpush2.bf16.msra.mxu0 %v13815_v51  ;;  %v13968_v22 = vcombine.high %v1184_v11, %v1188_v18  ;;  %v1240_v40 = vld [vmem:[%s15084_s12 + $0x1c98] sm:$0xff] }
 0x59e   : > { %11873 = vmatpush1.bf16.msra.mxu1 %v13879_v28  ;;  %11899 = vmatprep.subr.bf16.mxu0 %v14064_v6  ;;  %v1244_v8 = vld [vmem:[%s15084_s12 + $0x1cb8] sm:$0xff]  ;;  %v14031_v28 = vcombine.low %v1248_v10, %v1252_v56  ;;  %v13967_v6 = vcombine.low %v1184_v11, %v1188_v18 }
 0x59f   : > { %11874 = vmatprep.subr.bf16.mxu1 %v14000_v58  ;;  %v1176_v5 = vld [vmem:[%s15084_s12 + $0x1a98] sm:$0xff]  ;;  %v14024_v37 = vcombine.high %v1240_v40, %v1244_v8  ;;  %v14023_v62 = vcombine.low %v1240_v40, %v1244_v8 }
 0x5a0   : > { %v11605_v31 = vpop.f32.mrf.mxu0  ;;  %11850 = vmatmul.mubr.bf16.vlgmr.msra.gmra.mxu0 %v15364_v9  ;;  %v1180_v51 = vld [vmem:[%s15084_s12 + $0x1ab8] sm:$0xff] }
 0x5a1   : > { %v11606_v13 = vadd.f32 %v11605_v31, %v11565_v1  ;;  %11900 = vmatpush1.bf16.msra.mxu0 %v14063_v57  ;;  %11931 = vmatprep.mubr.bf16.mxu0 %v15380_v19  ;;  %v13960_v58 = vcombine.high %v1176_v5, %v1180_v51  ;;  %v1232_v52 = vld [vmem:[%s15084_s12 + $0x1c58] sm:$0xff]  ;;  %v13959_v57 = vcombine.low %v1176_v5, %v1180_v51 }
 0x5a2   : > { %11875 = vmatpush2.bf16.msra.mxu1 %v13999_v54  ;;  %v11607_v29 = vpop.f32.mrf.mxu0  ;;  %11901 = vmatprep.subr.bf16.mxu0 %v14056_v61  ;;  %v1236_v60 = vld [vmem:[%s15084_s12 + $0x1c78] sm:$0xff] }
 0x5a3   : > { %v12149_v9 = vadd.f32 %v11606_v13, %v308_v15  ;;  %v11608_v21 = vadd.f32 %v11607_v29, %v11567_v55  ;;  %11876 = vmatprep.subr.bf16.mxu1 %v13992_v4  ;;  %v1168_v34 = vld [vmem:[%s15084_s12 + $0x1a58] sm:$0xff]  ;;  %v14016_v54 = vcombine.high %v1232_v52, %v1236_v60  ;;  %v14015_v15 = vcombine.low %v1232_v52, %v1236_v60 }
 0x5a4   : > { %v11609_v30 = vpop.f32.mrf.mxu0  ;;  %v1172_v16 = vld [vmem:[%s15084_s12 + $0x1a78] sm:$0xff] }
 0x5a5   : > { %12157 = vst [vmem:[#allocation2 + $0x8] sm:$0xff] %v12149_v9  ;;  %v12150_v19 = vadd.f32 %v11608_v21, %v309_v63  ;;  %11902 = vmatpush1.bf16.msra.mxu0 %v14055_v33  ;;  %v13952_v61 = vcombine.high %v1168_v34, %v1172_v16  ;;  %v1224_v1 = vld [vmem:[%s15084_s12 + $0x1c18] sm:$0xff]  ;;  %v13951_v31 = vcombine.low %v1168_v34, %v1172_v16 }
 0x5a6   : > { %11877 = vmatpush2.bf16.msra.mxu1 %v13991_v20  ;;  %v11610_v39 = vpop.f32.mrf.mxu0  ;;  %11903 = vmatprep.subr.bf16.mxu0 %v14048_v36  ;;  %v1228_v4 = vld [vmem:[%s15084_s12 + $0x1c38] sm:$0xff] }
 0x5a7   : > { %12158 = vst [vmem:[#allocation2 + $0x20] sm:$0xff] %v12150_v19  ;;  %11878 = vmatprep.subr.bf16.mxu1 %v13984_v35  ;;  %v1160_v48 = vld [vmem:[%s15084_s12 + $0x1a18] sm:$0xff]  ;;  %v14008_v44 = vcombine.high %v1224_v1, %v1228_v4  ;;  %v14007_v29 = vcombine.low %v1224_v1, %v1228_v4 }
 0x5a8   : > { %v1164_v42 = vld [vmem:[%s15084_s12 + $0x1a38] sm:$0xff] }
 0x5a9   : > { %11904 = vmatpush1.bf16.msra.mxu0 %v14047_v27  ;;  %v13944_v32 = vcombine.high %v1160_v48, %v1164_v42  ;;  %v1344_v55 = vld [vmem:[%s15084_s12 + $0x1fd8] sm:$0xff]  ;;  %v13943_v20 = vcombine.low %v1160_v48, %v1164_v42 }
 0x5aa   : > { %11879 = vmatpush2.bf16.msra.mxu1 %v13983_v50  ;;  %11905 = vmatprep.subr.bf16.mxu0 %v14040_v38  ;;  %v1348_v13 = vld [vmem:[%s15084_s12 + $0x1ff8] sm:$0xff] }
 0x5ab   : > { %11880 = vmatprep.subr.bf16.mxu1 %v13976_v46  ;;  %v1408_v33 = vld [vmem:[%s15084_s12 + $0x21d8] sm:$0xff]  ;;  %v14128_v36 = vcombine.high %v1344_v55, %v1348_v13  ;;  %v14127_v30 = vcombine.low %v1344_v55, %v1348_v13 }
 0x5ac   : > { %v1412_v63 = vld [vmem:[%s15084_s12 + $0x21f8] sm:$0xff] }
 0x5ad   : > { %11906 = vmatpush1.bf16.msra.mxu0 %v14039_v17  ;;  %v14192_v9 = vcombine.high %v1408_v33, %v1412_v63  ;;  %v1336_v21 = vld [vmem:[%s15084_s12 + $0x1f98] sm:$0xff]  ;;  %v14191_v7 = vcombine.low %v1408_v33, %v1412_v63 }
 0x5ae   : > { %11881 = vmatpush2.bf16.msra.mxu1 %v13975_v43  ;;  %11907 = vmatprep.subr.bf16.mxu0 %v14032_v49  ;;  %v1340_v35 = vld [vmem:[%s15084_s12 + $0x1fb8] sm:$0xff] }
 0x5af   : > { %11882 = vmatprep.subr.bf16.mxu1 %v13968_v22  ;;  %v1400_v59 = vld [vmem:[%s15084_s12 + $0x2198] sm:$0xff]  ;;  %v14120_v41 = vcombine.high %v1336_v21, %v1340_v35  ;;  %v14119_v10 = vcombine.low %v1336_v21, %v1340_v35 }
 0x5b0   : > { %v1404_v14 = vld [vmem:[%s15084_s12 + $0x21b8] sm:$0xff] }
 0x5b1   : > { %11908 = vmatpush1.bf16.msra.mxu0 %v14031_v28  ;;  %v14184_v19 = vcombine.high %v1400_v59, %v1404_v14  ;;  %v1328_v27 = vld [vmem:[%s15084_s12 + $0x1f58] sm:$0xff]  ;;  %v14183_v56 = vcombine.low %v1400_v59, %v1404_v14 }
 0x5b2   : > { %11883 = vmatpush2.bf16.msra.mxu1 %v13967_v6  ;;  %11909 = vmatprep.subr.bf16.mxu0 %v14024_v37  ;;  %v1332_v39 = vld [vmem:[%s15084_s12 + $0x1f78] sm:$0xff] }
 0x5b3   : > { %11884 = vmatprep.subr.bf16.mxu1 %v13960_v58  ;;  %v1392_v50 = vld [vmem:[%s15084_s12 + $0x2158] sm:$0xff]  ;;  %v14112_v11 = vcombine.high %v1328_v27, %v1332_v39  ;;  %v14111_v8 = vcombine.low %v1328_v27, %v1332_v39 }
 0x5b4   : > { %v1396_v38 = vld [vmem:[%s15084_s12 + $0x2178] sm:$0xff] }
 0x5b5   : > { %11910 = vmatpush1.bf16.msra.mxu0 %v14023_v62  ;;  %v14176_v17 = vcombine.high %v1392_v50, %v1396_v38  ;;  %v1320_v43 = vld [vmem:[%s15084_s12 + $0x1f18] sm:$0xff]  ;;  %v14175_v5 = vcombine.low %v1392_v50, %v1396_v38 }
 0x5b6   : > { %11885 = vmatpush2.bf16.msra.mxu1 %v13959_v57  ;;  %11911 = vmatprep.subr.bf16.mxu0 %v14016_v54  ;;  %v1324_v49 = vld [vmem:[%s15084_s12 + $0x1f38] sm:$0xff] }
 0x5b7   : > { %11886 = vmatprep.subr.bf16.mxu1 %v13952_v61  ;;  %v1384_v22 = vld [vmem:[%s15084_s12 + $0x2118] sm:$0xff]  ;;  %v14104_v51 = vcombine.high %v1320_v43, %v1324_v49  ;;  %v14103_v60 = vcombine.low %v1320_v43, %v1324_v49 }
 0x5b8   : > { %v1312_v37 = vld [vmem:[%s15084_s12 + $0x1ed8] sm:$0xff] }
 0x5b9   : > { %11912 = vmatpush1.bf16.msra.mxu0 %v14015_v15  ;;  %v1316_v58 = vld [vmem:[%s15084_s12 + $0x1ef8] sm:$0xff] }
 0x5ba   : > { %11887 = vmatpush2.bf16.msra.mxu1 %v13951_v31  ;;  %11913 = vmatprep.subr.bf16.mxu0 %v14008_v44  ;;  %v1380_v52 = vld [vmem:[%s15084_s12 + $0x20f8] sm:$0xff]  ;;  %v14096_v16 = vcombine.high %v1312_v37, %v1316_v58  ;;  %v14095_v4 = vcombine.low %v1312_v37, %v1316_v58 }
 0x5bb   : > { %11888 = vmatprep.subr.bf16.mxu1 %v13944_v32  ;;  %v1304_v57 = vld [vmem:[%s15084_s12 + $0x1e98] sm:$0xff] }
 0x5bc   : > { %v1308_v54 = vld [vmem:[%s15084_s12 + $0x1eb8] sm:$0xff] }
 0x5bd   : > { %11914 = vmatpush1.bf16.msra.mxu0 %v14007_v29  ;;  %v1368_v61 = vld [vmem:[%s15084_s12 + $0x2098] sm:$0xff]  ;;  %v14088_v42 = vcombine.high %v1304_v57, %v1308_v54  ;;  %v14087_v13 = vcombine.low %v1304_v57, %v1308_v54 }
 0x5be   : > { %11889 = vmatpush2.bf16.msra.mxu1 %v13943_v20  ;;  %11915 = vmatprep.subr.bf16.mxu0 %v14128_v36  ;;  %v1372_v1 = vld [vmem:[%s15084_s12 + $0x20b8] sm:$0xff] }
 0x5bf   : > { %11940 = vmatprep.subr.bf16.mxu1 %v14192_v9  ;;  %v14152_v15 = vcombine.high %v1368_v61, %v1372_v1  ;;  %v1296_v31 = vld [vmem:[%s15084_s12 + $0x1e58] sm:$0xff]  ;;  %v14151_v33 = vcombine.low %v1368_v61, %v1372_v1 }
 0x5c0   : > { %v1300_v44 = vld [vmem:[%s15084_s12 + $0x1e78] sm:$0xff] }
 0x5c1   : > { %v16913_v46 = vpop.f32.mrf.mxu1  ;;  %11891 = vmatmul.mubr.bf16.vlgmr.msra.gmra.mxu1 %v15445_v23  ;;  %11916 = vmatpush2.bf16.msra.mxu0 %v14127_v30  ;;  %v1388_v23 = vld [vmem:[%s15084_s12 + $0x2138] sm:$0xff]  ;;  %v14080_v63 = vcombine.high %v1296_v31, %v1300_v44  ;;  %v14079_v35 = vcombine.low %v1296_v31, %v1300_v44 }
 0x5c2   : > { %11941 = vmatpush1.bf16.msra.mxu1 %v14191_v7  ;;  %11917 = vmatprep.subr.bf16.mxu0 %v14120_v41  ;;  %v14168_v6 = vcombine.high %v1384_v22, %v1388_v23  ;;  %v14167_v34 = vcombine.low %v1384_v22, %v1388_v23  ;;  %v1360_v32 = vld [vmem:[%s15084_s12 + $0x2058] sm:$0xff] }
 0x5c3   : > { %v16916_v18 = vpop.f32.mrf.mxu1  ;;  %11942 = vmatprep.subr.bf16.mxu1 %v14184_v19  ;;  %11972 = vmatprep.mubr.bf16.mxu1 %v15463_v0  ;;  %v1376_v0 = vld [vmem:[%s15084_s12 + $0x20d8] sm:$0xff] }
 0x5c4   : > { %v14160_v62 = vcombine.high %v1376_v0, %v1380_v52  ;;  %v14159_v48 = vcombine.low %v1376_v0, %v1380_v52  ;;  %v1364_v55 = vld [vmem:[%s15084_s12 + $0x2078] sm:$0xff] }
 0x5c5   : > { %v11650_v40 = vpop.f32.mrf.mxu1  ;;  %11918 = vmatpush2.bf16.msra.mxu0 %v14119_v10  ;;  %v14144_v29 = vcombine.high %v1360_v32, %v1364_v55  ;;  %v1288_v20 = vld [vmem:[%s15084_s12 + $0x1e18] sm:$0xff]  ;;  %v14143_v59 = vcombine.low %v1360_v32, %v1364_v55 }
 0x5c6   : > { %11943 = vmatpush1.bf16.msra.mxu1 %v14183_v56  ;;  %11919 = vmatprep.subr.bf16.mxu0 %v14112_v11  ;;  %v1292_v36 = vld [vmem:[%s15084_s12 + $0x1e38] sm:$0xff] }
 0x5c7   : > { %v11651_v28 = vpop.f32.mrf.mxu1  ;;  %11944 = vmatprep.subr.bf16.mxu1 %v14176_v17  ;;  %v1352_v9 = vld [vmem:[%s15084_s12 + $0x2018] sm:$0xff]  ;;  %v14072_v14 = vcombine.high %v1288_v20, %v1292_v36  ;;  %v14071_v39 = vcombine.low %v1288_v20, %v1292_v36 }
 0x5c8   : > { %v1356_v21 = vld [vmem:[%s15084_s12 + $0x2038] sm:$0xff] }
 0x5c9   : > { %11920 = vmatpush2.bf16.msra.mxu0 %v14111_v8  ;;  %v14136_v30 = vcombine.high %v1352_v9, %v1356_v21  ;;  %v1536_v7 = vld [vmem:[%s15084_s12 + $0x25d8] sm:$0xff]  ;;  %v14135_v50 = vcombine.low %v1352_v9, %v1356_v21 }
 0x5ca   : > { %11945 = vmatpush1.bf16.msra.mxu1 %v14175_v5  ;;  %11921 = vmatprep.subr.bf16.mxu0 %v14104_v51  ;;  %v1540_v41 = vld [vmem:[%s15084_s12 + $0x25f8] sm:$0xff] }
 0x5cb   : > { %11946 = vmatprep.subr.bf16.mxu1 %v14168_v6  ;;  %v1472_v19 = vld [vmem:[%s15084_s12 + $0x23d8] sm:$0xff]  ;;  %v14320_v38 = vcombine.high %v1536_v7, %v1540_v41  ;;  %v14319_v49 = vcombine.low %v1536_v7, %v1540_v41 }
 0x5cc   : > { %v1476_v27 = vld [vmem:[%s15084_s12 + $0x23f8] sm:$0xff] }
 0x5cd   : > { %11922 = vmatpush2.bf16.msra.mxu0 %v14103_v60  ;;  %v14256_v10 = vcombine.high %v1472_v19, %v1476_v27  ;;  %v1528_v56 = vld [vmem:[%s15084_s12 + $0x2598] sm:$0xff]  ;;  %v14255_v22 = vcombine.low %v1472_v19, %v1476_v27 }
 0x5ce   : > { %11947 = vmatpush1.bf16.msra.mxu1 %v14167_v34  ;;  %11923 = vmatprep.subr.bf16.mxu0 %v14096_v16  ;;  %v1532_v11 = vld [vmem:[%s15084_s12 + $0x25b8] sm:$0xff] }
 0x5cf   : > { %11948 = vmatprep.subr.bf16.mxu1 %v14160_v62  ;;  %v1464_v17 = vld [vmem:[%s15084_s12 + $0x2398] sm:$0xff]  ;;  %v14312_v23 = vcombine.high %v1528_v56, %v1532_v11  ;;  %v14311_v58 = vcombine.low %v1528_v56, %v1532_v11 }
 0x5d0   : > { %v1468_v43 = vld [vmem:[%s15084_s12 + $0x23b8] sm:$0xff] }
 0x5d1   : > { %11924 = vmatpush2.bf16.msra.mxu0 %v14095_v4  ;;  %v14248_v40 = vcombine.high %v1464_v17, %v1468_v43  ;;  %v1520_v8 = vld [vmem:[%s15084_s12 + $0x2558] sm:$0xff]  ;;  %v14247_v52 = vcombine.low %v1464_v17, %v1468_v43 }
 0x5d2   : > { %11949 = vmatpush1.bf16.msra.mxu1 %v14159_v48  ;;  %11925 = vmatprep.subr.bf16.mxu0 %v14088_v42  ;;  %v1524_v5 = vld [vmem:[%s15084_s12 + $0x2578] sm:$0xff] }
 0x5d3   : > { %11950 = vmatprep.subr.bf16.mxu1 %v14152_v15  ;;  %v1456_v28 = vld [vmem:[%s15084_s12 + $0x2358] sm:$0xff]  ;;  %v14304_v60 = vcombine.high %v1520_v8, %v1524_v5 }
 0x5d4   : > { %v1460_v6 = vld [vmem:[%s15084_s12 + $0x2378] sm:$0xff] }
 0x5d5   : > { %11926 = vmatpush2.bf16.msra.mxu0 %v14087_v13  ;;  %v1512_v16 = vld [vmem:[%s15084_s12 + $0x2518] sm:$0xff]  ;;  %v14239_v1 = vcombine.low %v1456_v28, %v1460_v6 }
 0x5d6   : > { %11951 = vmatpush1.bf16.msra.mxu1 %v14151_v33  ;;  %11927 = vmatprep.subr.bf16.mxu0 %v14080_v63  ;;  %v1448_v57 = vld [vmem:[%s15084_s12 + $0x2318] sm:$0xff] }
 0x5d7   : > { %11952 = vmatprep.subr.bf16.mxu1 %v14144_v29  ;;  %v1452_v54 = vld [vmem:[%s15084_s12 + $0x2338] sm:$0xff] }
 0x5d8   : > { %v14232_v4 = vcombine.high %v1448_v57, %v1452_v54  ;;  %v1504_v48 = vld [vmem:[%s15084_s12 + $0x24d8] sm:$0xff]  ;;  %v14231_v32 = vcombine.low %v1448_v57, %v1452_v54 }
 0x5d9   : > { %11928 = vmatpush2.bf16.msra.mxu0 %v14079_v35  ;;  %v1508_v42 = vld [vmem:[%s15084_s12 + $0x24f8] sm:$0xff] }
 0x5da   : > { %11953 = vmatpush1.bf16.msra.mxu1 %v14143_v59  ;;  %11929 = vmatprep.subr.bf16.mxu0 %v14072_v14  ;;  %v1440_v15 = vld [vmem:[%s15084_s12 + $0x22d8] sm:$0xff]  ;;  %v14288_v55 = vcombine.high %v1504_v48, %v1508_v42  ;;  %v14287_v36 = vcombine.low %v1504_v48, %v1508_v42 }
 0x5db   : > { %11954 = vmatprep.subr.bf16.mxu1 %v14136_v30  ;;  %v1444_v31 = vld [vmem:[%s15084_s12 + $0x22f8] sm:$0xff] }
 0x5dc   : > { %v14224_v13 = vcombine.high %v1440_v15, %v1444_v31  ;;  %v1496_v33 = vld [vmem:[%s15084_s12 + $0x2498] sm:$0xff]  ;;  %v14223_v9 = vcombine.low %v1440_v15, %v1444_v31 }
 0x5dd   : > { %11930 = vmatpush2.bf16.msra.mxu0 %v14071_v39  ;;  %v1500_v63 = vld [vmem:[%s15084_s12 + $0x24b8] sm:$0xff] }
 0x5de   : > { %11955 = vmatpush1.bf16.msra.mxu1 %v14135_v50  ;;  %11981 = vmatprep.subr.bf16.mxu0 %v14320_v38  ;;  %v1432_v29 = vld [vmem:[%s15084_s12 + $0x2298] sm:$0xff]  ;;  %v14280_v21 = vcombine.high %v1496_v33, %v1500_v63  ;;  %v14279_v41 = vcombine.low %v1496_v33, %v1500_v63 }
 0x5df   : > { %11956 = vmatprep.subr.bf16.mxu1 %v14256_v10  ;;  %v1436_v20 = vld [vmem:[%s15084_s12 + $0x22b8] sm:$0xff] }
 0x5e0   : > { %v11687_v51 = vpop.f32.mrf.mxu0  ;;  %11932 = vmatmul.mubr.bf16.vlgmr.msra.gmra.mxu0 %v15454_v53  ;;  %v14240_v53 = vcombine.high %v1456_v28, %v1460_v6  ;;  %v14216_v35 = vcombine.high %v1432_v29, %v1436_v20  ;;  %v1488_v59 = vld [vmem:[%s15084_s12 + $0x2458] sm:$0xff]  ;;  %v14215_v19 = vcombine.low %v1432_v29, %v1436_v20 }
 0x5e1   : > { %v16953_v37 = vadd.f32 %v11687_v51, %v16913_v46  ;;  %11982 = vmatpush1.bf16.msra.mxu0 %v14319_v49  ;;  %12013 = vmatprep.mubr.bf16.mxu0 %v15470_v3  ;;  %v1516_v46 = vld [vmem:[%s15084_s12 + $0x2538] sm:$0xff]  ;;  %v14303_v3 = vcombine.low %v1520_v8, %v1524_v5 }
 0x5e2   : > { %11957 = vmatpush2.bf16.msra.mxu1 %v14255_v22  ;;  %v11689_v0 = vpop.f32.mrf.mxu0  ;;  %11983 = vmatprep.subr.bf16.mxu0 %v14312_v23  ;;  %v14295_v44 = vcombine.low %v1512_v16, %v1516_v46  ;;  %v1492_v14 = vld [vmem:[%s15084_s12 + $0x2478] sm:$0xff] }
 0x5e3   : > { %v16957_v34 = vadd.f32 %v11689_v0, %v16916_v18  ;;  %11958 = vmatprep.subr.bf16.mxu1 %v14248_v40  ;;  %v14296_v18 = vcombine.high %v1512_v16, %v1516_v46  ;;  %v1424_v30 = vld [vmem:[%s15084_s12 + $0x2258] sm:$0xff]  ;;  %v14272_v27 = vcombine.high %v1488_v59, %v1492_v14  ;;  %v14271_v11 = vcombine.low %v1488_v59, %v1492_v14 }
 0x5e4   : > { %v11691_v62 = vpop.f32.mrf.mxu0  ;;  %v1428_v7 = vld [vmem:[%s15084_s12 + $0x2278] sm:$0xff] }
 0x5e5   : > { %11984 = vmatpush1.bf16.msra.mxu0 %v14311_v58  ;;  %v14208_v39 = vcombine.high %v1424_v30, %v1428_v7  ;;  %v1480_v50 = vld [vmem:[%s15084_s12 + $0x2418] sm:$0xff]  ;;  %v14207_v17 = vcombine.low %v1424_v30, %v1428_v7 }
 0x5e6   : > { %11959 = vmatpush2.bf16.msra.mxu1 %v14247_v52  ;;  %v11692_v61 = vpop.f32.mrf.mxu0  ;;  %11985 = vmatprep.subr.bf16.mxu0 %v14304_v60  ;;  %v1484_v38 = vld [vmem:[%s15084_s12 + $0x2438] sm:$0xff] }
 0x5e7   : > { %11960 = vmatprep.subr.bf16.mxu1 %v14240_v53  ;;  %v1416_v10 = vld [vmem:[%s15084_s12 + $0x2218] sm:$0xff]  ;;  %v14264_v43 = vcombine.high %v1480_v50, %v1484_v38  ;;  %v14263_v5 = vcombine.low %v1480_v50, %v1484_v38 }
 0x5e8   : > { %v1420_v56 = vld [vmem:[%s15084_s12 + $0x2238] sm:$0xff] }
 0x5e9   : > { %11986 = vmatpush1.bf16.msra.mxu0 %v14303_v3  ;;  %v14200_v49 = vcombine.high %v1416_v10, %v1420_v56  ;;  %v1600_v22 = vld [vmem:[%s15084_s12 + $0x27d8] sm:$0xff]  ;;  %v14199_v51 = vcombine.low %v1416_v10, %v1420_v56 }
 0x5ea   : > { %11961 = vmatpush2.bf16.msra.mxu1 %v14239_v1  ;;  %11987 = vmatprep.subr.bf16.mxu0 %v14296_v18  ;;  %v1604_v23 = vld [vmem:[%s15084_s12 + $0x27f8] sm:$0xff] }
 0x5eb   : > { %11962 = vmatprep.subr.bf16.mxu1 %v14232_v4  ;;  %v1664_v40 = vld [vmem:[%s15084_s12 + $0x29d8] sm:$0xff]  ;;  %v14384_v28 = vcombine.high %v1600_v22, %v1604_v23  ;;  %v14383_v53 = vcombine.low %v1600_v22, %v1604_v23 }
 0x5ec   : > { %v1668_v8 = vld [vmem:[%s15084_s12 + $0x29f8] sm:$0xff] }
 0x5ed   : > { %11988 = vmatpush1.bf16.msra.mxu0 %v14295_v44  ;;  %v14448_v6 = vcombine.high %v1664_v40, %v1668_v8  ;;  %v1592_v58 = vld [vmem:[%s15084_s12 + $0x2798] sm:$0xff]  ;;  %v14447_v16 = vcombine.low %v1664_v40, %v1668_v8 }
 0x5ee   : > { %11963 = vmatpush2.bf16.msra.mxu1 %v14231_v32  ;;  %11989 = vmatprep.subr.bf16.mxu0 %v14288_v55  ;;  %v1596_v0 = vld [vmem:[%s15084_s12 + $0x27b8] sm:$0xff] }
 0x5ef   : > { %11964 = vmatprep.subr.bf16.mxu1 %v14224_v13  ;;  %v1656_v52 = vld [vmem:[%s15084_s12 + $0x2998] sm:$0xff]  ;;  %v14376_v46 = vcombine.high %v1592_v58, %v1596_v0  ;;  %v14375_v18 = vcombine.low %v1592_v58, %v1596_v0 }
 0x5f0   : > { %v1660_v60 = vld [vmem:[%s15084_s12 + $0x29b8] sm:$0xff] }
 0x5f1   : > { %11990 = vmatpush1.bf16.msra.mxu0 %v14287_v36  ;;  %v14440_v62 = vcombine.high %v1656_v52, %v1660_v60  ;;  %v1584_v57 = vld [vmem:[%s15084_s12 + $0x2758] sm:$0xff]  ;;  %v14439_v48 = vcombine.low %v1656_v52, %v1660_v60 }
 0x5f2   : > { %11965 = vmatpush2.bf16.msra.mxu1 %v14223_v9  ;;  %11991 = vmatprep.subr.bf16.mxu0 %v14280_v21  ;;  %v1588_v54 = vld [vmem:[%s15084_s12 + $0x2778] sm:$0xff] }
 0x5f3   : > { %11966 = vmatprep.subr.bf16.mxu1 %v14216_v35  ;;  %v1648_v3 = vld [vmem:[%s15084_s12 + $0x2958] sm:$0xff]  ;;  %v14368_v42 = vcombine.high %v1584_v57, %v1588_v54  ;;  %v14367_v33 = vcombine.low %v1584_v57, %v1588_v54 }
 0x5f4   : > { %v1652_v61 = vld [vmem:[%s15084_s12 + $0x2978] sm:$0xff] }
 0x5f5   : > { %11992 = vmatpush1.bf16.msra.mxu0 %v14279_v41  ;;  %v14432_v31 = vcombine.high %v1648_v3, %v1652_v61  ;;  %v1576_v44 = vld [vmem:[%s15084_s12 + $0x2718] sm:$0xff]  ;;  %v14431_v63 = vcombine.low %v1648_v3, %v1652_v61 }
 0x5f6   : > { %11967 = vmatpush2.bf16.msra.mxu1 %v14215_v19  ;;  %11993 = vmatprep.subr.bf16.mxu0 %v14272_v27  ;;  %v1580_v32 = vld [vmem:[%s15084_s12 + $0x2738] sm:$0xff] }
 0x5f7   : > { %11968 = vmatprep.subr.bf16.mxu1 %v14208_v39  ;;  %v1644_v55 = vld [vmem:[%s15084_s12 + $0x2938] sm:$0xff]  ;;  %v14360_v29 = vcombine.high %v1576_v44, %v1580_v32  ;;  %v14359_v35 = vcombine.low %v1576_v44, %v1580_v32 }
 0x5f8   : > { %v1568_v36 = vld [vmem:[%s15084_s12 + $0x26d8] sm:$0xff] }
 0x5f9   : > { %11994 = vmatpush1.bf16.msra.mxu0 %v14271_v11  ;;  %v1632_v9 = vld [vmem:[%s15084_s12 + $0x28d8] sm:$0xff] }
 0x5fa   : > { %11969 = vmatpush2.bf16.msra.mxu1 %v14207_v17  ;;  %11995 = vmatprep.subr.bf16.mxu0 %v14264_v43  ;;  %v1636_v21 = vld [vmem:[%s15084_s12 + $0x28f8] sm:$0xff] }
 0x5fb   : > { %11970 = vmatprep.subr.bf16.mxu1 %v14200_v49  ;;  %v14416_v30 = vcombine.high %v1632_v9, %v1636_v21  ;;  %v1560_v7 = vld [vmem:[%s15084_s12 + $0x2698] sm:$0xff]  ;;  %v14415_v50 = vcombine.low %v1632_v9, %v1636_v21 }
 0x5fc   : > { %v1564_v41 = vld [vmem:[%s15084_s12 + $0x26b8] sm:$0xff] }
 0x5fd   : > { %11996 = vmatpush1.bf16.msra.mxu0 %v14263_v5  ;;  %v1624_v19 = vld [vmem:[%s15084_s12 + $0x2898] sm:$0xff]  ;;  %v14344_v38 = vcombine.high %v1560_v7, %v1564_v41  ;;  %v14343_v49 = vcombine.low %v1560_v7, %v1564_v41 }
 0x5fe   : > { %11971 = vmatpush2.bf16.msra.mxu1 %v14199_v51  ;;  %11997 = vmatprep.subr.bf16.mxu0 %v14384_v28  ;;  %v1628_v27 = vld [vmem:[%s15084_s12 + $0x28b8] sm:$0xff] }
 0x5ff   : > { %12022 = vmatprep.subr.bf16.mxu1 %v14448_v6  ;;  %v14408_v10 = vcombine.high %v1624_v19, %v1628_v27  ;;  %v1552_v56 = vld [vmem:[%s15084_s12 + $0x2658] sm:$0xff]  ;;  %v14407_v22 = vcombine.low %v1624_v19, %v1628_v27 }
 0x600   : > { %v1556_v11 = vld [vmem:[%s15084_s12 + $0x2678] sm:$0xff] }
 0x601   : > { %v11728_v1 = vpop.f32.mrf.mxu1  ;;  %11973 = vmatmul.mubr.bf16.vlgmr.msra.gmra.mxu1 %v15539_v2  ;;  %11998 = vmatpush2.bf16.msra.mxu0 %v14383_v53  ;;  %v1616_v17 = vld [vmem:[%s15084_s12 + $0x2858] sm:$0xff]  ;;  %v14336_v23 = vcombine.high %v1552_v56, %v1556_v11  ;;  %v14335_v6 = vcombine.low %v1552_v56, %v1556_v11 }
 0x602   : > { %v16993_v4 = vadd.f32 %v11728_v1, %v16953_v37  ;;  %12023 = vmatpush1.bf16.msra.mxu1 %v14447_v16  ;;  %11999 = vmatprep.subr.bf16.mxu0 %v14376_v46  ;;  %v1640_v37 = vld [vmem:[%s15084_s12 + $0x2918] sm:$0xff] }
 0x603   : > { %v11730_v15 = vpop.f32.mrf.mxu1  ;;  %12024 = vmatprep.subr.bf16.mxu1 %v14440_v62  ;;  %12054 = vmatprep.mubr.bf16.mxu1 %v15557_v24  ;;  %v14424_v24 = vcombine.high %v1640_v37, %v1644_v55  ;;  %v14423_v59 = vcombine.low %v1640_v37, %v1644_v55  ;;  %v1620_v43 = vld [vmem:[%s15084_s12 + $0x2878] sm:$0xff] }
 0x604   : > { %v16999_v2 = vadd.f32 %v11730_v15, %v16957_v34  ;;  %v1572_v34 = vld [vmem:[%s15084_s12 + $0x26f8] sm:$0xff]  ;;  %v14400_v40 = vcombine.high %v1616_v17, %v1620_v43  ;;  %v14399_v58 = vcombine.low %v1616_v17, %v1620_v43 }
 0x605   : > { %v11732_v13 = vpop.f32.mrf.mxu1  ;;  %12000 = vmatpush2.bf16.msra.mxu0 %v14375_v18  ;;  %v14352_v14 = vcombine.high %v1568_v36, %v1572_v34  ;;  %v14351_v39 = vcombine.low %v1568_v36, %v1572_v34  ;;  %v1544_v8 = vld [vmem:[%s15084_s12 + $0x2618] sm:$0xff] }
 0x606   : > { %12025 = vmatpush1.bf16.msra.mxu1 %v14439_v48  ;;  %12001 = vmatprep.subr.bf16.mxu0 %v14368_v42  ;;  %v1548_v5 = vld [vmem:[%s15084_s12 + $0x2638] sm:$0xff] }
 0x607   : > { %v11733_v20 = vpop.f32.mrf.mxu1  ;;  %12026 = vmatprep.subr.bf16.mxu1 %v14432_v31  ;;  %v1608_v51 = vld [vmem:[%s15084_s12 + $0x2818] sm:$0xff]  ;;  %v14328_v0 = vcombine.high %v1544_v8, %v1548_v5  ;;  %v14327_v62 = vcombine.low %v1544_v8, %v1548_v5 }
 0x608   : > { %v1612_v28 = vld [vmem:[%s15084_s12 + $0x2838] sm:$0xff] }
 0x609   : > { %12002 = vmatpush2.bf16.msra.mxu0 %v14367_v33  ;;  %v14392_v52 = vcombine.high %v1608_v51, %v1612_v28  ;;  %v1792_v60 = vld [vmem:[%s15084_s12 + $0x2dd8] sm:$0xff]  ;;  %v14391_v57 = vcombine.low %v1608_v51, %v1612_v28 }
 0x60a   : > { %12027 = vmatpush1.bf16.msra.mxu1 %v14431_v63  ;;  %12003 = vmatprep.subr.bf16.mxu0 %v14360_v29  ;;  %v1796_v53 = vld [vmem:[%s15084_s12 + $0x2df8] sm:$0xff] }
 0x60b   : > { %12028 = vmatprep.subr.bf16.mxu1 %v14424_v24  ;;  %v1728_v16 = vld [vmem:[%s15084_s12 + $0x2bd8] sm:$0xff]  ;;  %v14576_v54 = vcombine.high %v1792_v60, %v1796_v53  ;;  %v14575_v42 = vcombine.low %v1792_v60, %v1796_v53 }
 0x60c   : > { %v1732_v46 = vld [vmem:[%s15084_s12 + $0x2bf8] sm:$0xff] }
 0x60d   : > { %12004 = vmatpush2.bf16.msra.mxu0 %v14359_v35  ;;  %v14512_v3 = vcombine.high %v1728_v16, %v1732_v46  ;;  %v1784_v61 = vld [vmem:[%s15084_s12 + $0x2d98] sm:$0xff]  ;;  %v14511_v15 = vcombine.low %v1728_v16, %v1732_v46 }
 0x60e   : > { %12029 = vmatpush1.bf16.msra.mxu1 %v14423_v59  ;;  %12005 = vmatprep.subr.bf16.mxu0 %v14352_v14  ;;  %v1788_v1 = vld [vmem:[%s15084_s12 + $0x2db8] sm:$0xff] }
 0x60f   : > { %12030 = vmatprep.subr.bf16.mxu1 %v14416_v30  ;;  %v1720_v18 = vld [vmem:[%s15084_s12 + $0x2b98] sm:$0xff]  ;;  %v14568_v31 = vcombine.high %v1784_v61, %v1788_v1  ;;  %v14567_v29 = vcombine.low %v1784_v61, %v1788_v1 }
 0x610   : > { %v1724_v48 = vld [vmem:[%s15084_s12 + $0x2bb8] sm:$0xff] }
 0x611   : > { %12006 = vmatpush2.bf16.msra.mxu0 %v14351_v39  ;;  %v14504_v44 = vcombine.high %v1720_v18, %v1724_v48  ;;  %v1776_v32 = vld [vmem:[%s15084_s12 + $0x2d58] sm:$0xff]  ;;  %v14503_v24 = vcombine.low %v1720_v18, %v1724_v48 }
 0x612   : > { %12031 = vmatpush1.bf16.msra.mxu1 %v14415_v50  ;;  %12007 = vmatprep.subr.bf16.mxu0 %v14344_v38  ;;  %v1780_v37 = vld [vmem:[%s15084_s12 + $0x2d78] sm:$0xff] }
 0x613   : > { %12032 = vmatprep.subr.bf16.mxu1 %v14408_v10  ;;  %v1712_v13 = vld [vmem:[%s15084_s12 + $0x2b58] sm:$0xff]  ;;  %v14560_v36 = vcombine.high %v1776_v32, %v1780_v37 }
 0x614   : > { %v1716_v33 = vld [vmem:[%s15084_s12 + $0x2b78] sm:$0xff] }
 0x615   : > { %12008 = vmatpush2.bf16.msra.mxu0 %v14343_v49  ;;  %v1768_v9 = vld [vmem:[%s15084_s12 + $0x2d18] sm:$0xff]  ;;  %v14495_v30 = vcombine.low %v1712_v13, %v1716_v33 }
 0x616   : > { %12033 = vmatpush1.bf16.msra.mxu1 %v14407_v22  ;;  %12009 = vmatprep.subr.bf16.mxu0 %v14336_v23  ;;  %v1704_v35 = vld [vmem:[%s15084_s12 + $0x2b18] sm:$0xff] }
 0x617   : > { %12034 = vmatprep.subr.bf16.mxu1 %v14400_v40  ;;  %v1708_v59 = vld [vmem:[%s15084_s12 + $0x2b38] sm:$0xff] }
 0x618   : > { %v14488_v7 = vcombine.high %v1704_v35, %v1708_v59  ;;  %v1760_v41 = vld [vmem:[%s15084_s12 + $0x2cd8] sm:$0xff]  ;;  %v14487_v38 = vcombine.low %v1704_v35, %v1708_v59 }
 0x619   : > { %12010 = vmatpush2.bf16.msra.mxu0 %v14335_v6  ;;  %v1764_v19 = vld [vmem:[%s15084_s12 + $0x2cf8] sm:$0xff] }
 0x61a   : > { %12035 = vmatpush1.bf16.msra.mxu1 %v14399_v58  ;;  %12011 = vmatprep.subr.bf16.mxu0 %v14328_v0  ;;  %v1696_v27 = vld [vmem:[%s15084_s12 + $0x2ad8] sm:$0xff]  ;;  %v14544_v10 = vcombine.high %v1760_v41, %v1764_v19  ;;  %v14543_v22 = vcombine.low %v1760_v41, %v1764_v19 }
 0x61b   : > { %12036 = vmatprep.subr.bf16.mxu1 %v14392_v52  ;;  %v1700_v39 = vld [vmem:[%s15084_s12 + $0x2af8] sm:$0xff] }
 0x61c   : > { %v14480_v56 = vcombine.high %v1696_v27, %v1700_v39  ;;  %v1752_v11 = vld [vmem:[%s15084_s12 + $0x2c98] sm:$0xff]  ;;  %v14479_v23 = vcombine.low %v1696_v27, %v1700_v39 }
 0x61d   : > { %12012 = vmatpush2.bf16.msra.mxu0 %v14327_v62  ;;  %v1756_v17 = vld [vmem:[%s15084_s12 + $0x2cb8] sm:$0xff] }
 0x61e   : > { %12037 = vmatpush1.bf16.msra.mxu1 %v14391_v57  ;;  %12063 = vmatprep.subr.bf16.mxu0 %v14576_v54  ;;  %v1688_v43 = vld [vmem:[%s15084_s12 + $0x2a98] sm:$0xff]  ;;  %v14536_v40 = vcombine.high %v1752_v11, %v1756_v17  ;;  %v14535_v58 = vcombine.low %v1752_v11, %v1756_v17 }
 0x61f   : > { %12038 = vmatprep.subr.bf16.mxu1 %v14512_v3  ;;  %v1692_v49 = vld [vmem:[%s15084_s12 + $0x2ab8] sm:$0xff] }
 0x620   : > { %v11769_v55 = vpop.f32.mrf.mxu0  ;;  %12014 = vmatmul.mubr.bf16.vlgmr.msra.gmra.mxu0 %v15548_v12  ;;  %v14496_v12 = vcombine.high %v1712_v13, %v1716_v33  ;;  %v14472_v8 = vcombine.high %v1688_v43, %v1692_v49  ;;  %v1744_v5 = vld [vmem:[%s15084_s12 + $0x2c58] sm:$0xff]  ;;  %v14471_v0 = vcombine.low %v1688_v43, %v1692_v49 }
 0x621   : > { %v17033_v63 = vadd.f32 %v11769_v55, %v16993_v4  ;;  %12064 = vmatpush1.bf16.msra.mxu0 %v14575_v42  ;;  %12095 = vmatprep.mubr.bf16.mxu0 %v15564_v26  ;;  %v1772_v4 = vld [vmem:[%s15084_s12 + $0x2d38] sm:$0xff]  ;;  %v14559_v26 = vcombine.low %v1776_v32, %v1780_v37 }
 0x622   : > { %12039 = vmatpush2.bf16.msra.mxu1 %v14511_v15  ;;  %v11771_v20 = vpop.f32.mrf.mxu0  ;;  %12065 = vmatprep.subr.bf16.mxu0 %v14568_v31  ;;  %v14551_v50 = vcombine.low %v1768_v9, %v1772_v4  ;;  %v1748_v51 = vld [vmem:[%s15084_s12 + $0x2c78] sm:$0xff] }
 0x623   : > { %v17037_v34 = vadd.f32 %v11771_v20, %v16999_v2  ;;  %12040 = vmatprep.subr.bf16.mxu1 %v14504_v44  ;;  %v14552_v2 = vcombine.high %v1768_v9, %v1772_v4  ;;  %v1680_v28 = vld [vmem:[%s15084_s12 + $0x2a58] sm:$0xff]  ;;  %v14528_v52 = vcombine.high %v1744_v5, %v1748_v51  ;;  %v14527_v57 = vcombine.low %v1744_v5, %v1748_v51 }
 0x624   : > { %v11773_v21 = vpop.f32.mrf.mxu0  ;;  %v1684_v6 = vld [vmem:[%s15084_s12 + $0x2a78] sm:$0xff] }
 0x625   : > { %12066 = vmatpush1.bf16.msra.mxu0 %v14567_v29  ;;  %v14464_v60 = vcombine.high %v1680_v28, %v1684_v6  ;;  %v1736_v53 = vld [vmem:[%s15084_s12 + $0x2c18] sm:$0xff]  ;;  %v14463_v54 = vcombine.low %v1680_v28, %v1684_v6 }
 0x626   : > { %12041 = vmatpush2.bf16.msra.mxu1 %v14503_v24  ;;  %v11774_v14 = vpop.f32.mrf.mxu0  ;;  %12067 = vmatprep.subr.bf16.mxu0 %v14560_v36  ;;  %v1740_v16 = vld [vmem:[%s15084_s12 + $0x2c38] sm:$0xff] }
 0x627   : > { %12042 = vmatprep.subr.bf16.mxu1 %v14496_v12  ;;  %v1672_v46 = vld [vmem:[%s15084_s12 + $0x2a18] sm:$0xff]  ;;  %v14520_v3 = vcombine.high %v1736_v53, %v1740_v16  ;;  %v14519_v15 = vcombine.low %v1736_v53, %v1740_v16 }
 0x628   : > { %v1676_v62 = vld [vmem:[%s15084_s12 + $0x2a38] sm:$0xff] }
 0x629   : > { %12068 = vmatpush1.bf16.msra.mxu0 %v14559_v26  ;;  %v14456_v61 = vcombine.high %v1672_v46, %v1676_v62  ;;  %v1856_v1 = vld [vmem:[%s15084_s12 + $0x2fd8] sm:$0xff]  ;;  %v14455_v31 = vcombine.low %v1672_v46, %v1676_v62 }
 0x62a   : > { %12043 = vmatpush2.bf16.msra.mxu1 %v14495_v30  ;;  %12069 = vmatprep.subr.bf16.mxu0 %v14552_v2  ;;  %v1860_v18 = vld [vmem:[%s15084_s12 + $0x2ff8] sm:$0xff] }
 0x62b   : > { %12044 = vmatprep.subr.bf16.mxu1 %v14488_v7  ;;  %v1920_v48 = vld [vmem:[%s15084_s12 + $0x31d8] sm:$0xff]  ;;  %v14640_v44 = vcombine.high %v1856_v1, %v1860_v18  ;;  %v14639_v29 = vcombine.low %v1856_v1, %v1860_v18 }
 0x62c   : > { %v1924_v42 = vld [vmem:[%s15084_s12 + $0x31f8] sm:$0xff] }
 0x62d   : > { %12070 = vmatpush1.bf16.msra.mxu0 %v14551_v50  ;;  %v14704_v32 = vcombine.high %v1920_v48, %v1924_v42  ;;  %v1848_v37 = vld [vmem:[%s15084_s12 + $0x2f98] sm:$0xff]  ;;  %v14703_v20 = vcombine.low %v1920_v48, %v1924_v42 }
 0x62e   : > { %12045 = vmatpush2.bf16.msra.mxu1 %v14487_v38  ;;  %12071 = vmatprep.subr.bf16.mxu0 %v14544_v10  ;;  %v1852_v55 = vld [vmem:[%s15084_s12 + $0x2fb8] sm:$0xff] }
 0x62f   : > { %12046 = vmatprep.subr.bf16.mxu1 %v14480_v56  ;;  %v1912_v13 = vld [vmem:[%s15084_s12 + $0x3198] sm:$0xff]  ;;  %v14632_v24 = vcombine.high %v1848_v37, %v1852_v55  ;;  %v14631_v59 = vcombine.low %v1848_v37, %v1852_v55 }
 0x630   : > { %v1916_v33 = vld [vmem:[%s15084_s12 + $0x31b8] sm:$0xff] }
 0x631   : > { %12072 = vmatpush1.bf16.msra.mxu0 %v14543_v22  ;;  %v14696_v36 = vcombine.high %v1912_v13, %v1916_v33  ;;  %v1840_v12 = vld [vmem:[%s15084_s12 + $0x2f58] sm:$0xff]  ;;  %v14695_v14 = vcombine.low %v1912_v13, %v1916_v33  ;;  %v14939_v33 = vld [vmem:[%s15079_s8 + $0x60] ss:$0 sps:$4 sm:$0xff]  }
 0x632   : > { %12047 = vmatpush2.bf16.msra.mxu1 %v14479_v23  ;;  %12073 = vmatprep.subr.bf16.mxu0 %v14536_v40  ;;  %v1844_v9 = vld [vmem:[%s15084_s12 + $0x2f78] sm:$0xff] }
 0x633   : > { %12048 = vmatprep.subr.bf16.mxu1 %v14472_v8  ;;  %v1904_v4 = vld [vmem:[%s15084_s12 + $0x3158] sm:$0xff]  ;;  %v14624_v30 = vcombine.high %v1840_v12, %v1844_v9  ;;  %v14623_v50 = vcombine.low %v1840_v12, %v1844_v9 }
 0x634   : > { %v1908_v21 = vld [vmem:[%s15084_s12 + $0x3178] sm:$0xff] }
 0x635   : > { %12074 = vmatpush1.bf16.msra.mxu0 %v14535_v58  ;;  %v14688_v7 = vcombine.high %v1904_v4, %v1908_v21  ;;  %v1832_v41 = vld [vmem:[%s15084_s12 + $0x2f18] sm:$0xff]  ;;  %v14687_v38 = vcombine.low %v1904_v4, %v1908_v21 }
 0x636   : > { %12049 = vmatpush2.bf16.msra.mxu1 %v14471_v0  ;;  %12075 = vmatprep.subr.bf16.mxu0 %v14528_v52  ;;  %v1836_v19 = vld [vmem:[%s15084_s12 + $0x2f38] sm:$0xff] }
 0x637   : > { %12050 = vmatprep.subr.bf16.mxu1 %v14464_v60  ;;  %v1900_v27 = vld [vmem:[%s15084_s12 + $0x3138] sm:$0xff]  ;;  %v14616_v10 = vcombine.high %v1832_v41, %v1836_v19  ;;  %v14615_v49 = vcombine.low %v1832_v41, %v1836_v19 }
 0x638   : > { %v1824_v11 = vld [vmem:[%s15084_s12 + $0x2ed8] sm:$0xff] }
 0x639   : > { %12076 = vmatpush1.bf16.msra.mxu0 %v14527_v57  ;;  %v1888_v17 = vld [vmem:[%s15084_s12 + $0x30d8] sm:$0xff] }
 0x63a   : > { %12051 = vmatpush2.bf16.msra.mxu1 %v14463_v54  ;;  %12077 = vmatprep.subr.bf16.mxu0 %v14520_v3  ;;  %v1892_v43 = vld [vmem:[%s15084_s12 + $0x30f8] sm:$0xff] }
 0x63b   : > { %12052 = vmatprep.subr.bf16.mxu1 %v14456_v61  ;;  %v14672_v40 = vcombine.high %v1888_v17, %v1892_v43  ;;  %v1816_v8 = vld [vmem:[%s15084_s12 + $0x2e98] sm:$0xff]  ;;  %v14671_v58 = vcombine.low %v1888_v17, %v1892_v43 }
 0x63c   : > { %v1820_v5 = vld [vmem:[%s15084_s12 + $0x2eb8] sm:$0xff] }
 0x63d   : > { %12078 = vmatpush1.bf16.msra.mxu0 %v14519_v15  ;;  %v1880_v51 = vld [vmem:[%s15084_s12 + $0x3098] sm:$0xff]  ;;  %v14600_v0 = vcombine.high %v1816_v8, %v1820_v5  ;;  %v14599_v62 = vcombine.low %v1816_v8, %v1820_v5 }
 0x63e   : > { %12053 = vmatpush2.bf16.msra.mxu1 %v14455_v31  ;;  %12079 = vmatprep.subr.bf16.mxu0 %v14640_v44  ;;  %v1884_v28 = vld [vmem:[%s15084_s12 + $0x30b8] sm:$0xff] }
 0x63f   : > { %12104 = vmatprep.subr.bf16.mxu1 %v14704_v32  ;;  %v14664_v52 = vcombine.high %v1880_v51, %v1884_v28  ;;  %v1808_v60 = vld [vmem:[%s15084_s12 + $0x2e58] sm:$0xff]  ;;  %v14663_v57 = vcombine.low %v1880_v51, %v1884_v28  ;;  %v310_v51 = vld [vmem:[#allocation2 + $0x28] sm:$0xff] }
 0x640   : > { %v1812_v53 = vld [vmem:[%s15084_s12 + $0x2e78] sm:$0xff] }
 0x641   : > { %v11810_v35 = vpop.f32.mrf.mxu1  ;;  %12055 = vmatmul.mubr.bf16.vlgmr.msra.gmra.mxu1 %v15635_v45  ;;  %12080 = vmatpush2.bf16.msra.mxu0 %v14639_v29  ;;  %v1872_v16 = vld [vmem:[%s15084_s12 + $0x3058] sm:$0xff]  ;;  %v14592_v54 = vcombine.high %v1808_v60, %v1812_v53  ;;  %v14591_v42 = vcombine.low %v1808_v60, %v1812_v53 }
 0x642   : > { %v17073_v26 = vadd.f32 %v11810_v35, %v17033_v63  ;;  %12105 = vmatpush1.bf16.msra.mxu1 %v14703_v20  ;;  %12081 = vmatprep.subr.bf16.mxu0 %v14632_v24  ;;  %v1896_v63 = vld [vmem:[%s15084_s12 + $0x3118] sm:$0xff] }
 0x643   : > { %v11812_v2 = vpop.f32.mrf.mxu1  ;;  %12106 = vmatprep.subr.bf16.mxu1 %v14696_v36  ;;  %12136 = vmatprep.mubr.bf16.mxu1 %v15021_v25  ;;  %v14680_v25 = vcombine.high %v1896_v63, %v1900_v27  ;;  %v14679_v22 = vcombine.low %v1896_v63, %v1900_v27  ;;  %v1876_v46 = vld [vmem:[%s15084_s12 + $0x3078] sm:$0xff] }
 0x644   : > { %v17079_v45 = vadd.f32 %v11812_v2, %v17037_v34  ;;  %v1828_v34 = vld [vmem:[%s15084_s12 + $0x2ef8] sm:$0xff]  ;;  %v14656_v3 = vcombine.high %v1872_v16, %v1876_v46  ;;  %v14655_v15 = vcombine.low %v1872_v16, %v1876_v46 }
 0x645   : > { %v11814_v39 = vpop.f32.mrf.mxu1  ;;  %12082 = vmatpush2.bf16.msra.mxu0 %v14631_v59  ;;  %v14608_v23 = vcombine.high %v1824_v11, %v1828_v34  ;;  %v14607_v6 = vcombine.low %v1824_v11, %v1828_v34  ;;  %v1800_v61 = vld [vmem:[%s15084_s12 + $0x2e18] sm:$0xff] }
 0x646   : > { %12107 = vmatpush1.bf16.msra.mxu1 %v14695_v14  ;;  %12083 = vmatprep.subr.bf16.mxu0 %v14624_v30  ;;  %v1804_v1 = vld [vmem:[%s15084_s12 + $0x2e38] sm:$0xff] }
 0x647   : > { %v11815_v56 = vpop.f32.mrf.mxu1  ;;  %12108 = vmatprep.subr.bf16.mxu1 %v14688_v7  ;;  %v1864_v18 = vld [vmem:[%s15084_s12 + $0x3018] sm:$0xff]  ;;  %v14584_v31 = vcombine.high %v1800_v61, %v1804_v1  ;;  %v14583_v32 = vcombine.low %v1800_v61, %v1804_v1 }
 0x648   : > { %v1868_v48 = vld [vmem:[%s15084_s12 + $0x3038] sm:$0xff] }
 0x649   : > { %12084 = vmatpush2.bf16.msra.mxu0 %v14623_v50  ;;  %v14648_v44 = vcombine.high %v1864_v18, %v1868_v48  ;;  %v14647_v37 = vcombine.low %v1864_v18, %v1868_v48 }
 0x64a   : > { %12109 = vmatpush1.bf16.msra.mxu1 %v14687_v38  ;;  %12085 = vmatprep.subr.bf16.mxu0 %v14616_v10 }
 0x64b   : > { %12110 = vmatprep.subr.bf16.mxu1 %v14680_v25 }
 0x64d   : > { %12086 = vmatpush2.bf16.msra.mxu0 %v14615_v49 }
 0x64e   : > { %12111 = vmatpush1.bf16.msra.mxu1 %v14679_v22  ;;  %12087 = vmatprep.subr.bf16.mxu0 %v14608_v23 }
 0x64f   : > { %12112 = vmatprep.subr.bf16.mxu1 %v14672_v40 }
 0x651   : > { %12088 = vmatpush2.bf16.msra.mxu0 %v14607_v6 }
 0x652   : > { %12113 = vmatpush1.bf16.msra.mxu1 %v14671_v58  ;;  %12089 = vmatprep.subr.bf16.mxu0 %v14600_v0 }
 0x653   : > { %12114 = vmatprep.subr.bf16.mxu1 %v14664_v52  ;;  %v311_v52 = vld [vmem:[#allocation2 + $0x38] sm:$0xff] }
 0x655   : > { %12090 = vmatpush2.bf16.msra.mxu0 %v14599_v62 }
 0x656   : > { %12115 = vmatpush1.bf16.msra.mxu1 %v14663_v57  ;;  %12091 = vmatprep.subr.bf16.mxu0 %v14592_v54 }
 0x657   : > { %12116 = vmatprep.subr.bf16.mxu1 %v14656_v3 }
 0x659   : > { %12092 = vmatpush2.bf16.msra.mxu0 %v14591_v42 }
 0x65a   : > { %12117 = vmatpush1.bf16.msra.mxu1 %v14655_v15  ;;  %12093 = vmatprep.subr.bf16.mxu0 %v14584_v31 }
 0x65b   : > { %12118 = vmatprep.subr.bf16.mxu1 %v14648_v44 }
 0x65d   : > { %12094 = vmatpush2.bf16.msra.mxu0 %v14583_v32 }
 0x65e   : > { %12119 = vmatpush1.bf16.msra.mxu1 %v14647_v37 }
 0x660   : > { %v11851_v55 = vpop.f32.mrf.mxu0  ;;  %12096 = vmatmul.mubr.bf16.vlgmr.msra.gmra.mxu0 %v15641_v47 }
 0x661   : > { %v11852_v13 = vadd.f32 %v11851_v55, %v17073_v26  ;;  %12137 = vmatmul.mubr.bf16.vlgmr.msra.gmra.mxu1 %v14939_v33 }
 0x662   : > { %v11853_v29 = vpop.f32.mrf.mxu0 }
 0x663   : > { %v11854_v20 = vadd.f32 %v11853_v29, %v17079_v45 }
 0x664   : > { %v11855_v24 = vpop.f32.mrf.mxu0 }
 0x666   : > { %v11856_v36 = vpop.f32.mrf.mxu0 }
 0x681   : > { %v11892_v12 = vpop.f32.mrf.mxu1 }
 0x682   : > { %v11893_v9 = vadd.f32 %v11892_v12, %v11852_v13 }
 0x683   : > { %v11894_v4 = vpop.f32.mrf.mxu1 }
 0x684   : > { %v11895_v21 = vadd.f32 %v11894_v4, %v11854_v20 }
 0x685   : > { %v11896_v35 = vpop.f32.mrf.mxu1 }
 0x687   : > { %v11897_v59 = vpop.f32.mrf.mxu1 }
 0x6a0   : > { %v11933_v14 = vpop.f32.mrf.mxu0 }
 0x6a1   : > { %v11934_v30 = vadd.f32 %v11933_v14, %v11893_v9 }
 0x6a2   : > { %v11935_v2 = vpop.f32.mrf.mxu0 }
 0x6a3   : > { %v11936_v7 = vadd.f32 %v11935_v2, %v11895_v21 }
 0x6a4   : > { %v11937_v47 = vpop.f32.mrf.mxu0 }
 0x6a6   : > { %v11938_v41 = vpop.f32.mrf.mxu0 }
 0x6c1   : > { %v11974_v26 = vpop.f32.mrf.mxu1 }
 0x6c2   : > { %v11975_v19 = vadd.f32 %v11974_v26, %v11934_v30 }
 0x6c3   : > { %v11976_v63 = vpop.f32.mrf.mxu1 }
 0x6c4   : > { %v11977_v27 = vadd.f32 %v11976_v63, %v11936_v7 }
 0x6c5   : > { %v11978_v39 = vpop.f32.mrf.mxu1 }
 0x6c7   : > { %v11979_v45 = vpop.f32.mrf.mxu1 }
 0x6e0   : > { %v12015_v50 = vpop.f32.mrf.mxu0 }
 0x6e1   : > { %v12016_v43 = vadd.f32 %v12015_v50, %v11975_v19 }
 0x6e2   : > { %v12017_v38 = vpop.f32.mrf.mxu0 }
 0x6e3   : > { %v12018_v49 = vadd.f32 %v12017_v38, %v11977_v27 }
 0x6e4   : > { %v12019_v10 = vpop.f32.mrf.mxu0 }
 0x6e6   : > { %v12020_v56 = vpop.f32.mrf.mxu0 }
 0x701   : > { %v12056_v25 = vpop.f32.mrf.mxu1 }
 0x702   : > { %v12057_v22 = vadd.f32 %v12056_v25, %v12016_v43 }
 0x703   : > { %v12058_v11 = vpop.f32.mrf.mxu1 }
 0x704   : > { %v12059_v40 = vadd.f32 %v12058_v11, %v12018_v49 }
 0x705   : > { %v12060_v34 = vpop.f32.mrf.mxu1 }
 0x707   : > { %v12061_v17 = vpop.f32.mrf.mxu1 }
 0x720   : > { %v12097_v23 = vpop.f32.mrf.mxu0 }
 0x721   : > { %v12098_v8 = vadd.f32 %v12097_v23, %v12057_v22  ;;  %v12138_v5 = vpop.f32.mrf.mxu1 }
 0x722   : > { %v12099_v28 = vpop.f32.mrf.mxu0 }
 0x723   : > { %v12139_v6 = vadd.f32 %v12138_v5, %v12098_v8  ;;  %v12100_v58 = vadd.f32 %v12099_v28, %v12059_v40  ;;  %v12140_v0 = vpop.f32.mrf.mxu1 }
 0x724   : > { %v12101_v60 = vpop.f32.mrf.mxu0 }
 0x725   : > { %v12151_v53 = vadd.f32 %v12139_v6, %v310_v51  ;;  %v12141_v16 = vadd.f32 %v12140_v0, %v12100_v58  ;;  %v12142_v46 = vpop.f32.mrf.mxu1  ;;  %12164 = sbr.rel (%p14705_p6) target bundleno = 2304 (0x900), region = 56 }
 0x726   : > { %v12102_v62 = vpop.f32.mrf.mxu0 }
 0x727   : > { %12159 = vst [vmem:[#allocation2 + $0x28] sm:$0xff] %v12151_v53  ;;  %v12152_v57 = vadd.f32 %v12141_v16, %v311_v52  ;;  %v12143_v54 = vpop.f32.mrf.mxu1 }
 0x729   : > { %12160 = vst [vmem:[#allocation2 + $0x38] sm:$0xff] %v12152_v57 }
 0x72a   : > { %v14940_v3 = vld [vmem:[%s17358_s3 + $0x78] sm:$0xff]   ;;  %v14944_v48 = vld [vmem:[%s17358_s3 + $0x70] sm:$0xff]   ;;  %v14948_v44 = vld [vmem:[%s17358_s3 + $0x68] sm:$0xff]   ;;  %v12175_v9 = vlaneseq  ;;  %vm15023_vm0 = vmmov 0  }
 0x72b   : > { %v14941_v61 = vld [vmem:[%s17358_s3 + $0xf8] sm:$0xff]   ;;  %14783 = vmatprep.subr.bf16.mxu0 %v14940_v3  ;;  %v14945_v42 = vld [vmem:[%s17358_s3 + $0xf0] sm:$0xff]   ;;  %v14949_v32 = vld [vmem:[%s17358_s3 + $0xe8] sm:$0xff]  }
 0x72c   : > { %v14942_v1 = vld [vmem:[%s17358_s3 + $0x38] sm:$0xff]   ;;  %14805 = vmatprep.subr.bf16.mxu1 %v14941_v61  ;;  %v14946_v15 = vld [vmem:[%s17358_s3 + $0x30] sm:$0xff]   ;;  %v14950_v37 = vld [vmem:[%s17358_s3 + $0x28] sm:$0xff]   ;;  %v17173_v14 = vshrl.u32 %v12175_v9, 7 }
 0x72d   : > { %v14943_v18 = vld [vmem:[%s17358_s3 + $0xb8] sm:$0xff]   ;;  %14784 = vmatpush3.bf16.msra.mxu0 %v14942_v1  ;;  %v14947_v31 = vld [vmem:[%s17358_s3 + $0xb0] sm:$0xff]   ;;  %v14951_v55 = vld [vmem:[%s17358_s3 + $0xa8] sm:$0xff]  }
 0x72e   : > { %14806 = vmatpush3.bf16.msra.mxu1 %v14943_v18  ;;  %14785 = vmatprep.subr.bf16.mxu0 %v14944_v48  ;;  %v14952_v13 = vld [vmem:[%s17358_s3 + $0x60] sm:$0xff]   ;;  %v14956_v24 = vld [vmem:[%s17358_s3 + $0x58] sm:$0xff]   ;;  %v14960_v21 = vld [vmem:[%s17358_s3 + $0x50] sm:$0xff]   ;;  %v12181_v41 = vsub.s32 1, %v17173_v14  ;;  %v12189_v19 = vsub.s32 3, %v17173_v14  ;;  %v12177_v27 = vsub.s32 0, %v17173_v14 }
 0x72f   : > { %14807 = vmatprep.subr.bf16.mxu1 %v14945_v42  ;;  %v14953_v33 = vld [vmem:[%s17358_s3 + $0xe0] sm:$0xff]   ;;  %v14957_v36 = vld [vmem:[%s17358_s3 + $0xd8] sm:$0xff]   ;;  %v14961_v35 = vld [vmem:[%s17358_s3 + $0xd0] sm:$0xff]   ;;  %v12185_v45 = vsub.s32 2, %v17173_v14 }
 0x730   : > { %v14954_v29 = vld [vmem:[%s17358_s3 + $0x20] sm:$0xff]   ;;  %v14958_v12 = vld [vmem:[%s17358_s3 + $0x18] sm:$0xff]   ;;  %v14962_v59 = vld [vmem:[%s17358_s3 + $0x10] sm:$0xff]  }
 0x731   : > { %14786 = vmatpush3.bf16.msra.mxu0 %v14946_v15  ;;  %v14955_v20 = vld [vmem:[%s17358_s3 + $0xa0] sm:$0xff]   ;;  %v14959_v4 = vld [vmem:[%s17358_s3 + $0x98] sm:$0xff]   ;;  %v14963_v30 = vld [vmem:[%s17358_s3 + $0x90] sm:$0xff]  }
 0x732   : > { %14808 = vmatpush3.bf16.msra.mxu1 %v14947_v31  ;;  %14787 = vmatprep.subr.bf16.mxu0 %v14948_v44  ;;  %v14964_v2 = vld [vmem:[%s17358_s3 + $0x48] sm:$0xff]   ;;  %v14968_v63 = vld [vmem:[%s17358_s3 + $0x40] sm:$0xff]   ;;  %v12168_v25 = vld [vmem:[#allocation2 + $0x10] sm:$0xff] }
 0x733   : > { %14809 = vmatprep.subr.bf16.mxu1 %v14949_v32  ;;  %v14965_v7 = vld [vmem:[%s17358_s3 + $0xc8] sm:$0xff]   ;;  %v14969_v39 = vld [vmem:[%s17358_s3 + $0xc0] sm:$0xff]   ;;  %v12165_v17 = vld [vmem:[#allocation2 + $0x30] sm:$0xff] }
 0x734   : > { %v14966_v47 = vld [vmem:[%s17358_s3 + $0x8] sm:$0xff]   ;;  %v14970_v50 = vld [vmem:[%s17358_s3] sm:$0xff]   ;;  %v12167_v49 = vld [vmem:[#allocation2 + $0x18] sm:$0xff] }
 0x735   : > { %14788 = vmatpush3.bf16.msra.mxu0 %v14950_v37  ;;  %v14967_v26 = vld [vmem:[%s17358_s3 + $0x88] sm:$0xff]   ;;  %v14971_v38 = vld [vmem:[%s17358_s3 + $0x80] sm:$0xff]   ;;  %v14972_v23 = vld [vmem:[%s17358_s3 + $0x178] sm:$0xff]  }
 0x736   : > { %14810 = vmatpush3.bf16.msra.mxu1 %v14951_v55  ;;  %14789 = vmatprep.subr.bf16.mxu0 %v14952_v13  ;;  %v12166_v10 = vld [vmem:[#allocation2] sm:$0xff]  ;;  %v14973_v28 = vld [vmem:[%s17358_s3 + $0x1f8] sm:$0xff]   ;;  %v14976_v54 = vld [vmem:[%s17358_s3 + $0x170] sm:$0xff]  }
 0x737   : > { %14811 = vmatprep.subr.bf16.mxu1 %v14953_v33  ;;  %v17209_v56 = vld [vmem:[%s17357_s2] sm:$0xff]  ;;  %v14974_v60 = vld [vmem:[%s17358_s3 + $0x138] sm:$0xff]   ;;  %v14977_v3 = vld [vmem:[%s17358_s3 + $0x1f0] sm:$0xff]  }
 0x738   : > { %v12182_v11 = vrot.slane %v17209_v56, %v12181_v41  ;;  %v12190_v34 = vrot.slane %v17209_v56, %v12189_v19  ;;  %v12178_v43 = vrot.slane %v17209_v56, %v12177_v27  ;;  %v12186_v22 = vrot.slane %v17209_v56, %v12185_v45  ;;  %v14975_v53 = vld [vmem:[%s17358_s3 + $0x1b8] sm:$0xff]   ;;  %v14978_v61 = vld [vmem:[%s17358_s3 + $0x130] sm:$0xff]   ;;  %v14980_v18 = vld [vmem:[%s17358_s3 + $0x168] sm:$0xff]  }
 0x739   : > { %14790 = vmatpush3.bf16.msra.mxu0 %v14954_v29  ;;  %v14979_v1 = vld [vmem:[%s17358_s3 + $0x1b0] sm:$0xff]   ;;  %v14981_v48 = vld [vmem:[%s17358_s3 + $0x1e8] sm:$0xff]   ;;  %v14984_v31 = vld [vmem:[%s17358_s3 + $0x160] sm:$0xff]  }
 0x73a   : > { %14812 = vmatpush3.bf16.msra.mxu1 %v14955_v20  ;;  %14791 = vmatprep.subr.bf16.mxu0 %v14956_v24  ;;  %v12216_v40 = vadd.f32 %v12182_v11, %v12166_v10  ;;  %v12218_v8 = vadd.f32 %v12190_v34, %v12168_v25  ;;  %v12215_v5 = vadd.f32 %v12178_v43, %v12165_v17  ;;  %v14982_v42 = vld [vmem:[%s17358_s3 + $0x128] sm:$0xff]   ;;  %v14985_v44 = vld [vmem:[%s17358_s3 + $0x1e0] sm:$0xff]   ;;  %v14988_v55 = vld [vmem:[%s17358_s3 + $0x158] sm:$0xff]  }
 0x73b   : > { %14813 = vmatprep.subr.bf16.mxu1 %v14957_v36  ;;  %v12217_v51 = vadd.f32 %v12186_v22, %v12167_v49  ;;  %v14983_v15 = vld [vmem:[%s17358_s3 + $0x1a8] sm:$0xff]   ;;  %v14986_v32 = vld [vmem:[%s17358_s3 + $0x120] sm:$0xff]   ;;  %v14989_v13 = vld [vmem:[%s17358_s3 + $0x1d8] sm:$0xff]  }
 0x73c   : > { %v12224_v6 = vmax.f32 %v12216_v40, 0.0  ;;  %v12226_v58 = vmax.f32 %v12218_v8, 0.0  ;;  %v12223_v0 = vmax.f32 %v12215_v5, 0.0  ;;  %v14987_v37 = vld [vmem:[%s17358_s3 + $0x1a0] sm:$0xff]   ;;  %v14990_v33 = vld [vmem:[%s17358_s3 + $0x118] sm:$0xff]   ;;  %v14992_v20 = vld [vmem:[%s17358_s3 + $0x150] sm:$0xff]  }
 0x73d   : > { %14792 = vmatpush3.bf16.msra.mxu0 %v14958_v12  ;;  %v12225_v52 = vmax.f32 %v12217_v51, 0.0  ;;  %v14991_v29 = vld [vmem:[%s17358_s3 + $0x198] sm:$0xff]   ;;  %v14993_v24 = vld [vmem:[%s17358_s3 + $0x1d0] sm:$0xff]   ;;  %v12197_v12 = vsub.s32 5, %v17173_v14  ;;  %v15002_v27 = vld [vmem:[%s17358_s3 + $0x100] sm:$0xff]  }
 0x73e   : > { %14814 = vmatpush3.bf16.msra.mxu1 %v14959_v4  ;;  %14793 = vmatprep.subr.bf16.mxu0 %v14960_v21  ;;  %v12232_v16 = vpack.c.bf16 %v12224_v6, %v12224_v6  ;;  %v12234_v46 = vpack.c.bf16 %v12226_v58, %v12226_v58  ;;  %v12231_v62 = vpack.c.bf16 %v12223_v0, %v12223_v0  ;;  %v14994_v36 = vld [vmem:[%s17358_s3 + $0x110] sm:$0xff]   ;;  %v12205_v4 = vsub.s32 7, %v17173_v14  ;;  %v14996_v21 = vld [vmem:[%s17358_s3 + $0x148] sm:$0xff]   ;;  %v12170_v45 = vld [vmem:[#allocation2 + $0x20] sm:$0xff] }
 0x73f   : > { %14815 = vmatprep.subr.bf16.mxu1 %v14961_v35  ;;  %v12233_v57 = vpack.c.bf16 %v12225_v52, %v12225_v52  ;;  %v14995_v9 = vld [vmem:[%s17358_s3 + $0x190] sm:$0xff]   ;;  %v12193_v35 = vsub.s32 4, %v17173_v14  ;;  %v12198_v41 = vrot.slane %v17209_v56, %v12197_v12  ;;  %v12169_v25 = vld [vmem:[#allocation2 + $0x8] sm:$0xff]  ;;  %v15004_v51 = vld [vmem:[%s17360_s5 + $0x38] sm:$0xff]  }
 0x740   : > { %12790 = vmatprep.mubr.bf16.mxu0 %v12232_v16  ;;  %12830 = vmatprep.mubr.bf16.mxu1 %v12234_v46  ;;  %v12171_v11 = vld [vmem:[#allocation2 + $0x28] sm:$0xff]  ;;  %v15005_v6 = vld [vmem:[%s17360_s5 + $0x30] sm:$0xff]   ;;  %v15007_v0 = vld [vmem:[%s17360_s5 + $0x20] sm:$0xff]  }
 0x741   : > { %14794 = vmatpush3.bf16.msra.mxu0 %v14962_v59  ;;  %v14997_v59 = vld [vmem:[%s17358_s3 + $0x1c8] sm:$0xff]   ;;  %v12194_v19 = vrot.slane %v17209_v56, %v12193_v35  ;;  %v15008_v52 = vld [vmem:[%s17360_s5 + $0x18] sm:$0xff]   ;;  %v15011_v16 = vld [vmem:[%s17360_s5] sm:$0xff]  }
 0x742   : > { %14816 = vmatpush3.bf16.msra.mxu1 %v14963_v30  ;;  %14795 = vmatprep.subr.bf16.mxu0 %v14964_v2  ;;  %v12201_v30 = vsub.s32 6, %v17173_v14  ;;  %v14998_v2 = vld [vmem:[%s17358_s3 + $0x108] sm:$0xff]   ;;  %v15001_v14 = vld [vmem:[%s17358_s3 + $0x1c0] sm:$0xff]  }
 0x743   : > { %14817 = vmatprep.subr.bf16.mxu1 %v14965_v7  ;;  %v14999_v7 = vld [vmem:[%s17358_s3 + $0x188] sm:$0xff]   ;;  %v12219_v34 = vadd.f32 %v12194_v19, %v12169_v25 }
 0x744   : > { %v15006_v58 = vld [vmem:[%s17360_s5 + $0x28] sm:$0xff]  }
 0x745   : > { %14796 = vmatpush3.bf16.msra.mxu0 %v14966_v47  ;;  %v15000_v47 = vld [vmem:[%s17358_s3 + $0x140] sm:$0xff]   ;;  %v12227_v49 = vmax.f32 %v12219_v34, 0.0 }
 0x746   : > { %14818 = vmatpush3.bf16.msra.mxu1 %v14967_v26  ;;  %14797 = vmatprep.subr.bf16.mxu0 %v14968_v63  ;;  %v12206_v26 = vrot.slane %v17209_v56, %v12205_v4  ;;  %v12202_v63 = vrot.slane %v17209_v56, %v12201_v30 }
 0x747   : > { %14819 = vmatprep.subr.bf16.mxu1 %v14969_v39  ;;  %v15003_v39 = vld [vmem:[%s17358_s3 + $0x180] sm:$0xff]   ;;  %v12235_v8 = vpack.c.bf16 %v12227_v49, %v12227_v49 }
 0x748   : > { %v12221_v56 = vadd.f32 %v12202_v63, %v12171_v11 }
 0x749   : > { %14798 = vmatpush3.bf16.msra.mxu0 %v14970_v50  ;;  %v12172_v50 = vld [vmem:[#allocation2 + $0x38] sm:$0xff] }
 0x74a   : > { %14820 = vmatpush3.bf16.msra.mxu1 %v14971_v38  ;;  %14827 = vmatprep.subr.bf16.mxu0 %v14972_v23  ;;  %v12220_v38 = vadd.f32 %v12198_v41, %v12170_v45  ;;  %v12222_v10 = vadd.f32 %v12206_v26, %v12172_v50  ;;  %v12229_v22 = vmax.f32 %v12221_v56, 0.0 }
 0x74b   : > { %14849 = vmatprep.subr.bf16.mxu1 %v14973_v28  ;;  %v15022_v28 = vmov 0.0  }
 0x74c   : > { %12791 = vmatmul.mubr.bf16.vlgmr.msra.gmra.mxu0 %v12231_v62  ;;  %v12228_v17 = vmax.f32 %v12220_v38, 0.0  ;;  %v12230_v43 = vmax.f32 %v12222_v10, 0.0  ;;  %v12237_v5 = vpack.c.bf16 %v12229_v22, %v12229_v22 }
 0x74d   : > { %12831 = vmatmul.mubr.bf16.vlgmr.msra.gmra.mxu1 %v12233_v57  ;;  %14828 = vmatpush3.bf16.msra.mxu0 %v14974_v60  ;;  %v15009_v60 = vld [vmem:[%s17360_s5 + $0x10] sm:$0xff]  }
 0x74e   : > { %14850 = vmatpush3.bf16.msra.mxu1 %v14975_v53  ;;  %14829 = vmatprep.subr.bf16.mxu0 %v14976_v54  ;;  %v12236_v23 = vpack.c.bf16 %v12228_v17, %v12228_v17  ;;  %v12238_v40 = vpack.c.bf16 %v12230_v43, %v12230_v43  ;;  %v15010_v53 = vld [vmem:[%s17360_s5 + $0x8] sm:$0xff]  }
 0x74f   : > { %14851 = vmatprep.subr.bf16.mxu1 %v14977_v3 }
 0x750   : > { %12870 = vmatprep.mubr.bf16.mxu0 %v12236_v23  ;;  %12910 = vmatprep.mubr.bf16.mxu1 %v12238_v40 }
 0x751   : > { %14830 = vmatpush3.bf16.msra.mxu0 %v14978_v61 }
 0x752   : > { %14852 = vmatpush3.bf16.msra.mxu1 %v14979_v1  ;;  %14831 = vmatprep.subr.bf16.mxu0 %v14980_v18 }
 0x753   : > { %14853 = vmatprep.subr.bf16.mxu1 %v14981_v48 }
 0x755   : > { %14832 = vmatpush3.bf16.msra.mxu0 %v14982_v42  ;;  %v14706_v42 = vld [vmem:[%s17359_s4] ss:$0 sm:$0xff] }
 0x756   : > { %14854 = vmatpush3.bf16.msra.mxu1 %v14983_v15  ;;  %14833 = vmatprep.subr.bf16.mxu0 %v14984_v31 }
 0x757   : > { %14855 = vmatprep.subr.bf16.mxu1 %v14985_v44 }
 0x759   : > { %14834 = vmatpush3.bf16.msra.mxu0 %v14986_v32 }
 0x75a   : > { %14856 = vmatpush3.bf16.msra.mxu1 %v14987_v37  ;;  %14835 = vmatprep.subr.bf16.mxu0 %v14988_v55 }
 0x75b   : > { %14857 = vmatprep.subr.bf16.mxu1 %v14989_v13 }
 0x75d   : > { %14836 = vmatpush3.bf16.msra.mxu0 %v14990_v33 }
 0x75e   : > { %14858 = vmatpush3.bf16.msra.mxu1 %v14991_v29  ;;  %14837 = vmatprep.subr.bf16.mxu0 %v14992_v20 }
 0x75f   : > { %14859 = vmatprep.subr.bf16.mxu1 %v14993_v24 }
 0x761   : > { %14838 = vmatpush3.bf16.msra.mxu0 %v14994_v36 }
 0x762   : > { %14860 = vmatpush3.bf16.msra.mxu1 %v14995_v9  ;;  %14839 = vmatprep.subr.bf16.mxu0 %v14996_v21 }
 0x763   : > { %14861 = vmatprep.subr.bf16.mxu1 %v14997_v59  ;;  %v14771_v59 = vld [vmem:[%s17361_s6] ss:$0 sm:$0xff] }
 0x765   : > { %14840 = vmatpush3.bf16.msra.mxu0 %v14998_v2 }
 0x766   : > { %14862 = vmatpush3.bf16.msra.mxu1 %v14999_v7  ;;  %14841 = vmatprep.subr.bf16.mxu0 %v15000_v47 }
 0x767   : > { %14863 = vmatprep.subr.bf16.mxu1 %v15001_v14 }
 0x769   : > { %14842 = vmatpush3.bf16.msra.mxu0 %v15002_v27 }
 0x76a   : > { %14864 = vmatpush3.bf16.msra.mxu1 %v15003_v39  ;;  %14880 = vmatprep.subr.bf16.mxu0 %v15022_v28 }
 0x76c   : > { %12871 = vmatmul.mubr.bf16.vlgmr.msra.gmra.mxu0 %v12235_v8 }
 0x76d   : > { %12911 = vmatmul.mubr.bf16.vlgmr.msra.gmra.mxu1 %v12237_v5  ;;  %14881 = vmatpush3.bf16.msra.mxu0 %v15004_v51 }
 0x76e   : > { %14882 = vmatprep.subr.bf16.mxu0 %v15022_v28  ;;  %14896 = vmatprep.mubr.msk.bf16.mxu0 %vm15023_vm0, %v15022_v28 }
 0x771   : > { %14883 = vmatpush3.bf16.msra.mxu0 %v15005_v6 }
 0x772   : > { %14884 = vmatprep.subr.bf16.mxu0 %v15022_v28 }
 0x775   : > { %14885 = vmatpush3.bf16.msra.mxu0 %v15006_v58 }
 0x776   : > { %14886 = vmatprep.subr.bf16.mxu0 %v15022_v28 }
 0x779   : > { %14887 = vmatpush3.bf16.msra.mxu0 %v15007_v0 }
 0x77a   : > { %14888 = vmatprep.subr.bf16.mxu0 %v15022_v28 }
 0x77d   : > { %14889 = vmatpush3.bf16.msra.mxu0 %v15008_v52 }
 0x77e   : > { %14890 = vmatprep.subr.bf16.mxu0 %v15022_v28 }
 0x781   : > { %14891 = vmatpush3.bf16.msra.mxu0 %v15009_v60 }
 0x782   : > { %14892 = vmatprep.subr.bf16.mxu0 %v15022_v28 }
 0x785   : > { %14893 = vmatpush3.bf16.msra.mxu0 %v15010_v53 }
 0x786   : > { %14894 = vmatprep.subr.bf16.mxu0 %v15022_v28 }
 0x789   : > { %14895 = vmatpush3.bf16.msra.mxu0 %v15011_v16 }
 0x80c   : > { %v14799_v46 = vpop.f32.mrf.mxu0 }
 0x80d   : > { %v14821_v62 = vpop.f32.mrf.mxu1 }
 0x80e   : > { %v14800_v57 = vpop.f32.mrf.mxu0 }
 0x80f   : > { %v14822_v54 = vpop.f32.mrf.mxu1  ;;  %v14801_v48 = vadd.f32 %v14800_v57, %v14799_v46 }
 0x810   : > { %v14802_v3 = vpop.f32.mrf.mxu0  ;;  %v14823_v31 = vadd.f32 %v14822_v54, %v14821_v62 }
 0x811   : > { %v14824_v61 = vpop.f32.mrf.mxu1  ;;  %v12793_v15 = vadd.f32 %v14801_v48, %v14706_v42 }
 0x812   : > { %v14803_v1 = vpop.f32.mrf.mxu0 }
 0x813   : > { %v14825_v18 = vpop.f32.mrf.mxu1  ;;  %v12833_v13 = vadd.f32 %v14823_v31, %v12793_v15 }
 0x82c   : > { %v14843_v44 = vpop.f32.mrf.mxu0 }
 0x82d   : > { %v14865_v32 = vpop.f32.mrf.mxu1 }
 0x82e   : > { %v14844_v37 = vpop.f32.mrf.mxu0 }
 0x82f   : > { %v14866_v55 = vpop.f32.mrf.mxu1  ;;  %v14845_v33 = vadd.f32 %v14844_v37, %v14843_v44 }
 0x830   : > { %v14846_v29 = vpop.f32.mrf.mxu0  ;;  %v14867_v36 = vadd.f32 %v14866_v55, %v14865_v32 }
 0x831   : > { %v14868_v20 = vpop.f32.mrf.mxu1  ;;  %v12873_v24 = vadd.f32 %v14845_v33, %v12833_v13 }
 0x832   : > { %v14847_v12 = vpop.f32.mrf.mxu0 }
 0x833   : > { %v14869_v9 = vpop.f32.mrf.mxu1  ;;  %v12913_v4 = vadd.f32 %v14867_v36, %v12873_v24 }
 0x835   : > { %v12918_v21 = vmax.f32 %v12913_v4, 0.0 }
 0x837   : > { %v12919_v35 = vpack.c.bf16 %v12918_v21, %v12918_v21 }
 0x839   : > { %14897 = vmatmul.mubr.bf16.vlgmr.msra.gmra.mxu0 %v12919_v35 }
 0x8f9   : > { %v13025_v30 = vpop.f32.mrf.mxu0 }
 0x8fa   : > { %v13026_v2 = vadd.f32 %v14771_v59, %v13025_v30 }
 0x8fb   : > { %v14898_v7 = vpop.f32.mrf.mxu0 }
 0x8fc   : > { %13031 = vst [vmem:[%s17362_s7] sm:$0xff] %v13026_v2 }
 0x8fd   : > { %v13028_v47 = vpop.f32.mrf.mxu0 }
 0x8ff   : > { %v14899_v41 = vpop.f32.mrf.mxu0 }
 0x900 PF: > { %s17_s24 = sadd.s32 1, %s15018_s24  }
 0x901   : > { %p14_p7 = scmp.ge.s32.totalorder %s17_s24, 4  }
 0x903   :  { %16 = sbr.rel (!%p14_p7) target bundleno = 1 (0x1), region = 85 }

</bundles_post_ra>
